<compile_context>
chip_gen: v7x
topology: tpu7x:2x2x1
jax: 0.10.0
libtpu: 0.0.40
codegen_flags: <defaults>
</compile_context>

<pallas_src>
import functools

import jax
import jax.numpy as jnp
from jax import lax
from jax.experimental import pallas as pl
from jax.experimental.pallas import tpu as pltpu

NEIGHBOR_K = 3


def ssmm_kernel(q_ref, s_ref, g_ref, o_ref, *, way, m, m_pad, neighbor_k):
    q = q_ref[0]                     # (rq_t, dim)
    s = s_ref[0]                     # (dim, way*m_pad), pre-transposed
    grp = g_ref[...]                 # (nq_t, rq_t) 0/1 grouping matrix

    rq_t = q.shape[0]
    neg_inf = jnp.float32(-jnp.inf)

    # One fused NN MXU push: all query rows of this tile x all support columns.
    ip = lax.dot_general(
        q, s, dimension_numbers=(((1,), (0,)), ((), ())),
        preferred_element_type=jnp.float32)                 # (rq_t, way*m_pad)

    # Pad-validity mask is identical for every way segment -> hoisted.
    seg_col = lax.broadcasted_iota(jnp.int32, (rq_t, m_pad), 1)
    seg_valid = seg_col < m
    wlane = lax.broadcasted_iota(jnp.int32, (rq_t, way), 1)

    acc = jnp.zeros((rq_t, way), jnp.float32)
    for j in range(way):                                    # small static loop
        # Lane-aligned static slice: the top-k loop touches only (rq_t, m_pad).
        work = jnp.where(seg_valid, ip[:, j * m_pad:(j + 1) * m_pad], neg_inf)
        tk = jnp.zeros((rq_t, 1), jnp.float32)
        remaining = jnp.full((rq_t, 1), float(neighbor_k), jnp.float32)
        for _ in range(neighbor_k):
            mx = jnp.max(work, axis=1, keepdims=True)       # (rq_t, 1)
            is_max = work == mx
            cnt = jnp.sum(is_max.astype(jnp.float32), axis=1, keepdims=True)
            finite = mx > neg_inf
            # Duplicate-count take: exact torch.topk multiset semantics.
            take = jnp.where(finite, jnp.minimum(cnt, remaining), 0.0)
            mx_safe = jnp.where(finite, mx, 0.0)    # guard: never multiply -inf
            tk = tk + mx_safe * take
            remaining = remaining - take
            work = jnp.where(is_max, neg_inf, work)
        acc = acc + jnp.where(wlane == j, tk, 0.0)

    # Per-query patch reduction: 0/1 grouping matmul (MXU, no in-kernel reshape).
    sims = lax.dot_general(
        grp, acc, dimension_numbers=(((1,), (0,)), ((), ())),
        preferred_element_type=jnp.float32)                 # (nq_t, way)
    o_ref[0] = sims


def _estimate_need(nq_t, patch_num, dim, way, m_pad, itemsize=4):
    """Rough per-step VMEM working set (double-buffered inputs + temporaries)."""
    rq_t = nq_t * patch_num
    c_pad = way * m_pad
    return (2 * rq_t * dim * itemsize        # query blocks (double-buffered)
            + 2 * dim * c_pad * itemsize     # support blocks (double-buffered)
            + 4 * rq_t * c_pad               # fused inner-product matrix (f32)
            + 3 * 4 * rq_t * m_pad           # per-way work buffer + temps
            + 4 * rq_t * way                 # per-row accumulator
            + 2 * 4 * nq_t * rq_t            # grouping matrix blocks
            + 2 * 4 * nq_t * way)            # output blocks


def _pick_nq_tile(n_wq, patch_num, dim, way, m_pad, budget, itemsize=4):
    need_full = _estimate_need(n_wq, patch_num, dim, way, m_pad, itemsize)
    if need_full <= budget:
        return n_wq, need_full               # whole problem in one tile
    for nq_t in range(max(8, (n_wq // 8) * 8), 7, -8):
        need = _estimate_need(nq_t, patch_num, dim, way, m_pad, itemsize)
        if need <= budget:
            return nq_t, need
    # Even the minimum aligned tile overshoots; let vmem_limit stretch a bit.
    return 8, _estimate_need(8, patch_num, dim, way, m_pad, itemsize)


def ssmm_forward(query_fea, support_fea, neighbor_k=NEIGHBOR_K, *,
                 nq_tile=None, input_dtype=jnp.float32,
                 vmem_budget_bytes=24 << 20):
    batch, n_wq, patch_num, dim = query_fea.shape
    b2, way, shot, patch_num_s, dim_s = support_fea.shape
    assert b2 == batch and dim_s == dim and patch_num_s == patch_num
    m = shot * patch_num_s
    assert neighbor_k <= m

    itemsize = jnp.dtype(input_dtype).itemsize
    # Lane-pad each class segment to a multiple of 128 so per-way slices of the
    # fused inner-product matrix are (8,128)-tile aligned inside the kernel.
    m_pad = ((m + 127) // 128) * 128
    c_pad = way * m_pad

    if nq_tile is None:
        nq_t, need = _pick_nq_tile(n_wq, patch_num, dim, way, m_pad,
                                   vmem_budget_bytes, itemsize)
    else:
        # Alignment-safe choices only: full problem, >= n_wq (single padded
        # tile), or a multiple of 8 (sublane-aligned second-minor blocks).
        assert nq_tile == n_wq or nq_tile >= n_wq or nq_tile % 8 == 0
        nq_t = nq_tile
        need = _estimate_need(nq_t, patch_num, dim, way, m_pad, itemsize)

    nq_pad = -(-n_wq // nq_t) * nq_t
    n_tiles = nq_pad // nq_t
    rq_t = nq_t * patch_num
    rq_pad = nq_pad * patch_num

    # --- wrapper-side layout plumbing (free XLA ops, never in-kernel) --------
    q = query_fea.astype(input_dtype)
    if nq_pad != n_wq:
        q = jnp.pad(q, ((0, 0), (0, nq_pad - n_wq), (0, 0), (0, 0)))
    q = q.reshape(batch, rq_pad, dim)

    sup = support_fea.reshape(batch, way, m, dim).astype(input_dtype)
    if m_pad != m:
        sup = jnp.pad(sup, ((0, 0), (0, 0), (0, m_pad - m), (0, 0)))
    # NT -> NN: put the contraction (dim) on the RHS sublane axis so the MXU is
    # fed directly (no per-step XLU transpose of the support tile).
    sup = jnp.transpose(sup.reshape(batch, c_pad, dim), (0, 2, 1))  # (b, dim, c_pad)

    # 0/1 grouping matrix (tile-local row -> tile-local query), built once and
    # fetched with a constant index_map (identical for every tile).
    grp = (jnp.arange(rq_t) // patch_num ==
           jnp.arange(nq_t)[:, None]).astype(jnp.float32)           # (nq_t, rq_t)

    kernel = functools.partial(ssmm_kernel, way=way, m=m, m_pad=m_pad,
                               neighbor_k=neighbor_k)

    flops = (2 * batch * n_tiles * rq_t * c_pad * dim
             + 2 * batch * n_tiles * nq_t * rq_t * way)
    bytes_accessed = (itemsize * (batch * rq_pad * dim + batch * dim * c_pad)
                      + 4 * (nq_t * rq_t + batch * nq_pad * way))

    # Scoped VMEM: 32 MiB is safe on every generation (v7x physical = 64 MiB);
    # only stretch beyond it if even the minimum tile overshoots the budget.
    vmem_limit = int(min(max(32 << 20, (need * 3) // 2), 56 << 20))

    out = pl.pallas_call(
        kernel,
        out_shape=jax.ShapeDtypeStruct((batch, nq_pad, way), jnp.float32),
        grid_spec=pltpu.PrefetchScalarGridSpec(
            num_scalar_prefetch=0,
            grid=(batch, n_tiles),
            in_specs=[
                pl.BlockSpec((1, rq_t, dim), lambda b, t: (b, t, 0)),
                pl.BlockSpec((1, dim, c_pad), lambda b, t: (b, 0, 0)),
                pl.BlockSpec((nq_t, rq_t), lambda b, t: (0, 0)),
            ],
            out_specs=pl.BlockSpec((1, nq_t, way), lambda b, t: (b, t, 0)),
        ),
        compiler_params=pltpu.CompilerParams(
            dimension_semantics=("parallel", "parallel"),
            vmem_limit_bytes=vmem_limit),
        cost_estimate=pl.CostEstimate(
            flops=flops, transcendentals=0, bytes_accessed=bytes_accessed),
    )(q, sup, grp)

    # Drop padded queries; row order matches torch.cat of the (batch -> n_wq)
    # loops: row = b*n_wq + i.
    return out[:, :n_wq, :].reshape(batch * n_wq, way)


def ssmm_reference(query_fea, support_fea, neighbor_k=NEIGHBOR_K):
    """Pure-JAX reference mirroring the PyTorch module exactly."""
    batch, n_wq, patch_num, dim = query_fea.shape
    _, way, shot, pn, _ = support_fea.shape
    sup = support_fea.reshape(batch, way, shot * pn, dim)
    ip = jnp.einsum('bipd,bjmd->bijpm', query_fea, sup)
    tv = lax.top_k(ip, neighbor_k)[0]             # (b, i, j, p, k)
    sims = tv.sum(axis=(-1, -2))                  # (b, i, j)
    return sims.reshape(batch * n_wq, way)


if __name__ == "__main__":
    key = jax.random.PRNGKey(0)
    batch, n_wq, way, shot, patch_num, dim = 2, 10, 4, 1, 16, 32

    kq, ks = jax.random.split(key)
    query_fea = jax.random.normal(kq, (batch, n_wq, patch_num, dim),
                                  dtype=jnp.float32)
    support_fea = jax.random.normal(ks, (batch, way, shot, patch_num, dim),
                                    dtype=jnp.float32)

    ref = ssmm_reference(query_fea, support_fea)

    # Auto-tiled path (small shapes -> single tile per batch element).
    out = jax.block_until_ready(ssmm_forward(query_fea, support_fea))
    assert out.shape == (batch * n_wq, way), out.shape
    assert jnp.allclose(out, ref, rtol=1e-3, atol=1e-3), (out, ref)

    # Explicitly exercise the tiled + padded query path (grid = (batch, 2)).
    out_tiled = jax.block_until_ready(
        ssmm_forward(query_fea, support_fea, nq_tile=8))
    assert jnp.allclose(out_tiled, ref, rtol=1e-3, atol=1e-3), (out_tiled, ref)

    print("KERNEL_OK")
</pallas_src>

<mosaic_0001>
module attributes {stable_mosaic.version = 11 : i64} {
  func.func @ssmm_kernel(%arg0: i32, %arg1: i32, %arg2: memref<1x160x32xf32, #tpu.memory_space<vmem>>, %arg3: memref<1x32x512xf32, #tpu.memory_space<vmem>>, %arg4: memref<10x160xf32, #tpu.memory_space<vmem>>, %arg5: memref<1x10x4xf32, #tpu.memory_space<vmem>>) attributes {dimension_semantics = [#tpu.dimension_semantics<parallel>, #tpu.dimension_semantics<parallel>], iteration_bounds = array<i64: 2, 1>, scalar_prefetch = 0 : i64, scratch_operands = 0 : i64, tpu.core_type = #tpu.core_type<tc>, window_params = [{transform_indices = @transform_0, window_bounds = array<i64: 1, 160, 32>}, {transform_indices = @transform_1, window_bounds = array<i64: 1, 32, 512>}, {pipeline_mode = #tpu.pipeline_mode<synchronous>, transform_indices = @transform_2, window_bounds = array<i64: 10, 160>}, {transform_indices = @transform_3, window_bounds = array<i64: 1, 10, 4>}]} {
    %c0 = arith.constant 0 : index
    %c0_0 = arith.constant 0 : index
    %c0_1 = arith.constant 0 : index
    %0 = vector.load %arg2[%c0, %c0_0, %c0_1] : memref<1x160x32xf32, #tpu.memory_space<vmem>>, vector<1x160x32xf32>
    %1 = vector.shape_cast %0 : vector<1x160x32xf32> to vector<160x32xf32>
    %c0_2 = arith.constant 0 : index
    %c0_3 = arith.constant 0 : index
    %c0_4 = arith.constant 0 : index
    %2 = vector.load %arg3[%c0_2, %c0_3, %c0_4] : memref<1x32x512xf32, #tpu.memory_space<vmem>>, vector<1x32x512xf32>
    %3 = vector.shape_cast %2 : vector<1x32x512xf32> to vector<32x512xf32>
    %c0_5 = arith.constant 0 : index
    %c0_6 = arith.constant 0 : index
    %4 = vector.load %arg4[%c0_5, %c0_6] : memref<10x160xf32, #tpu.memory_space<vmem>>, vector<10x160xf32>
    %cst = arith.constant dense<0.000000e+00> : vector<160x512xf32>
    %5 = tpu.matmul %1, %3, %cst {dimension_numbers = #tpu.dot_dimension_numbers<[1], [0], [0], [1], [0, 0, 1, 1], [], []>} : vector<160x32xf32>, vector<32x512xf32>, vector<160x512xf32> -> vector<160x512xf32>
    %6 = tpu.iota {dimensions = array<i32: 1>} : vector<160x128xi32>
    %c16_i32 = arith.constant 16 : i32
    %7 = vector.broadcast %c16_i32 : i32 to vector<160x128xi32>
    %8 = arith.cmpi slt, %6, %7 : vector<160x128xi32>
    %9 = tpu.iota {dimensions = array<i32: 1>} : vector<160x4xi32>
    %cst_7 = arith.constant 0.000000e+00 : f32
    %10 = vector.broadcast %cst_7 : f32 to vector<160x4xf32>
    %11 = vector.extract_strided_slice %5 {offsets = [0, 0], sizes = [160, 128], strides = [1, 1]} : vector<160x512xf32> to vector<160x128xf32>
    %cst_8 = arith.constant 0xFF800000 : f32
    %12 = vector.broadcast %cst_8 : f32 to vector<160x128xf32>
    %13 = arith.select %8, %11, %12 : vector<160x128xi1>, vector<160x128xf32>
    %cst_9 = arith.constant 0.000000e+00 : f32
    %14 = vector.broadcast %cst_9 : f32 to vector<160x1xf32>
    %cst_10 = arith.constant 3.000000e+00 : f32
    %15 = vector.broadcast %cst_10 : f32 to vector<160x1xf32>
    %cst_11 = arith.constant dense<0xFF800000> : vector<160xf32>
    %16 = vector.multi_reduction <maximumf>, %13, %cst_11 [1] : vector<160x128xf32> to vector<160xf32>
    %17 = vector.shape_cast %16 : vector<160xf32> to vector<160x1xf32>
    %18 = vector.broadcast %17 : vector<160x1xf32> to vector<160x128xf32>
    %19 = arith.cmpf oeq, %13, %18 : vector<160x128xf32>
    %20 = arith.extui %19 : vector<160x128xi1> to vector<160x128xi32>
    %21 = arith.sitofp %20 : vector<160x128xi32> to vector<160x128xf32>
    %cst_12 = arith.constant dense<0.000000e+00> : vector<160xf32>
    %22 = vector.multi_reduction <add>, %21, %cst_12 [1] : vector<160x128xf32> to vector<160xf32>
    %23 = vector.shape_cast %22 : vector<160xf32> to vector<160x1xf32>
    %cst_13 = arith.constant 0xFF800000 : f32
    %24 = vector.broadcast %cst_13 : f32 to vector<160x1xf32>
    %25 = arith.cmpf ogt, %17, %24 : vector<160x1xf32>
    %26 = arith.minimumf %23, %15 : vector<160x1xf32>
    %cst_14 = arith.constant 0.000000e+00 : f32
    %27 = vector.broadcast %cst_14 : f32 to vector<160x1xf32>
    %28 = arith.select %25, %26, %27 : vector<160x1xi1>, vector<160x1xf32>
    %cst_15 = arith.constant 0.000000e+00 : f32
    %29 = vector.broadcast %cst_15 : f32 to vector<160x1xf32>
    %30 = arith.select %25, %17, %29 : vector<160x1xi1>, vector<160x1xf32>
    %31 = arith.mulf %30, %28 : vector<160x1xf32>
    %32 = arith.addf %14, %31 : vector<160x1xf32>
    %33 = arith.subf %15, %28 : vector<160x1xf32>
    %cst_16 = arith.constant 0xFF800000 : f32
    %34 = vector.broadcast %cst_16 : f32 to vector<160x128xf32>
    %35 = arith.select %19, %34, %13 : vector<160x128xi1>, vector<160x128xf32>
    %cst_17 = arith.constant dense<0xFF800000> : vector<160xf32>
    %36 = vector.multi_reduction <maximumf>, %35, %cst_17 [1] : vector<160x128xf32> to vector<160xf32>
    %37 = vector.shape_cast %36 : vector<160xf32> to vector<160x1xf32>
    %38 = vector.broadcast %37 : vector<160x1xf32> to vector<160x128xf32>
    %39 = arith.cmpf oeq, %35, %38 : vector<160x128xf32>
    %40 = arith.extui %39 : vector<160x128xi1> to vector<160x128xi32>
    %41 = arith.sitofp %40 : vector<160x128xi32> to vector<160x128xf32>
    %cst_18 = arith.constant dense<0.000000e+00> : vector<160xf32>
    %42 = vector.multi_reduction <add>, %41, %cst_18 [1] : vector<160x128xf32> to vector<160xf32>
    %43 = vector.shape_cast %42 : vector<160xf32> to vector<160x1xf32>
    %cst_19 = arith.constant 0xFF800000 : f32
    %44 = vector.broadcast %cst_19 : f32 to vector<160x1xf32>
    %45 = arith.cmpf ogt, %37, %44 : vector<160x1xf32>
    %46 = arith.minimumf %43, %33 : vector<160x1xf32>
    %cst_20 = arith.constant 0.000000e+00 : f32
    %47 = vector.broadcast %cst_20 : f32 to vector<160x1xf32>
    %48 = arith.select %45, %46, %47 : vector<160x1xi1>, vector<160x1xf32>
    %cst_21 = arith.constant 0.000000e+00 : f32
    %49 = vector.broadcast %cst_21 : f32 to vector<160x1xf32>
    %50 = arith.select %45, %37, %49 : vector<160x1xi1>, vector<160x1xf32>
    %51 = arith.mulf %50, %48 : vector<160x1xf32>
    %52 = arith.addf %32, %51 : vector<160x1xf32>
    %53 = arith.subf %33, %48 : vector<160x1xf32>
    %cst_22 = arith.constant 0xFF800000 : f32
    %54 = vector.broadcast %cst_22 : f32 to vector<160x128xf32>
    %55 = arith.select %39, %54, %35 : vector<160x128xi1>, vector<160x128xf32>
    %cst_23 = arith.constant dense<0xFF800000> : vector<160xf32>
    %56 = vector.multi_reduction <maximumf>, %55, %cst_23 [1] : vector<160x128xf32> to vector<160xf32>
    %57 = vector.shape_cast %56 : vector<160xf32> to vector<160x1xf32>
    %58 = vector.broadcast %57 : vector<160x1xf32> to vector<160x128xf32>
    %59 = arith.cmpf oeq, %55, %58 : vector<160x128xf32>
    %60 = arith.extui %59 : vector<160x128xi1> to vector<160x128xi32>
    %61 = arith.sitofp %60 : vector<160x128xi32> to vector<160x128xf32>
    %cst_24 = arith.constant dense<0.000000e+00> : vector<160xf32>
    %62 = vector.multi_reduction <add>, %61, %cst_24 [1] : vector<160x128xf32> to vector<160xf32>
    %63 = vector.shape_cast %62 : vector<160xf32> to vector<160x1xf32>
    %cst_25 = arith.constant 0xFF800000 : f32
    %64 = vector.broadcast %cst_25 : f32 to vector<160x1xf32>
    %65 = arith.cmpf ogt, %57, %64 : vector<160x1xf32>
    %66 = arith.minimumf %63, %53 : vector<160x1xf32>
    %cst_26 = arith.constant 0.000000e+00 : f32
    %67 = vector.broadcast %cst_26 : f32 to vector<160x1xf32>
    %68 = arith.select %65, %66, %67 : vector<160x1xi1>, vector<160x1xf32>
    %cst_27 = arith.constant 0.000000e+00 : f32
    %69 = vector.broadcast %cst_27 : f32 to vector<160x1xf32>
    %70 = arith.select %65, %57, %69 : vector<160x1xi1>, vector<160x1xf32>
    %71 = arith.mulf %70, %68 : vector<160x1xf32>
    %72 = arith.addf %52, %71 : vector<160x1xf32>
    %c0_i32 = arith.constant 0 : i32
    %73 = vector.broadcast %c0_i32 : i32 to vector<160x4xi32>
    %74 = arith.cmpi eq, %9, %73 : vector<160x4xi32>
    %cst_28 = arith.constant 0.000000e+00 : f32
    %75 = vector.shape_cast %72 : vector<160x1xf32> to vector<160x1xf32>
    %76 = vector.broadcast %75 : vector<160x1xf32> to vector<160x4xf32>
    %77 = vector.broadcast %cst_28 : f32 to vector<160x4xf32>
    %78 = arith.select %74, %76, %77 : vector<160x4xi1>, vector<160x4xf32>
    %79 = arith.addf %10, %78 : vector<160x4xf32>
    %80 = vector.extract_strided_slice %5 {offsets = [0, 128], sizes = [160, 128], strides = [1, 1]} : vector<160x512xf32> to vector<160x128xf32>
    %cst_29 = arith.constant 0xFF800000 : f32
    %81 = vector.broadcast %cst_29 : f32 to vector<160x128xf32>
    %82 = arith.select %8, %80, %81 : vector<160x128xi1>, vector<160x128xf32>
    %cst_30 = arith.constant 0.000000e+00 : f32
    %83 = vector.broadcast %cst_30 : f32 to vector<160x1xf32>
    %cst_31 = arith.constant 3.000000e+00 : f32
    %84 = vector.broadcast %cst_31 : f32 to vector<160x1xf32>
    %cst_32 = arith.constant dense<0xFF800000> : vector<160xf32>
    %85 = vector.multi_reduction <maximumf>, %82, %cst_32 [1] : vector<160x128xf32> to vector<160xf32>
    %86 = vector.shape_cast %85 : vector<160xf32> to vector<160x1xf32>
    %87 = vector.broadcast %86 : vector<160x1xf32> to vector<160x128xf32>
    %88 = arith.cmpf oeq, %82, %87 : vector<160x128xf32>
    %89 = arith.extui %88 : vector<160x128xi1> to vector<160x128xi32>
    %90 = arith.sitofp %89 : vector<160x128xi32> to vector<160x128xf32>
    %cst_33 = arith.constant dense<0.000000e+00> : vector<160xf32>
    %91 = vector.multi_reduction <add>, %90, %cst_33 [1] : vector<160x128xf32> to vector<160xf32>
    %92 = vector.shape_cast %91 : vector<160xf32> to vector<160x1xf32>
    %cst_34 = arith.constant 0xFF800000 : f32
    %93 = vector.broadcast %cst_34 : f32 to vector<160x1xf32>
    %94 = arith.cmpf ogt, %86, %93 : vector<160x1xf32>
    %95 = arith.minimumf %92, %84 : vector<160x1xf32>
    %cst_35 = arith.constant 0.000000e+00 : f32
    %96 = vector.broadcast %cst_35 : f32 to vector<160x1xf32>
    %97 = arith.select %94, %95, %96 : vector<160x1xi1>, vector<160x1xf32>
    %cst_36 = arith.constant 0.000000e+00 : f32
    %98 = vector.broadcast %cst_36 : f32 to vector<160x1xf32>
    %99 = arith.select %94, %86, %98 : vector<160x1xi1>, vector<160x1xf32>
    %100 = arith.mulf %99, %97 : vector<160x1xf32>
    %101 = arith.addf %83, %100 : vector<160x1xf32>
    %102 = arith.subf %84, %97 : vector<160x1xf32>
    %cst_37 = arith.constant 0xFF800000 : f32
    %103 = vector.broadcast %cst_37 : f32 to vector<160x128xf32>
    %104 = arith.select %88, %103, %82 : vector<160x128xi1>, vector<160x128xf32>
    %cst_38 = arith.constant dense<0xFF800000> : vector<160xf32>
    %105 = vector.multi_reduction <maximumf>, %104, %cst_38 [1] : vector<160x128xf32> to vector<160xf32>
    %106 = vector.shape_cast %105 : vector<160xf32> to vector<160x1xf32>
    %107 = vector.broadcast %106 : vector<160x1xf32> to vector<160x128xf32>
    %108 = arith.cmpf oeq, %104, %107 : vector<160x128xf32>
    %109 = arith.extui %108 : vector<160x128xi1> to vector<160x128xi32>
    %110 = arith.sitofp %109 : vector<160x128xi32> to vector<160x128xf32>
    %cst_39 = arith.constant dense<0.000000e+00> : vector<160xf32>
    %111 = vector.multi_reduction <add>, %110, %cst_39 [1] : vector<160x128xf32> to vector<160xf32>
    %112 = vector.shape_cast %111 : vector<160xf32> to vector<160x1xf32>
    %cst_40 = arith.constant 0xFF800000 : f32
    %113 = vector.broadcast %cst_40 : f32 to vector<160x1xf32>
    %114 = arith.cmpf ogt, %106, %113 : vector<160x1xf32>
    %115 = arith.minimumf %112, %102 : vector<160x1xf32>
    %cst_41 = arith.constant 0.000000e+00 : f32
    %116 = vector.broadcast %cst_41 : f32 to vector<160x1xf32>
    %117 = arith.select %114, %115, %116 : vector<160x1xi1>, vector<160x1xf32>
    %cst_42 = arith.constant 0.000000e+00 : f32
    %118 = vector.broadcast %cst_42 : f32 to vector<160x1xf32>
    %119 = arith.select %114, %106, %118 : vector<160x1xi1>, vector<160x1xf32>
    %120 = arith.mulf %119, %117 : vector<160x1xf32>
    %121 = arith.addf %101, %120 : vector<160x1xf32>
    %122 = arith.subf %102, %117 : vector<160x1xf32>
    %cst_43 = arith.constant 0xFF800000 : f32
    %123 = vector.broadcast %cst_43 : f32 to vector<160x128xf32>
    %124 = arith.select %108, %123, %104 : vector<160x128xi1>, vector<160x128xf32>
    %cst_44 = arith.constant dense<0xFF800000> : vector<160xf32>
    %125 = vector.multi_reduction <maximumf>, %124, %cst_44 [1] : vector<160x128xf32> to vector<160xf32>
    %126 = vector.shape_cast %125 : vector<160xf32> to vector<160x1xf32>
    %127 = vector.broadcast %126 : vector<160x1xf32> to vector<160x128xf32>
    %128 = arith.cmpf oeq, %124, %127 : vector<160x128xf32>
    %129 = arith.extui %128 : vector<160x128xi1> to vector<160x128xi32>
    %130 = arith.sitofp %129 : vector<160x128xi32> to vector<160x128xf32>
    %cst_45 = arith.constant dense<0.000000e+00> : vector<160xf32>
    %131 = vector.multi_reduction <add>, %130, %cst_45 [1] : vector<160x128xf32> to vector<160xf32>
    %132 = vector.shape_cast %131 : vector<160xf32> to vector<160x1xf32>
    %cst_46 = arith.constant 0xFF800000 : f32
    %133 = vector.broadcast %cst_46 : f32 to vector<160x1xf32>
    %134 = arith.cmpf ogt, %126, %133 : vector<160x1xf32>
    %135 = arith.minimumf %132, %122 : vector<160x1xf32>
    %cst_47 = arith.constant 0.000000e+00 : f32
    %136 = vector.broadcast %cst_47 : f32 to vector<160x1xf32>
    %137 = arith.select %134, %135, %136 : vector<160x1xi1>, vector<160x1xf32>
    %cst_48 = arith.constant 0.000000e+00 : f32
    %138 = vector.broadcast %cst_48 : f32 to vector<160x1xf32>
    %139 = arith.select %134, %126, %138 : vector<160x1xi1>, vector<160x1xf32>
    %140 = arith.mulf %139, %137 : vector<160x1xf32>
    %141 = arith.addf %121, %140 : vector<160x1xf32>
    %c1_i32 = arith.constant 1 : i32
    %142 = vector.broadcast %c1_i32 : i32 to vector<160x4xi32>
    %143 = arith.cmpi eq, %9, %142 : vector<160x4xi32>
    %cst_49 = arith.constant 0.000000e+00 : f32
    %144 = vector.shape_cast %141 : vector<160x1xf32> to vector<160x1xf32>
    %145 = vector.broadcast %144 : vector<160x1xf32> to vector<160x4xf32>
    %146 = vector.broadcast %cst_49 : f32 to vector<160x4xf32>
    %147 = arith.select %143, %145, %146 : vector<160x4xi1>, vector<160x4xf32>
    %148 = arith.addf %79, %147 : vector<160x4xf32>
    %149 = vector.extract_strided_slice %5 {offsets = [0, 256], sizes = [160, 128], strides = [1, 1]} : vector<160x512xf32> to vector<160x128xf32>
    %cst_50 = arith.constant 0xFF800000 : f32
    %150 = vector.broadcast %cst_50 : f32 to vector<160x128xf32>
    %151 = arith.select %8, %149, %150 : vector<160x128xi1>, vector<160x128xf32>
    %cst_51 = arith.constant 0.000000e+00 : f32
    %152 = vector.broadcast %cst_51 : f32 to vector<160x1xf32>
    %cst_52 = arith.constant 3.000000e+00 : f32
    %153 = vector.broadcast %cst_52 : f32 to vector<160x1xf32>
    %cst_53 = arith.constant dense<0xFF800000> : vector<160xf32>
    %154 = vector.multi_reduction <maximumf>, %151, %cst_53 [1] : vector<160x128xf32> to vector<160xf32>
    %155 = vector.shape_cast %154 : vector<160xf32> to vector<160x1xf32>
    %156 = vector.broadcast %155 : vector<160x1xf32> to vector<160x128xf32>
    %157 = arith.cmpf oeq, %151, %156 : vector<160x128xf32>
    %158 = arith.extui %157 : vector<160x128xi1> to vector<160x128xi32>
    %159 = arith.sitofp %158 : vector<160x128xi32> to vector<160x128xf32>
    %cst_54 = arith.constant dense<0.000000e+00> : vector<160xf32>
    %160 = vector.multi_reduction <add>, %159, %cst_54 [1] : vector<160x128xf32> to vector<160xf32>
    %161 = vector.shape_cast %160 : vector<160xf32> to vector<160x1xf32>
    %cst_55 = arith.constant 0xFF800000 : f32
    %162 = vector.broadcast %cst_55 : f32 to vector<160x1xf32>
    %163 = arith.cmpf ogt, %155, %162 : vector<160x1xf32>
    %164 = arith.minimumf %161, %153 : vector<160x1xf32>
    %cst_56 = arith.constant 0.000000e+00 : f32
    %165 = vector.broadcast %cst_56 : f32 to vector<160x1xf32>
    %166 = arith.select %163, %164, %165 : vector<160x1xi1>, vector<160x1xf32>
    %cst_57 = arith.constant 0.000000e+00 : f32
    %167 = vector.broadcast %cst_57 : f32 to vector<160x1xf32>
    %168 = arith.select %163, %155, %167 : vector<160x1xi1>, vector<160x1xf32>
    %169 = arith.mulf %168, %166 : vector<160x1xf32>
    %170 = arith.addf %152, %169 : vector<160x1xf32>
    %171 = arith.subf %153, %166 : vector<160x1xf32>
    %cst_58 = arith.constant 0xFF800000 : f32
    %172 = vector.broadcast %cst_58 : f32 to vector<160x128xf32>
    %173 = arith.select %157, %172, %151 : vector<160x128xi1>, vector<160x128xf32>
    %cst_59 = arith.constant dense<0xFF800000> : vector<160xf32>
    %174 = vector.multi_reduction <maximumf>, %173, %cst_59 [1] : vector<160x128xf32> to vector<160xf32>
    %175 = vector.shape_cast %174 : vector<160xf32> to vector<160x1xf32>
    %176 = vector.broadcast %175 : vector<160x1xf32> to vector<160x128xf32>
    %177 = arith.cmpf oeq, %173, %176 : vector<160x128xf32>
    %178 = arith.extui %177 : vector<160x128xi1> to vector<160x128xi32>
    %179 = arith.sitofp %178 : vector<160x128xi32> to vector<160x128xf32>
    %cst_60 = arith.constant dense<0.000000e+00> : vector<160xf32>
    %180 = vector.multi_reduction <add>, %179, %cst_60 [1] : vector<160x128xf32> to vector<160xf32>
    %181 = vector.shape_cast %180 : vector<160xf32> to vector<160x1xf32>
    %cst_61 = arith.constant 0xFF800000 : f32
    %182 = vector.broadcast %cst_61 : f32 to vector<160x1xf32>
    %183 = arith.cmpf ogt, %175, %182 : vector<160x1xf32>
    %184 = arith.minimumf %181, %171 : vector<160x1xf32>
    %cst_62 = arith.constant 0.000000e+00 : f32
    %185 = vector.broadcast %cst_62 : f32 to vector<160x1xf32>
    %186 = arith.select %183, %184, %185 : vector<160x1xi1>, vector<160x1xf32>
    %cst_63 = arith.constant 0.000000e+00 : f32
    %187 = vector.broadcast %cst_63 : f32 to vector<160x1xf32>
    %188 = arith.select %183, %175, %187 : vector<160x1xi1>, vector<160x1xf32>
    %189 = arith.mulf %188, %186 : vector<160x1xf32>
    %190 = arith.addf %170, %189 : vector<160x1xf32>
    %191 = arith.subf %171, %186 : vector<160x1xf32>
    %cst_64 = arith.constant 0xFF800000 : f32
    %192 = vector.broadcast %cst_64 : f32 to vector<160x128xf32>
    %193 = arith.select %177, %192, %173 : vector<160x128xi1>, vector<160x128xf32>
    %cst_65 = arith.constant dense<0xFF800000> : vector<160xf32>
    %194 = vector.multi_reduction <maximumf>, %193, %cst_65 [1] : vector<160x128xf32> to vector<160xf32>
    %195 = vector.shape_cast %194 : vector<160xf32> to vector<160x1xf32>
    %196 = vector.broadcast %195 : vector<160x1xf32> to vector<160x128xf32>
    %197 = arith.cmpf oeq, %193, %196 : vector<160x128xf32>
    %198 = arith.extui %197 : vector<160x128xi1> to vector<160x128xi32>
    %199 = arith.sitofp %198 : vector<160x128xi32> to vector<160x128xf32>
    %cst_66 = arith.constant dense<0.000000e+00> : vector<160xf32>
    %200 = vector.multi_reduction <add>, %199, %cst_66 [1] : vector<160x128xf32> to vector<160xf32>
    %201 = vector.shape_cast %200 : vector<160xf32> to vector<160x1xf32>
    %cst_67 = arith.constant 0xFF800000 : f32
    %202 = vector.broadcast %cst_67 : f32 to vector<160x1xf32>
    %203 = arith.cmpf ogt, %195, %202 : vector<160x1xf32>
    %204 = arith.minimumf %201, %191 : vector<160x1xf32>
    %cst_68 = arith.constant 0.000000e+00 : f32
    %205 = vector.broadcast %cst_68 : f32 to vector<160x1xf32>
    %206 = arith.select %203, %204, %205 : vector<160x1xi1>, vector<160x1xf32>
    %cst_69 = arith.constant 0.000000e+00 : f32
    %207 = vector.broadcast %cst_69 : f32 to vector<160x1xf32>
    %208 = arith.select %203, %195, %207 : vector<160x1xi1>, vector<160x1xf32>
    %209 = arith.mulf %208, %206 : vector<160x1xf32>
    %210 = arith.addf %190, %209 : vector<160x1xf32>
    %c2_i32 = arith.constant 2 : i32
    %211 = vector.broadcast %c2_i32 : i32 to vector<160x4xi32>
    %212 = arith.cmpi eq, %9, %211 : vector<160x4xi32>
    %cst_70 = arith.constant 0.000000e+00 : f32
    %213 = vector.shape_cast %210 : vector<160x1xf32> to vector<160x1xf32>
    %214 = vector.broadcast %213 : vector<160x1xf32> to vector<160x4xf32>
    %215 = vector.broadcast %cst_70 : f32 to vector<160x4xf32>
    %216 = arith.select %212, %214, %215 : vector<160x4xi1>, vector<160x4xf32>
    %217 = arith.addf %148, %216 : vector<160x4xf32>
    %218 = vector.extract_strided_slice %5 {offsets = [0, 384], sizes = [160, 128], strides = [1, 1]} : vector<160x512xf32> to vector<160x128xf32>
    %cst_71 = arith.constant 0xFF800000 : f32
    %219 = vector.broadcast %cst_71 : f32 to vector<160x128xf32>
    %220 = arith.select %8, %218, %219 : vector<160x128xi1>, vector<160x128xf32>
    %cst_72 = arith.constant 0.000000e+00 : f32
    %221 = vector.broadcast %cst_72 : f32 to vector<160x1xf32>
    %cst_73 = arith.constant 3.000000e+00 : f32
    %222 = vector.broadcast %cst_73 : f32 to vector<160x1xf32>
    %cst_74 = arith.constant dense<0xFF800000> : vector<160xf32>
    %223 = vector.multi_reduction <maximumf>, %220, %cst_74 [1] : vector<160x128xf32> to vector<160xf32>
    %224 = vector.shape_cast %223 : vector<160xf32> to vector<160x1xf32>
    %225 = vector.broadcast %224 : vector<160x1xf32> to vector<160x128xf32>
    %226 = arith.cmpf oeq, %220, %225 : vector<160x128xf32>
    %227 = arith.extui %226 : vector<160x128xi1> to vector<160x128xi32>
    %228 = arith.sitofp %227 : vector<160x128xi32> to vector<160x128xf32>
    %cst_75 = arith.constant dense<0.000000e+00> : vector<160xf32>
    %229 = vector.multi_reduction <add>, %228, %cst_75 [1] : vector<160x128xf32> to vector<160xf32>
    %230 = vector.shape_cast %229 : vector<160xf32> to vector<160x1xf32>
    %cst_76 = arith.constant 0xFF800000 : f32
    %231 = vector.broadcast %cst_76 : f32 to vector<160x1xf32>
    %232 = arith.cmpf ogt, %224, %231 : vector<160x1xf32>
    %233 = arith.minimumf %230, %222 : vector<160x1xf32>
    %cst_77 = arith.constant 0.000000e+00 : f32
    %234 = vector.broadcast %cst_77 : f32 to vector<160x1xf32>
    %235 = arith.select %232, %233, %234 : vector<160x1xi1>, vector<160x1xf32>
    %cst_78 = arith.constant 0.000000e+00 : f32
    %236 = vector.broadcast %cst_78 : f32 to vector<160x1xf32>
    %237 = arith.select %232, %224, %236 : vector<160x1xi1>, vector<160x1xf32>
    %238 = arith.mulf %237, %235 : vector<160x1xf32>
    %239 = arith.addf %221, %238 : vector<160x1xf32>
    %240 = arith.subf %222, %235 : vector<160x1xf32>
    %cst_79 = arith.constant 0xFF800000 : f32
    %241 = vector.broadcast %cst_79 : f32 to vector<160x128xf32>
    %242 = arith.select %226, %241, %220 : vector<160x128xi1>, vector<160x128xf32>
    %cst_80 = arith.constant dense<0xFF800000> : vector<160xf32>
    %243 = vector.multi_reduction <maximumf>, %242, %cst_80 [1] : vector<160x128xf32> to vector<160xf32>
    %244 = vector.shape_cast %243 : vector<160xf32> to vector<160x1xf32>
    %245 = vector.broadcast %244 : vector<160x1xf32> to vector<160x128xf32>
    %246 = arith.cmpf oeq, %242, %245 : vector<160x128xf32>
    %247 = arith.extui %246 : vector<160x128xi1> to vector<160x128xi32>
    %248 = arith.sitofp %247 : vector<160x128xi32> to vector<160x128xf32>
    %cst_81 = arith.constant dense<0.000000e+00> : vector<160xf32>
    %249 = vector.multi_reduction <add>, %248, %cst_81 [1] : vector<160x128xf32> to vector<160xf32>
    %250 = vector.shape_cast %249 : vector<160xf32> to vector<160x1xf32>
    %cst_82 = arith.constant 0xFF800000 : f32
    %251 = vector.broadcast %cst_82 : f32 to vector<160x1xf32>
    %252 = arith.cmpf ogt, %244, %251 : vector<160x1xf32>
    %253 = arith.minimumf %250, %240 : vector<160x1xf32>
    %cst_83 = arith.constant 0.000000e+00 : f32
    %254 = vector.broadcast %cst_83 : f32 to vector<160x1xf32>
    %255 = arith.select %252, %253, %254 : vector<160x1xi1>, vector<160x1xf32>
    %cst_84 = arith.constant 0.000000e+00 : f32
    %256 = vector.broadcast %cst_84 : f32 to vector<160x1xf32>
    %257 = arith.select %252, %244, %256 : vector<160x1xi1>, vector<160x1xf32>
    %258 = arith.mulf %257, %255 : vector<160x1xf32>
    %259 = arith.addf %239, %258 : vector<160x1xf32>
    %260 = arith.subf %240, %255 : vector<160x1xf32>
    %cst_85 = arith.constant 0xFF800000 : f32
    %261 = vector.broadcast %cst_85 : f32 to vector<160x128xf32>
    %262 = arith.select %246, %261, %242 : vector<160x128xi1>, vector<160x128xf32>
    %cst_86 = arith.constant dense<0xFF800000> : vector<160xf32>
    %263 = vector.multi_reduction <maximumf>, %262, %cst_86 [1] : vector<160x128xf32> to vector<160xf32>
    %264 = vector.shape_cast %263 : vector<160xf32> to vector<160x1xf32>
    %265 = vector.broadcast %264 : vector<160x1xf32> to vector<160x128xf32>
    %266 = arith.cmpf oeq, %262, %265 : vector<160x128xf32>
    %267 = arith.extui %266 : vector<160x128xi1> to vector<160x128xi32>
    %268 = arith.sitofp %267 : vector<160x128xi32> to vector<160x128xf32>
    %cst_87 = arith.constant dense<0.000000e+00> : vector<160xf32>
    %269 = vector.multi_reduction <add>, %268, %cst_87 [1] : vector<160x128xf32> to vector<160xf32>
    %270 = vector.shape_cast %269 : vector<160xf32> to vector<160x1xf32>
    %cst_88 = arith.constant 0xFF800000 : f32
    %271 = vector.broadcast %cst_88 : f32 to vector<160x1xf32>
    %272 = arith.cmpf ogt, %264, %271 : vector<160x1xf32>
    %273 = arith.minimumf %270, %260 : vector<160x1xf32>
    %cst_89 = arith.constant 0.000000e+00 : f32
    %274 = vector.broadcast %cst_89 : f32 to vector<160x1xf32>
    %275 = arith.select %272, %273, %274 : vector<160x1xi1>, vector<160x1xf32>
    %cst_90 = arith.constant 0.000000e+00 : f32
    %276 = vector.broadcast %cst_90 : f32 to vector<160x1xf32>
    %277 = arith.select %272, %264, %276 : vector<160x1xi1>, vector<160x1xf32>
    %278 = arith.mulf %277, %275 : vector<160x1xf32>
    %279 = arith.addf %259, %278 : vector<160x1xf32>
    %c3_i32 = arith.constant 3 : i32
    %280 = vector.broadcast %c3_i32 : i32 to vector<160x4xi32>
    %281 = arith.cmpi eq, %9, %280 : vector<160x4xi32>
    %cst_91 = arith.constant 0.000000e+00 : f32
    %282 = vector.shape_cast %279 : vector<160x1xf32> to vector<160x1xf32>
    %283 = vector.broadcast %282 : vector<160x1xf32> to vector<160x4xf32>
    %284 = vector.broadcast %cst_91 : f32 to vector<160x4xf32>
    %285 = arith.select %281, %283, %284 : vector<160x4xi1>, vector<160x4xf32>
    %286 = arith.addf %217, %285 : vector<160x4xf32>
    %cst_92 = arith.constant dense<0.000000e+00> : vector<10x4xf32>
    %287 = tpu.matmul %4, %286, %cst_92 {dimension_numbers = #tpu.dot_dimension_numbers<[1], [0], [0], [1], [0, 0, 1, 1], [], []>} : vector<10x160xf32>, vector<160x4xf32>, vector<10x4xf32> -> vector<10x4xf32>
    %c0_93 = arith.constant 0 : index
    %c0_94 = arith.constant 0 : index
    %c0_95 = arith.constant 0 : index
    %288 = vector.load %arg5[%c0_93, %c0_94, %c0_95] : memref<1x10x4xf32, #tpu.memory_space<vmem>>, vector<1x10x4xf32>
    %289 = vector.shape_cast %288 : vector<1x10x4xf32> to vector<10x4xf32>
    %290 = vector.shape_cast %287 : vector<10x4xf32> to vector<1x10x4xf32>
    tpu.vector_store %arg5[%c0_93, %c0_94, %c0_95], %290 {strides = array<i32>} : memref<1x10x4xf32, #tpu.memory_space<vmem>>, vector<1x10x4xf32>,
    return
  }
  func.func @transform_0(%arg0: i32, %arg1: i32) -> (i32, i32, i32) {
    %c0_i32 = arith.constant 0 : i32
    %c0_i32_0 = arith.constant 0 : i32
    return %arg0, %arg1, %c0_i32 : i32, i32, i32
  }
  func.func @transform_1(%arg0: i32, %arg1: i32) -> (i32, i32, i32) {
    %c0_i32 = arith.constant 0 : i32
    %c0_i32_0 = arith.constant 0 : i32
    %c0_i32_1 = arith.constant 0 : i32
    return %arg0, %c0_i32, %c0_i32_0 : i32, i32, i32
  }
  func.func @transform_2(%arg0: i32, %arg1: i32) -> (i32, i32) {
    %c0_i32 = arith.constant 0 : i32
    %c0_i32_0 = arith.constant 0 : i32
    %c0_i32_1 = arith.constant 0 : i32
    return %c0_i32, %c0_i32_0 : i32, i32
  }
  func.func @transform_3(%arg0: i32, %arg1: i32) -> (i32, i32, i32) {
    %c0_i32 = arith.constant 0 : i32
    %c0_i32_0 = arith.constant 0 : i32
    return %arg0, %arg1, %c0_i32 : i32, i32, i32
  }
}

</mosaic_0001>

<bundles_post_ra>
// kernel: tpu_custom_call.1
= control target key start
LH: loop header
LB: loop body
LE: loop exit
PB: predicated region body
PF: predicated region fallthrough
CT: control target
= control target key end

     0   :  { %s5007_s12 = smov 0   ;;  %s5009_s13 = smov 0   ;;  %s10860_s0 = inlined_call_operand.vmem [shape: f32[2,160,32], index: 0, kind: input, shape index: {}]   ;;  %s10861_s1 = inlined_call_operand.vmem [shape: f32[2,32,512], index: 1, kind: input, shape index: {}]   ;;  %s10862_s2 = inlined_call_operand.vmem [shape: f32[10,160], index: 2, kind: input, shape index: {}]   ;;  %s10863_s3 = inlined_call_operand.vmem [shape: f32[2,10,4], index: 3, kind: output, shape index: {}]  }
   0x1   :  { %s5011_s14 = smov 0  }
   0x2 LB: > { %s25_s15 = sadd.s32 1, %s4979_s13  ;;  %p4576_p0 = scmp.ge.s32.totalorder %s4983_s14, 1  ;;  %s4983_s14 = sphi %s5011_s14, %s13_s14   ;;  %s4979_s13 = sphi %s5009_s13, %s13177_s13   ;;  %s4975_s12 = sphi %s5007_s12, %s13176_s12  }
   0x3   : > { %p27_p1 = scmp.ge.s32.totalorder %s25_s15, 2  ;;  %p168_p2 = scmp.lt.s32.totalorder %s4983_s14, 3 }
   0x5   : > { %s13179_s15 = smov (%p27_p1, %s25_s15), 0  ;;  %p169_p3 = pnand %p4576_p0, %p168_p2 }
   0x7   : > { %172 = sbr.rel (%p169_p3) target bundleno = 1585 (0x631), region = 32 }
   0xe   : > { %p206_p4 = scmp.lt.s32.totalorder %s4975_s12, 1  ;;  %v10864_v0 = vmov 0.0   ;;  %vm11036_vm0 = vcmask 261120   ;;  %v701_v45 = vlaneseq }
   0xf   : > { %395 = vmatprep.mubr.f32.mxu0 %v10864_v0  ;;  %580 = vmatprep.mubr.f32.mxu1 %v10864_v0 }
  0x10   : > { %s13181_s12 = smov (!%p206_p4, %s4975_s12), 1  ;;  %v5137_v46 = vand.u32 127, %v701_v45 }
  0x11   : > { %s4866_s16 = sshll.u32 %s13181_s12, 7  ;;  %s4934_s20 = smul.u32 160, %s13181_s12 }
  0x12   : > { %s219_s19 = scalar_lea.vmem %s10861_s1, %s4866_s16  ;;  %11756 = vst [vmem:[#allocation2_spill] sm:$0xff] %v5137_v46  ;;  %vm703_vm1 = vcmp.lt.s32.totalorder %v5137_v46, 16  ;;  %s4867_s5 = sshll.u32 %s13181_s12, 4 }
  0x13   : > { %v251_v1 = vld [vmem:[%s219_s19 + $0x8] sm:$0xff]  ;;  %v253_v3 = vld [vmem:[%s219_s19 + $0x18] sm:$0xff]  ;;  %v250_v6 = vld [vmem:[%s219_s19] sm:$0xff]  ;;  %s5037_s23 = scalar_lea.vmem %s10860_s0, %s4934_s20  ;;  %s228_s8 = scalar_lea.vmem %s10863_s3, %s4867_s5 }
  0x14   : > { %v255_v2 = vld [vmem:[%s219_s19 + $0x28] sm:$0xff]  ;;  %v257_v5 = vld [vmem:[%s219_s19 + $0x38] sm:$0xff]  ;;  %v254_v7 = vld [vmem:[%s219_s19 + $0x20] sm:$0xff] }
  0x15   : > { %v4868_v4 = vpack.c.bf16 %v255_v2, %v251_v1  ;;  %v4876_v8 = vpack.c.bf16 %v257_v5, %v253_v3  ;;  %v4870_v9 = vpack.c.bf16 %v254_v7, %v250_v6  ;;  %v252_v10 = vld [vmem:[%s219_s19 + $0x10] sm:$0xff]  ;;  %v259_v12 = vld [vmem:[%s219_s19 + $0x48] sm:$0xff]  ;;  %v261_v15 = vld [vmem:[%s219_s19 + $0x58] sm:$0xff] }
  0x16   : > { %v256_v11 = vld [vmem:[%s219_s19 + $0x30] sm:$0xff]  ;;  %v263_v14 = vld [vmem:[%s219_s19 + $0x68] sm:$0xff]  ;;  %v265_v16 = vld [vmem:[%s219_s19 + $0x78] sm:$0xff] }
  0x17   : > { %4869 = vmatprep.subr.bf16.mxu0 %v4868_v4  ;;  %v4878_v13 = vpack.c.bf16 %v256_v11, %v252_v10  ;;  %4877 = vmatprep.subr.bf16.mxu1 %v4876_v8  ;;  %v4872_v17 = vpack.c.bf16 %v263_v14, %v259_v12  ;;  %v4880_v18 = vpack.c.bf16 %v265_v16, %v261_v15  ;;  %v258_v19 = vld [vmem:[%s219_s19 + $0x40] sm:$0xff]  ;;  %v260_v21 = vld [vmem:[%s219_s19 + $0x50] sm:$0xff]  ;;  %v231_v26 = vld [vmem:[%s5037_s23 + $0x8] sm:$0xff] }
  0x18   : > { %4871 = vmatpush1.bf16.msra.mxu0 %v4870_v9  ;;  %v262_v20 = vld [vmem:[%s219_s19 + $0x60] sm:$0xff]  ;;  %v264_v23 = vld [vmem:[%s219_s19 + $0x70] sm:$0xff]  ;;  %v233_v28 = vld [vmem:[%s5037_s23 + $0x18] sm:$0xff] }
  0x19   : > { %4879 = vmatpush1.bf16.msra.mxu1 %v4878_v13  ;;  %v4874_v22 = vpack.c.bf16 %v262_v20, %v258_v19  ;;  %4873 = vmatprep.subr.bf16.mxu0 %v4872_v17  ;;  %v4882_v24 = vpack.c.bf16 %v264_v23, %v260_v21  ;;  %v230_v25 = vld [vmem:[%s5037_s23] sm:$0xff]  ;;  %v232_v27 = vld [vmem:[%s5037_s23 + $0x10] sm:$0xff]  ;;  %v235_v30 = vld [vmem:[%s5037_s23 + $0x28] sm:$0xff] }
  0x1a   : > { %4881 = vmatprep.subr.bf16.mxu1 %v4880_v18  ;;  %v234_v29 = vld [vmem:[%s5037_s23 + $0x20] sm:$0xff]  ;;  %v236_v31 = vld [vmem:[%s5037_s23 + $0x30] sm:$0xff]  ;;  %v237_v32 = vld [vmem:[%s5037_s23 + $0x38] sm:$0xff] }
  0x1b   : > { %v238_v33 = vld [vmem:[%s5037_s23 + $0x40] sm:$0xff]  ;;  %v239_v34 = vld [vmem:[%s5037_s23 + $0x48] sm:$0xff]  ;;  %v240_v35 = vld [vmem:[%s5037_s23 + $0x50] sm:$0xff] }
  0x1c   : > { %4875 = vmatpush1.bf16.msra.mxu0 %v4874_v22  ;;  %v241_v36 = vld [vmem:[%s5037_s23 + $0x58] sm:$0xff]  ;;  %v242_v37 = vld [vmem:[%s5037_s23 + $0x60] sm:$0xff]  ;;  %v243_v38 = vld [vmem:[%s5037_s23 + $0x68] sm:$0xff] }
  0x1d   : > { %4883 = vmatpush1.bf16.msra.mxu1 %v4882_v24  ;;  %v244_v39 = vld [vmem:[%s5037_s23 + $0x70] sm:$0xff]  ;;  %v245_v40 = vld [vmem:[%s5037_s23 + $0x78] sm:$0xff]  ;;  %v246_v41 = vld [vmem:[%s5037_s23 + $0x80] sm:$0xff] }
  0x1e   : > { %v247_v42 = vld [vmem:[%s5037_s23 + $0x88] sm:$0xff]  ;;  %v248_v43 = vld [vmem:[%s5037_s23 + $0x90] sm:$0xff]  ;;  %v249_v44 = vld [vmem:[%s5037_s23 + $0x98] sm:$0xff] }
  0x1f   : > { %4582 = vmatmul.mubr.msk.f32.vlgmr.msra.gmra.mrb[0].mxu0 %vm11036_vm0, %v230_v25 }
  0x20   : > { %4602 = vmatmul.mubr.msk.f32.vlgmr.msra.gmra.mrb[0].mxu1 %vm11036_vm0, %v230_v25  ;;  %401 = vmatprep.mubr.f32.mxu0 %v10864_v0 }
  0x21   : > { %586 = vmatprep.mubr.f32.mxu1 %v10864_v0 }
  0x23   : > { %4583 = vmatmul.mubr.msk.f32.gmra.mrb[2].mxu0 %vm11036_vm0, %v231_v26 }
  0x24   : > { %407 = vmatprep.mubr.f32.mxu0 %v10864_v0  ;;  %4603 = vmatmul.mubr.msk.f32.gmra.mrb[2].mxu1 %vm11036_vm0, %v231_v26 }
  0x25   : > { %592 = vmatprep.mubr.f32.mxu1 %v10864_v0 }
  0x27   : > { %4584 = vmatmul.mubr.msk.f32.gmra.mrb[4].mxu0 %vm11036_vm0, %v232_v27 }
  0x28   : > { %4604 = vmatmul.mubr.msk.f32.gmra.mrb[4].mxu1 %vm11036_vm0, %v232_v27  ;;  %413 = vmatprep.mubr.f32.mxu0 %v10864_v0 }
  0x29   : > { %598 = vmatprep.mubr.f32.mxu1 %v10864_v0 }
  0x2b   : > { %4585 = vmatmul.mubr.msk.f32.gmra.mrb[6].mxu0 %vm11036_vm0, %v233_v28 }
  0x2c   : > { %4605 = vmatmul.mubr.msk.f32.gmra.mrb[6].mxu1 %vm11036_vm0, %v233_v28  ;;  %419 = vmatprep.mubr.f32.mxu0 %v10864_v0 }
  0x2d   : > { %604 = vmatprep.mubr.f32.mxu1 %v10864_v0 }
  0x2f   : > { %4586 = vmatmul.mubr.msk.f32.gmra.mrb[8].mxu0 %vm11036_vm0, %v234_v29 }
  0x30   : > { %4606 = vmatmul.mubr.msk.f32.gmra.mrb[8].mxu1 %vm11036_vm0, %v234_v29  ;;  %425 = vmatprep.mubr.f32.mxu0 %v10864_v0 }
  0x31   : > { %610 = vmatprep.mubr.f32.mxu1 %v10864_v0 }
  0x33   : > { %4587 = vmatmul.mubr.msk.f32.gmra.mrb[10].mxu0 %vm11036_vm0, %v235_v30 }
  0x34   : > { %4607 = vmatmul.mubr.msk.f32.gmra.mrb[10].mxu1 %vm11036_vm0, %v235_v30  ;;  %431 = vmatprep.mubr.f32.mxu0 %v10864_v0 }
  0x35   : > { %616 = vmatprep.mubr.f32.mxu1 %v10864_v0 }
  0x37   : > { %4588 = vmatmul.mubr.msk.f32.gmra.mrb[12].mxu0 %vm11036_vm0, %v236_v31 }
  0x38   : > { %4608 = vmatmul.mubr.msk.f32.gmra.mrb[12].mxu1 %vm11036_vm0, %v236_v31  ;;  %437 = vmatprep.mubr.f32.mxu0 %v10864_v0 }
  0x39   : > { %622 = vmatprep.mubr.f32.mxu1 %v10864_v0 }
  0x3b   : > { %4589 = vmatmul.mubr.msk.f32.gmra.mrb[14].mxu0 %vm11036_vm0, %v237_v32 }
  0x3c   : > { %4609 = vmatmul.mubr.msk.f32.gmra.mrb[14].mxu1 %vm11036_vm0, %v237_v32  ;;  %443 = vmatprep.mubr.f32.mxu0 %v10864_v0 }
  0x3d   : > { %628 = vmatprep.mubr.f32.mxu1 %v10864_v0 }
  0x3f   : > { %4590 = vmatmul.mubr.msk.f32.gmra.mrb[16].mxu0 %vm11036_vm0, %v238_v33 }
  0x40   : > { %4610 = vmatmul.mubr.msk.f32.gmra.mrb[16].mxu1 %vm11036_vm0, %v238_v33  ;;  %449 = vmatprep.mubr.f32.mxu0 %v10864_v0 }
  0x41   : > { %634 = vmatprep.mubr.f32.mxu1 %v10864_v0 }
  0x43   : > { %4591 = vmatmul.mubr.msk.f32.gmra.mrb[18].mxu0 %vm11036_vm0, %v239_v34 }
  0x44   : > { %4611 = vmatmul.mubr.msk.f32.gmra.mrb[18].mxu1 %vm11036_vm0, %v239_v34  ;;  %455 = vmatprep.mubr.f32.mxu0 %v10864_v0 }
  0x45   : > { %640 = vmatprep.mubr.f32.mxu1 %v10864_v0 }
  0x47   : > { %4592 = vmatmul.mubr.msk.f32.gmra.mrb[20].mxu0 %vm11036_vm0, %v240_v35 }
  0x48   : > { %4612 = vmatmul.mubr.msk.f32.gmra.mrb[20].mxu1 %vm11036_vm0, %v240_v35  ;;  %461 = vmatprep.mubr.f32.mxu0 %v10864_v0 }
  0x49   : > { %646 = vmatprep.mubr.f32.mxu1 %v10864_v0 }
  0x4b   : > { %4593 = vmatmul.mubr.msk.f32.gmra.mrb[22].mxu0 %vm11036_vm0, %v241_v36 }
  0x4c   : > { %4613 = vmatmul.mubr.msk.f32.gmra.mrb[22].mxu1 %vm11036_vm0, %v241_v36  ;;  %467 = vmatprep.mubr.f32.mxu0 %v10864_v0 }
  0x4d   : > { %652 = vmatprep.mubr.f32.mxu1 %v10864_v0 }
  0x4f   : > { %4594 = vmatmul.mubr.msk.f32.gmra.mrb[24].mxu0 %vm11036_vm0, %v242_v37 }
  0x50   : > { %4614 = vmatmul.mubr.msk.f32.gmra.mrb[24].mxu1 %vm11036_vm0, %v242_v37  ;;  %473 = vmatprep.mubr.f32.mxu0 %v10864_v0 }
  0x51   : > { %658 = vmatprep.mubr.f32.mxu1 %v10864_v0 }
  0x53   : > { %4595 = vmatmul.mubr.msk.f32.gmra.mrb[26].mxu0 %vm11036_vm0, %v243_v38 }
  0x54   : > { %4615 = vmatmul.mubr.msk.f32.gmra.mrb[26].mxu1 %vm11036_vm0, %v243_v38  ;;  %479 = vmatprep.mubr.f32.mxu0 %v10864_v0 }
  0x55   : > { %664 = vmatprep.mubr.f32.mxu1 %v10864_v0 }
  0x57   : > { %4596 = vmatmul.mubr.msk.f32.gmra.mrb[28].mxu0 %vm11036_vm0, %v244_v39 }
  0x58   : > { %4616 = vmatmul.mubr.msk.f32.gmra.mrb[28].mxu1 %vm11036_vm0, %v244_v39  ;;  %485 = vmatprep.mubr.f32.mxu0 %v10864_v0 }
  0x59   : > { %670 = vmatprep.mubr.f32.mxu1 %v10864_v0 }
  0x5b   : > { %4597 = vmatmul.mubr.msk.f32.gmra.mrb[30].mxu0 %vm11036_vm0, %v245_v40 }
  0x5c   : > { %4617 = vmatmul.mubr.msk.f32.gmra.mrb[30].mxu1 %vm11036_vm0, %v245_v40  ;;  %491 = vmatprep.mubr.f32.mxu0 %v10864_v0 }
  0x5d   : > { %676 = vmatprep.mubr.f32.mxu1 %v10864_v0 }
  0x5f   : > { %4598 = vmatmul.mubr.msk.f32.gmra.mrb[32].mxu0 %vm11036_vm0, %v246_v41 }
  0x60   : > { %4618 = vmatmul.mubr.msk.f32.gmra.mrb[32].mxu1 %vm11036_vm0, %v246_v41  ;;  %497 = vmatprep.mubr.f32.mxu0 %v10864_v0 }
  0x61   : > { %682 = vmatprep.mubr.f32.mxu1 %v10864_v0 }
  0x63   : > { %4599 = vmatmul.mubr.msk.f32.gmra.mrb[34].mxu0 %vm11036_vm0, %v247_v42 }
  0x64   : > { %4619 = vmatmul.mubr.msk.f32.gmra.mrb[34].mxu1 %vm11036_vm0, %v247_v42  ;;  %503 = vmatprep.mubr.f32.mxu0 %v10864_v0 }
  0x65   : > { %688 = vmatprep.mubr.f32.mxu1 %v10864_v0 }
  0x67   : > { %4600 = vmatmul.mubr.msk.f32.gmra.mrb[36].mxu0 %vm11036_vm0, %v248_v43 }
  0x68   : > { %4620 = vmatmul.mubr.msk.f32.gmra.mrb[36].mxu1 %vm11036_vm0, %v248_v43  ;;  %509 = vmatprep.mubr.f32.mxu0 %v10864_v0 }
  0x69   : > { %694 = vmatprep.mubr.f32.mxu1 %v10864_v0 }
  0x6b   : > { %4601 = vmatmul.mubr.msk.f32.gmra.mrb[38].mxu0 %vm11036_vm0, %v249_v44 }
  0x6c   : > { %4621 = vmatmul.mubr.msk.f32.gmra.mrb[38].mxu1 %vm11036_vm0, %v249_v44 }
  0xf2   : > { %v397_v47 = vpop.f32.mrb[0].mxu0 }
  0xf3   : > { %v5142_v48 = vsel %vm703_vm1, %v397_v47, -inf  ;;  %v582_v49 = vpop.f32.mrb[0].mxu1  ;;  %v399_v50 = vpop.f32.mrb[1].mxu0 }
  0xf4   : > { %v5146_v51 = vsel %vm703_vm1, %v582_v49, -inf  ;;  %v584_v52 = vpop.f32.mrb[1].mxu1  ;;  %724 = vmax.xlane.f32.xlu0 %v5142_v48  ;;  %v5152_v54 = vsel %vm703_vm1, %v399_v50, -inf }
  0xf5   : > { %11757 = vst [vmem:[#allocation3_spill] sm:$0xff] %v5146_v51  ;;  %2566 = vmax.xlane.f32.xlu1 %v5146_v51  ;;  %v5156_v57 = vsel %vm703_vm1, %v584_v52, -inf }
  0xf6   : > { %v403_v53 = vpop.f32.mrb[2].mxu0  ;;  %11758 = vst [vmem:[#allocation4_spill] sm:$0xff] %v5156_v57 }
  0xf7   : > { %v405_v55 = vpop.f32.mrb[3].mxu0  ;;  %v588_v56 = vpop.f32.mrb[2].mxu1  ;;  %v5162_v59 = vsel %vm703_vm1, %v403_v53, -inf }
  0xf8   : > { %1645 = vmax.xlane.f32.xlu0 %v5152_v54  ;;  %v590_v58 = vpop.f32.mrb[3].mxu1  ;;  %v5166_v60 = vsel %vm703_vm1, %v405_v55, -inf  ;;  %v5172_v2 = vsel %vm703_vm1, %v588_v56, -inf }
  0xf9   : > { %3487 = vmax.xlane.f32.xlu1 %v5156_v57  ;;  %11759 = vst [vmem:[#allocation5_spill] sm:$0xff] %v5172_v2  ;;  %v5186_v10 = vsel %vm703_vm1, %v590_v58, -inf }
  0xfa   : > { %v409_v61 = vpop.f32.mrb[4].mxu0  ;;  %11761 = vst [vmem:[#allocation7_spill] sm:$0xff] %v5186_v10 }
  0xfb   : > { %v411_v62 = vpop.f32.mrb[5].mxu0  ;;  %v594_v63 = vpop.f32.mrb[4].mxu1  ;;  %v5176_v3 = vsel %vm703_vm1, %v409_v61, -inf }
  0xfc   : > { %726 = vmax.xlane.f32.xlu0 %v5162_v59  ;;  %v596_v1 = vpop.f32.mrb[5].mxu1  ;;  %v5182_v8 = vsel %vm703_vm1, %v594_v63, -inf  ;;  %v5192_v15 = vsel %vm703_vm1, %v411_v62, -inf }
  0xfd   : > { %1647 = vmax.xlane.f32.xlu1 %v5166_v60  ;;  %11760 = vst [vmem:[#allocation6_spill] sm:$0xff] %v5182_v8  ;;  %v5196_v18 = vsel %vm703_vm1, %v596_v1, -inf }
  0xfe   : > { %v415_v4 = vpop.f32.mrb[6].mxu0  ;;  %11762 = vst [vmem:[#allocation8_spill] sm:$0xff] %v5196_v18 }
  0xff   : > { %v600_v5 = vpop.f32.mrb[6].mxu1  ;;  %v417_v6 = vpop.f32.mrb[7].mxu0  ;;  %v5206_v21 = vsel %vm703_vm1, %v415_v4, -inf }
 0x100   : > { %2568 = vmax.xlane.f32.xlu0 %v5172_v2  ;;  %v602_v7 = vpop.f32.mrb[7].mxu1  ;;  %v5202_v20 = vsel %vm703_vm1, %v600_v5, -inf  ;;  %v5218_v30 = vsel %vm703_vm1, %v417_v6, -inf }
 0x101   : > { %728 = vmax.xlane.f32.xlu1 %v5176_v3  ;;  %11763 = vst [vmem:[#allocation9_spill] sm:$0xff] %v5202_v20  ;;  %v5212_v27 = vsel %vm703_vm1, %v602_v7, -inf }
 0x102   : > { %v421_v9 = vpop.f32.mrb[8].mxu0  ;;  %11764 = vst [vmem:[#allocation10_spill] sm:$0xff] %v5212_v27 }
 0x103   : > { %v606_v11 = vpop.f32.mrb[8].mxu1  ;;  %v423_v12 = vpop.f32.mrb[9].mxu0  ;;  %v5224_v32 = vsel %vm703_vm1, %v421_v9, -inf }
 0x104   : > { %3489 = vmax.xlane.f32.xlu0 %v5186_v10  ;;  %v608_v13 = vpop.f32.mrb[9].mxu1  ;;  %v5228_v33 = vsel %vm703_vm1, %v606_v11, -inf  ;;  %v5240_v39 = vsel %vm703_vm1, %v423_v12, -inf }
 0x105   : > { %2570 = vmax.xlane.f32.xlu1 %v5182_v8  ;;  %11765 = vst [vmem:[#allocation11_spill] sm:$0xff] %v5228_v33  ;;  %11766 = vst [vmem:[#allocation12_spill] sm:$0xff] %v5240_v39  ;;  %v5248_v42 = vsel %vm703_vm1, %v608_v13, -inf }
 0x106   : > { %v427_v14 = vpop.f32.mrb[10].mxu0  ;;  %11767 = vst [vmem:[#allocation13_spill] sm:$0xff] %v5248_v42 }
 0x107   : > { %v612_v16 = vpop.f32.mrb[10].mxu1  ;;  %v429_v17 = vpop.f32.mrb[11].mxu0  ;;  %v5260_v45 = vsel %vm703_vm1, %v427_v14, -inf }
 0x108   : > { %1649 = vmax.xlane.f32.xlu0 %v5192_v15  ;;  %v614_v19 = vpop.f32.mrb[11].mxu1  ;;  %v5256_v44 = vsel %vm703_vm1, %v612_v16, -inf  ;;  %11769 = vst [vmem:[#allocation15_spill] sm:$0xff] %v5260_v45  ;;  %v5284_v61 = vsel %vm703_vm1, %v429_v17, -inf }
 0x109   : > { %3491 = vmax.xlane.f32.xlu1 %v5196_v18  ;;  %11768 = vst [vmem:[#allocation14_spill] sm:$0xff] %v5256_v44  ;;  %v5276_v55 = vsel %vm703_vm1, %v614_v19, -inf  ;;  %11771 = vst [vmem:[#allocation17_spill] sm:$0xff] %v5284_v61 }
 0x10a   : > { %v433_v22 = vpop.f32.mrb[12].mxu0  ;;  %11770 = vst [vmem:[#allocation16_spill] sm:$0xff] %v5276_v55 }
 0x10b   : > { %v618_v23 = vpop.f32.mrb[12].mxu1  ;;  %v435_v24 = vpop.f32.mrb[13].mxu0  ;;  %v5292_v63 = vsel %vm703_vm1, %v433_v22, -inf }
 0x10c   : > { %2572 = vmax.xlane.f32.xlu0 %v5202_v20  ;;  %v620_v25 = vpop.f32.mrb[13].mxu1  ;;  %11772 = vst [vmem:[#allocation18_spill] sm:$0xff] %v5292_v63  ;;  %v5296_v1 = vsel %vm703_vm1, %v618_v23, -inf  ;;  %v5312_v11 = vsel %vm703_vm1, %v435_v24, -inf }
 0x10d   : > { %730 = vmax.xlane.f32.xlu1 %v5206_v21  ;;  %11773 = vst [vmem:[#allocation19_spill] sm:$0xff] %v5296_v1  ;;  %11774 = vst [vmem:[#allocation20_spill] sm:$0xff] %v5312_v11  ;;  %v5320_v14 = vsel %vm703_vm1, %v620_v25, -inf }
 0x10e   : > { %v439_v26 = vpop.f32.mrb[14].mxu0  ;;  %11775 = vst [vmem:[#allocation21_spill] sm:$0xff] %v5320_v14 }
 0x10f   : > { %v624_v28 = vpop.f32.mrb[14].mxu1  ;;  %v5214_v29 = vpop.f32.mrb[15].mxu0  ;;  %v5332_v19 = vsel %vm703_vm1, %v439_v26, -inf }
 0x110   : > { %3493 = vmax.xlane.f32.xlu0 %v5212_v27  ;;  %v626_v31 = vpop.f32.mrb[15].mxu1  ;;  %v5328_v17 = vsel %vm703_vm1, %v624_v28, -inf  ;;  %11777 = vst [vmem:[#allocation23_spill] sm:$0xff] %v5332_v19 }
 0x111   : > { %1651 = vmax.xlane.f32.xlu1 %v5218_v30  ;;  %11776 = vst [vmem:[#allocation22_spill] sm:$0xff] %v5328_v17  ;;  %v5348_v28 = vsel %vm703_vm1, %v626_v31, -inf }
 0x112   : > { %v445_v34 = vpop.f32.mrb[16].mxu0  ;;  %11778 = vst [vmem:[#allocation24_spill] sm:$0xff] %v5348_v28 }
 0x113   : > { %v630_v35 = vpop.f32.mrb[16].mxu1  ;;  %v5230_v36 = vpop.f32.mrb[17].mxu0 }
 0x114   : > { %732 = vmax.xlane.f32.xlu0 %v5224_v32  ;;  %v5233_v37 = vpop.f32.mrb[17].mxu1  ;;  %v5369_v31 = vsel %vm703_vm1, %v630_v35, -inf }
 0x115   : > { %2574 = vmax.xlane.f32.xlu1 %v5228_v33  ;;  %11781 = vst [vmem:[#allocation27_spill] sm:$0xff] %v5369_v31 }
 0x116   : > { %v5236_v38 = vpop.f32.mrb[18].mxu0 }
 0x117   : > { %v5242_v40 = vpop.f32.mrb[18].mxu1  ;;  %v5244_v41 = vpop.f32.mrb[19].mxu0 }
 0x118   : > { %1653 = vmax.xlane.f32.xlu0 %v5240_v39  ;;  %v5251_v43 = vpop.f32.mrb[19].mxu1 }
 0x119   : > { %3495 = vmax.xlane.f32.xlu1 %v5248_v42  ;;  %v5435_v42 = vsel %vm703_vm1, %v5244_v41, -inf }
 0x11a   : > { %v5262_v47 = vpop.f32.mrb[20].mxu0 }
 0x11b   : > { %v5264_v49 = vpop.f32.mrb[20].mxu1  ;;  %v5266_v50 = vpop.f32.mrb[21].mxu0 }
 0x11c   : > { %2576 = vmax.xlane.f32.xlu0 %v5256_v44  ;;  %v5269_v52 = vpop.f32.mrb[21].mxu1  ;;  %v5456_v41 = vsel %vm703_vm1, %v5266_v50, -inf }
 0x11d   : > { %734 = vmax.xlane.f32.xlu1 %v5260_v45 }
 0x11e   : > { %v5272_v53 = vpop.f32.mrb[22].mxu0 }
 0x11f   : > { %v5278_v56 = vpop.f32.mrb[22].mxu1  ;;  %v5280_v58 = vpop.f32.mrb[23].mxu0 }
 0x120   : > { %3497 = vmax.xlane.f32.xlu0 %v5276_v55  ;;  %v5287_v62 = vpop.f32.mrb[23].mxu1 }
 0x121   : > { %1655 = vmax.xlane.f32.xlu1 %v5284_v61  ;;  %v5395_v61 = vsel %vm703_vm1, %v5233_v37, -inf  ;;  %v5480_v50 = vsel %vm703_vm1, %v5287_v62, -inf }
 0x122   : > { %v5298_v4 = vpop.f32.mrb[24].mxu0  ;;  %11783 = vst [vmem:[#allocation29_spill] sm:$0xff] %v5395_v61  ;;  %11790 = vst [vmem:[#allocation36_spill] sm:$0xff] %v5480_v50 }
 0x123   : > { %v5300_v5 = vpop.f32.mrb[24].mxu1  ;;  %v5302_v6 = vpop.f32.mrb[25].mxu0 }
 0x124   : > { %736 = vmax.xlane.f32.xlu0 %v5292_v63  ;;  %v5305_v7 = vpop.f32.mrb[25].mxu1 }
 0x125   : > { %2578 = vmax.xlane.f32.xlu1 %v5296_v1  ;;  %v5509_v62 = vsel %vm703_vm1, %v5305_v7, -inf }
 0x126   : > { %v5308_v9 = vpop.f32.mrb[26].mxu0  ;;  %11792 = vst [vmem:[#allocation38_spill] sm:$0xff] %v5509_v62 }
 0x127   : > { %v5314_v12 = vpop.f32.mrb[26].mxu1  ;;  %v5316_v13 = vpop.f32.mrb[27].mxu0 }
 0x128   : > { %1657 = vmax.xlane.f32.xlu0 %v5312_v11  ;;  %v5323_v16 = vpop.f32.mrb[27].mxu1  ;;  %v5533_v7 = vsel %vm703_vm1, %v5316_v13, -inf }
 0x129   : > { %3499 = vmax.xlane.f32.xlu1 %v5320_v14  ;;  %v5357_v14 = vsel %vm703_vm1, %v5214_v29, -inf }
 0x12a   : > { %v5334_v22 = vpop.f32.mrb[28].mxu0  ;;  %11779 = vst [vmem:[#allocation25_spill] sm:$0xff] %v5357_v14 }
 0x12b   : > { %v5336_v23 = vpop.f32.mrb[28].mxu1  ;;  %v5338_v24 = vpop.f32.mrb[29].mxu0 }
 0x12c   : > { %2580 = vmax.xlane.f32.xlu0 %v5328_v17  ;;  %v5341_v25 = vpop.f32.mrb[29].mxu1  ;;  %v5552_v13 = vsel %vm703_vm1, %v5338_v24, -inf }
 0x12d   : > { %738 = vmax.xlane.f32.xlu1 %v5332_v19  ;;  %v5365_v19 = vsel %vm703_vm1, %v445_v34, -inf  ;;  %v5386_v34 = vsel %vm703_vm1, %v5230_v36, -inf  ;;  %v5404_v36 = vsel %vm703_vm1, %v5242_v40, -inf  ;;  %v5426_v40 = vsel %vm703_vm1, %v5251_v43, -inf }
 0x12e   : > { %v5344_v0 = vpop.f32.mrb[30].mxu0  ;;  %11780 = vst [vmem:[#allocation26_spill] sm:$0xff] %v5365_v19  ;;  %11782 = vst [vmem:[#allocation28_spill] sm:$0xff] %v5386_v34  ;;  %v5444_v43 = vsel %vm703_vm1, %v5262_v47, -inf  ;;  %v5468_v47 = vsel %vm703_vm1, %v5278_v56, -inf  ;;  %v5497_v56 = vsel %vm703_vm1, %v5300_v5, -inf }
 0x12f   : > { %v5350_v26 = vpop.f32.mrb[30].mxu1  ;;  %v5352_v11 = vpop.f32.mrb[31].mxu0  ;;  %11784 = vst [vmem:[#allocation30_spill] sm:$0xff] %v5404_v36  ;;  %11786 = vst [vmem:[#allocation32_spill] sm:$0xff] %v5426_v40  ;;  %v5521_v5 = vsel %vm703_vm1, %v5308_v9, -inf  ;;  %v5540_v9 = vsel %vm703_vm1, %v5334_v22, -inf }
 0x130   : > { %3501 = vmax.xlane.f32.xlu0 %v5348_v28  ;;  %v5360_v17 = vpop.f32.mrb[31].mxu1  ;;  %11789 = vst [vmem:[#allocation35_spill] sm:$0xff] %v5468_v47  ;;  %11791 = vst [vmem:[#allocation37_spill] sm:$0xff] %v5497_v56  ;;  %v5564_v22 = vsel %vm703_vm1, %v5350_v26, -inf }
 0x131   : > { %1659 = vmax.xlane.f32.xlu1 %v5357_v14  ;;  %11797 = vst [vmem:[#allocation43_spill] sm:$0xff] %v5564_v22  ;;  %v5576_v24 = vsel %vm703_vm1, %v5360_v17, -inf }
 0x132   : > { %v5371_v1 = vpop.f32.mrb[32].mxu0  ;;  %11798 = vst [vmem:[#allocation44_spill] sm:$0xff] %v5576_v24 }
 0x133   : > { %v5373_v63 = vpop.f32.mrb[32].mxu1  ;;  %v5375_v29 = vpop.f32.mrb[33].mxu0 }
 0x134   : > { %740 = vmax.xlane.f32.xlu0 %v5365_v19  ;;  %v5378_v28 = vpop.f32.mrb[33].mxu1  ;;  %v5593_v26 = vsel %vm703_vm1, %v5373_v63, -inf }
 0x135   : > { %2582 = vmax.xlane.f32.xlu1 %v5369_v31  ;;  %v5409_v31 = vsel %vm703_vm1, %v5236_v38, -inf  ;;  %11801 = vst [vmem:[#allocation47_spill] sm:$0xff] %v5593_v26  ;;  %v5605_v17 = vsel %vm703_vm1, %v5378_v28, -inf }
 0x136   : > { %v5381_v14 = vpop.f32.mrb[34].mxu0  ;;  %11785 = vst [vmem:[#allocation31_spill] sm:$0xff] %v5409_v31  ;;  %11803 = vst [vmem:[#allocation49_spill] sm:$0xff] %v5605_v17 }
 0x137   : > { %v5388_v35 = vpop.f32.mrb[34].mxu1  ;;  %v5390_v55 = vpop.f32.mrb[35].mxu0 }
 0x138   : > { %1661 = vmax.xlane.f32.xlu0 %v5386_v34  ;;  %v5398_v19 = vpop.f32.mrb[35].mxu1  ;;  %v5612_v63 = vsel %vm703_vm1, %v5388_v35, -inf }
 0x139   : > { %3503 = vmax.xlane.f32.xlu1 %v5395_v61  ;;  %11804 = vst [vmem:[#allocation50_spill] sm:$0xff] %v5612_v63  ;;  %v5624_v28 = vsel %vm703_vm1, %v5398_v19, -inf }
 0x13a   : > { %v5411_v44 = vpop.f32.mrb[36].mxu0  ;;  %11806 = vst [vmem:[#allocation52_spill] sm:$0xff] %v5624_v28 }
 0x13b   : > { %v5413_v37 = vpop.f32.mrb[36].mxu1  ;;  %v5415_v45 = vpop.f32.mrb[37].mxu0  ;;  %v5638_v35 = vsel %vm703_vm1, %v5411_v44, -inf }
 0x13c   : > { %2584 = vmax.xlane.f32.xlu0 %v5404_v36  ;;  %v5418_v34 = vpop.f32.mrb[37].mxu1  ;;  %11808 = vst [vmem:[#allocation54_spill] sm:$0xff] %v5638_v35  ;;  %v5645_v19 = vsel %vm703_vm1, %v5413_v37, -inf  ;;  %v5656_v44 = vsel %vm703_vm1, %v5415_v45, -inf }
 0x13d   : > { %742 = vmax.xlane.f32.xlu1 %v5409_v31  ;;  %v5449_v31 = vsel %vm703_vm1, %v5264_v49, -inf  ;;  %v5473_v49 = vsel %vm703_vm1, %v5272_v53, -inf  ;;  %v5492_v53 = vsel %vm703_vm1, %v5298_v4, -inf  ;;  %v5516_v4 = vsel %vm703_vm1, %v5314_v12, -inf  ;;  %11810 = vst [vmem:[#allocation56_spill] sm:$0xff] %v5645_v19  ;;  %11812 = vst [vmem:[#allocation58_spill] sm:$0xff] %v5656_v44 }
 0x13e   : > { %v5421_v61 = vpop.f32.mrb[38].mxu0  ;;  %11787 = vst [vmem:[#allocation33_spill] sm:$0xff] %v5449_v31  ;;  %11793 = vst [vmem:[#allocation39_spill] sm:$0xff] %v5516_v4  ;;  %v5545_v12 = vsel %vm703_vm1, %v5336_v23, -inf  ;;  %v5569_v23 = vsel %vm703_vm1, %v5344_v0, -inf  ;;  %v5588_v0 = vsel %vm703_vm1, %v5371_v1, -inf }
 0x13f   : > { %v5428_v38 = vpop.f32.mrb[38].mxu1  ;;  %v5430_v39 = vpop.f32.mrb[39].mxu0  ;;  %11795 = vst [vmem:[#allocation41_spill] sm:$0xff] %v5545_v12  ;;  %11800 = vst [vmem:[#allocation46_spill] sm:$0xff] %v5588_v0  ;;  %v5617_v1 = vsel %vm703_vm1, %v5381_v14, -inf  ;;  %v5677_v45 = vsel %vm703_vm1, %v5421_v61, -inf }
 0x140   : > { %3505 = vmax.xlane.f32.xlu0 %v5426_v40  ;;  %v5438_v36 = vpop.f32.mrb[39].mxu1  ;;  %v5461_v40 = vsel %vm703_vm1, %v5269_v52, -inf  ;;  %v5485_v52 = vsel %vm703_vm1, %v5280_v58, -inf  ;;  %v5504_v58 = vsel %vm703_vm1, %v5302_v6, -inf  ;;  %v5528_v6 = vsel %vm703_vm1, %v5323_v16, -inf  ;;  %11805 = vst [vmem:[#allocation51_spill] sm:$0xff] %v5617_v1 }
 0x141   : > { %1663 = vmax.xlane.f32.xlu1 %v5435_v42  ;;  %11788 = vst [vmem:[#allocation34_spill] sm:$0xff] %v5461_v40  ;;  %11794 = vst [vmem:[#allocation40_spill] sm:$0xff] %v5528_v6  ;;  %v5557_v16 = vsel %vm703_vm1, %v5341_v25, -inf  ;;  %v5581_v25 = vsel %vm703_vm1, %v5352_v11, -inf  ;;  %v5600_v11 = vsel %vm703_vm1, %v5375_v29, -inf  ;;  %v5629_v29 = vsel %vm703_vm1, %v5390_v55, -inf }
 0x142   : > { %11796 = vst [vmem:[#allocation42_spill] sm:$0xff] %v5557_v16  ;;  %11799 = vst [vmem:[#allocation45_spill] sm:$0xff] %v5581_v25  ;;  %v5668_v37 = vsel %vm703_vm1, %v5428_v38, -inf  ;;  %v5688_v38 = vsel %vm703_vm1, %v5438_v36, -inf  ;;  %v11821_v36 = vmov 0.0  }
 0x143   : > { %11802 = vst [vmem:[#allocation48_spill] sm:$0xff] %v5600_v11  ;;  %11807 = vst [vmem:[#allocation53_spill] sm:$0xff] %v5629_v29 }
 0x144   : > { %744 = vmax.xlane.f32.xlu0 %v5444_v43  ;;  %11814 = vst [vmem:[#allocation60_spill] sm:$0xff] %v5668_v37  ;;  %11815 = vst [vmem:[#allocation61_spill] sm:$0xff] %v5677_v45 }
 0x145   : > { %2586 = vmax.xlane.f32.xlu1 %v5449_v31  ;;  %11817 = vst [vmem:[#allocation63_spill] sm:$0xff] %v5688_v38 }
 0x148   : > { %1665 = vmax.xlane.f32.xlu0 %v5456_v41 }
 0x149   : > { %3507 = vmax.xlane.f32.xlu1 %v5461_v40 }
 0x14c   : > { %2588 = vmax.xlane.f32.xlu0 %v5468_v47 }
 0x14d   : > { %746 = vmax.xlane.f32.xlu1 %v5473_v49 }
 0x150   : > { %3509 = vmax.xlane.f32.xlu0 %v5480_v50 }
 0x151   : > { %1667 = vmax.xlane.f32.xlu1 %v5485_v52 }
 0x154   : > { %748 = vmax.xlane.f32.xlu0 %v5492_v53 }
 0x155   : > { %2590 = vmax.xlane.f32.xlu1 %v5497_v56 }
 0x158   : > { %1669 = vmax.xlane.f32.xlu0 %v5504_v58 }
 0x159   : > { %3511 = vmax.xlane.f32.xlu1 %v5509_v62 }
 0x15c   : > { %2592 = vmax.xlane.f32.xlu0 %v5516_v4 }
 0x15d   : > { %750 = vmax.xlane.f32.xlu1 %v5521_v5 }
 0x160   : > { %3513 = vmax.xlane.f32.xlu0 %v5528_v6 }
 0x161   : > { %1671 = vmax.xlane.f32.xlu1 %v5533_v7 }
 0x164   : > { %752 = vmax.xlane.f32.xlu0 %v5540_v9 }
 0x165   : > { %2594 = vmax.xlane.f32.xlu1 %v5545_v12 }
 0x168   : > { %1673 = vmax.xlane.f32.xlu0 %v5552_v13 }
 0x169   : > { %3515 = vmax.xlane.f32.xlu1 %v5557_v16 }
 0x16c   : > { %2596 = vmax.xlane.f32.xlu0 %v5564_v22 }
 0x16d   : > { %754 = vmax.xlane.f32.xlu1 %v5569_v23 }
 0x170   : > { %3517 = vmax.xlane.f32.xlu0 %v5576_v24 }
 0x171   : > { %1675 = vmax.xlane.f32.xlu1 %v5581_v25 }
 0x174   : > { %756 = vmax.xlane.f32.xlu0 %v5588_v0 }
 0x175   : > { %2598 = vmax.xlane.f32.xlu1 %v5593_v26 }
 0x178   : > { %1677 = vmax.xlane.f32.xlu0 %v5600_v11 }
 0x179   : > { %3519 = vmax.xlane.f32.xlu1 %v5605_v17 }
 0x17c   : > { %2600 = vmax.xlane.f32.xlu0 %v5612_v63 }
 0x17d   : > { %758 = vmax.xlane.f32.xlu1 %v5617_v1 }
 0x180   : > { %3521 = vmax.xlane.f32.xlu0 %v5624_v28 }
 0x181   : > { %1679 = vmax.xlane.f32.xlu1 %v5629_v29  ;;  %v5633_v14 = vpop.xlane.xlu0 %724  ;;  %v5661_v29 = vsel %vm703_vm1, %v5418_v34, -inf }
 0x182   : > { %v5640_v63 = vpop.xlane.xlu1 %2566  ;;  %11813 = vst [vmem:[#allocation59_spill] sm:$0xff] %v5661_v29  ;;  %vm764_vm2 = vcmp.eq.f32.partialorder %v5142_v48, %v5633_v14 }
 0x183   : > { %11809 = vst [vmem:[#allocation55_spill] sm:$0xff] %v5640_v63  ;;  %vm2606_vm3 = vcmp.eq.f32.partialorder %v5146_v51, %v5640_v63 }
 0x184   : > { %760 = vmax.xlane.f32.xlu0 %v5638_v35 }
 0x185   : > { %2602 = vmax.xlane.f32.xlu1 %v5645_v19  ;;  %v5649_v55 = vpop.xlane.xlu0 %1645 }
 0x186   : > { %v5651_v28 = vpop.xlane.xlu1 %3487  ;;  %vm1685_vm5 = vcmp.eq.f32.partialorder %v5152_v54, %v5649_v55 }
 0x187   : > { %11811 = vst [vmem:[#allocation57_spill] sm:$0xff] %v5651_v28  ;;  %vm3527_vm4 = vcmp.eq.f32.partialorder %v5156_v57, %v5651_v28 }
 0x188   : > { %1681 = vmax.xlane.f32.xlu0 %v5656_v44 }
 0x189   : > { %3523 = vmax.xlane.f32.xlu1 %v5661_v29  ;;  %v5670_v19 = vpop.xlane.xlu0 %726  ;;  %v5693_v29 = vsel %vm703_vm1, %v5430_v39, -inf  ;;  %v5710_v39 = vsel %vm2606_vm3, -inf, %v5146_v51  ;;  %v4682_v51 = vsel %vm1685_vm5, 1.0, %v11821_v36 }
 0x18a   : > { %v5672_v35 = vpop.xlane.xlu1 %1647  ;;  %11818 = vst [vmem:[#allocation64_spill] sm:$0xff] %v5693_v29  ;;  %11822 = vst [vmem:[#allocation67_spill] sm:$0xff] %v5710_v39  ;;  %vm765_vm6 = vcmp.eq.f32.partialorder %v5162_v59, %v5670_v19 }
 0x18b   : > { %vm1686_vm8 = vcmp.eq.f32.partialorder %v5166_v60, %v5672_v35 }
 0x18c   : > { %2604 = vmax.xlane.f32.xlu0 %v5668_v37 }
 0x18d   : > { %762 = vmax.xlane.f32.xlu1 %v5677_v45  ;;  %v5681_v34 = vpop.xlane.xlu0 %2568  ;;  %v4622_v45 = vsel %vm764_vm2, 1.0, %v11821_v36 }
 0x18e   : > { %11816 = vst [vmem:[#allocation62_spill] sm:$0xff] %v5681_v34  ;;  %v5683_v44 = vpop.xlane.xlu1 %728  ;;  %vm2607_vm7 = vcmp.eq.f32.partialorder %v5172_v2, %v5681_v34  ;;  %v5782_v34 = vsel %vm1686_vm8, -inf, %v5166_v60 }
 0x18f   : > { %11837 = vst [vmem:[#allocation82_spill] sm:$0xff] %v5782_v34  ;;  %vm766_vm10 = vcmp.eq.f32.partialorder %v5176_v3, %v5683_v44 }
 0x190   : > { %3525 = vmax.xlane.f32.xlu0 %v5688_v38 }
 0x191   : > { %1683 = vmax.xlane.f32.xlu1 %v5693_v29  ;;  %v5699_v61 = vpop.xlane.xlu0 %3489  ;;  %v5720_v29 = vsel %vm764_vm2, -inf, %v5142_v48 }
 0x192   : > { %11819 = vst [vmem:[#allocation65_spill] sm:$0xff] %v5699_v61  ;;  %v5703_v37 = vpop.xlane.xlu1 %2570  ;;  %11824 = vst [vmem:[#allocation69_spill] sm:$0xff] %v5720_v29  ;;  %vm3528_vm9 = vcmp.eq.f32.partialorder %v5186_v10, %v5699_v61  ;;  %v4624_v61 = vsel %vm766_vm10, 1.0, %v11821_v36 }
 0x193   : > { %11820 = vst [vmem:[#allocation66_spill] sm:$0xff] %v5703_v37  ;;  %v5778_v1 = vsel %vm3528_vm9, -inf, %v5186_v10  ;;  %vm2608_vm11 = vcmp.eq.f32.partialorder %v5182_v8, %v5703_v37 }
 0x194   : > { %824 = vadd.xlane.f32.xlu0 %v4622_v45  ;;  %v5727_v45 = vsel %vm3527_vm4, -inf, %v5156_v57  ;;  %11836 = vst [vmem:[#allocation81_spill] sm:$0xff] %v5778_v1  ;;  %v5798_v60 = vsel %vm2608_vm11, -inf, %v5182_v8 }
 0x195   : > { %2866 = vmax.xlane.f32.xlu1 %v5710_v39  ;;  %v5713_v46 = vpop.xlane.xlu0 %1649  ;;  %11825 = vst [vmem:[#allocation70_spill] sm:$0xff] %v5727_v45  ;;  %v4623_v39 = vsel %vm765_vm6, 1.0, %v11821_v36  ;;  %11840 = vst [vmem:[#allocation85_spill] sm:$0xff] %v5798_v60 }
 0x196   : > { %v5717_v38 = vpop.xlane.xlu1 %3491  ;;  %vm1687_vm13 = vcmp.eq.f32.partialorder %v5192_v15, %v5713_v46 }
 0x197   : > { %11823 = vst [vmem:[#allocation68_spill] sm:$0xff] %v5717_v38  ;;  %vm11514_vm12 = vcmp.eq.f32.partialorder %v5196_v18, %v5717_v38  ;;  %v4684_v8 = vsel %vm1687_vm13, 1.0, %v11821_v36 }
 0x198   : > { %1024 = vmax.xlane.f32.xlu0 %v5720_v29  ;;  %v5745_v29 = vsel %vm1685_vm5, -inf, %v5152_v54  ;;  %v5764_v54 = vsel %vm2607_vm7, -inf, %v5172_v2 }
 0x199   : > { %3787 = vmax.xlane.f32.xlu1 %v5727_v45  ;;  %v5732_v63 = vpop.xlane.xlu0 %2572  ;;  %11829 = vst [vmem:[#allocation74_spill] sm:$0xff] %v5745_v29  ;;  %v5749_v45 = vsel %vm765_vm6, -inf, %v5162_v59  ;;  %11833 = vst [vmem:[#allocation78_spill] sm:$0xff] %v5764_v54  ;;  %v4683_v59 = vsel %vm1686_vm8, 1.0, %v11821_v36 }
 0x19a   : > { %11826 = vst [vmem:[#allocation71_spill] sm:$0xff] %v5732_v63  ;;  %v5736_v48 = vpop.xlane.xlu1 %730  ;;  %11830 = vst [vmem:[#allocation75_spill] sm:$0xff] %v5749_v45  ;;  %vm2609_vm15 = vcmp.eq.f32.partialorder %v5202_v20, %v5732_v63 }
 0x19b   : > { %vm767_vm14 = vcmp.eq.f32.partialorder %v5206_v21, %v5736_v48 }
 0x19c   : > { %1745 = vadd.xlane.f32.xlu0 %v4682_v51 }
 0x19d   : > { %826 = vadd.xlane.f32.xlu1 %v4623_v39  ;;  %v5740_v28 = vpop.xlane.xlu0 %3493 }
 0x19e   : > { %11827 = vst [vmem:[#allocation72_spill] sm:$0xff] %v5740_v28  ;;  %v5742_v57 = vpop.xlane.xlu1 %1651  ;;  %vm11513_vm2 = vcmp.eq.f32.partialorder %v5212_v27, %v5740_v28 }
 0x19f   : > { %11828 = vst [vmem:[#allocation73_spill] sm:$0xff] %v5742_v57  ;;  %vm1688_vm1 = vcmp.eq.f32.partialorder %v5218_v30, %v5742_v57 }
 0x1a0   : > { %1945 = vmax.xlane.f32.xlu0 %v5745_v29  ;;  %v5870_v63 = vsel %vm1688_vm1, -inf, %v5218_v30 }
 0x1a1   : > { %1026 = vmax.xlane.f32.xlu1 %v5749_v45  ;;  %v5754_v51 = vpop.xlane.xlu0 %732  ;;  %11857 = vst [vmem:[#allocation102_spill] sm:$0xff] %v5870_v63 }
 0x1a2   : > { %11831 = vst [vmem:[#allocation76_spill] sm:$0xff] %v5754_v51  ;;  %v5758_v39 = vpop.xlane.xlu1 %2574  ;;  %vm768_vm5 = vcmp.eq.f32.partialorder %v5224_v32, %v5754_v51 }
 0x1a3   : > { %11832 = vst [vmem:[#allocation77_spill] sm:$0xff] %v5758_v39  ;;  %vm11325_vm6 = vcmp.eq.f32.partialorder %v5228_v33, %v5758_v39  ;;  %v4626_v28 = vsel %vm768_vm5, 1.0, %v11821_v36  ;;  %v11866_v39 = vld [vmem:[#allocation12_spill] sm:$0xff] }
 0x1a4   : > { %2868 = vmax.xlane.f32.xlu0 %v5764_v54  ;;  %v5866_v54 = vsel %vm11513_vm2, -inf, %v5212_v27  ;;  %v5886_v30 = vsel %vm11325_vm6, -inf, %v5228_v33 }
 0x1a5   : > { %1747 = vadd.xlane.f32.xlu1 %v4683_v59  ;;  %v5770_v29 = vpop.xlane.xlu0 %1653  ;;  %11856 = vst [vmem:[#allocation101_spill] sm:$0xff] %v5866_v54  ;;  %11860 = vst [vmem:[#allocation105_spill] sm:$0xff] %v5886_v30 }
 0x1a6   : > { %11834 = vst [vmem:[#allocation79_spill] sm:$0xff] %v5770_v29  ;;  %v5772_v45 = vpop.xlane.xlu1 %3495 }
 0x1a7   : > { %11835 = vst [vmem:[#allocation80_spill] sm:$0xff] %v5772_v45 }
 0x1a8   : > { %3789 = vmax.xlane.f32.xlu0 %v5778_v1 }
 0x1a9   : > { %1947 = vmax.xlane.f32.xlu1 %v5782_v34  ;;  %v5787_v59 = vpop.xlane.xlu0 %2576  ;;  %v5808_v34 = vsel %vm766_vm10, -inf, %v5176_v3  ;;  %vm1689_vm10 = vcmp.eq.f32.partialorder %v11866_v39, %v5770_v29 }
 0x1aa   : > { %11838 = vst [vmem:[#allocation83_spill] sm:$0xff] %v5787_v59  ;;  %v5791_v2 = vpop.xlane.xlu1 %734  ;;  %11843 = vst [vmem:[#allocation88_spill] sm:$0xff] %v5808_v34  ;;  %v5921_v29 = vsel %vm1689_vm10, -inf, %v11866_v39 }
 0x1ab   : > { %11839 = vst [vmem:[#allocation84_spill] sm:$0xff] %v5791_v2  ;;  %11872 = vst [vmem:[#allocation112_spill] sm:$0xff] %v5921_v29 }
 0x1ac   : > { %828 = vadd.xlane.f32.xlu0 %v4624_v61  ;;  %v5815_v61 = vsel %vm11514_vm12, -inf, %v5196_v18 }
 0x1ad   : > { %2870 = vmax.xlane.f32.xlu1 %v5798_v60  ;;  %v5801_v10 = vpop.xlane.xlu0 %3497  ;;  %11844 = vst [vmem:[#allocation89_spill] sm:$0xff] %v5815_v61  ;;  %v4625_v60 = vsel %vm767_vm14, 1.0, %v11821_v36 }
 0x1ae   : > { %11841 = vst [vmem:[#allocation86_spill] sm:$0xff] %v5801_v10  ;;  %v5805_v1 = vpop.xlane.xlu1 %1655 }
 0x1af   : > { %11842 = vst [vmem:[#allocation87_spill] sm:$0xff] %v5805_v1 }
 0x1b0   : > { %1028 = vmax.xlane.f32.xlu0 %v5808_v34  ;;  %v5833_v34 = vsel %vm1687_vm13, -inf, %v5192_v15  ;;  %v5852_v15 = vsel %vm2609_vm15, -inf, %v5202_v20 }
 0x1b1   : > { %3791 = vmax.xlane.f32.xlu1 %v5815_v61  ;;  %v5820_v37 = vpop.xlane.xlu0 %736  ;;  %11849 = vst [vmem:[#allocation94_spill] sm:$0xff] %v5833_v34  ;;  %v5837_v61 = vsel %vm767_vm14, -inf, %v5206_v21  ;;  %11853 = vst [vmem:[#allocation98_spill] sm:$0xff] %v5852_v15  ;;  %v4685_v21 = vsel %vm1688_vm1, 1.0, %v11821_v36 }
 0x1b2   : > { %11845 = vst [vmem:[#allocation90_spill] sm:$0xff] %v5820_v37  ;;  %v5824_v3 = vpop.xlane.xlu1 %2578  ;;  %11850 = vst [vmem:[#allocation95_spill] sm:$0xff] %v5837_v61 }
 0x1b3   : > { %11846 = vst [vmem:[#allocation91_spill] sm:$0xff] %v5824_v3 }
 0x1b4   : > { %1749 = vadd.xlane.f32.xlu0 %v4684_v8 }
 0x1b5   : > { %830 = vadd.xlane.f32.xlu1 %v4625_v60  ;;  %v5828_v38 = vpop.xlane.xlu0 %1657 }
 0x1b6   : > { %11847 = vst [vmem:[#allocation92_spill] sm:$0xff] %v5828_v38  ;;  %v5830_v18 = vpop.xlane.xlu1 %3499 }
 0x1b7   : > { %11848 = vst [vmem:[#allocation93_spill] sm:$0xff] %v5830_v18 }
 0x1b8   : > { %1949 = vmax.xlane.f32.xlu0 %v5833_v34 }
 0x1b9   : > { %1030 = vmax.xlane.f32.xlu1 %v5837_v61  ;;  %v5842_v8 = vpop.xlane.xlu0 %2580 }
 0x1ba   : > { %11851 = vst [vmem:[#allocation96_spill] sm:$0xff] %v5842_v8  ;;  %v5846_v60 = vpop.xlane.xlu1 %738 }
 0x1bb   : > { %11852 = vst [vmem:[#allocation97_spill] sm:$0xff] %v5846_v60 }
 0x1bc   : > { %2872 = vmax.xlane.f32.xlu0 %v5852_v15  ;;  %v5896_v15 = vsel %vm768_vm5, -inf, %v5224_v32 }
 0x1bd   : > { %1751 = vadd.xlane.f32.xlu1 %v4685_v21  ;;  %v5858_v34 = vpop.xlane.xlu0 %3501  ;;  %11864 = vst [vmem:[#allocation108_spill] sm:$0xff] %v5896_v15 }
 0x1be   : > { %11854 = vst [vmem:[#allocation99_spill] sm:$0xff] %v5858_v34  ;;  %v5860_v61 = vpop.xlane.xlu1 %1659 }
 0x1bf   : > { %11855 = vst [vmem:[#allocation100_spill] sm:$0xff] %v5860_v61 }
 0x1c0   : > { %3793 = vmax.xlane.f32.xlu0 %v5866_v54  ;;  %v11862_v54 = vld [vmem:[#allocation13_spill] sm:$0xff] }
 0x1c1   : > { %1951 = vmax.xlane.f32.xlu1 %v5870_v63  ;;  %v5875_v21 = vpop.xlane.xlu0 %740  ;;  %vm11145_vm8 = vcmp.eq.f32.partialorder %v11862_v54, %v5772_v45 }
 0x1c2   : > { %11858 = vst [vmem:[#allocation103_spill] sm:$0xff] %v5875_v21  ;;  %v5879_v20 = vpop.xlane.xlu1 %2582 }
 0x1c3   : > { %11859 = vst [vmem:[#allocation104_spill] sm:$0xff] %v5879_v20 }
 0x1c4   : > { %832 = vadd.xlane.f32.xlu0 %v4626_v28  ;;  %v5903_v28 = vsel %vm11145_vm8, -inf, %v11862_v54 }
 0x1c5   : > { %2874 = vmax.xlane.f32.xlu1 %v5886_v30  ;;  %v5889_v27 = vpop.xlane.xlu0 %1661  ;;  %11865 = vst [vmem:[#allocation109_spill] sm:$0xff] %v5903_v28  ;;  %v11868_v30 = vld [vmem:[#allocation15_spill] sm:$0xff] }
 0x1c6   : > { %11861 = vst [vmem:[#allocation106_spill] sm:$0xff] %v5889_v27  ;;  %v5893_v63 = vpop.xlane.xlu1 %3503  ;;  %vm769_vm13 = vcmp.eq.f32.partialorder %v11868_v30, %v5791_v2  ;;  %v11874_v2 = vld [vmem:[#allocation14_spill] sm:$0xff] }
 0x1c7   : > { %11863 = vst [vmem:[#allocation107_spill] sm:$0xff] %v5893_v63  ;;  %v4627_v11 = vsel %vm769_vm13, 1.0, %v11821_v36  ;;  %vm11337_vm14 = vcmp.eq.f32.partialorder %v11874_v2, %v5787_v59 }
 0x1c8   : > { %1032 = vmax.xlane.f32.xlu0 %v5896_v15  ;;  %v4686_v15 = vsel %vm1689_vm10, 1.0, %v11821_v36  ;;  %v5940_v39 = vsel %vm11337_vm14, -inf, %v11874_v2  ;;  %v11882_v2 = vld [vmem:[#allocation18_spill] sm:$0xff] }
 0x1c9   : > { %3795 = vmax.xlane.f32.xlu1 %v5903_v28  ;;  %v5908_v33 = vpop.xlane.xlu0 %2584  ;;  %v5925_v28 = vsel %vm769_vm13, -inf, %v11868_v30  ;;  %11877 = vst [vmem:[#allocation114_spill] sm:$0xff] %v5940_v39  ;;  %vm770_vm10 = vcmp.eq.f32.partialorder %v11882_v2, %v5820_v37 }
 0x1ca   : > { %11867 = vst [vmem:[#allocation12_spill] sm:$0xff] %v5908_v33  ;;  %v5912_v32 = vpop.xlane.xlu1 %742  ;;  %11873 = vst [vmem:[#allocation113_spill] sm:$0xff] %v5925_v28  ;;  %v5984_v37 = vsel %vm770_vm10, -inf, %v11882_v2 }
 0x1cb   : > { %11869 = vst [vmem:[#allocation15_spill] sm:$0xff] %v5912_v32  ;;  %11888 = vst [vmem:[#allocation120_spill] sm:$0xff] %v5984_v37 }
 0x1cc   : > { %1753 = vadd.xlane.f32.xlu0 %v4686_v15 }
 0x1cd   : > { %834 = vadd.xlane.f32.xlu1 %v4627_v11  ;;  %v5916_v45 = vpop.xlane.xlu0 %3505  ;;  %v11875_v11 = vld [vmem:[#allocation17_spill] sm:$0xff] }
 0x1ce   : > { %11870 = vst [vmem:[#allocation110_spill] sm:$0xff] %v5916_v45  ;;  %v5918_v54 = vpop.xlane.xlu1 %1663  ;;  %vm1690_vm1 = vcmp.eq.f32.partialorder %v11875_v11, %v5805_v1 }
 0x1cf   : > { %11871 = vst [vmem:[#allocation111_spill] sm:$0xff] %v5918_v54  ;;  %v4687_v30 = vsel %vm1690_vm1, 1.0, %v11821_v36  ;;  %v5958_v59 = vsel %vm1690_vm1, -inf, %v11875_v11 }
 0x1d0   : > { %1953 = vmax.xlane.f32.xlu0 %v5921_v29  ;;  %v11878_v29 = vld [vmem:[#allocation16_spill] sm:$0xff]  ;;  %11881 = vst [vmem:[#allocation117_spill] sm:$0xff] %v5958_v59 }
 0x1d1   : > { %1034 = vmax.xlane.f32.xlu1 %v5925_v28  ;;  %v5930_v15 = vpop.xlane.xlu0 %744  ;;  %vm11321_vm5 = vcmp.eq.f32.partialorder %v11878_v29, %v5801_v10  ;;  %v4628_v10 = vsel %vm770_vm10, 1.0, %v11821_v36 }
 0x1d2   : > { %v5934_v17 = vpop.xlane.xlu1 %2586  ;;  %v5954_v1 = vsel %vm11321_vm5, -inf, %v11878_v29 }
 0x1d3   : > { %11876 = vst [vmem:[#allocation17_spill] sm:$0xff] %v5934_v17  ;;  %11880 = vst [vmem:[#allocation116_spill] sm:$0xff] %v5954_v1 }
 0x1d4   : > { %2876 = vmax.xlane.f32.xlu0 %v5940_v39  ;;  %v11884_v39 = vld [vmem:[#allocation19_spill] sm:$0xff] }
 0x1d5   : > { %1755 = vadd.xlane.f32.xlu1 %v4687_v30  ;;  %v5946_v28 = vpop.xlane.xlu0 %1665  ;;  %vm11040_vm13 = vcmp.eq.f32.partialorder %v11884_v39, %v5824_v3  ;;  %v11890_v3 = vld [vmem:[#allocation20_spill] sm:$0xff] }
 0x1d6   : > { %v5948_v26 = vpop.xlane.xlu1 %3507  ;;  %v5974_v11 = vsel %vm11040_vm13, -inf, %v11884_v39  ;;  %vm1691_vm0 = vcmp.eq.f32.partialorder %v11890_v3, %v5828_v38  ;;  %vm1795_vm14 = vcmp.gt.f32.partialorder %v5946_v28, -inf }
 0x1d7   : > { %11879 = vst [vmem:[#allocation115_spill] sm:$0xff] %v5948_v26  ;;  %11885 = vst [vmem:[#allocation118_spill] sm:$0xff] %v5974_v11  ;;  %v6009_v38 = vsel %vm1691_vm0, -inf, %v11890_v3 }
 0x1d8   : > { %3797 = vmax.xlane.f32.xlu0 %v5954_v1  ;;  %v11887_v1 = vld [vmem:[#allocation21_spill] sm:$0xff]  ;;  %11894 = vst [vmem:[#allocation122_spill] sm:$0xff] %v6009_v38 }
 0x1d9   : > { %1955 = vmax.xlane.f32.xlu1 %v5958_v59  ;;  %v5963_v30 = vpop.xlane.xlu0 %2588  ;;  %vm11054_vm1 = vcmp.eq.f32.partialorder %v11887_v1, %v5830_v18 }
 0x1da   : > { %11883 = vst [vmem:[#allocation18_spill] sm:$0xff] %v5963_v30  ;;  %v5967_v51 = vpop.xlane.xlu1 %746 }
 0x1dc   : > { %836 = vadd.xlane.f32.xlu0 %v4628_v10  ;;  %v5991_v10 = vsel %vm11054_vm1, -inf, %v11887_v1 }
 0x1dd   : > { %2878 = vmax.xlane.f32.xlu1 %v5974_v11  ;;  %v5977_v29 = vpop.xlane.xlu0 %3509  ;;  %11889 = vst [vmem:[#allocation121_spill] sm:$0xff] %v5991_v10  ;;  %v11891_v11 = vld [vmem:[#allocation23_spill] sm:$0xff] }
 0x1de   : > { %11886 = vst [vmem:[#allocation119_spill] sm:$0xff] %v5977_v29  ;;  %v5981_v59 = vpop.xlane.xlu1 %1667  ;;  %vm771_vm13 = vcmp.eq.f32.partialorder %v11891_v11, %v5846_v60  ;;  %v11896_v60 = vld [vmem:[#allocation22_spill] sm:$0xff] }
 0x1df   : > { %v4629_v0 = vsel %vm771_vm13, 1.0, %v11821_v36  ;;  %vm11070_vm10 = vcmp.eq.f32.partialorder %v11896_v60, %v5842_v8 }
 0x1e0   : > { %1036 = vmax.xlane.f32.xlu0 %v5984_v37  ;;  %v4688_v37 = vsel %vm1691_vm0, 1.0, %v11821_v36  ;;  %v6028_v3 = vsel %vm11070_vm10, -inf, %v11896_v60  ;;  %v11904_v60 = vld [vmem:[#allocation26_spill] sm:$0xff] }
 0x1e1   : > { %3799 = vmax.xlane.f32.xlu1 %v5991_v10  ;;  %v5996_v39 = vpop.xlane.xlu0 %748  ;;  %v6013_v10 = vsel %vm771_vm13, -inf, %v11891_v11  ;;  %vm772_vm13 = vcmp.eq.f32.partialorder %v11904_v60, %v5875_v21 }
 0x1e2   : > { %v6000_v2 = vpop.xlane.xlu1 %2590  ;;  %11895 = vst [vmem:[#allocation123_spill] sm:$0xff] %v6013_v10  ;;  %v6072_v21 = vsel %vm772_vm13, -inf, %v11904_v60 }
 0x1e3   : > { %11892 = vst [vmem:[#allocation20_spill] sm:$0xff] %v6000_v2  ;;  %11910 = vst [vmem:[#allocation130_spill] sm:$0xff] %v6072_v21  ;;  %vm11156_vm8 = vcmp.eq.f32.partialorder %v5497_v56, %v6000_v2 }
 0x1e4   : > { %1757 = vadd.xlane.f32.xlu0 %v4688_v37 }
 0x1e5   : > { %838 = vadd.xlane.f32.xlu1 %v4629_v0  ;;  %v6004_v18 = vpop.xlane.xlu0 %1669  ;;  %v11898_v0 = vld [vmem:[#allocation25_spill] sm:$0xff] }
 0x1e6   : > { %v6006_v1 = vpop.xlane.xlu1 %3511  ;;  %vm1692_vm1 = vcmp.eq.f32.partialorder %v11898_v0, %v5860_v61  ;;  %11899 = vst [vmem:[#allocation25_spill] sm:$0xff] %v6028_v3 }
 0x1e7   : > { %11893 = vst [vmem:[#allocation23_spill] sm:$0xff] %v6006_v1  ;;  %v4689_v11 = vsel %vm1692_vm1, 1.0, %v11821_v36  ;;  %v6046_v8 = vsel %vm1692_vm1, -inf, %v11898_v0 }
 0x1e8   : > { %1957 = vmax.xlane.f32.xlu0 %v6009_v38  ;;  %v11900_v38 = vld [vmem:[#allocation24_spill] sm:$0xff]  ;;  %11903 = vst [vmem:[#allocation127_spill] sm:$0xff] %v6046_v8 }
 0x1e9   : > { %1038 = vmax.xlane.f32.xlu1 %v6013_v10  ;;  %v6018_v37 = vpop.xlane.xlu0 %2592  ;;  %vm11088_vm0 = vcmp.eq.f32.partialorder %v11900_v38, %v5858_v34  ;;  %v4630_v34 = vsel %vm772_vm13, 1.0, %v11821_v36 }
 0x1ea   : > { %11897 = vst [vmem:[#allocation124_spill] sm:$0xff] %v6018_v37  ;;  %v6022_v24 = vpop.xlane.xlu1 %750  ;;  %v6042_v61 = vsel %vm11088_vm0, -inf, %v11900_v38 }
 0x1eb   : > { %11902 = vst [vmem:[#allocation126_spill] sm:$0xff] %v6042_v61 }
 0x1ec   : > { %2880 = vmax.xlane.f32.xlu0 %v6028_v3  ;;  %v11905_v3 = vld [vmem:[#allocation27_spill] sm:$0xff] }
 0x1ed   : > { %1759 = vadd.xlane.f32.xlu1 %v4689_v11  ;;  %v6034_v10 = vpop.xlane.xlu0 %3513  ;;  %vm11084_vm10 = vcmp.eq.f32.partialorder %v11905_v3, %v5879_v20  ;;  %v11912_v20 = vld [vmem:[#allocation28_spill] sm:$0xff] }
 0x1ee   : > { %11901 = vst [vmem:[#allocation125_spill] sm:$0xff] %v6034_v10  ;;  %v6036_v57 = vpop.xlane.xlu1 %1671  ;;  %v6062_v0 = vsel %vm11084_vm10, -inf, %v11905_v3  ;;  %vm1693_vm10 = vcmp.eq.f32.partialorder %v11912_v20, %v5889_v27 }
 0x1ef   : > { %11907 = vst [vmem:[#allocation128_spill] sm:$0xff] %v6062_v0  ;;  %v6097_v27 = vsel %vm1693_vm10, -inf, %v11912_v20 }
 0x1f0   : > { %3801 = vmax.xlane.f32.xlu0 %v6042_v61  ;;  %v11908_v61 = vld [vmem:[#allocation29_spill] sm:$0xff]  ;;  %11916 = vst [vmem:[#allocation132_spill] sm:$0xff] %v6097_v27 }
 0x1f1   : > { %1959 = vmax.xlane.f32.xlu1 %v6046_v8  ;;  %v6051_v11 = vpop.xlane.xlu0 %752  ;;  %vm11102_vm1 = vcmp.eq.f32.partialorder %v11908_v61, %v5893_v63 }
 0x1f2   : > { %v6055_v25 = vpop.xlane.xlu1 %2594 }
 0x1f3   : > { %11906 = vst [vmem:[#allocation26_spill] sm:$0xff] %v6055_v25 }
 0x1f4   : > { %840 = vadd.xlane.f32.xlu0 %v4630_v34  ;;  %v6079_v34 = vsel %vm11102_vm1, -inf, %v11908_v61  ;;  %vm1694_vm1 = vcmp.eq.f32.partialorder %v5435_v42, %v5918_v54 }
 0x1f5   : > { %2882 = vmax.xlane.f32.xlu1 %v6062_v0  ;;  %v6065_v38 = vpop.xlane.xlu0 %1673  ;;  %11911 = vst [vmem:[#allocation131_spill] sm:$0xff] %v6079_v34  ;;  %v11914_v0 = vld [vmem:[#allocation31_spill] sm:$0xff] }
 0x1f6   : > { %v6069_v8 = vpop.xlane.xlu1 %3515  ;;  %vm773_vm0 = vcmp.eq.f32.partialorder %v11914_v0, %v5912_v32  ;;  %v11918_v32 = vld [vmem:[#allocation30_spill] sm:$0xff] }
 0x1f7   : > { %11909 = vst [vmem:[#allocation129_spill] sm:$0xff] %v6069_v8  ;;  %v4631_v22 = vsel %vm773_vm0, 1.0, %v11821_v36  ;;  %vm11112_vm13 = vcmp.eq.f32.partialorder %v11918_v32, %v5908_v33  ;;  %v6134_v33 = vsel %vm1694_vm1, -inf, %v5435_v42 }
 0x1f8   : > { %1040 = vmax.xlane.f32.xlu0 %v6072_v21  ;;  %v4690_v21 = vsel %vm1693_vm10, 1.0, %v11821_v36  ;;  %v6116_v20 = vsel %vm11112_vm13, -inf, %v11918_v32  ;;  %11925 = vst [vmem:[#allocation139_spill] sm:$0xff] %v6134_v33  ;;  %vm11121_vm13 = vcmp.eq.f32.partialorder %v5449_v31, %v5934_v17 }
 0x1f9   : > { %3803 = vmax.xlane.f32.xlu1 %v6079_v34  ;;  %v6084_v3 = vpop.xlane.xlu0 %2596  ;;  %v6101_v34 = vsel %vm773_vm0, -inf, %v11914_v0  ;;  %11921 = vst [vmem:[#allocation136_spill] sm:$0xff] %v6116_v20  ;;  %v4691_v0 = vsel %vm1694_vm1, 1.0, %v11821_v36  ;;  %vm774_vm0 = vcmp.eq.f32.partialorder %v5444_v43, %v5930_v15  ;;  %v6150_v42 = vsel %vm11121_vm13, -inf, %v5449_v31 }
 0x1fa   : > { %11913 = vst [vmem:[#allocation28_spill] sm:$0xff] %v6084_v3  ;;  %v6088_v60 = vpop.xlane.xlu1 %754  ;;  %11917 = vst [vmem:[#allocation133_spill] sm:$0xff] %v6101_v34  ;;  %vm11135_vm1 = vcmp.eq.f32.partialorder %v5461_v40, %v5948_v26  ;;  %vm1695_vm13 = vcmp.eq.f32.partialorder %v5456_v41, %v5946_v28 }
 0x1fb   : > { %11927 = vst [vmem:[#allocation141_spill] sm:$0xff] %v6150_v42  ;;  %v4692_v31 = vsel %vm1695_vm13, 1.0, %v11821_v36 }
 0x1fc   : > { %1761 = vadd.xlane.f32.xlu0 %v4690_v21 }
 0x1fd   : > { %842 = vadd.xlane.f32.xlu1 %v4631_v22  ;;  %v6092_v63 = vpop.xlane.xlu0 %3517 }
 0x1fe   : > { %11915 = vst [vmem:[#allocation31_spill] sm:$0xff] %v6092_v63  ;;  %v6094_v61 = vpop.xlane.xlu1 %1675 }
 0x200   : > { %1961 = vmax.xlane.f32.xlu0 %v6097_v27  ;;  %v11922_v27 = vld [vmem:[#allocation32_spill] sm:$0xff] }
 0x201   : > { %1042 = vmax.xlane.f32.xlu1 %v6101_v34  ;;  %v6106_v21 = vpop.xlane.xlu0 %756  ;;  %vm11124_vm10 = vcmp.eq.f32.partialorder %v11922_v27, %v5916_v45  ;;  %v4632_v45 = vsel %vm774_vm0, 1.0, %v11821_v36 }
 0x202   : > { %11919 = vst [vmem:[#allocation134_spill] sm:$0xff] %v6106_v21  ;;  %v6110_v22 = vpop.xlane.xlu1 %2598  ;;  %v6130_v54 = vsel %vm11124_vm10, -inf, %v11922_v27  ;;  %vm775_vm10 = vcmp.eq.f32.partialorder %v5473_v49, %v5967_v51 }
 0x203   : > { %11920 = vst [vmem:[#allocation135_spill] sm:$0xff] %v6110_v22  ;;  %11924 = vst [vmem:[#allocation138_spill] sm:$0xff] %v6130_v54 }
 0x204   : > { %2884 = vmax.xlane.f32.xlu0 %v6116_v20 }
 0x205   : > { %1763 = vadd.xlane.f32.xlu1 %v4691_v0  ;;  %v6122_v34 = vpop.xlane.xlu0 %1677 }
 0x206   : > { %v6124_v21 = vpop.xlane.xlu1 %3519 }
 0x207   : > { %11923 = vst [vmem:[#allocation137_spill] sm:$0xff] %v6124_v21 }
 0x208   : > { %3805 = vmax.xlane.f32.xlu0 %v6130_v54 }
 0x209   : > { %1963 = vmax.xlane.f32.xlu1 %v6134_v33  ;;  %v6139_v0 = vpop.xlane.xlu0 %2600  ;;  %v6160_v33 = vsel %vm774_vm0, -inf, %v5444_v43  ;;  %vm11144_vm0 = vcmp.eq.f32.partialorder %v5468_v47, %v5963_v30 }
 0x20a   : > { %11926 = vst [vmem:[#allocation140_spill] sm:$0xff] %v6139_v0  ;;  %v6143_v32 = vpop.xlane.xlu1 %758  ;;  %11929 = vst [vmem:[#allocation143_spill] sm:$0xff] %v6160_v33 }
 0x20c   : > { %844 = vadd.xlane.f32.xlu0 %v4632_v45  ;;  %v6167_v45 = vsel %vm11135_vm1, -inf, %v5461_v40  ;;  %vm1696_vm1 = vcmp.eq.f32.partialorder %v5485_v52, %v5981_v59 }
 0x20d   : > { %2886 = vmax.xlane.f32.xlu1 %v6150_v42  ;;  %v6153_v27 = vpop.xlane.xlu0 %3521  ;;  %11930 = vst [vmem:[#allocation144_spill] sm:$0xff] %v6167_v45  ;;  %v4633_v42 = vsel %vm775_vm10, 1.0, %v11821_v36  ;;  %v6222_v30 = vsel %vm1696_vm1, -inf, %v5485_v52 }
 0x20e   : > { %11928 = vst [vmem:[#allocation142_spill] sm:$0xff] %v6153_v27  ;;  %v6157_v54 = vpop.xlane.xlu1 %1679  ;;  %11941 = vst [vmem:[#allocation155_spill] sm:$0xff] %v6222_v30 }
 0x210   : > { %1044 = vmax.xlane.f32.xlu0 %v6160_v33  ;;  %v6185_v33 = vsel %vm1695_vm13, -inf, %v5456_v41  ;;  %v6204_v41 = vsel %vm11144_vm0, -inf, %v5468_v47  ;;  %vm11157_vm13 = vcmp.eq.f32.partialorder %v5480_v50, %v5977_v29  ;;  %vm864_vm0 = vcmp.gt.f32.partialorder %v5633_v14, -inf }
 0x211   : > { %3807 = vmax.xlane.f32.xlu1 %v6167_v45  ;;  %v6172_v17 = vpop.xlane.xlu0 %760  ;;  %11933 = vst [vmem:[#allocation147_spill] sm:$0xff] %v6185_v33  ;;  %v6189_v45 = vsel %vm775_vm10, -inf, %v5473_v49  ;;  %11937 = vst [vmem:[#allocation151_spill] sm:$0xff] %v6204_v41  ;;  %v4693_v49 = vsel %vm1696_vm1, 1.0, %v11821_v36  ;;  %v6218_v20 = vsel %vm11157_vm13, -inf, %v5480_v50  ;;  %vm776_vm10 = vcmp.eq.f32.partialorder %v5492_v53, %v5996_v39 }
 0x212   : > { %v6176_v43 = vpop.xlane.xlu1 %2602  ;;  %11934 = vst [vmem:[#allocation148_spill] sm:$0xff] %v6189_v45  ;;  %11940 = vst [vmem:[#allocation154_spill] sm:$0xff] %v6218_v20  ;;  %v4634_v52 = vsel %vm776_vm10, 1.0, %v11821_v36  ;;  %v924_v50 = vsel %vm864_vm0, %v5633_v14, 0.0  ;;  %vm11174_vm1 = vcmp.eq.f32.partialorder %v5509_v62, %v6006_v1  ;;  %vm865_vm13 = vcmp.gt.f32.partialorder %v5670_v19, -inf }
 0x213   : > { %11931 = vst [vmem:[#allocation145_spill] sm:$0xff] %v6176_v43 }
 0x214   : > { %1765 = vadd.xlane.f32.xlu0 %v4692_v31 }
 0x215   : > { %846 = vadd.xlane.f32.xlu1 %v4633_v42  ;;  %v6180_v26 = vpop.xlane.xlu0 %1681 }
 0x216   : > { %v6182_v40 = vpop.xlane.xlu1 %3523 }
 0x217   : > { %11932 = vst [vmem:[#allocation146_spill] sm:$0xff] %v6182_v40 }
 0x218   : > { %1965 = vmax.xlane.f32.xlu0 %v6185_v33 }
 0x219   : > { %1046 = vmax.xlane.f32.xlu1 %v6189_v45  ;;  %v6194_v31 = vpop.xlane.xlu0 %2604 }
 0x21a   : > { %11935 = vst [vmem:[#allocation149_spill] sm:$0xff] %v6194_v31  ;;  %v6198_v42 = vpop.xlane.xlu1 %762 }
 0x21b   : > { %11936 = vst [vmem:[#allocation150_spill] sm:$0xff] %v6198_v42 }
 0x21c   : > { %2888 = vmax.xlane.f32.xlu0 %v6204_v41 }
 0x21d   : > { %1767 = vadd.xlane.f32.xlu1 %v4693_v49  ;;  %v6210_v33 = vpop.xlane.xlu0 %3525 }
 0x21e   : > { %11938 = vst [vmem:[#allocation152_spill] sm:$0xff] %v6210_v33  ;;  %v6212_v45 = vpop.xlane.xlu1 %1683 }
 0x21f   : > { %11939 = vst [vmem:[#allocation153_spill] sm:$0xff] %v6212_v45 }
 0x220   : > { %3809 = vmax.xlane.f32.xlu0 %v6218_v20 }
 0x221   : > { %1967 = vmax.xlane.f32.xlu1 %v6222_v30  ;;  %v825_v49 = vpop.xlane.xlu0 %824  ;;  %v6243_v30 = vsel %vm11156_vm8, -inf, %v5497_v56  ;;  %vm1785_vm8 = vcmp.gt.f32.partialorder %v5649_v55, -inf }
 0x222   : > { %v884_v47 = vmin.f32 %v825_v49, 3.0  ;;  %v6230_v29 = vpop.xlane.xlu1 %2866  ;;  %11944 = vst [vmem:[#allocation158_spill] sm:$0xff] %v6243_v30 }
 0x223   : > { %11942 = vst [vmem:[#allocation156_spill] sm:$0xff] %v6230_v29 }
 0x224   : > { %v6237_v20 = vsel %vm864_vm0, %v884_v47, 0.0  ;;  %848 = vadd.xlane.f32.xlu0 %v4634_v52  ;;  %v6259_v47 = vsel %vm776_vm10, -inf, %v5492_v53  ;;  %vm1697_vm0 = vcmp.eq.f32.partialorder %v5504_v58, %v6004_v18  ;;  %vm777_vm10 = vcmp.eq.f32.partialorder %v5521_v5, %v6022_v24 }
 0x225   : > { %11943 = vst [vmem:[#allocation157_spill] sm:$0xff] %v6237_v20  ;;  %v6246_v49 = vmul.f32 %v924_v50, %v6237_v20  ;;  %2890 = vmax.xlane.f32.xlu1 %v6243_v30  ;;  %v6249_v41 = vpop.xlane.xlu0 %1024  ;;  %11948 = vst [vmem:[#allocation162_spill] sm:$0xff] %v6259_v47  ;;  %v6266_v50 = vsel %vm11174_vm1, -inf, %v5509_v62  ;;  %v4694_v1 = vsel %vm1697_vm0, 1.0, %v11821_v36  ;;  %v1845_v62 = vsel %vm1785_vm8, %v5649_v55, 0.0 }
 0x226   : > { %11946 = vst [vmem:[#allocation160_spill] sm:$0xff] %v6249_v41  ;;  %v6253_v14 = vpop.xlane.xlu1 %3787  ;;  %11949 = vst [vmem:[#allocation163_spill] sm:$0xff] %v6266_v50  ;;  %vm866_vm1 = vcmp.gt.f32.partialorder %v5683_v44, -inf }
 0x227   : > { %11945 = vst [vmem:[#allocation159_spill] sm:$0xff] %v6246_v49  ;;  %11947 = vst [vmem:[#allocation161_spill] sm:$0xff] %v6253_v14 }
 0x228   : > { %1048 = vmax.xlane.f32.xlu0 %v6259_v47 }
 0x229   : > { %3811 = vmax.xlane.f32.xlu1 %v6266_v50  ;;  %v1746_v52 = vpop.xlane.xlu0 %1745  ;;  %v4635_v50 = vsel %vm777_vm10, 1.0, %v11821_v36 }
 0x22a   : > { %v1805_v53 = vmin.f32 %v1746_v52, 3.0  ;;  %v827_v2 = vpop.xlane.xlu1 %826 }
 0x22b   : > { %v885_v56 = vmin.f32 %v827_v2, 3.0  ;;  %v925_v2 = vsel %vm865_vm13, %v5670_v19, 0.0 }
 0x22c   : > { %v6280_v30 = vsel %vm1785_vm8, %v1805_v53, 0.0  ;;  %1769 = vadd.xlane.f32.xlu0 %v4694_v1  ;;  %v6303_v1 = vsel %vm1697_vm0, -inf, %v5504_v58  ;;  %vm11182_vm8 = vcmp.eq.f32.partialorder %v5516_v4, %v6018_v37  ;;  %vm1786_vm0 = vcmp.gt.f32.partialorder %v5672_v35, -inf }
 0x22d   : > { %11950 = vst [vmem:[#allocation164_spill] sm:$0xff] %v6280_v30  ;;  %v6287_v52 = vmul.f32 %v1845_v62, %v6280_v30  ;;  %v6290_v49 = vsel %vm865_vm13, %v885_v56, 0.0  ;;  %850 = vadd.xlane.f32.xlu1 %v4635_v50  ;;  %v6292_v20 = vpop.xlane.xlu0 %1945  ;;  %11955 = vst [vmem:[#allocation169_spill] sm:$0xff] %v6303_v1  ;;  %v6310_v56 = vsel %vm777_vm10, -inf, %v5521_v5  ;;  %vm1698_vm13 = vcmp.eq.f32.partialorder %v5533_v7, %v6036_v57 }
 0x22e   : > { %11952 = vst [vmem:[#allocation166_spill] sm:$0xff] %v6290_v49  ;;  %v6295_v55 = vmul.f32 %v925_v2, %v6290_v49  ;;  %v6297_v53 = vpop.xlane.xlu1 %1026  ;;  %11956 = vst [vmem:[#allocation170_spill] sm:$0xff] %v6310_v56  ;;  %v6324_v5 = vsel %vm11182_vm8, -inf, %v5516_v4  ;;  %v4695_v50 = vsel %vm1698_vm13, 1.0, %v11821_v36  ;;  %vm11175_vm10 = vcmp.eq.f32.partialorder %v5528_v6, %v6034_v10 }
 0x22f   : > { %11951 = vst [vmem:[#allocation165_spill] sm:$0xff] %v6287_v52  ;;  %11954 = vst [vmem:[#allocation168_spill] sm:$0xff] %v6297_v53  ;;  %v1846_v2 = vsel %vm1786_vm0, %v5672_v35, 0.0  ;;  %v6354_v35 = vsel %vm1698_vm13, -inf, %v5533_v7  ;;  %v926_v10 = vsel %vm866_vm1, %v5683_v44, 0.0  ;;  %vm11224_vm13 = vcmp.eq.f32.partialorder %v5557_v16, %v6069_v8 }
 0x230   : > { %11953 = vst [vmem:[#allocation167_spill] sm:$0xff] %v6295_v55  ;;  %1969 = vmax.xlane.f32.xlu0 %v6303_v1  ;;  %11958 = vst [vmem:[#allocation172_spill] sm:$0xff] %v6324_v5  ;;  %vm867_vm8 = vcmp.gt.f32.partialorder %v5736_v48, -inf  ;;  %v12029_v1 = vld [vmem:[#allocation59_spill] sm:$0xff] }
 0x231   : > { %1050 = vmax.xlane.f32.xlu1 %v6310_v56  ;;  %v6315_v62 = vpop.xlane.xlu0 %2868  ;;  %11963 = vst [vmem:[#allocation177_spill] sm:$0xff] %v6354_v35 }
 0x232   : > { %11957 = vst [vmem:[#allocation171_spill] sm:$0xff] %v6315_v62  ;;  %v1748_v58 = vpop.xlane.xlu1 %1747 }
 0x233   : > { %v1806_v19 = vmin.f32 %v1748_v58, 3.0 }
 0x234   : > { %2892 = vmax.xlane.f32.xlu0 %v6324_v5  ;;  %v6347_v5 = vsel %vm11175_vm10, -inf, %v5528_v6  ;;  %vm11181_vm10 = vcmp.eq.f32.partialorder %v5545_v12, %v6055_v25 }
 0x235   : > { %v6334_v52 = vsel %vm1786_vm0, %v1806_v19, 0.0  ;;  %1771 = vadd.xlane.f32.xlu1 %v4695_v50  ;;  %v6336_v58 = vpop.xlane.xlu0 %3789  ;;  %11962 = vst [vmem:[#allocation176_spill] sm:$0xff] %v6347_v5  ;;  %vm778_vm0 = vcmp.eq.f32.partialorder %v5540_v9, %v6051_v11 }
 0x236   : > { %11959 = vst [vmem:[#allocation173_spill] sm:$0xff] %v6334_v52  ;;  %11960 = vst [vmem:[#allocation174_spill] sm:$0xff] %v6336_v58  ;;  %v6339_v37 = vmul.f32 %v1846_v2, %v6334_v52  ;;  %v6341_v4 = vpop.xlane.xlu1 %1947  ;;  %v4636_v7 = vsel %vm778_vm0, 1.0, %v11821_v36 }
 0x238   : > { %11961 = vst [vmem:[#allocation175_spill] sm:$0xff] %v6339_v37  ;;  %3813 = vmax.xlane.f32.xlu0 %v6347_v5  ;;  %v6375_v5 = vsel %vm11181_vm10, -inf, %v5545_v12  ;;  %vm1787_vm10 = vcmp.gt.f32.partialorder %v5713_v46, -inf }
 0x239   : > { %1971 = vmax.xlane.f32.xlu1 %v6354_v35  ;;  %v829_v19 = vpop.xlane.xlu0 %828  ;;  %11966 = vst [vmem:[#allocation180_spill] sm:$0xff] %v6375_v5 }
 0x23a   : > { %v886_v50 = vmin.f32 %v829_v19, 3.0  ;;  %v6362_v2 = vpop.xlane.xlu1 %2870 }
 0x23b   : > { %11964 = vst [vmem:[#allocation178_spill] sm:$0xff] %v6362_v2 }
 0x23c   : > { %v6369_v6 = vsel %vm866_vm1, %v886_v50, 0.0  ;;  %852 = vadd.xlane.f32.xlu0 %v4636_v7  ;;  %v6391_v50 = vsel %vm778_vm0, -inf, %v5540_v9  ;;  %vm1699_vm1 = vcmp.eq.f32.partialorder %v5552_v13, %v6065_v38  ;;  %vm779_vm0 = vcmp.eq.f32.partialorder %v5569_v23, %v6088_v60 }
 0x23d   : > { %11965 = vst [vmem:[#allocation179_spill] sm:$0xff] %v6369_v6  ;;  %v6378_v19 = vmul.f32 %v926_v10, %v6369_v6  ;;  %2894 = vmax.xlane.f32.xlu1 %v6375_v5  ;;  %v6381_v37 = vpop.xlane.xlu0 %1028  ;;  %11969 = vst [vmem:[#allocation183_spill] sm:$0xff] %v6391_v50  ;;  %v6398_v10 = vsel %vm11224_vm13, -inf, %v5557_v16  ;;  %v4696_v8 = vsel %vm1699_vm1, 1.0, %v11821_v36  ;;  %v1847_v16 = vsel %vm1787_vm10, %v5713_v46, 0.0 }
 0x23e   : > { %v6385_v44 = vpop.xlane.xlu1 %3791  ;;  %11970 = vst [vmem:[#allocation184_spill] sm:$0xff] %v6398_v10 }
 0x23f   : > { %11967 = vst [vmem:[#allocation181_spill] sm:$0xff] %v6378_v19  ;;  %11968 = vst [vmem:[#allocation182_spill] sm:$0xff] %v6385_v44 }
 0x240   : > { %1052 = vmax.xlane.f32.xlu0 %v6391_v50  ;;  %v11997_v50 = vld [vmem:[#allocation49_spill] sm:$0xff] }
 0x241   : > { %3815 = vmax.xlane.f32.xlu1 %v6398_v10  ;;  %v1750_v7 = vpop.xlane.xlu0 %1749  ;;  %v4637_v10 = vsel %vm779_vm0, 1.0, %v11821_v36 }
 0x242   : > { %v1807_v9 = vmin.f32 %v1750_v7, 3.0  ;;  %v831_v25 = vpop.xlane.xlu1 %830 }
 0x243   : > { %v887_v12 = vmin.f32 %v831_v25, 3.0  ;;  %v927_v25 = vsel %vm867_vm8, %v5736_v48, 0.0 }
 0x244   : > { %v6412_v5 = vsel %vm1787_vm10, %v1807_v9, 0.0  ;;  %1773 = vadd.xlane.f32.xlu0 %v4696_v8  ;;  %v6435_v8 = vsel %vm1699_vm1, -inf, %v5552_v13  ;;  %v11981_v13 = vld [vmem:[#allocation73_spill] sm:$0xff] }
 0x245   : > { %11971 = vst [vmem:[#allocation185_spill] sm:$0xff] %v6412_v5  ;;  %v6419_v7 = vmul.f32 %v1847_v16, %v6412_v5  ;;  %v6422_v19 = vsel %vm867_vm8, %v887_v12, 0.0  ;;  %854 = vadd.xlane.f32.xlu1 %v4637_v10  ;;  %v6424_v6 = vpop.xlane.xlu0 %1949  ;;  %11976 = vst [vmem:[#allocation190_spill] sm:$0xff] %v6435_v8  ;;  %v6442_v12 = vsel %vm779_vm0, -inf, %v5569_v23  ;;  %v11978_v16 = vld [vmem:[#allocation43_spill] sm:$0xff]  ;;  %v11980_v10 = vld [vmem:[#allocation45_spill] sm:$0xff] }
 0x246   : > { %11973 = vst [vmem:[#allocation187_spill] sm:$0xff] %v6422_v19  ;;  %v6427_v46 = vmul.f32 %v927_v25, %v6422_v19  ;;  %v6429_v9 = vpop.xlane.xlu1 %1030  ;;  %11977 = vst [vmem:[#allocation191_spill] sm:$0xff] %v6442_v12  ;;  %vm11203_vm8 = vcmp.eq.f32.partialorder %v11978_v16, %v6084_v3  ;;  %vm1700_vm10 = vcmp.eq.f32.partialorder %v11980_v10, %v6094_v61  ;;  %vm1788_vm1 = vcmp.gt.f32.partialorder %v11981_v13, -inf }
 0x247   : > { %11972 = vst [vmem:[#allocation186_spill] sm:$0xff] %v6419_v7  ;;  %11975 = vst [vmem:[#allocation189_spill] sm:$0xff] %v6429_v9  ;;  %v6456_v23 = vsel %vm11203_vm8, -inf, %v11978_v16  ;;  %v4697_v5 = vsel %vm1700_vm10, 1.0, %v11821_v36  ;;  %v1848_v19 = vsel %vm1788_vm1, %v11981_v13, 0.0  ;;  %v11990_v13 = vld [vmem:[#allocation46_spill] sm:$0xff] }
 0x248   : > { %11974 = vst [vmem:[#allocation188_spill] sm:$0xff] %v6427_v46  ;;  %1973 = vmax.xlane.f32.xlu0 %v6435_v8  ;;  %11982 = vst [vmem:[#allocation45_spill] sm:$0xff] %v6456_v23  ;;  %v11983_v46 = vld [vmem:[#allocation44_spill] sm:$0xff] }
 0x249   : > { %1054 = vmax.xlane.f32.xlu1 %v6442_v12  ;;  %v6447_v48 = vpop.xlane.xlu0 %2872  ;;  %vm11206_vm0 = vcmp.eq.f32.partialorder %v11983_v46, %v6092_v63  ;;  %v11992_v63 = vld [vmem:[#allocation47_spill] sm:$0xff] }
 0x24a   : > { %11979 = vst [vmem:[#allocation192_spill] sm:$0xff] %v6447_v48  ;;  %v1752_v25 = vpop.xlane.xlu1 %1751 }
 0x24b   : > { %v1808_v7 = vmin.f32 %v1752_v25, 3.0 }
 0x24c   : > { %2896 = vmax.xlane.f32.xlu0 %v6456_v23  ;;  %v6479_v23 = vsel %vm11206_vm0, -inf, %v11983_v46  ;;  %vm11220_vm0 = vcmp.eq.f32.partialorder %v11992_v63, %v6110_v22  ;;  %v12002_v22 = vld [vmem:[#allocation79_spill] sm:$0xff] }
 0x24d   : > { %v6466_v8 = vsel %vm1788_vm1, %v1808_v7, 0.0  ;;  %1775 = vadd.xlane.f32.xlu1 %v4697_v5  ;;  %v6468_v25 = vpop.xlane.xlu0 %3793  ;;  %11987 = vst [vmem:[#allocation195_spill] sm:$0xff] %v6479_v23  ;;  %v6486_v5 = vsel %vm1700_vm10, -inf, %v11980_v10  ;;  %v11989_v7 = vld [vmem:[#allocation134_spill] sm:$0xff]  ;;  %vm11265_vm10 = vcmp.eq.f32.partialorder %v11997_v50, %v6124_v21 }
 0x24e   : > { %11984 = vst [vmem:[#allocation73_spill] sm:$0xff] %v6466_v8  ;;  %11985 = vst [vmem:[#allocation193_spill] sm:$0xff] %v6468_v25  ;;  %v6471_v3 = vmul.f32 %v1848_v19, %v6466_v8  ;;  %v6473_v16 = vpop.xlane.xlu1 %1951  ;;  %vm780_vm1 = vcmp.eq.f32.partialorder %v11990_v13, %v11989_v7  ;;  %v11991_v19 = vld [vmem:[#allocation76_spill] sm:$0xff] }
 0x24f   : > { %11988 = vst [vmem:[#allocation196_spill] sm:$0xff] %v6486_v5  ;;  %vm868_vm8 = vcmp.gt.f32.partialorder %v11991_v19, -inf  ;;  %v4638_v10 = vsel %vm780_vm1, 1.0, %v11821_v36  ;;  %vm2088_vm2 = vcmp.gt.f32.partialorder %v6473_v16, -inf }
 0x250   : > { %11986 = vst [vmem:[#allocation194_spill] sm:$0xff] %v6471_v3  ;;  %3817 = vmax.xlane.f32.xlu0 %v6479_v23  ;;  %v928_v23 = vsel %vm868_vm8, %v11991_v19, 0.0 }
 0x251   : > { %1975 = vmax.xlane.f32.xlu1 %v6486_v5  ;;  %v833_v3 = vpop.xlane.xlu0 %832  ;;  %v6507_v5 = vsel %vm11220_vm0, -inf, %v11992_v63  ;;  %vm1789_vm0 = vcmp.gt.f32.partialorder %v12002_v22, -inf }
 0x252   : > { %v888_v46 = vmin.f32 %v833_v3, 3.0  ;;  %v6494_v8 = vpop.xlane.xlu1 %2874  ;;  %11995 = vst [vmem:[#allocation76_spill] sm:$0xff] %v6507_v5 }
 0x253   : > { %11993 = vst [vmem:[#allocation134_spill] sm:$0xff] %v6494_v8 }
 0x254   : > { %v6501_v12 = vsel %vm868_vm8, %v888_v46, 0.0  ;;  %856 = vadd.xlane.f32.xlu0 %v4638_v10  ;;  %v6523_v46 = vsel %vm780_vm1, -inf, %v11990_v13  ;;  %v12001_v10 = vld [vmem:[#allocation48_spill] sm:$0xff] }
 0x255   : > { %11994 = vst [vmem:[#allocation46_spill] sm:$0xff] %v6501_v12  ;;  %v6510_v3 = vmul.f32 %v928_v23, %v6501_v12  ;;  %2898 = vmax.xlane.f32.xlu1 %v6507_v5  ;;  %v6513_v52 = vpop.xlane.xlu0 %1032  ;;  %11999 = vst [vmem:[#allocation199_spill] sm:$0xff] %v6523_v46  ;;  %v6530_v23 = vsel %vm11265_vm10, -inf, %v11997_v50  ;;  %vm1701_vm8 = vcmp.eq.f32.partialorder %v12001_v10, %v6122_v34  ;;  %v12003_v5 = vld [vmem:[#allocation51_spill] sm:$0xff]  ;;  %v1849_v50 = vsel %vm1789_vm0, %v12002_v22, 0.0 }
 0x256   : > { %v6517_v19 = vpop.xlane.xlu1 %3795  ;;  %12000 = vst [vmem:[#allocation200_spill] sm:$0xff] %v6530_v23  ;;  %vm781_vm1 = vcmp.eq.f32.partialorder %v12003_v5, %v6143_v32  ;;  %v4698_v21 = vsel %vm1701_vm8, 1.0, %v11821_v36 }
 0x257   : > { %11996 = vst [vmem:[#allocation197_spill] sm:$0xff] %v6510_v3  ;;  %11998 = vst [vmem:[#allocation198_spill] sm:$0xff] %v6517_v19  ;;  %v12004_v3 = vld [vmem:[#allocation84_spill] sm:$0xff] }
 0x258   : > { %1056 = vmax.xlane.f32.xlu0 %v6523_v46  ;;  %vm869_vm13 = vcmp.gt.f32.partialorder %v12004_v3, -inf }
 0x259   : > { %3819 = vmax.xlane.f32.xlu1 %v6530_v23  ;;  %v1754_v63 = vpop.xlane.xlu0 %1753  ;;  %v4639_v23 = vsel %vm781_vm1, 1.0, %v11821_v36 }
 0x25a   : > { %v1809_v13 = vmin.f32 %v1754_v63, 3.0  ;;  %v835_v12 = vpop.xlane.xlu1 %834 }
 0x25b   : > { %v889_v46 = vmin.f32 %v835_v12, 3.0  ;;  %v929_v12 = vsel %vm869_vm13, %v12004_v3, 0.0  ;;  %v12011_v3 = vld [vmem:[#allocation50_spill] sm:$0xff] }
 0x25c   : > { %v6544_v30 = vsel %vm1789_vm0, %v1809_v13, 0.0  ;;  %1777 = vadd.xlane.f32.xlu0 %v4698_v21  ;;  %v6567_v21 = vsel %vm1701_vm8, -inf, %v12001_v10  ;;  %v12014_v10 = vld [vmem:[#allocation87_spill] sm:$0xff] }
 0x25d   : > { %12005 = vst [vmem:[#allocation48_spill] sm:$0xff] %v6544_v30  ;;  %v6551_v63 = vmul.f32 %v1849_v50, %v6544_v30  ;;  %v6554_v55 = vsel %vm869_vm13, %v889_v46, 0.0  ;;  %858 = vadd.xlane.f32.xlu1 %v4639_v23  ;;  %v6556_v35 = vpop.xlane.xlu0 %1953  ;;  %12009 = vst [vmem:[#allocation201_spill] sm:$0xff] %v6567_v21  ;;  %v6574_v50 = vsel %vm781_vm1, -inf, %v12003_v5  ;;  %vm11245_vm13 = vcmp.eq.f32.partialorder %v12011_v3, %v6139_v0  ;;  %v12013_v23 = vld [vmem:[#allocation53_spill] sm:$0xff] }
 0x25e   : > { %12007 = vst [vmem:[#allocation51_spill] sm:$0xff] %v6554_v55  ;;  %v6559_v22 = vmul.f32 %v929_v12, %v6554_v55  ;;  %v6561_v13 = vpop.xlane.xlu1 %1034  ;;  %12010 = vst [vmem:[#allocation202_spill] sm:$0xff] %v6574_v50  ;;  %vm1702_vm0 = vcmp.eq.f32.partialorder %v12013_v23, %v6157_v54  ;;  %vm1790_vm8 = vcmp.gt.f32.partialorder %v12014_v10, -inf  ;;  %v6588_v5 = vsel %vm11245_vm13, -inf, %v12011_v3 }
 0x25f   : > { %12006 = vst [vmem:[#allocation79_spill] sm:$0xff] %v6551_v63  ;;  %12015 = vst [vmem:[#allocation53_spill] sm:$0xff] %v6588_v5  ;;  %v4699_v30 = vsel %vm1702_vm0, 1.0, %v11821_v36  ;;  %v1850_v55 = vsel %vm1790_vm8, %v12014_v10, 0.0 }
 0x260   : > { %12008 = vst [vmem:[#allocation84_spill] sm:$0xff] %v6559_v22  ;;  %1977 = vmax.xlane.f32.xlu0 %v6567_v21  ;;  %v12016_v22 = vld [vmem:[#allocation52_spill] sm:$0xff] }
 0x261   : > { %1058 = vmax.xlane.f32.xlu1 %v6574_v50  ;;  %v6579_v46 = vpop.xlane.xlu0 %2876  ;;  %vm11248_vm1 = vcmp.eq.f32.partialorder %v12016_v22, %v6153_v27  ;;  %v12024_v27 = vld [vmem:[#allocation56_spill] sm:$0xff] }
 0x262   : > { %12012 = vst [vmem:[#allocation203_spill] sm:$0xff] %v6579_v46  ;;  %v1756_v12 = vpop.xlane.xlu1 %1755 }
 0x263   : > { %v1810_v63 = vmin.f32 %v1756_v12, 3.0 }
 0x264   : > { %2900 = vmax.xlane.f32.xlu0 %v6588_v5  ;;  %v6611_v5 = vsel %vm11248_vm1, -inf, %v12016_v22  ;;  %vm11261_vm1 = vcmp.eq.f32.partialorder %v12024_v27, %v6176_v43  ;;  %v12034_v43 = vld [vmem:[#allocation92_spill] sm:$0xff] }
 0x265   : > { %v6598_v21 = vsel %vm1790_vm8, %v1810_v63, 0.0  ;;  %1779 = vadd.xlane.f32.xlu1 %v4699_v30  ;;  %v6600_v12 = vpop.xlane.xlu0 %3797  ;;  %12020 = vst [vmem:[#allocation206_spill] sm:$0xff] %v6611_v5  ;;  %v6618_v30 = vsel %vm1702_vm0, -inf, %v12013_v23  ;;  %v12022_v63 = vld [vmem:[#allocation54_spill] sm:$0xff]  ;;  %vm11288_vm0 = vcmp.eq.f32.partialorder %v12029_v1, %v6182_v40 }
 0x266   : > { %12017 = vst [vmem:[#allocation87_spill] sm:$0xff] %v6598_v21  ;;  %12018 = vst [vmem:[#allocation204_spill] sm:$0xff] %v6600_v12  ;;  %v6603_v0 = vmul.f32 %v1850_v55, %v6598_v21  ;;  %v6605_v3 = vpop.xlane.xlu1 %1955  ;;  %vm782_vm8 = vcmp.eq.f32.partialorder %v12022_v63, %v6172_v17  ;;  %v12023_v55 = vld [vmem:[#allocation90_spill] sm:$0xff] }
 0x267   : > { %12021 = vst [vmem:[#allocation207_spill] sm:$0xff] %v6618_v30  ;;  %vm870_vm13 = vcmp.gt.f32.partialorder %v12023_v55, -inf  ;;  %v4640_v23 = vsel %vm782_vm8, 1.0, %v11821_v36 }
 0x268   : > { %12019 = vst [vmem:[#allocation205_spill] sm:$0xff] %v6603_v0  ;;  %3821 = vmax.xlane.f32.xlu0 %v6611_v5  ;;  %v930_v5 = vsel %vm870_vm13, %v12023_v55, 0.0 }
 0x269   : > { %1979 = vmax.xlane.f32.xlu1 %v6618_v30  ;;  %v837_v10 = vpop.xlane.xlu0 %836  ;;  %v6639_v30 = vsel %vm11261_vm1, -inf, %v12024_v27  ;;  %vm1791_vm1 = vcmp.gt.f32.partialorder %v12034_v43, -inf }
 0x26a   : > { %v890_v22 = vmin.f32 %v837_v10, 3.0  ;;  %v6626_v0 = vpop.xlane.xlu1 %2878  ;;  %12027 = vst [vmem:[#allocation208_spill] sm:$0xff] %v6639_v30 }
 0x26b   : > { %12025 = vst [vmem:[#allocation54_spill] sm:$0xff] %v6626_v0 }
 0x26c   : > { %v6633_v21 = vsel %vm870_vm13, %v890_v22, 0.0  ;;  %860 = vadd.xlane.f32.xlu0 %v4640_v23  ;;  %v6655_v22 = vsel %vm782_vm8, -inf, %v12022_v63  ;;  %v12033_v23 = vld [vmem:[#allocation58_spill] sm:$0xff] }
 0x26d   : > { %12026 = vst [vmem:[#allocation90_spill] sm:$0xff] %v6633_v21  ;;  %v6642_v10 = vmul.f32 %v930_v5, %v6633_v21  ;;  %2902 = vmax.xlane.f32.xlu1 %v6639_v30  ;;  %v6645_v50 = vpop.xlane.xlu0 %1036  ;;  %12031 = vst [vmem:[#allocation211_spill] sm:$0xff] %v6655_v22  ;;  %v6662_v5 = vsel %vm11288_vm0, -inf, %v12029_v1  ;;  %vm1703_vm13 = vcmp.eq.f32.partialorder %v12033_v23, %v6180_v26  ;;  %v12035_v30 = vld [vmem:[#allocation61_spill] sm:$0xff]  ;;  %v1851_v1 = vsel %vm1791_vm1, %v12034_v43, 0.0 }
 0x26e   : > { %v6649_v55 = vpop.xlane.xlu1 %3799  ;;  %12032 = vst [vmem:[#allocation212_spill] sm:$0xff] %v6662_v5  ;;  %vm783_vm8 = vcmp.eq.f32.partialorder %v12035_v30, %v6198_v42  ;;  %v4700_v40 = vsel %vm1703_vm13, 1.0, %v11821_v36 }
 0x26f   : > { %12028 = vst [vmem:[#allocation209_spill] sm:$0xff] %v6642_v10  ;;  %12030 = vst [vmem:[#allocation210_spill] sm:$0xff] %v6649_v55  ;;  %v12036_v10 = vld [vmem:[#allocation97_spill] sm:$0xff] }
 0x270   : > { %1060 = vmax.xlane.f32.xlu0 %v6655_v22  ;;  %vm871_vm10 = vcmp.gt.f32.partialorder %v12036_v10, -inf }
 0x271   : > { %3823 = vmax.xlane.f32.xlu1 %v6662_v5  ;;  %v1758_v27 = vpop.xlane.xlu0 %1757  ;;  %v4641_v5 = vsel %vm783_vm8, 1.0, %v11821_v36 }
 0x272   : > { %v1811_v63 = vmin.f32 %v1758_v27, 3.0  ;;  %v839_v21 = vpop.xlane.xlu1 %838 }
 0x273   : > { %v891_v22 = vmin.f32 %v839_v21, 3.0  ;;  %v931_v21 = vsel %vm871_vm10, %v12036_v10, 0.0  ;;  %v12043_v10 = vld [vmem:[#allocation60_spill] sm:$0xff] }
 0x274   : > { %v6676_v49 = vsel %vm1791_vm1, %v1811_v63, 0.0  ;;  %1781 = vadd.xlane.f32.xlu0 %v4700_v40  ;;  %v6699_v40 = vsel %vm1703_vm13, -inf, %v12033_v23  ;;  %v12046_v23 = vld [vmem:[#allocation100_spill] sm:$0xff] }
 0x275   : > { %12037 = vst [vmem:[#allocation58_spill] sm:$0xff] %v6676_v49  ;;  %v6683_v27 = vmul.f32 %v1851_v1, %v6676_v49  ;;  %v6686_v56 = vsel %vm871_vm10, %v891_v22, 0.0  ;;  %862 = vadd.xlane.f32.xlu1 %v4641_v5  ;;  %v6688_v47 = vpop.xlane.xlu0 %1957  ;;  %12041 = vst [vmem:[#allocation213_spill] sm:$0xff] %v6699_v40  ;;  %v6706_v1 = vsel %vm783_vm8, -inf, %v12035_v30  ;;  %vm11304_vm10 = vcmp.eq.f32.partialorder %v12043_v10, %v6194_v31  ;;  %v12045_v5 = vld [vmem:[#allocation64_spill] sm:$0xff] }
 0x276   : > { %12039 = vst [vmem:[#allocation61_spill] sm:$0xff] %v6686_v56  ;;  %v6691_v43 = vmul.f32 %v931_v21, %v6686_v56  ;;  %v6693_v63 = vpop.xlane.xlu1 %1038  ;;  %12042 = vst [vmem:[#allocation214_spill] sm:$0xff] %v6706_v1  ;;  %vm1704_vm1 = vcmp.eq.f32.partialorder %v12045_v5, %v6212_v45  ;;  %vm1792_vm13 = vcmp.gt.f32.partialorder %v12046_v23, -inf  ;;  %v6720_v30 = vsel %vm11304_vm10, -inf, %v12043_v10 }
 0x277   : > { %12038 = vst [vmem:[#allocation92_spill] sm:$0xff] %v6683_v27  ;;  %12047 = vst [vmem:[#allocation64_spill] sm:$0xff] %v6720_v30  ;;  %v4701_v49 = vsel %vm1704_vm1, 1.0, %v11821_v36  ;;  %v1852_v56 = vsel %vm1792_vm13, %v12046_v23, 0.0 }
 0x278   : > { %12040 = vst [vmem:[#allocation97_spill] sm:$0xff] %v6691_v43  ;;  %1981 = vmax.xlane.f32.xlu0 %v6699_v40  ;;  %v12048_v43 = vld [vmem:[#allocation63_spill] sm:$0xff] }
 0x279   : > { %1062 = vmax.xlane.f32.xlu1 %v6706_v1  ;;  %v6711_v22 = vpop.xlane.xlu0 %2880  ;;  %vm11291_vm8 = vcmp.eq.f32.partialorder %v12048_v43, %v6210_v33  ;;  %v12056_v33 = vld [vmem:[#allocation75_spill] sm:$0xff] }
 0x27a   : > { %12044 = vst [vmem:[#allocation215_spill] sm:$0xff] %v6711_v22  ;;  %v1760_v21 = vpop.xlane.xlu1 %1759 }
 0x27b   : > { %v1812_v27 = vmin.f32 %v1760_v21, 3.0 }
 0x27c   : > { %2904 = vmax.xlane.f32.xlu0 %v6720_v30  ;;  %v6743_v30 = vsel %vm11291_vm8, -inf, %v12048_v43  ;;  %vm1065_vm8 = vcmp.eq.f32.partialorder %v12056_v33, %v6297_v53 }
 0x27d   : > { %v6730_v40 = vsel %vm1792_vm13, %v1812_v27, 0.0  ;;  %1783 = vadd.xlane.f32.xlu1 %v4701_v49  ;;  %v6732_v21 = vpop.xlane.xlu0 %3801  ;;  %12052 = vst [vmem:[#allocation218_spill] sm:$0xff] %v6743_v30  ;;  %v6750_v49 = vsel %vm1704_vm1, -inf, %v12045_v5  ;;  %v12054_v27 = vld [vmem:[#allocation69_spill] sm:$0xff] }
 0x27e   : > { %12049 = vst [vmem:[#allocation100_spill] sm:$0xff] %v6730_v40  ;;  %12050 = vst [vmem:[#allocation216_spill] sm:$0xff] %v6732_v21  ;;  %v6735_v31 = vmul.f32 %v1852_v56, %v6730_v40  ;;  %v6737_v10 = vpop.xlane.xlu1 %1959  ;;  %vm1064_vm13 = vcmp.eq.f32.partialorder %v12054_v27, %v6249_v41  ;;  %v12055_v56 = vld [vmem:[#allocation103_spill] sm:$0xff] }
 0x27f   : > { %12053 = vst [vmem:[#allocation219_spill] sm:$0xff] %v6750_v49  ;;  %vm872_vm0 = vcmp.gt.f32.partialorder %v12055_v56, -inf  ;;  %v4642_v5 = vsel %vm1064_vm13, 1.0, %v11821_v36  ;;  %v6779_v45 = vsel %vm1064_vm13, -inf, %v12054_v27 }
 0x280   : > { %12051 = vst [vmem:[#allocation217_spill] sm:$0xff] %v6735_v31  ;;  %3825 = vmax.xlane.f32.xlu0 %v6743_v30  ;;  %v932_v30 = vsel %vm872_vm0, %v12055_v56, 0.0  ;;  %12062 = vst [vmem:[#allocation222_spill] sm:$0xff] %v6779_v45  ;;  %v12064_v56 = vld [vmem:[#allocation67_spill] sm:$0xff] }
 0x281   : > { %1983 = vmax.xlane.f32.xlu1 %v6750_v49  ;;  %v841_v23 = vpop.xlane.xlu0 %840  ;;  %v4643_v49 = vsel %vm1065_vm8, 1.0, %v11821_v36 }
 0x282   : > { %v892_v43 = vmin.f32 %v841_v23, 3.0  ;;  %v6758_v31 = vpop.xlane.xlu1 %2882 }
 0x283   : > { %12057 = vst [vmem:[#allocation69_spill] sm:$0xff] %v6758_v31 }
 0x284   : > { %v6765_v40 = vsel %vm872_vm0, %v892_v43, 0.0  ;;  %1124 = vadd.xlane.f32.xlu0 %v4642_v5  ;;  %v6783_v43 = vsel %vm1065_vm8, -inf, %v12056_v33  ;;  %vm11527_vm0 = vcmp.eq.f32.partialorder %v12064_v56, %v6230_v29  ;;  %v12066_v5 = vld [vmem:[#allocation78_spill] sm:$0xff] }
 0x285   : > { %12058 = vst [vmem:[#allocation103_spill] sm:$0xff] %v6765_v40  ;;  %v6769_v1 = vmul.f32 %v932_v30, %v6765_v40  ;;  %1126 = vadd.xlane.f32.xlu1 %v4643_v49  ;;  %v6771_v53 = vpop.xlane.xlu0 %1040  ;;  %12063 = vst [vmem:[#allocation223_spill] sm:$0xff] %v6783_v43  ;;  %v12065_v30 = vld [vmem:[#allocation106_spill] sm:$0xff]  ;;  %vm11519_vm10 = vcmp.eq.f32.partialorder %v12066_v5, %v6315_v62  ;;  %v12067_v40 = vld [vmem:[#allocation15_spill] sm:$0xff]  ;;  %v6796_v33 = vsel %vm11527_vm0, -inf, %v12064_v56 }
 0x286   : > { %12060 = vst [vmem:[#allocation220_spill] sm:$0xff] %v6771_v53  ;;  %v6773_v23 = vpop.xlane.xlu1 %3803  ;;  %vm1793_vm1 = vcmp.gt.f32.partialorder %v12065_v30, -inf  ;;  %vm873_vm13 = vcmp.gt.f32.partialorder %v12067_v40, -inf  ;;  %12068 = vst [vmem:[#allocation106_spill] sm:$0xff] %v6796_v33 }
 0x287   : > { %12059 = vst [vmem:[#allocation75_spill] sm:$0xff] %v6769_v1  ;;  %12061 = vst [vmem:[#allocation221_spill] sm:$0xff] %v6773_v23  ;;  %v933_v29 = vsel %vm873_vm13, %v12067_v40, 0.0 }
 0x288   : > { %1324 = vmax.xlane.f32.xlu0 %v6779_v45  ;;  %v1853_v45 = vsel %vm1793_vm1, %v12065_v30, 0.0  ;;  %v12075_v30 = vld [vmem:[#allocation82_spill] sm:$0xff] }
 0x289   : > { %1326 = vmax.xlane.f32.xlu1 %v6783_v43  ;;  %v1762_v49 = vpop.xlane.xlu0 %1761 }
 0x28a   : > { %v1813_v1 = vmin.f32 %v1762_v49, 3.0  ;;  %v843_v27 = vpop.xlane.xlu1 %842  ;;  %v6806_v49 = vsel %vm11519_vm10, -inf, %v12066_v5 }
 0x28b   : > { %v893_v41 = vmin.f32 %v843_v27, 3.0  ;;  %12070 = vst [vmem:[#allocation224_spill] sm:$0xff] %v6806_v49  ;;  %v12071_v27 = vld [vmem:[#allocation74_spill] sm:$0xff] }
 0x28c   : > { %v6799_v43 = vsel %vm1793_vm1, %v1813_v1, 0.0  ;;  %3166 = vmax.xlane.f32.xlu0 %v6796_v33  ;;  %vm1985_vm8 = vcmp.eq.f32.partialorder %v12071_v27, %v6292_v20  ;;  %vm1986_vm1 = vcmp.eq.f32.partialorder %v12075_v30, %v6341_v4 }
 0x28d   : > { %12069 = vst [vmem:[#allocation15_spill] sm:$0xff] %v6799_v43  ;;  %v6811_v42 = vmul.f32 %v1853_v45, %v6799_v43  ;;  %v6814_v56 = vsel %vm873_vm13, %v893_v41, 0.0  ;;  %3168 = vmax.xlane.f32.xlu1 %v6806_v49  ;;  %v6817_v1 = vpop.xlane.xlu0 %1961  ;;  %v4702_v45 = vsel %vm1985_vm8, 1.0, %v11821_v36  ;;  %v4703_v41 = vsel %vm1986_vm1, 1.0, %v11821_v36  ;;  %v12079_v49 = vld [vmem:[#allocation111_spill] sm:$0xff] }
 0x28e   : > { %12073 = vst [vmem:[#allocation225_spill] sm:$0xff] %v6814_v56  ;;  %12074 = vst [vmem:[#allocation226_spill] sm:$0xff] %v6817_v1  ;;  %v6822_v33 = vmul.f32 %v933_v29, %v6814_v56  ;;  %v6824_v62 = vpop.xlane.xlu1 %1042  ;;  %vm1794_vm13 = vcmp.gt.f32.partialorder %v12079_v49, -inf  ;;  %v6838_v29 = vsel %vm1985_vm8, -inf, %v12071_v27  ;;  %v6842_v43 = vsel %vm1986_vm1, -inf, %v12075_v30  ;;  %v12085_v56 = vld [vmem:[#allocation81_spill] sm:$0xff] }
 0x28f   : > { %12072 = vst [vmem:[#allocation74_spill] sm:$0xff] %v6811_v42  ;;  %12077 = vst [vmem:[#allocation227_spill] sm:$0xff] %v6824_v62  ;;  %vm11502_vm8 = vcmp.eq.f32.partialorder %v12085_v56, %v6336_v58 }
 0x290   : > { %12076 = vst [vmem:[#allocation82_spill] sm:$0xff] %v6822_v33  ;;  %2045 = vadd.xlane.f32.xlu0 %v4702_v45  ;;  %12080 = vst [vmem:[#allocation111_spill] sm:$0xff] %v6838_v29  ;;  %v12082_v45 = vld [vmem:[#allocation70_spill] sm:$0xff] }
 0x291   : > { %2047 = vadd.xlane.f32.xlu1 %v4703_v41  ;;  %v6831_v40 = vpop.xlane.xlu0 %2884  ;;  %12081 = vst [vmem:[#allocation229_spill] sm:$0xff] %v6842_v43  ;;  %vm11338_vm5 = vcmp.eq.f32.partialorder %v12082_v45, %v6253_v14  ;;  %v1854_v41 = vsel %vm1794_vm13, %v12079_v49, 0.0  ;;  %v12090_v49 = vld [vmem:[#allocation88_spill] sm:$0xff] }
 0x292   : > { %12078 = vst [vmem:[#allocation228_spill] sm:$0xff] %v6831_v40  ;;  %v1764_v42 = vpop.xlane.xlu1 %1763  ;;  %v6863_v30 = vsel %vm11338_vm5, -inf, %v12082_v45  ;;  %vm1066_vm1 = vcmp.eq.f32.partialorder %v12090_v49, %v6381_v37 }
 0x293   : > { %v1814_v5 = vmin.f32 %v1764_v42, 3.0  ;;  %12088 = vst [vmem:[#allocation234_spill] sm:$0xff] %v6863_v30 }
 0x294   : > { %2245 = vmax.xlane.f32.xlu0 %v6838_v29 }
 0x295   : > { %v6847_v33 = vsel %vm1794_vm13, %v1814_v5, 0.0  ;;  %2247 = vmax.xlane.f32.xlu1 %v6842_v43  ;;  %v6850_v42 = vpop.xlane.xlu0 %3805  ;;  %v6870_v5 = vsel %vm11502_vm8, -inf, %v12085_v56  ;;  %vm874_vm13 = vcmp.gt.f32.partialorder %v5930_v15, -inf  ;;  %v12091_v43 = vld [vmem:[#allocation95_spill] sm:$0xff] }
 0x296   : > { %12083 = vst [vmem:[#allocation230_spill] sm:$0xff] %v6847_v33  ;;  %12084 = vst [vmem:[#allocation231_spill] sm:$0xff] %v6850_v42  ;;  %v6855_v27 = vmul.f32 %v1854_v41, %v6847_v33  ;;  %v6857_v29 = vpop.xlane.xlu1 %1963  ;;  %vm1067_vm6 = vcmp.eq.f32.partialorder %v12091_v43, %v6429_v9  ;;  %v934_v58 = vsel %vm874_vm13, %v5930_v15, 0.0  ;;  %v6899_v9 = vsel %vm1066_vm1, -inf, %v12090_v49 }
 0x297   : > { %12087 = vst [vmem:[#allocation233_spill] sm:$0xff] %v6857_v29  ;;  %12089 = vst [vmem:[#allocation235_spill] sm:$0xff] %v6870_v5  ;;  %v6903_v15 = vsel %vm1067_vm6, -inf, %v12091_v43 }
 0x298   : > { %12086 = vst [vmem:[#allocation232_spill] sm:$0xff] %v6855_v27  ;;  %4087 = vmax.xlane.f32.xlu0 %v6863_v30  ;;  %v4644_v30 = vsel %vm1066_vm1, 1.0, %v11821_v36  ;;  %12097 = vst [vmem:[#allocation239_spill] sm:$0xff] %v6899_v9  ;;  %vm875_vm1 = vcmp.gt.f32.partialorder %v5967_v51, -inf }
 0x299   : > { %4089 = vmax.xlane.f32.xlu1 %v6870_v5  ;;  %v845_v41 = vpop.xlane.xlu0 %844  ;;  %v4645_v5 = vsel %vm1067_vm6, 1.0, %v11821_v36  ;;  %12098 = vst [vmem:[#allocation240_spill] sm:$0xff] %v6903_v15 }
 0x29a   : > { %v894_v14 = vmin.f32 %v845_v41, 3.0  ;;  %v6878_v45 = vpop.xlane.xlu1 %2886 }
 0x29b   : > { %12092 = vst [vmem:[#allocation88_spill] sm:$0xff] %v6878_v45 }
 0x29c   : > { %v6885_v56 = vsel %vm874_vm13, %v894_v14, 0.0  ;;  %1128 = vadd.xlane.f32.xlu0 %v4644_v30  ;;  %v12099_v14 = vld [vmem:[#allocation85_spill] sm:$0xff]  ;;  %v12100_v30 = vld [vmem:[#allocation98_spill] sm:$0xff] }
 0x29d   : > { %12093 = vst [vmem:[#allocation95_spill] sm:$0xff] %v6885_v56  ;;  %v6889_v27 = vmul.f32 %v934_v58, %v6885_v56  ;;  %1130 = vadd.xlane.f32.xlu1 %v4645_v5  ;;  %v6891_v33 = vpop.xlane.xlu0 %1044  ;;  %vm11350_vm13 = vcmp.eq.f32.partialorder %v12099_v14, %v6362_v2  ;;  %vm11366_vm5 = vcmp.eq.f32.partialorder %v12100_v30, %v6447_v48  ;;  %v935_v2 = vsel %vm875_vm1, %v5967_v51, 0.0 }
 0x29e   : > { %12095 = vst [vmem:[#allocation237_spill] sm:$0xff] %v6891_v33  ;;  %v6893_v41 = vpop.xlane.xlu1 %3807  ;;  %v6916_v43 = vsel %vm11350_vm13, -inf, %v12099_v14 }
 0x29f   : > { %12094 = vst [vmem:[#allocation236_spill] sm:$0xff] %v6889_v27  ;;  %12096 = vst [vmem:[#allocation238_spill] sm:$0xff] %v6893_v41 }
 0x2a0   : > { %1328 = vmax.xlane.f32.xlu0 %v6899_v9  ;;  %12101 = vst [vmem:[#allocation241_spill] sm:$0xff] %v6916_v43  ;;  %v1855_v9 = vsel %vm1795_vm14, %v5946_v28, 0.0 }
 0x2a1   : > { %1330 = vmax.xlane.f32.xlu1 %v6903_v15  ;;  %v1766_v58 = vpop.xlane.xlu0 %1765 }
 0x2a2   : > { %v1815_v5 = vmin.f32 %v1766_v58, 3.0  ;;  %v847_v49 = vpop.xlane.xlu1 %846  ;;  %v6926_v58 = vsel %vm11366_vm5, -inf, %v12100_v30 }
 0x2a3   : > { %v895_v27 = vmin.f32 %v847_v49, 3.0  ;;  %12103 = vst [vmem:[#allocation243_spill] sm:$0xff] %v6926_v58  ;;  %v12104_v49 = vld [vmem:[#allocation94_spill] sm:$0xff] }
 0x2a4   : > { %v6919_v15 = vsel %vm1795_vm14, %v1815_v5, 0.0  ;;  %3170 = vmax.xlane.f32.xlu0 %v6916_v43  ;;  %vm1987_vm6 = vcmp.eq.f32.partialorder %v12104_v49, %v6424_v6  ;;  %v12108_v5 = vld [vmem:[#allocation102_spill] sm:$0xff] }
 0x2a5   : > { %12102 = vst [vmem:[#allocation242_spill] sm:$0xff] %v6919_v15  ;;  %v6931_v56 = vmul.f32 %v1855_v9, %v6919_v15  ;;  %v6934_v14 = vsel %vm875_vm1, %v895_v27, 0.0  ;;  %3172 = vmax.xlane.f32.xlu1 %v6926_v58  ;;  %v6937_v28 = vpop.xlane.xlu0 %1965  ;;  %vm1988_vm14 = vcmp.eq.f32.partialorder %v12108_v5, %v6473_v16  ;;  %v4704_v9 = vsel %vm1987_vm6, 1.0, %v11821_v36 }
 0x2a6   : > { %12106 = vst [vmem:[#allocation244_spill] sm:$0xff] %v6934_v14  ;;  %12107 = vst [vmem:[#allocation245_spill] sm:$0xff] %v6937_v28  ;;  %v6942_v43 = vmul.f32 %v935_v2, %v6934_v14  ;;  %v6944_v48 = vpop.xlane.xlu1 %1046  ;;  %v4705_v51 = vsel %vm1988_vm14, 1.0, %v11821_v36  ;;  %vm1796_vm1 = vcmp.gt.f32.partialorder %v5981_v59, -inf  ;;  %v6958_v2 = vsel %vm1987_vm6, -inf, %v12104_v49 }
 0x2a7   : > { %12105 = vst [vmem:[#allocation94_spill] sm:$0xff] %v6931_v56  ;;  %12110 = vst [vmem:[#allocation246_spill] sm:$0xff] %v6944_v48  ;;  %v6962_v56 = vsel %vm1988_vm14, -inf, %v12108_v5 }
 0x2a8   : > { %12109 = vst [vmem:[#allocation102_spill] sm:$0xff] %v6942_v43  ;;  %2049 = vadd.xlane.f32.xlu0 %v4704_v9  ;;  %12112 = vst [vmem:[#allocation248_spill] sm:$0xff] %v6958_v2  ;;  %v12114_v9 = vld [vmem:[#allocation89_spill] sm:$0xff] }
 0x2a9   : > { %2051 = vadd.xlane.f32.xlu1 %v4705_v51  ;;  %v6951_v27 = vpop.xlane.xlu0 %2888  ;;  %12113 = vst [vmem:[#allocation249_spill] sm:$0xff] %v6962_v56  ;;  %vm11354_vm13 = vcmp.eq.f32.partialorder %v12114_v9, %v6385_v44  ;;  %v1856_v51 = vsel %vm1796_vm1, %v5981_v59, 0.0  ;;  %v12117_v43 = vld [vmem:[#allocation101_spill] sm:$0xff] }
 0x2aa   : > { %12111 = vst [vmem:[#allocation247_spill] sm:$0xff] %v6951_v27  ;;  %v1768_v58 = vpop.xlane.xlu1 %1767  ;;  %vm11365_vm6 = vcmp.eq.f32.partialorder %v12117_v43, %v6468_v25  ;;  %v6983_v5 = vsel %vm11354_vm13, -inf, %v12114_v9 }
 0x2ab   : > { %v1816_v30 = vmin.f32 %v1768_v58, 3.0  ;;  %12120 = vst [vmem:[#allocation254_spill] sm:$0xff] %v6983_v5  ;;  %v6990_v59 = vsel %vm11365_vm6, -inf, %v12117_v43  ;;  %vm1797_vm6 = vcmp.gt.f32.partialorder %v6004_v18, -inf }
 0x2ac   : > { %2249 = vmax.xlane.f32.xlu0 %v6958_v2  ;;  %12121 = vst [vmem:[#allocation255_spill] sm:$0xff] %v6990_v59 }
 0x2ad   : > { %v6967_v15 = vsel %vm1796_vm1, %v1816_v30, 0.0  ;;  %2251 = vmax.xlane.f32.xlu1 %v6962_v56  ;;  %v6970_v58 = vpop.xlane.xlu0 %3809  ;;  %v12122_v30 = vld [vmem:[#allocation108_spill] sm:$0xff]  ;;  %vm876_vm1 = vcmp.gt.f32.partialorder %v5996_v39, -inf  ;;  %v12123_v56 = vld [vmem:[#allocation113_spill] sm:$0xff] }
 0x2ae   : > { %12115 = vst [vmem:[#allocation250_spill] sm:$0xff] %v6967_v15  ;;  %12116 = vst [vmem:[#allocation251_spill] sm:$0xff] %v6970_v58  ;;  %v6975_v49 = vmul.f32 %v1856_v51, %v6967_v15  ;;  %v6977_v2 = vpop.xlane.xlu1 %1967  ;;  %vm1068_vm14 = vcmp.eq.f32.partialorder %v12122_v30, %v6513_v52  ;;  %vm1069_vm13 = vcmp.eq.f32.partialorder %v12123_v56, %v6561_v13  ;;  %v936_v25 = vsel %vm876_vm1, %v5996_v39, 0.0 }
 0x2af   : > { %12119 = vst [vmem:[#allocation253_spill] sm:$0xff] %v6977_v2  ;;  %v7019_v14 = vsel %vm1068_vm14, -inf, %v12122_v30  ;;  %v7023_v39 = vsel %vm1069_vm13, -inf, %v12123_v56 }
 0x2b0   : > { %12118 = vst [vmem:[#allocation252_spill] sm:$0xff] %v6975_v49  ;;  %4091 = vmax.xlane.f32.xlu0 %v6983_v5  ;;  %v4646_v5 = vsel %vm1068_vm14, 1.0, %v11821_v36  ;;  %12129 = vst [vmem:[#allocation259_spill] sm:$0xff] %v7019_v14  ;;  %vm877_vm14 = vcmp.gt.f32.partialorder %v6022_v24, -inf }
 0x2b1   : > { %4093 = vmax.xlane.f32.xlu1 %v6990_v59  ;;  %v849_v51 = vpop.xlane.xlu0 %848  ;;  %v4647_v59 = vsel %vm1069_vm13, 1.0, %v11821_v36  ;;  %12130 = vst [vmem:[#allocation260_spill] sm:$0xff] %v7023_v39 }
 0x2b2   : > { %v896_v44 = vmin.f32 %v849_v51, 3.0  ;;  %v6998_v9 = vpop.xlane.xlu1 %2890 }
 0x2b3   : > { %12124 = vst [vmem:[#allocation108_spill] sm:$0xff] %v6998_v9 }
 0x2b4   : > { %v7005_v43 = vsel %vm876_vm1, %v896_v44, 0.0  ;;  %1132 = vadd.xlane.f32.xlu0 %v4646_v5  ;;  %v12131_v44 = vld [vmem:[#allocation105_spill] sm:$0xff]  ;;  %v12132_v5 = vld [vmem:[#allocation114_spill] sm:$0xff] }
 0x2b5   : > { %12125 = vst [vmem:[#allocation113_spill] sm:$0xff] %v7005_v43  ;;  %v7009_v49 = vmul.f32 %v936_v25, %v7005_v43  ;;  %1134 = vadd.xlane.f32.xlu1 %v4647_v59  ;;  %v7011_v15 = vpop.xlane.xlu0 %1048  ;;  %vm11394_vm1 = vcmp.eq.f32.partialorder %v12131_v44, %v6494_v8  ;;  %vm11378_vm5 = vcmp.eq.f32.partialorder %v12132_v5, %v6579_v46  ;;  %v1857_v43 = vsel %vm1797_vm6, %v6004_v18, 0.0 }
 0x2b6   : > { %12127 = vst [vmem:[#allocation257_spill] sm:$0xff] %v7011_v15  ;;  %v7013_v51 = vpop.xlane.xlu1 %3811  ;;  %v7036_v56 = vsel %vm11394_vm1, -inf, %v12131_v44  ;;  %v937_v8 = vsel %vm877_vm14, %v6022_v24, 0.0 }
 0x2b7   : > { %12126 = vst [vmem:[#allocation256_spill] sm:$0xff] %v7009_v49  ;;  %12128 = vst [vmem:[#allocation258_spill] sm:$0xff] %v7013_v51 }
 0x2b8   : > { %1332 = vmax.xlane.f32.xlu0 %v7019_v14  ;;  %12133 = vst [vmem:[#allocation261_spill] sm:$0xff] %v7036_v56 }
 0x2b9   : > { %1334 = vmax.xlane.f32.xlu1 %v7023_v39  ;;  %v1770_v25 = vpop.xlane.xlu0 %1769 }
 0x2ba   : > { %v1817_v59 = vmin.f32 %v1770_v25, 3.0  ;;  %v851_v30 = vpop.xlane.xlu1 %850  ;;  %v7046_v25 = vsel %vm11378_vm5, -inf, %v12132_v5 }
 0x2bb   : > { %v897_v49 = vmin.f32 %v851_v30, 3.0  ;;  %12135 = vst [vmem:[#allocation263_spill] sm:$0xff] %v7046_v25  ;;  %v12136_v30 = vld [vmem:[#allocation112_spill] sm:$0xff] }
 0x2bc   : > { %v7039_v39 = vsel %vm1797_vm6, %v1817_v59, 0.0  ;;  %3174 = vmax.xlane.f32.xlu0 %v7036_v56  ;;  %vm1989_vm13 = vcmp.eq.f32.partialorder %v12136_v30, %v6556_v35  ;;  %v12140_v59 = vld [vmem:[#allocation117_spill] sm:$0xff] }
 0x2bd   : > { %12134 = vst [vmem:[#allocation262_spill] sm:$0xff] %v7039_v39  ;;  %v7051_v14 = vmul.f32 %v1857_v43, %v7039_v39  ;;  %v7054_v44 = vsel %vm877_vm14, %v897_v49, 0.0  ;;  %3176 = vmax.xlane.f32.xlu1 %v7046_v25  ;;  %v7057_v18 = vpop.xlane.xlu0 %1969  ;;  %vm1990_vm6 = vcmp.eq.f32.partialorder %v12140_v59, %v6605_v3  ;;  %v4706_v43 = vsel %vm1989_vm13, 1.0, %v11821_v36  ;;  %v12149_v39 = vld [vmem:[#allocation116_spill] sm:$0xff] }
 0x2be   : > { %12138 = vst [vmem:[#allocation264_spill] sm:$0xff] %v7054_v44  ;;  %12139 = vst [vmem:[#allocation265_spill] sm:$0xff] %v7057_v18  ;;  %v7062_v56 = vmul.f32 %v937_v8, %v7054_v44  ;;  %v7064_v46 = vpop.xlane.xlu1 %1050  ;;  %v4707_v24 = vsel %vm1990_vm6, 1.0, %v11821_v36  ;;  %vm1798_vm14 = vcmp.gt.f32.partialorder %v6036_v57, -inf  ;;  %v7078_v8 = vsel %vm1989_vm13, -inf, %v12136_v30 }
 0x2bf   : > { %12137 = vst [vmem:[#allocation112_spill] sm:$0xff] %v7051_v14  ;;  %12142 = vst [vmem:[#allocation266_spill] sm:$0xff] %v7064_v46  ;;  %v7082_v14 = vsel %vm1990_vm6, -inf, %v12140_v59  ;;  %vm11393_vm13 = vcmp.eq.f32.partialorder %v12149_v39, %v6600_v12 }
 0x2c0   : > { %12141 = vst [vmem:[#allocation117_spill] sm:$0xff] %v7062_v56  ;;  %2053 = vadd.xlane.f32.xlu0 %v4706_v43  ;;  %12144 = vst [vmem:[#allocation268_spill] sm:$0xff] %v7078_v8  ;;  %v12146_v43 = vld [vmem:[#allocation109_spill] sm:$0xff] }
 0x2c1   : > { %2055 = vadd.xlane.f32.xlu1 %v4707_v24  ;;  %v7071_v49 = vpop.xlane.xlu0 %2892  ;;  %12145 = vst [vmem:[#allocation269_spill] sm:$0xff] %v7082_v14  ;;  %vm11382_vm5 = vcmp.eq.f32.partialorder %v12146_v43, %v6517_v19  ;;  %v1858_v24 = vsel %vm1798_vm14, %v6036_v57, 0.0  ;;  %v7110_v57 = vsel %vm11393_vm13, -inf, %v12149_v39  ;;  %vm1799_vm13 = vcmp.gt.f32.partialorder %v6065_v38, -inf }
 0x2c2   : > { %12143 = vst [vmem:[#allocation267_spill] sm:$0xff] %v7071_v49  ;;  %v1772_v25 = vpop.xlane.xlu1 %1771  ;;  %v7103_v59 = vsel %vm11382_vm5, -inf, %v12146_v43  ;;  %12153 = vst [vmem:[#allocation275_spill] sm:$0xff] %v7110_v57 }
 0x2c3   : > { %v1818_v5 = vmin.f32 %v1772_v25, 3.0  ;;  %12152 = vst [vmem:[#allocation274_spill] sm:$0xff] %v7103_v59 }
 0x2c4   : > { %2253 = vmax.xlane.f32.xlu0 %v7078_v8 }
 0x2c5   : > { %v7087_v56 = vsel %vm1798_vm14, %v1818_v5, 0.0  ;;  %2255 = vmax.xlane.f32.xlu1 %v7082_v14  ;;  %v7090_v25 = vpop.xlane.xlu0 %3813  ;;  %v12154_v5 = vld [vmem:[#allocation120_spill] sm:$0xff]  ;;  %vm878_vm14 = vcmp.gt.f32.partialorder %v6051_v11, -inf  ;;  %v12155_v14 = vld [vmem:[#allocation123_spill] sm:$0xff] }
 0x2c6   : > { %12147 = vst [vmem:[#allocation270_spill] sm:$0xff] %v7087_v56  ;;  %12148 = vst [vmem:[#allocation271_spill] sm:$0xff] %v7090_v25  ;;  %v7095_v30 = vmul.f32 %v1858_v24, %v7087_v56  ;;  %v7097_v8 = vpop.xlane.xlu1 %1971  ;;  %vm1070_vm6 = vcmp.eq.f32.partialorder %v12154_v5, %v6645_v50  ;;  %vm1071_vm5 = vcmp.eq.f32.partialorder %v12155_v14, %v6693_v63  ;;  %v938_v12 = vsel %vm878_vm14, %v6051_v11, 0.0 }
 0x2c7   : > { %12151 = vst [vmem:[#allocation273_spill] sm:$0xff] %v7097_v8  ;;  %v7139_v44 = vsel %vm1070_vm6, -inf, %v12154_v5  ;;  %v7143_v11 = vsel %vm1071_vm5, -inf, %v12155_v14 }
 0x2c8   : > { %12150 = vst [vmem:[#allocation272_spill] sm:$0xff] %v7095_v30  ;;  %4095 = vmax.xlane.f32.xlu0 %v7103_v59  ;;  %v4648_v59 = vsel %vm1070_vm6, 1.0, %v11821_v36  ;;  %12161 = vst [vmem:[#allocation279_spill] sm:$0xff] %v7139_v44  ;;  %vm879_vm6 = vcmp.gt.f32.partialorder %v6088_v60, -inf }
 0x2c9   : > { %4097 = vmax.xlane.f32.xlu1 %v7110_v57  ;;  %v853_v24 = vpop.xlane.xlu0 %852  ;;  %v4649_v57 = vsel %vm1071_vm5, 1.0, %v11821_v36  ;;  %12162 = vst [vmem:[#allocation280_spill] sm:$0xff] %v7143_v11 }
 0x2ca   : > { %v898_v19 = vmin.f32 %v853_v24, 3.0  ;;  %v7118_v43 = vpop.xlane.xlu1 %2894 }
 0x2cb   : > { %12156 = vst [vmem:[#allocation120_spill] sm:$0xff] %v7118_v43 }
 0x2cc   : > { %v7125_v39 = vsel %vm878_vm14, %v898_v19, 0.0  ;;  %1136 = vadd.xlane.f32.xlu0 %v4648_v59  ;;  %v12163_v19 = vld [vmem:[#allocation118_spill] sm:$0xff]  ;;  %v12164_v59 = vld [vmem:[#allocation25_spill] sm:$0xff] }
 0x2cd   : > { %12157 = vst [vmem:[#allocation123_spill] sm:$0xff] %v7125_v39  ;;  %v7129_v30 = vmul.f32 %v938_v12, %v7125_v39  ;;  %1138 = vadd.xlane.f32.xlu1 %v4649_v57  ;;  %v7131_v56 = vpop.xlane.xlu0 %1052  ;;  %vm11422_vm14 = vcmp.eq.f32.partialorder %v12163_v19, %v6626_v0  ;;  %vm11406_vm1 = vcmp.eq.f32.partialorder %v12164_v59, %v6711_v22  ;;  %v1859_v39 = vsel %vm1799_vm13, %v6065_v38, 0.0 }
 0x2ce   : > { %12159 = vst [vmem:[#allocation277_spill] sm:$0xff] %v7131_v56  ;;  %v7133_v24 = vpop.xlane.xlu1 %3815  ;;  %v7156_v14 = vsel %vm11422_vm14, -inf, %v12163_v19  ;;  %v939_v0 = vsel %vm879_vm6, %v6088_v60, 0.0 }
 0x2cf   : > { %12158 = vst [vmem:[#allocation276_spill] sm:$0xff] %v7129_v30  ;;  %12160 = vst [vmem:[#allocation278_spill] sm:$0xff] %v7133_v24 }
 0x2d0   : > { %1336 = vmax.xlane.f32.xlu0 %v7139_v44  ;;  %12165 = vst [vmem:[#allocation281_spill] sm:$0xff] %v7156_v14 }
 0x2d1   : > { %1338 = vmax.xlane.f32.xlu1 %v7143_v11  ;;  %v1774_v12 = vpop.xlane.xlu0 %1773 }
 0x2d2   : > { %v1819_v57 = vmin.f32 %v1774_v12, 3.0  ;;  %v855_v5 = vpop.xlane.xlu1 %854  ;;  %v7166_v12 = vsel %vm11406_vm1, -inf, %v12164_v59 }
 0x2d3   : > { %v899_v30 = vmin.f32 %v855_v5, 3.0  ;;  %12167 = vst [vmem:[#allocation283_spill] sm:$0xff] %v7166_v12  ;;  %v12168_v5 = vld [vmem:[#allocation122_spill] sm:$0xff] }
 0x2d4   : > { %v7159_v11 = vsel %vm1799_vm13, %v1819_v57, 0.0  ;;  %3178 = vmax.xlane.f32.xlu0 %v7156_v14  ;;  %vm1991_vm5 = vcmp.eq.f32.partialorder %v12168_v5, %v6688_v47  ;;  %v12171_v57 = vld [vmem:[#allocation127_spill] sm:$0xff] }
 0x2d5   : > { %12166 = vst [vmem:[#allocation282_spill] sm:$0xff] %v7159_v11  ;;  %v7171_v44 = vmul.f32 %v1859_v39, %v7159_v11  ;;  %v7174_v19 = vsel %vm879_vm6, %v899_v30, 0.0  ;;  %3180 = vmax.xlane.f32.xlu1 %v7166_v12  ;;  %v7177_v38 = vpop.xlane.xlu0 %1973  ;;  %vm1992_vm13 = vcmp.eq.f32.partialorder %v12171_v57, %v6737_v10  ;;  %v4708_v39 = vsel %vm1991_vm5, 1.0, %v11821_v36  ;;  %v12180_v11 = vld [vmem:[#allocation126_spill] sm:$0xff] }
 0x2d6   : > { %12170 = vst [vmem:[#allocation284_spill] sm:$0xff] %v7174_v19  ;;  %v7182_v14 = vmul.f32 %v939_v0, %v7174_v19  ;;  %v7184_v22 = vpop.xlane.xlu1 %1054  ;;  %v4709_v60 = vsel %vm1992_vm13, 1.0, %v11821_v36  ;;  %vm1800_vm6 = vcmp.gt.f32.partialorder %v6094_v61, -inf  ;;  %v7198_v0 = vsel %vm1991_vm5, -inf, %v12168_v5 }
 0x2d7   : > { %12169 = vst [vmem:[#allocation122_spill] sm:$0xff] %v7171_v44  ;;  %12173 = vst [vmem:[#allocation285_spill] sm:$0xff] %v7184_v22  ;;  %v7202_v44 = vsel %vm1992_vm13, -inf, %v12171_v57  ;;  %vm11421_vm5 = vcmp.eq.f32.partialorder %v12180_v11, %v6732_v21 }
 0x2d8   : > { %12172 = vst [vmem:[#allocation127_spill] sm:$0xff] %v7182_v14  ;;  %2057 = vadd.xlane.f32.xlu0 %v4708_v39  ;;  %12175 = vst [vmem:[#allocation287_spill] sm:$0xff] %v7198_v0  ;;  %v12177_v39 = vld [vmem:[#allocation121_spill] sm:$0xff] }
 0x2d9   : > { %2059 = vadd.xlane.f32.xlu1 %v4709_v60  ;;  %v7191_v30 = vpop.xlane.xlu0 %2896  ;;  %12176 = vst [vmem:[#allocation288_spill] sm:$0xff] %v7202_v44  ;;  %vm11410_vm1 = vcmp.eq.f32.partialorder %v12177_v39, %v6649_v55  ;;  %v1860_v60 = vsel %vm1800_vm6, %v6094_v61, 0.0  ;;  %v7230_v61 = vsel %vm11421_vm5, -inf, %v12180_v11  ;;  %vm1801_vm5 = vcmp.gt.f32.partialorder %v6122_v34, -inf }
 0x2da   : > { %12174 = vst [vmem:[#allocation286_spill] sm:$0xff] %v7191_v30  ;;  %v1776_v12 = vpop.xlane.xlu1 %1775  ;;  %v7223_v57 = vsel %vm11410_vm1, -inf, %v12177_v39  ;;  %12183 = vst [vmem:[#allocation293_spill] sm:$0xff] %v7230_v61 }
 0x2db   : > { %v1820_v59 = vmin.f32 %v1776_v12, 3.0  ;;  %12182 = vst [vmem:[#allocation292_spill] sm:$0xff] %v7223_v57 }
 0x2dc   : > { %2257 = vmax.xlane.f32.xlu0 %v7198_v0 }
 0x2dd   : > { %v7207_v14 = vsel %vm1800_vm6, %v1820_v59, 0.0  ;;  %2259 = vmax.xlane.f32.xlu1 %v7202_v44  ;;  %v7210_v12 = vpop.xlane.xlu0 %3817  ;;  %v12184_v59 = vld [vmem:[#allocation130_spill] sm:$0xff]  ;;  %vm880_vm6 = vcmp.gt.f32.partialorder %v11989_v7, -inf  ;;  %v12185_v44 = vld [vmem:[#allocation133_spill] sm:$0xff] }
 0x2de   : > { %12178 = vst [vmem:[#allocation289_spill] sm:$0xff] %v7207_v14  ;;  %12179 = vst [vmem:[#allocation290_spill] sm:$0xff] %v7210_v12  ;;  %v7215_v5 = vmul.f32 %v1860_v60, %v7207_v14  ;;  %v7217_v0 = vpop.xlane.xlu1 %1975  ;;  %vm1072_vm13 = vcmp.eq.f32.partialorder %v12184_v59, %v6771_v53  ;;  %vm1073_vm1 = vcmp.eq.f32.partialorder %v12185_v44, %v6824_v62  ;;  %v940_v21 = vsel %vm880_vm6, %v11989_v7, 0.0 }
 0x2df   : > { %v7259_v19 = vsel %vm1072_vm13, -inf, %v12184_v59  ;;  %v7263_v7 = vsel %vm1073_vm1, -inf, %v12185_v44 }
 0x2e0   : > { %12181 = vst [vmem:[#allocation291_spill] sm:$0xff] %v7215_v5  ;;  %4099 = vmax.xlane.f32.xlu0 %v7223_v57  ;;  %v4650_v57 = vsel %vm1072_vm13, 1.0, %v11821_v36  ;;  %12190 = vst [vmem:[#allocation296_spill] sm:$0xff] %v7259_v19  ;;  %vm881_vm13 = vcmp.gt.f32.partialorder %v6143_v32, -inf }
 0x2e1   : > { %4101 = vmax.xlane.f32.xlu1 %v7230_v61  ;;  %v857_v60 = vpop.xlane.xlu0 %856  ;;  %v4651_v61 = vsel %vm1073_vm1, 1.0, %v11821_v36  ;;  %12191 = vst [vmem:[#allocation297_spill] sm:$0xff] %v7263_v7 }
 0x2e2   : > { %v900_v55 = vmin.f32 %v857_v60, 3.0  ;;  %v7238_v39 = vpop.xlane.xlu1 %2898 }
 0x2e3   : > { %12186 = vst [vmem:[#allocation130_spill] sm:$0xff] %v7238_v39 }
 0x2e4   : > { %v7245_v11 = vsel %vm880_vm6, %v900_v55, 0.0  ;;  %1140 = vadd.xlane.f32.xlu0 %v4650_v57  ;;  %v12192_v55 = vld [vmem:[#allocation128_spill] sm:$0xff] }
 0x2e5   : > { %12187 = vst [vmem:[#allocation133_spill] sm:$0xff] %v7245_v11  ;;  %v7249_v5 = vmul.f32 %v940_v21, %v7245_v11  ;;  %1142 = vadd.xlane.f32.xlu1 %v4651_v61  ;;  %v7251_v14 = vpop.xlane.xlu0 %1056  ;;  %vm11452_vm6 = vcmp.eq.f32.partialorder %v12192_v55, %v6758_v31  ;;  %v12193_v57 = vld [vmem:[#allocation136_spill] sm:$0xff]  ;;  %v1861_v11 = vsel %vm1801_vm5, %v6122_v34, 0.0  ;;  %v941_v31 = vsel %vm881_vm13, %v6143_v32, 0.0 }
 0x2e6   : > { %v7253_v60 = vpop.xlane.xlu1 %3819  ;;  %vm11434_vm14 = vcmp.eq.f32.partialorder %v12193_v57, %v6831_v40  ;;  %v7276_v44 = vsel %vm11452_vm6, -inf, %v12192_v55 }
 0x2e7   : > { %12188 = vst [vmem:[#allocation294_spill] sm:$0xff] %v7249_v5  ;;  %12189 = vst [vmem:[#allocation295_spill] sm:$0xff] %v7253_v60 }
 0x2e8   : > { %1340 = vmax.xlane.f32.xlu0 %v7259_v19  ;;  %12194 = vst [vmem:[#allocation298_spill] sm:$0xff] %v7276_v44 }
 0x2e9   : > { %1342 = vmax.xlane.f32.xlu1 %v7263_v7  ;;  %v1778_v21 = vpop.xlane.xlu0 %1777 }
 0x2ea   : > { %v1821_v61 = vmin.f32 %v1778_v21, 3.0  ;;  %v859_v59 = vpop.xlane.xlu1 %858  ;;  %v7286_v21 = vsel %vm11434_vm14, -inf, %v12193_v57 }
 0x2eb   : > { %v901_v5 = vmin.f32 %v859_v59, 3.0  ;;  %12196 = vst [vmem:[#allocation300_spill] sm:$0xff] %v7286_v21  ;;  %v12197_v59 = vld [vmem:[#allocation132_spill] sm:$0xff] }
 0x2ec   : > { %v7279_v7 = vsel %vm1801_vm5, %v1821_v61, 0.0  ;;  %3182 = vmax.xlane.f32.xlu0 %v7276_v44  ;;  %vm1993_vm1 = vcmp.eq.f32.partialorder %v12197_v59, %v6817_v1  ;;  %v12200_v61 = vld [vmem:[#allocation139_spill] sm:$0xff] }
 0x2ed   : > { %12195 = vst [vmem:[#allocation299_spill] sm:$0xff] %v7279_v7  ;;  %v7291_v19 = vmul.f32 %v1861_v11, %v7279_v7  ;;  %v7294_v55 = vsel %vm881_vm13, %v901_v5, 0.0  ;;  %3184 = vmax.xlane.f32.xlu1 %v7286_v21  ;;  %v7297_v34 = vpop.xlane.xlu0 %1977  ;;  %vm1994_vm5 = vcmp.eq.f32.partialorder %v12200_v61, %v6857_v29  ;;  %v4710_v11 = vsel %vm1993_vm1, 1.0, %v11821_v36  ;;  %v12209_v7 = vld [vmem:[#allocation138_spill] sm:$0xff] }
 0x2ee   : > { %12199 = vst [vmem:[#allocation301_spill] sm:$0xff] %v7294_v55  ;;  %v7302_v44 = vmul.f32 %v941_v31, %v7294_v55  ;;  %v7304_v40 = vpop.xlane.xlu1 %1058  ;;  %v4711_v32 = vsel %vm1994_vm5, 1.0, %v11821_v36  ;;  %vm1802_vm13 = vcmp.gt.f32.partialorder %v6157_v54, -inf  ;;  %v7318_v31 = vsel %vm1993_vm1, -inf, %v12197_v59 }
 0x2ef   : > { %12198 = vst [vmem:[#allocation132_spill] sm:$0xff] %v7291_v19  ;;  %12202 = vst [vmem:[#allocation302_spill] sm:$0xff] %v7304_v40  ;;  %v7322_v19 = vsel %vm1994_vm5, -inf, %v12200_v61  ;;  %vm11451_vm1 = vcmp.eq.f32.partialorder %v12209_v7, %v6850_v42 }
 0x2f0   : > { %12201 = vst [vmem:[#allocation139_spill] sm:$0xff] %v7302_v44  ;;  %2061 = vadd.xlane.f32.xlu0 %v4710_v11  ;;  %12204 = vst [vmem:[#allocation304_spill] sm:$0xff] %v7318_v31  ;;  %v12206_v11 = vld [vmem:[#allocation131_spill] sm:$0xff] }
 0x2f1   : > { %2063 = vadd.xlane.f32.xlu1 %v4711_v32  ;;  %v7311_v5 = vpop.xlane.xlu0 %2900  ;;  %12205 = vst [vmem:[#allocation305_spill] sm:$0xff] %v7322_v19  ;;  %vm11438_vm14 = vcmp.eq.f32.partialorder %v12206_v11, %v6773_v23  ;;  %v1862_v32 = vsel %vm1802_vm13, %v6157_v54, 0.0  ;;  %v7350_v54 = vsel %vm11451_vm1, -inf, %v12209_v7  ;;  %vm1803_vm1 = vcmp.gt.f32.partialorder %v6180_v26, -inf }
 0x2f2   : > { %12203 = vst [vmem:[#allocation303_spill] sm:$0xff] %v7311_v5  ;;  %v1780_v21 = vpop.xlane.xlu1 %1779  ;;  %v7343_v61 = vsel %vm11438_vm14, -inf, %v12206_v11  ;;  %12212 = vst [vmem:[#allocation310_spill] sm:$0xff] %v7350_v54 }
 0x2f3   : > { %v1822_v57 = vmin.f32 %v1780_v21, 3.0  ;;  %12211 = vst [vmem:[#allocation309_spill] sm:$0xff] %v7343_v61 }
 0x2f4   : > { %2261 = vmax.xlane.f32.xlu0 %v7318_v31 }
 0x2f5   : > { %v7327_v44 = vsel %vm1802_vm13, %v1822_v57, 0.0  ;;  %2263 = vmax.xlane.f32.xlu1 %v7322_v19  ;;  %v7330_v21 = vpop.xlane.xlu0 %3821  ;;  %v12213_v57 = vld [vmem:[#allocation143_spill] sm:$0xff]  ;;  %vm882_vm13 = vcmp.gt.f32.partialorder %v6172_v17, -inf  ;;  %v12214_v19 = vld [vmem:[#allocation148_spill] sm:$0xff] }
 0x2f6   : > { %12207 = vst [vmem:[#allocation306_spill] sm:$0xff] %v7327_v44  ;;  %12208 = vst [vmem:[#allocation307_spill] sm:$0xff] %v7330_v21  ;;  %v7335_v59 = vmul.f32 %v1862_v32, %v7327_v44  ;;  %v7337_v31 = vpop.xlane.xlu1 %1979  ;;  %vm1074_vm5 = vcmp.eq.f32.partialorder %v12213_v57, %v6891_v33  ;;  %vm1075_vm14 = vcmp.eq.f32.partialorder %v12214_v19, %v6944_v48  ;;  %v942_v42 = vsel %vm882_vm13, %v6172_v17, 0.0 }
 0x2f7   : > { %v7379_v55 = vsel %vm1074_vm5, -inf, %v12213_v57  ;;  %v7383_v17 = vsel %vm1075_vm14, -inf, %v12214_v19 }
 0x2f8   : > { %12210 = vst [vmem:[#allocation308_spill] sm:$0xff] %v7335_v59  ;;  %4103 = vmax.xlane.f32.xlu0 %v7343_v61  ;;  %v4652_v61 = vsel %vm1074_vm5, 1.0, %v11821_v36  ;;  %12219 = vst [vmem:[#allocation313_spill] sm:$0xff] %v7379_v55 }
 0x2f9   : > { %4105 = vmax.xlane.f32.xlu1 %v7350_v54  ;;  %v861_v32 = vpop.xlane.xlu0 %860  ;;  %v4653_v54 = vsel %vm1075_vm14, 1.0, %v11821_v36  ;;  %12220 = vst [vmem:[#allocation314_spill] sm:$0xff] %v7383_v17 }
 0x2fa   : > { %v902_v23 = vmin.f32 %v861_v32, 3.0  ;;  %v7358_v11 = vpop.xlane.xlu1 %2902 }
 0x2fb   : > { %12215 = vst [vmem:[#allocation143_spill] sm:$0xff] %v7358_v11 }
 0x2fc   : > { %v7365_v7 = vsel %vm882_vm13, %v902_v23, 0.0  ;;  %1144 = vadd.xlane.f32.xlu0 %v4652_v61  ;;  %v12221_v23 = vld [vmem:[#allocation141_spill] sm:$0xff]  ;;  %v12222_v61 = vld [vmem:[#allocation151_spill] sm:$0xff] }
 0x2fd   : > { %12216 = vst [vmem:[#allocation148_spill] sm:$0xff] %v7365_v7  ;;  %v7369_v59 = vmul.f32 %v942_v42, %v7365_v7  ;;  %1146 = vadd.xlane.f32.xlu1 %v4653_v54  ;;  %v7371_v44 = vpop.xlane.xlu0 %1060  ;;  %vm11487_vm13 = vcmp.eq.f32.partialorder %v12221_v23, %v6878_v45  ;;  %vm11467_vm6 = vcmp.eq.f32.partialorder %v12222_v61, %v6951_v27 }
 0x2fe   : > { %v7373_v32 = vpop.xlane.xlu1 %3823  ;;  %v7396_v19 = vsel %vm11487_vm13, -inf, %v12221_v23 }
 0x2ff   : > { %12217 = vst [vmem:[#allocation311_spill] sm:$0xff] %v7369_v59  ;;  %12218 = vst [vmem:[#allocation312_spill] sm:$0xff] %v7373_v32  ;;  %v12223_v59 = vld [vmem:[#allocation150_spill] sm:$0xff] }
 0x300   : > { %1344 = vmax.xlane.f32.xlu0 %v7379_v55  ;;  %vm883_vm5 = vcmp.gt.f32.partialorder %v12223_v59, -inf  ;;  %12224 = vst [vmem:[#allocation150_spill] sm:$0xff] %v7396_v19  ;;  %v1863_v55 = vsel %vm1803_vm1, %v6180_v26, 0.0 }
 0x301   : > { %1346 = vmax.xlane.f32.xlu1 %v7383_v17  ;;  %v1782_v42 = vpop.xlane.xlu0 %1781  ;;  %v943_v45 = vsel %vm883_vm5, %v12223_v59, 0.0 }
 0x302   : > { %v1823_v54 = vmin.f32 %v1782_v42, 3.0  ;;  %v863_v57 = vpop.xlane.xlu1 %862  ;;  %v7406_v42 = vsel %vm11467_vm6, -inf, %v12222_v61 }
 0x303   : > { %v903_v7 = vmin.f32 %v863_v57, 3.0  ;;  %12226 = vst [vmem:[#allocation316_spill] sm:$0xff] %v7406_v42  ;;  %v12227_v57 = vld [vmem:[#allocation147_spill] sm:$0xff] }
 0x304   : > { %v7399_v17 = vsel %vm1803_vm1, %v1823_v54, 0.0  ;;  %3186 = vmax.xlane.f32.xlu0 %v7396_v19  ;;  %vm1995_vm14 = vcmp.eq.f32.partialorder %v12227_v57, %v6937_v28  ;;  %v12230_v54 = vld [vmem:[#allocation155_spill] sm:$0xff]  ;;  %v12244_v28 = vld [vmem:[#allocation168_spill] sm:$0xff] }
 0x305   : > { %12225 = vst [vmem:[#allocation315_spill] sm:$0xff] %v7399_v17  ;;  %v7411_v48 = vmul.f32 %v1863_v55, %v7399_v17  ;;  %v7414_v23 = vsel %vm883_vm5, %v903_v7, 0.0  ;;  %3188 = vmax.xlane.f32.xlu1 %v7406_v42  ;;  %v7417_v26 = vpop.xlane.xlu0 %1981  ;;  %vm1996_vm1 = vcmp.eq.f32.partialorder %v12230_v54, %v6977_v2  ;;  %v4712_v55 = vsel %vm1995_vm14, 1.0, %v11821_v36  ;;  %v12233_v42 = vld [vmem:[#allocation153_spill] sm:$0xff]  ;;  %v12242_v2 = vld [vmem:[#allocation160_spill] sm:$0xff] }
 0x306   : > { %12229 = vst [vmem:[#allocation317_spill] sm:$0xff] %v7414_v23  ;;  %v7422_v19 = vmul.f32 %v943_v45, %v7414_v23  ;;  %v7424_v27 = vpop.xlane.xlu1 %1062  ;;  %v4713_v7 = vsel %vm1996_vm1, 1.0, %v11821_v36  ;;  %vm1804_vm5 = vcmp.gt.f32.partialorder %v12233_v42, -inf  ;;  %v7438_v45 = vsel %vm1995_vm14, -inf, %v12227_v57  ;;  %v12239_v23 = vld [vmem:[#allocation170_spill] sm:$0xff] }
 0x307   : > { %12228 = vst [vmem:[#allocation147_spill] sm:$0xff] %v7411_v48  ;;  %12234 = vst [vmem:[#allocation153_spill] sm:$0xff] %v7438_v45  ;;  %vm1077_vm14 = vcmp.eq.f32.partialorder %v12239_v23, %v7064_v46 }
 0x308   : > { %12231 = vst [vmem:[#allocation155_spill] sm:$0xff] %v7422_v19  ;;  %2065 = vadd.xlane.f32.xlu0 %v4712_v55  ;;  %v7442_v19 = vsel %vm1996_vm1, -inf, %v12230_v54  ;;  %v12236_v55 = vld [vmem:[#allocation162_spill] sm:$0xff]  ;;  %vm1164_vm1 = vcmp.gt.f32.partialorder %v12242_v2, -inf }
 0x309   : > { %2067 = vadd.xlane.f32.xlu1 %v4713_v7  ;;  %v7431_v59 = vpop.xlane.xlu0 %2904  ;;  %12235 = vst [vmem:[#allocation319_spill] sm:$0xff] %v7442_v19  ;;  %vm1076_vm6 = vcmp.eq.f32.partialorder %v12236_v55, %v7011_v15  ;;  %v1864_v7 = vsel %vm1804_vm5, %v12233_v42, 0.0  ;;  %v12241_v42 = vld [vmem:[#allocation157_spill] sm:$0xff]  ;;  %v1224_v1 = vsel %vm1164_vm1, %v12242_v2, 0.0 }
 0x30a   : > { %12232 = vst [vmem:[#allocation318_spill] sm:$0xff] %v7431_v59  ;;  %v1784_v61 = vpop.xlane.xlu1 %1783  ;;  %v4654_v54 = vsel %vm1076_vm6, 1.0, %v11821_v36  ;;  %v7476_v62 = vsel %vm1076_vm6, -inf, %v12236_v55  ;;  %v12247_v2 = vld [vmem:[#allocation169_spill] sm:$0xff] }
 0x30b   : > { %v1824_v48 = vmin.f32 %v1784_v61, 3.0  ;;  %12245 = vst [vmem:[#allocation157_spill] sm:$0xff] %v7476_v62  ;;  %vm1997_vm13 = vcmp.eq.f32.partialorder %v12247_v2, %v7057_v18 }
 0x30c   : > { %2265 = vmax.xlane.f32.xlu0 %v7438_v45 }
 0x30d   : > { %v7447_v17 = vsel %vm1804_vm5, %v1824_v48, 0.0  ;;  %2267 = vmax.xlane.f32.xlu1 %v7442_v19  ;;  %v7450_v61 = vpop.xlane.xlu0 %3825  ;;  %v4655_v48 = vsel %vm1077_vm14, 1.0, %v11821_v36  ;;  %v984_v19 = vsub.f32 3.0, %v12241_v42  ;;  %vm1165_vm5 = vcmp.gt.f32.partialorder %v12244_v28, -inf }
 0x30e   : > { %12237 = vst [vmem:[#allocation162_spill] sm:$0xff] %v7447_v17  ;;  %12238 = vst [vmem:[#allocation320_spill] sm:$0xff] %v7450_v61  ;;  %v7455_v57 = vmul.f32 %v1864_v7, %v7447_v17  ;;  %v7457_v45 = vpop.xlane.xlu1 %1983  ;;  %v1225_v53 = vsel %vm1165_vm5, %v12244_v28, 0.0 }
 0x310   : > { %12240 = vst [vmem:[#allocation170_spill] sm:$0xff] %v7455_v57  ;;  %1148 = vadd.xlane.f32.xlu0 %v4654_v54  ;;  %v12243_v57 = vld [vmem:[#allocation166_spill] sm:$0xff] }
 0x311   : > { %1150 = vadd.xlane.f32.xlu1 %v4655_v48  ;;  %v1125_v7 = vpop.xlane.xlu0 %1124  ;;  %v985_v17 = vsub.f32 3.0, %v12243_v57  ;;  %v7484_v57 = vsel %vm1077_vm14, -inf, %v12239_v23  ;;  %v12251_v23 = vld [vmem:[#allocation159_spill] sm:$0xff] }
 0x312   : > { %v1184_v33 = vmin.f32 %v1125_v7, %v984_v19  ;;  %v1127_v29 = vpop.xlane.xlu1 %1126  ;;  %12246 = vst [vmem:[#allocation160_spill] sm:$0xff] %v7484_v57 }
 0x313   : > { %v1185_v54 = vmin.f32 %v1127_v29, %v985_v17 }
 0x314   : > { %v1204_v42 = vsel %vm1164_vm1, %v1184_v33, 0.0  ;;  %1348 = vmax.xlane.f32.xlu0 %v7476_v62  ;;  %v12248_v33 = vld [vmem:[#allocation177_spill] sm:$0xff]  ;;  %vm2085_vm1 = vcmp.gt.f32.partialorder %v6292_v20, -inf }
 0x315   : > { %v1244_v29 = vmul.f32 %v1224_v1, %v1204_v42  ;;  %v1205_v48 = vsel %vm1165_vm5, %v1185_v54, 0.0  ;;  %1350 = vmax.xlane.f32.xlu1 %v7484_v57  ;;  %v7489_v55 = vpop.xlane.xlu0 %1324  ;;  %vm1998_vm6 = vcmp.eq.f32.partialorder %v12248_v33, %v7097_v8  ;;  %v7493_v28 = vsub.f32 %v984_v19, %v1204_v42  ;;  %v12253_v54 = vld [vmem:[#allocation167_spill] sm:$0xff] }
 0x316   : > { %v1245_v7 = vmul.f32 %v1225_v53, %v1205_v48  ;;  %v7495_v62 = vpop.xlane.xlu1 %1326  ;;  %v7497_v46 = vsub.f32 %v985_v17, %v1205_v48  ;;  %v4714_v1 = vsel %vm1997_vm13, 1.0, %v11821_v36  ;;  %v4715_v19 = vsel %vm1998_vm6, 1.0, %v11821_v36  ;;  %v12259_v48 = vld [vmem:[#allocation164_spill] sm:$0xff] }
 0x317   : > { %12249 = vst [vmem:[#allocation166_spill] sm:$0xff] %v7493_v28  ;;  %v7500_v15 = vadd.f32 %v1244_v29, %v12251_v23  ;;  %v7518_v17 = vsel %vm1997_vm13, -inf, %v12247_v2  ;;  %v7522_v29 = vsel %vm1998_vm6, -inf, %v12248_v33  ;;  %v12260_v23 = vld [vmem:[#allocation183_spill] sm:$0xff]  ;;  %vm2086_vm5 = vcmp.gt.f32.partialorder %v6341_v4, -inf }
 0x318   : > { %12250 = vst [vmem:[#allocation168_spill] sm:$0xff] %v7497_v46  ;;  %v7507_v57 = vadd.f32 %v1245_v7, %v12253_v54  ;;  %2069 = vadd.xlane.f32.xlu0 %v4714_v1  ;;  %12257 = vst [vmem:[#allocation321_spill] sm:$0xff] %v7518_v17  ;;  %v1905_v7 = vsub.f32 3.0, %v12259_v48  ;;  %vm1078_vm14 = vcmp.eq.f32.partialorder %v12260_v23, %v7131_v56  ;;  %v12261_v54 = vld [vmem:[#allocation173_spill] sm:$0xff]  ;;  %v12262_v2 = vld [vmem:[#allocation191_spill] sm:$0xff] }
 0x319   : > { %12252 = vst [vmem:[#allocation169_spill] sm:$0xff] %v7500_v15  ;;  %2071 = vadd.xlane.f32.xlu1 %v4715_v19  ;;  %v7510_v53 = vpop.xlane.xlu0 %3166  ;;  %12258 = vst [vmem:[#allocation322_spill] sm:$0xff] %v7522_v29  ;;  %v1906_v19 = vsub.f32 3.0, %v12261_v54  ;;  %vm1079_vm13 = vcmp.eq.f32.partialorder %v12262_v2, %v7184_v22  ;;  %v4656_v48 = vsel %vm1078_vm14, 1.0, %v11821_v36 }
 0x31a   : > { %12254 = vst [vmem:[#allocation177_spill] sm:$0xff] %v7507_v57  ;;  %12255 = vst [vmem:[#allocation159_spill] sm:$0xff] %v7510_v53  ;;  %v7512_v42 = vpop.xlane.xlu1 %3168  ;;  %v4657_v54 = vsel %vm1079_vm13, 1.0, %v11821_v36 }
 0x31b   : > { %12256 = vst [vmem:[#allocation167_spill] sm:$0xff] %v7512_v42 }
 0x31c   : > { %2269 = vmax.xlane.f32.xlu0 %v7518_v17 }
 0x31d   : > { %2271 = vmax.xlane.f32.xlu1 %v7522_v29  ;;  %v2046_v1 = vpop.xlane.xlu0 %2045  ;;  %v2145_v29 = vsel %vm2085_vm1, %v6292_v20, 0.0 }
 0x31e   : > { %v2105_v57 = vmin.f32 %v2046_v1, %v1905_v7  ;;  %v2048_v33 = vpop.xlane.xlu1 %2047  ;;  %v2146_v1 = vsel %vm2086_vm5, %v6341_v4, 0.0  ;;  %v12270_v4 = vld [vmem:[#allocation175_spill] sm:$0xff] }
 0x31f   : > { %v2106_v17 = vmin.f32 %v2048_v33, %v1906_v19 }
 0x320   : > { %v2125_v46 = vsel %vm2085_vm1, %v2105_v57, 0.0  ;;  %1152 = vadd.xlane.f32.xlu0 %v4656_v48  ;;  %v12267_v57 = vld [vmem:[#allocation165_spill] sm:$0xff] }
 0x321   : > { %v2165_v15 = vmul.f32 %v2145_v29, %v2125_v46  ;;  %v2126_v28 = vsel %vm2086_vm5, %v2106_v17, 0.0  ;;  %1154 = vadd.xlane.f32.xlu1 %v4657_v54  ;;  %v7543_v33 = vpop.xlane.xlu0 %2245  ;;  %v7545_v53 = vsub.f32 %v1905_v7, %v2125_v46  ;;  %v7558_v29 = vsel %vm1078_vm14, -inf, %v12260_v23  ;;  %v12275_v7 = vld [vmem:[#allocation196_spill] sm:$0xff] }
 0x322   : > { %12263 = vst [vmem:[#allocation164_spill] sm:$0xff] %v7543_v33  ;;  %v2166_v8 = vmul.f32 %v2146_v1, %v2126_v28  ;;  %v7547_v42 = vpop.xlane.xlu1 %2247  ;;  %v7549_v20 = vsub.f32 %v1906_v19, %v2126_v28  ;;  %12269 = vst [vmem:[#allocation323_spill] sm:$0xff] %v7558_v29  ;;  %v7568_v46 = vsel %vm1079_vm13, -inf, %v12262_v2  ;;  %vm2000_vm14 = vcmp.eq.f32.partialorder %v12275_v7, %v7217_v0  ;;  %v12277_v2 = vld [vmem:[#allocation179_spill] sm:$0xff] }
 0x323   : > { %12264 = vst [vmem:[#allocation183_spill] sm:$0xff] %v7545_v53  ;;  %12265 = vst [vmem:[#allocation173_spill] sm:$0xff] %v7547_v42  ;;  %v7552_v48 = vadd.f32 %v2165_v15, %v12267_v57  ;;  %v12273_v15 = vld [vmem:[#allocation190_spill] sm:$0xff]  ;;  %v4717_v19 = vsel %vm2000_vm14, 1.0, %v11821_v36  ;;  %v986_v54 = vsub.f32 3.0, %v12277_v2  ;;  %v12278_v1 = vld [vmem:[#allocation199_spill] sm:$0xff] }
 0x324   : > { %12266 = vst [vmem:[#allocation191_spill] sm:$0xff] %v7549_v20  ;;  %v7561_v17 = vadd.f32 %v2166_v8, %v12270_v4  ;;  %1352 = vmax.xlane.f32.xlu0 %v7558_v29  ;;  %12272 = vst [vmem:[#allocation324_spill] sm:$0xff] %v7568_v46  ;;  %vm1999_vm6 = vcmp.eq.f32.partialorder %v12273_v15, %v7177_v38  ;;  %vm1080_vm1 = vcmp.eq.f32.partialorder %v12278_v1, %v7251_v14  ;;  %v12279_v4 = vld [vmem:[#allocation187_spill] sm:$0xff]  ;;  %v12281_v53 = vld [vmem:[#allocation189_spill] sm:$0xff] }
 0x325   : > { %12268 = vst [vmem:[#allocation165_spill] sm:$0xff] %v7552_v48  ;;  %1354 = vmax.xlane.f32.xlu1 %v7568_v46  ;;  %v7573_v28 = vpop.xlane.xlu0 %4087  ;;  %v4716_v23 = vsel %vm1999_vm6, 1.0, %v11821_v36  ;;  %vm1166_vm13 = vcmp.gt.f32.partialorder %v6381_v37, -inf  ;;  %v987_v48 = vsub.f32 3.0, %v12279_v4  ;;  %vm1167_vm8 = vcmp.gt.f32.partialorder %v12281_v53, -inf }
 0x326   : > { %12271 = vst [vmem:[#allocation175_spill] sm:$0xff] %v7561_v17  ;;  %12274 = vst [vmem:[#allocation190_spill] sm:$0xff] %v7573_v28  ;;  %v7577_v8 = vpop.xlane.xlu1 %4089  ;;  %v12280_v17 = vld [vmem:[#allocation202_spill] sm:$0xff]  ;;  %v4658_v2 = vsel %vm1080_vm1, 1.0, %v11821_v36 }
 0x327   : > { %12276 = vst [vmem:[#allocation196_spill] sm:$0xff] %v7577_v8  ;;  %vm1081_vm5 = vcmp.eq.f32.partialorder %v12280_v17, %v7304_v40  ;;  %v12304_v40 = vld [vmem:[#allocation186_spill] sm:$0xff] }
 0x328   : > { %2073 = vadd.xlane.f32.xlu0 %v4716_v23  ;;  %v4659_v4 = vsel %vm1081_vm5, 1.0, %v11821_v36 }
 0x329   : > { %2075 = vadd.xlane.f32.xlu1 %v4717_v19  ;;  %v1129_v57 = vpop.xlane.xlu0 %1128  ;;  %v1226_v19 = vsel %vm1166_vm13, %v6381_v37, 0.0 }
 0x32a   : > { %v1186_v23 = vmin.f32 %v1129_v57, %v986_v54  ;;  %v1131_v20 = vpop.xlane.xlu1 %1130  ;;  %v1227_v57 = vsel %vm1167_vm8, %v12281_v53, 0.0  ;;  %v12289_v53 = vld [vmem:[#allocation188_spill] sm:$0xff] }
 0x32b   : > { %v1187_v28 = vmin.f32 %v1131_v20, %v987_v48 }
 0x32c   : > { %v1206_v8 = vsel %vm1166_vm13, %v1186_v23, 0.0  ;;  %1156 = vadd.xlane.f32.xlu0 %v4658_v2  ;;  %v12286_v23 = vld [vmem:[#allocation181_spill] sm:$0xff] }
 0x32d   : > { %v1246_v46 = vmul.f32 %v1226_v19, %v1206_v8  ;;  %v1207_v29 = vsel %vm1167_vm8, %v1187_v28, 0.0  ;;  %1158 = vadd.xlane.f32.xlu1 %v4659_v4  ;;  %v7605_v20 = vpop.xlane.xlu0 %1328  ;;  %v7607_v22 = vsub.f32 %v986_v54, %v1206_v8  ;;  %v7620_v19 = vsel %vm1080_vm1, -inf, %v12278_v1  ;;  %v12294_v8 = vld [vmem:[#allocation207_spill] sm:$0xff]  ;;  %v12296_v1 = vld [vmem:[#allocation185_spill] sm:$0xff] }
 0x32e   : > { %12282 = vst [vmem:[#allocation179_spill] sm:$0xff] %v7605_v20  ;;  %v1247_v56 = vmul.f32 %v1227_v57, %v1207_v29  ;;  %v7609_v18 = vpop.xlane.xlu1 %1330  ;;  %v7611_v37 = vsub.f32 %v987_v48, %v1207_v29  ;;  %12288 = vst [vmem:[#allocation181_spill] sm:$0xff] %v7620_v19  ;;  %v7630_v48 = vsel %vm1081_vm5, -inf, %v12280_v17  ;;  %v12292_v29 = vld [vmem:[#allocation201_spill] sm:$0xff]  ;;  %vm2002_vm1 = vcmp.eq.f32.partialorder %v12294_v8, %v7337_v31  ;;  %v12297_v57 = vld [vmem:[#allocation211_spill] sm:$0xff] }
 0x32f   : > { %12283 = vst [vmem:[#allocation199_spill] sm:$0xff] %v7607_v22  ;;  %12284 = vst [vmem:[#allocation187_spill] sm:$0xff] %v7609_v18  ;;  %v7614_v2 = vadd.f32 %v1246_v46, %v12286_v23  ;;  %vm2001_vm8 = vcmp.eq.f32.partialorder %v12292_v29, %v7297_v34  ;;  %v4719_v17 = vsel %vm2002_vm1, 1.0, %v11821_v36  ;;  %v1907_v4 = vsub.f32 3.0, %v12296_v1 }
 0x330   : > { %12285 = vst [vmem:[#allocation202_spill] sm:$0xff] %v7611_v37  ;;  %v7623_v28 = vadd.f32 %v1247_v56, %v12289_v53  ;;  %1356 = vmax.xlane.f32.xlu0 %v7620_v19  ;;  %12291 = vst [vmem:[#allocation325_spill] sm:$0xff] %v7630_v48  ;;  %v4718_v54 = vsel %vm2001_vm8, 1.0, %v11821_v36  ;;  %vm1082_vm13 = vcmp.eq.f32.partialorder %v12297_v57, %v7371_v44  ;;  %vm2087_vm5 = vcmp.gt.f32.partialorder %v6424_v6, -inf  ;;  %v12298_v53 = vld [vmem:[#allocation73_spill] sm:$0xff]  ;;  %v12301_v19 = vld [vmem:[#allocation214_spill] sm:$0xff] }
 0x331   : > { %12287 = vst [vmem:[#allocation189_spill] sm:$0xff] %v7614_v2  ;;  %1358 = vmax.xlane.f32.xlu1 %v7630_v48  ;;  %v7635_v46 = vpop.xlane.xlu0 %3170  ;;  %v4660_v1 = vsel %vm1082_vm13, 1.0, %v11821_v36  ;;  %vm1083_vm10 = vcmp.eq.f32.partialorder %v12301_v19, %v7424_v27 }
 0x332   : > { %12290 = vst [vmem:[#allocation188_spill] sm:$0xff] %v7623_v28  ;;  %12293 = vst [vmem:[#allocation201_spill] sm:$0xff] %v7635_v46  ;;  %v7639_v56 = vpop.xlane.xlu1 %3172  ;;  %v1908_v28 = vsub.f32 3.0, %v12298_v53  ;;  %v2148_v46 = vsel %vm2088_vm2, %v6473_v16, 0.0 }
 0x333   : > { %12295 = vst [vmem:[#allocation207_spill] sm:$0xff] %v7639_v56 }
 0x334   : > { %2077 = vadd.xlane.f32.xlu0 %v4718_v54  ;;  %v12299_v54 = vld [vmem:[#allocation154_spill] sm:$0xff] }
 0x335   : > { %2079 = vadd.xlane.f32.xlu1 %v4719_v17  ;;  %v2050_v23 = vpop.xlane.xlu0 %2049  ;;  %vm11526_vm12 = vcmp.eq.f32.partialorder %v12299_v54, %v6970_v58  ;;  %v2147_v17 = vsel %vm2087_vm5, %v6424_v6, 0.0 }
 0x336   : > { %v2107_v37 = vmin.f32 %v2050_v23, %v1907_v4  ;;  %v2052_v2 = vpop.xlane.xlu1 %2051  ;;  %v7667_v53 = vsel %vm11526_vm12, -inf, %v12299_v54  ;;  %vm1169_vm12 = vcmp.gt.f32.partialorder %v6561_v13, -inf }
 0x337   : > { %v2108_v22 = vmin.f32 %v2052_v2, %v1908_v28  ;;  %12300 = vst [vmem:[#allocation185_spill] sm:$0xff] %v7667_v53 }
 0x338   : > { %v2127_v56 = vsel %vm2087_vm5, %v2107_v37, 0.0  ;;  %1160 = vadd.xlane.f32.xlu0 %v4660_v1 }
 0x339   : > { %v2167_v23 = vmul.f32 %v2147_v17, %v2127_v56  ;;  %v2128_v48 = vsel %vm2088_vm2, %v2108_v22, 0.0  ;;  %4109 = vmax.xlane.f32.xlu1 %v7667_v53  ;;  %v7670_v2 = vpop.xlane.xlu0 %2249  ;;  %v7674_v6 = vsub.f32 %v1907_v4, %v2127_v56  ;;  %v7687_v22 = vsel %vm1082_vm13, -inf, %v12297_v57  ;;  %v12307_v17 = vld [vmem:[#allocation194_spill] sm:$0xff] }
 0x33a   : > { %v2168_v37 = vmul.f32 %v2148_v46, %v2128_v48  ;;  %v7676_v16 = vpop.xlane.xlu1 %2251  ;;  %v7678_v1 = vsub.f32 %v1908_v28, %v2128_v48  ;;  %12306 = vst [vmem:[#allocation186_spill] sm:$0xff] %v7687_v22  ;;  %v4661_v28 = vsel %vm1083_vm10, 1.0, %v11821_v36  ;;  %v12309_v48 = vld [vmem:[#allocation213_spill] sm:$0xff]  ;;  %v7711_v4 = vsel %vm1083_vm10, -inf, %v12301_v19  ;;  %v12313_v57 = vld [vmem:[#allocation46_spill] sm:$0xff] }
 0x33b   : > { %12302 = vst [vmem:[#allocation211_spill] sm:$0xff] %v7674_v6  ;;  %v7681_v58 = vadd.f32 %v2167_v23, %v12304_v40  ;;  %vm2003_vm2 = vcmp.eq.f32.partialorder %v12309_v48, %v7417_v26  ;;  %12312 = vst [vmem:[#allocation327_spill] sm:$0xff] %v7711_v4  ;;  %v988_v23 = vsub.f32 3.0, %v12313_v57  ;;  %vm1168_vm13 = vcmp.gt.f32.partialorder %v6513_v52, -inf }
 0x33c   : > { %12303 = vst [vmem:[#allocation73_spill] sm:$0xff] %v7678_v1  ;;  %v7690_v53 = vadd.f32 %v2168_v37, %v12307_v17  ;;  %1360 = vmax.xlane.f32.xlu0 %v7687_v22  ;;  %v4720_v56 = vsel %vm2003_vm2, 1.0, %v11821_v36  ;;  %v12314_v37 = vld [vmem:[#allocation144_spill] sm:$0xff]  ;;  %v1228_v6 = vsel %vm1168_vm13, %v6513_v52, 0.0 }
 0x33d   : > { %12305 = vst [vmem:[#allocation214_spill] sm:$0xff] %v7681_v58  ;;  %1162 = vadd.xlane.f32.xlu1 %v4661_v28  ;;  %v7699_v40 = vpop.xlane.xlu0 %4091  ;;  %vm11717_vm5 = vcmp.eq.f32.partialorder %v12314_v37, %v6893_v41  ;;  %v12315_v28 = vld [vmem:[#allocation51_spill] sm:$0xff]  ;;  %v12320_v41 = vld [vmem:[#allocation172_spill] sm:$0xff] }
 0x33e   : > { %12308 = vst [vmem:[#allocation194_spill] sm:$0xff] %v7690_v53  ;;  %12310 = vst [vmem:[#allocation213_spill] sm:$0xff] %v7699_v40  ;;  %v7701_v46 = vpop.xlane.xlu1 %4093  ;;  %v989_v58 = vsub.f32 3.0, %v12315_v28  ;;  %v7727_v1 = vsel %vm11717_vm5, -inf, %v12314_v37  ;;  %v12318_v28 = vld [vmem:[#allocation158_spill] sm:$0xff] }
 0x33f   : > { %12311 = vst [vmem:[#allocation326_spill] sm:$0xff] %v7701_v46  ;;  %12317 = vst [vmem:[#allocation46_spill] sm:$0xff] %v7727_v1  ;;  %v1229_v46 = vsel %vm1169_vm12, %v6561_v13, 0.0  ;;  %vm11541_vm10 = vcmp.eq.f32.partialorder %v12318_v28, %v6998_v9 }
 0x340   : > { %2081 = vadd.xlane.f32.xlu0 %v4720_v56  ;;  %v12316_v56 = vld [vmem:[#allocation219_spill] sm:$0xff] }
 0x341   : > { %1362 = vmax.xlane.f32.xlu1 %v7711_v4  ;;  %v1133_v17 = vpop.xlane.xlu0 %1132  ;;  %vm2004_vm0 = vcmp.eq.f32.partialorder %v12316_v56, %v7457_v45  ;;  %v12324_v4 = vld [vmem:[#allocation197_spill] sm:$0xff] }
 0x342   : > { %v1188_v53 = vmin.f32 %v1133_v17, %v988_v23  ;;  %v1135_v19 = vpop.xlane.xlu1 %1134  ;;  %v4721_v17 = vsel %vm2004_vm0, 1.0, %v11821_v36 }
 0x343   : > { %v1189_v57 = vmin.f32 %v1135_v19, %v989_v58 }
 0x344   : > { %v1208_v54 = vsel %vm1168_vm13, %v1188_v53, 0.0  ;;  %4107 = vmax.xlane.f32.xlu0 %v7727_v1  ;;  %vm11538_vm13 = vcmp.eq.f32.partialorder %v12320_v41, %v7071_v49 }
 0x345   : > { %v1248_v52 = vmul.f32 %v1228_v6, %v1208_v54  ;;  %v1209_v19 = vsel %vm1169_vm12, %v1189_v57, 0.0  ;;  %2083 = vadd.xlane.f32.xlu1 %v4721_v17  ;;  %v7737_v40 = vpop.xlane.xlu0 %1332  ;;  %v7741_v53 = vsub.f32 %v988_v23, %v1208_v54  ;;  %v7754_v6 = vsel %vm11541_vm10, -inf, %v12318_v28  ;;  %v12327_v57 = vld [vmem:[#allocation84_spill] sm:$0xff] }
 0x346   : > { %12319 = vst [vmem:[#allocation51_spill] sm:$0xff] %v7737_v40  ;;  %v1249_v13 = vmul.f32 %v1229_v46, %v1209_v19  ;;  %v7743_v1 = vpop.xlane.xlu1 %1334  ;;  %v7745_v37 = vsub.f32 %v989_v58, %v1209_v19  ;;  %12326 = vst [vmem:[#allocation330_spill] sm:$0xff] %v7754_v6  ;;  %v7764_v58 = vsel %vm11538_vm13, -inf, %v12320_v41  ;;  %v7782_v23 = vsel %vm2000_vm14, -inf, %v12275_v7 }
 0x347   : > { %12321 = vst [vmem:[#allocation219_spill] sm:$0xff] %v7741_v53  ;;  %12322 = vst [vmem:[#allocation328_spill] sm:$0xff] %v7743_v1  ;;  %v7748_v22 = vadd.f32 %v1248_v52, %v12324_v4  ;;  %v7775_v4 = vsel %vm1999_vm6, -inf, %v12273_v15  ;;  %v12334_v52 = vld [vmem:[#allocation48_spill] sm:$0xff]  ;;  %vm2089_vm12 = vcmp.gt.f32.partialorder %v6556_v35, -inf  ;;  %v12336_v15 = vld [vmem:[#allocation87_spill] sm:$0xff] }
 0x348   : > { %12323 = vst [vmem:[#allocation329_spill] sm:$0xff] %v7745_v37  ;;  %v7757_v17 = vadd.f32 %v1249_v13, %v12327_v57  ;;  %3190 = vmax.xlane.f32.xlu0 %v7754_v6  ;;  %12329 = vst [vmem:[#allocation331_spill] sm:$0xff] %v7764_v58  ;;  %v1909_v19 = vsub.f32 3.0, %v12334_v52  ;;  %v12335_v13 = vld [vmem:[#allocation163_spill] sm:$0xff]  ;;  %vm2090_vm6 = vcmp.gt.f32.partialorder %v6605_v3, -inf  ;;  %v2149_v49 = vsel %vm2089_vm12, %v6556_v35, 0.0 }
 0x349   : > { %12325 = vst [vmem:[#allocation197_spill] sm:$0xff] %v7748_v22  ;;  %3192 = vmax.xlane.f32.xlu1 %v7764_v58  ;;  %v7767_v54 = vpop.xlane.xlu0 %3174  ;;  %12332 = vst [vmem:[#allocation334_spill] sm:$0xff] %v7775_v4  ;;  %vm11711_vm13 = vcmp.eq.f32.partialorder %v12335_v13, %v7013_v51  ;;  %v1910_v58 = vsub.f32 3.0, %v12336_v15  ;;  %v2150_v9 = vsel %vm2090_vm6, %v6605_v3, 0.0  ;;  %v12340_v35 = vld [vmem:[#allocation180_spill] sm:$0xff]  ;;  %v12464_v53 = vld [vmem:[#allocation161_spill] sm:$0xff] }
 0x34a   : > { %12328 = vst [vmem:[#allocation84_spill] sm:$0xff] %v7757_v17  ;;  %12330 = vst [vmem:[#allocation332_spill] sm:$0xff] %v7767_v54  ;;  %v7769_v46 = vpop.xlane.xlu1 %3176  ;;  %v7798_v41 = vsel %vm11711_vm13, -inf, %v12335_v13  ;;  %vm11562_vm14 = vcmp.eq.f32.partialorder %v12340_v35, %v7118_v43  ;;  %v12417_v43 = vld [vmem:[#allocation57_spill] sm:$0xff]  ;;  %v12443_v22 = vld [vmem:[#allocation68_spill] sm:$0xff] }
 0x34b   : > { %12331 = vst [vmem:[#allocation333_spill] sm:$0xff] %v7769_v46  ;;  %12333 = vst [vmem:[#allocation335_spill] sm:$0xff] %v7782_v23 }
 0x34c   : > { %2273 = vmax.xlane.f32.xlu0 %v7775_v4  ;;  %v12337_v4 = vld [vmem:[#allocation176_spill] sm:$0xff]  ;;  %12338 = vst [vmem:[#allocation48_spill] sm:$0xff] %v7798_v41 }
 0x34d   : > { %2275 = vmax.xlane.f32.xlu1 %v7782_v23  ;;  %v2054_v57 = vpop.xlane.xlu0 %2053  ;;  %vm11704_vm10 = vcmp.eq.f32.partialorder %v12337_v4, %v7090_v25 }
 0x34e   : > { %v2109_v6 = vmin.f32 %v2054_v57, %v1909_v19  ;;  %v2056_v7 = vpop.xlane.xlu1 %2055  ;;  %v7806_v57 = vsel %vm11704_vm10, -inf, %v12337_v4  ;;  %v12346_v4 = vld [vmem:[#allocation79_spill] sm:$0xff] }
 0x34f   : > { %v2110_v52 = vmin.f32 %v2056_v7, %v1910_v58  ;;  %12339 = vst [vmem:[#allocation87_spill] sm:$0xff] %v7806_v57 }
 0x350   : > { %v2129_v23 = vsel %vm2089_vm12, %v2109_v6, 0.0  ;;  %4111 = vmax.xlane.f32.xlu0 %v7798_v41  ;;  %v12342_v6 = vld [vmem:[#allocation45_spill] sm:$0xff] }
 0x351   : > { %v2169_v15 = vmul.f32 %v2149_v49, %v2129_v23  ;;  %v2130_v7 = vsel %vm2090_vm6, %v2110_v52, 0.0  ;;  %4113 = vmax.xlane.f32.xlu1 %v7806_v57  ;;  %v7811_v51 = vpop.xlane.xlu0 %2253  ;;  %vm11558_vm12 = vcmp.eq.f32.partialorder %v12342_v6, %v7191_v30  ;;  %v7815_v3 = vsub.f32 %v1909_v19, %v2129_v23  ;;  %v12349_v52 = vld [vmem:[#allocation205_spill] sm:$0xff]  ;;  %v12356_v19 = vld [vmem:[#allocation90_spill] sm:$0xff] }
 0x352   : > { %12341 = vst [vmem:[#allocation336_spill] sm:$0xff] %v7811_v51  ;;  %v2170_v41 = vmul.f32 %v2150_v9, %v2130_v7  ;;  %v7817_v13 = vpop.xlane.xlu1 %2255  ;;  %v7819_v25 = vsub.f32 %v1910_v58, %v2130_v7  ;;  %v7828_v49 = vsel %vm11562_vm14, -inf, %v12340_v35  ;;  %v7838_v9 = vsel %vm11558_vm12, -inf, %v12342_v6  ;;  %v12357_v7 = vld [vmem:[#allocation184_spill] sm:$0xff] }
 0x353   : > { %12343 = vst [vmem:[#allocation337_spill] sm:$0xff] %v7815_v3  ;;  %12344 = vst [vmem:[#allocation338_spill] sm:$0xff] %v7817_v13  ;;  %v7822_v28 = vadd.f32 %v2169_v15, %v12346_v4  ;;  %v7856_v23 = vsel %vm2002_vm1, -inf, %v12294_v8  ;;  %v990_v15 = vsub.f32 3.0, %v12356_v19  ;;  %vm1170_vm6 = vcmp.gt.f32.partialorder %v6645_v50, -inf }
 0x354   : > { %12345 = vst [vmem:[#allocation339_spill] sm:$0xff] %v7819_v25  ;;  %12348 = vst [vmem:[#allocation340_spill] sm:$0xff] %v7828_v49  ;;  %v7831_v57 = vadd.f32 %v2170_v41, %v12349_v52  ;;  %3194 = vmax.xlane.f32.xlu0 %v7828_v49  ;;  %v7849_v41 = vsel %vm2001_vm8, -inf, %v12292_v29  ;;  %vm11703_vm12 = vcmp.eq.f32.partialorder %v12357_v7, %v7133_v24  ;;  %v12358_v29 = vld [vmem:[#allocation61_spill] sm:$0xff]  ;;  %vm1171_vm8 = vcmp.gt.f32.partialorder %v6693_v63, -inf }
 0x355   : > { %12347 = vst [vmem:[#allocation79_spill] sm:$0xff] %v7822_v28  ;;  %12351 = vst [vmem:[#allocation341_spill] sm:$0xff] %v7838_v9  ;;  %3196 = vmax.xlane.f32.xlu1 %v7838_v9  ;;  %v7841_v58 = vpop.xlane.xlu0 %4095  ;;  %v991_v9 = vsub.f32 3.0, %v12358_v29  ;;  %v7872_v28 = vsel %vm11703_vm12, -inf, %v12357_v7  ;;  %v1231_v25 = vsel %vm1171_vm8, %v6693_v63, 0.0 }
 0x356   : > { %12350 = vst [vmem:[#allocation205_spill] sm:$0xff] %v7831_v57  ;;  %12352 = vst [vmem:[#allocation342_spill] sm:$0xff] %v7841_v58  ;;  %v7843_v4 = vpop.xlane.xlu1 %4097  ;;  %v1230_v57 = vsel %vm1170_vm6, %v6645_v50, 0.0  ;;  %v12362_v50 = vld [vmem:[#allocation76_spill] sm:$0xff] }
 0x357   : > { %12353 = vst [vmem:[#allocation343_spill] sm:$0xff] %v7843_v4  ;;  %12354 = vst [vmem:[#allocation344_spill] sm:$0xff] %v7849_v41  ;;  %vm11579_vm1 = vcmp.eq.f32.partialorder %v12362_v50, %v7238_v39 }
 0x358   : > { %2277 = vmax.xlane.f32.xlu0 %v7849_v41  ;;  %12355 = vst [vmem:[#allocation345_spill] sm:$0xff] %v7856_v23  ;;  %v12359_v41 = vld [vmem:[#allocation195_spill] sm:$0xff]  ;;  %12360 = vst [vmem:[#allocation90_spill] sm:$0xff] %v7872_v28 }
 0x359   : > { %2279 = vmax.xlane.f32.xlu1 %v7856_v23  ;;  %v1137_v52 = vpop.xlane.xlu0 %1136  ;;  %vm11702_vm14 = vcmp.eq.f32.partialorder %v12359_v41, %v7210_v12 }
 0x35a   : > { %v1190_v49 = vmin.f32 %v1137_v52, %v990_v15  ;;  %v1139_v8 = vpop.xlane.xlu1 %1138  ;;  %v7880_v52 = vsel %vm11702_vm14, -inf, %v12359_v41  ;;  %v12368_v41 = vld [vmem:[#allocation209_spill] sm:$0xff] }
 0x35b   : > { %v1191_v19 = vmin.f32 %v1139_v8, %v991_v9  ;;  %12361 = vst [vmem:[#allocation61_spill] sm:$0xff] %v7880_v52 }
 0x35c   : > { %v1210_v23 = vsel %vm1170_vm6, %v1190_v49, 0.0  ;;  %4115 = vmax.xlane.f32.xlu0 %v7872_v28  ;;  %v12364_v49 = vld [vmem:[#allocation53_spill] sm:$0xff] }
 0x35d   : > { %v1250_v29 = vmul.f32 %v1230_v57, %v1210_v23  ;;  %v1211_v8 = vsel %vm1171_vm8, %v1191_v19, 0.0  ;;  %4117 = vmax.xlane.f32.xlu1 %v7880_v52  ;;  %v7885_v3 = vpop.xlane.xlu0 %1336  ;;  %vm11574_vm6 = vcmp.eq.f32.partialorder %v12364_v49, %v7311_v5  ;;  %v7889_v63 = vsub.f32 %v990_v15, %v1210_v23  ;;  %v12371_v19 = vld [vmem:[#allocation97_spill] sm:$0xff]  ;;  %v12378_v15 = vld [vmem:[#allocation58_spill] sm:$0xff] }
 0x35e   : > { %12363 = vst [vmem:[#allocation346_spill] sm:$0xff] %v7885_v3  ;;  %v1251_v28 = vmul.f32 %v1231_v25, %v1211_v8  ;;  %v7891_v24 = vpop.xlane.xlu1 %1338  ;;  %v7893_v12 = vsub.f32 %v991_v9, %v1211_v8  ;;  %v7902_v57 = vsel %vm11579_vm1, -inf, %v12362_v50  ;;  %v7912_v25 = vsel %vm11574_vm6, -inf, %v12364_v49  ;;  %v12379_v8 = vld [vmem:[#allocation200_spill] sm:$0xff] }
 0x35f   : > { %12365 = vst [vmem:[#allocation347_spill] sm:$0xff] %v7889_v63  ;;  %12366 = vst [vmem:[#allocation348_spill] sm:$0xff] %v7891_v24  ;;  %v7896_v7 = vadd.f32 %v1250_v29, %v12368_v41  ;;  %v7930_v23 = vsel %vm2004_vm0, -inf, %v12316_v56  ;;  %v1911_v29 = vsub.f32 3.0, %v12378_v15  ;;  %vm11589_vm8 = vcmp.eq.f32.partialorder %v12379_v8, %v7253_v60  ;;  %v12391_v50 = vld [vmem:[#allocation92_spill] sm:$0xff] }
 0x360   : > { %12367 = vst [vmem:[#allocation349_spill] sm:$0xff] %v7893_v12  ;;  %12370 = vst [vmem:[#allocation350_spill] sm:$0xff] %v7902_v57  ;;  %v7905_v52 = vadd.f32 %v1251_v28, %v12371_v19  ;;  %3198 = vmax.xlane.f32.xlu0 %v7902_v57  ;;  %v7923_v28 = vsel %vm2003_vm2, -inf, %v12309_v48  ;;  %vm2091_vm6 = vcmp.gt.f32.partialorder %v6688_v47, -inf  ;;  %v12380_v48 = vld [vmem:[#allocation100_spill] sm:$0xff]  ;;  %vm2092_vm1 = vcmp.gt.f32.partialorder %v6737_v10, -inf }
 0x361   : > { %12369 = vst [vmem:[#allocation209_spill] sm:$0xff] %v7896_v7  ;;  %12373 = vst [vmem:[#allocation351_spill] sm:$0xff] %v7912_v25  ;;  %3200 = vmax.xlane.f32.xlu1 %v7912_v25  ;;  %v7915_v9 = vpop.xlane.xlu0 %3178  ;;  %v1912_v25 = vsub.f32 3.0, %v12380_v48  ;;  %v7945_v15 = vsel %vm11589_vm8, -inf, %v12379_v8  ;;  %v2151_v49 = vsel %vm2091_vm6, %v6688_v47, 0.0  ;;  %v12386_v47 = vld [vmem:[#allocation64_spill] sm:$0xff] }
 0x362   : > { %12372 = vst [vmem:[#allocation97_spill] sm:$0xff] %v7905_v52  ;;  %12374 = vst [vmem:[#allocation352_spill] sm:$0xff] %v7915_v9  ;;  %v7917_v41 = vpop.xlane.xlu1 %3180  ;;  %vm11603_vm8 = vcmp.eq.f32.partialorder %v12386_v47, %v7431_v59  ;;  %v12433_v12 = vld [vmem:[#allocation156_spill] sm:$0xff] }
 0x363   : > { %12375 = vst [vmem:[#allocation353_spill] sm:$0xff] %v7917_v41  ;;  %12376 = vst [vmem:[#allocation354_spill] sm:$0xff] %v7923_v28 }
 0x364   : > { %2281 = vmax.xlane.f32.xlu0 %v7923_v28  ;;  %12377 = vst [vmem:[#allocation355_spill] sm:$0xff] %v7930_v23  ;;  %v12381_v28 = vld [vmem:[#allocation206_spill] sm:$0xff]  ;;  %12382 = vst [vmem:[#allocation58_spill] sm:$0xff] %v7945_v15 }
 0x365   : > { %2283 = vmax.xlane.f32.xlu1 %v7930_v23  ;;  %v2058_v19 = vpop.xlane.xlu0 %2057  ;;  %vm11701_vm2 = vcmp.eq.f32.partialorder %v12381_v28, %v7330_v21  ;;  %v2152_v23 = vsel %vm2092_vm1, %v6737_v10, 0.0  ;;  %v7987_v10 = vsel %vm11603_vm8, -inf, %v12386_v47  ;;  %v12407_v47 = vld [vmem:[#allocation55_spill] sm:$0xff] }
 0x366   : > { %v2111_v57 = vmin.f32 %v2058_v19, %v1911_v29  ;;  %v2060_v56 = vpop.xlane.xlu1 %2059  ;;  %v7953_v48 = vsel %vm11701_vm2, -inf, %v12381_v28  ;;  %v12384_v19 = vld [vmem:[#allocation208_spill] sm:$0xff]  ;;  %12393 = vst [vmem:[#allocation361_spill] sm:$0xff] %v7987_v10 }
 0x367   : > { %v2112_v5 = vmin.f32 %v2060_v56, %v1912_v25  ;;  %12383 = vst [vmem:[#allocation100_spill] sm:$0xff] %v7953_v48  ;;  %vm11700_vm0 = vcmp.eq.f32.partialorder %v12384_v19, %v7358_v11 }
 0x368   : > { %4119 = vmax.xlane.f32.xlu0 %v7945_v15  ;;  %v2131_v56 = vsel %vm2091_vm6, %v2111_v57, 0.0 }
 0x369   : > { %4121 = vmax.xlane.f32.xlu1 %v7953_v48  ;;  %v7961_v60 = vpop.xlane.xlu0 %2257  ;;  %v2171_v15 = vmul.f32 %v2151_v49, %v2131_v56  ;;  %v7965_v8 = vsub.f32 %v1911_v29, %v2131_v56  ;;  %v2132_v21 = vsel %vm2092_vm1, %v2112_v5, 0.0  ;;  %v7977_v48 = vsel %vm11700_vm0, -inf, %v12384_v19  ;;  %v12394_v5 = vld [vmem:[#allocation212_spill] sm:$0xff]  ;;  %v12402_v56 = vld [vmem:[#allocation103_spill] sm:$0xff] }
 0x36a   : > { %12385 = vst [vmem:[#allocation356_spill] sm:$0xff] %v7961_v60  ;;  %v7969_v28 = vpop.xlane.xlu1 %2259  ;;  %v2172_v57 = vmul.f32 %v2152_v23, %v2132_v21  ;;  %v7971_v39 = vsub.f32 %v1912_v25, %v2132_v21  ;;  %12390 = vst [vmem:[#allocation360_spill] sm:$0xff] %v7977_v48  ;;  %vm11607_vm1 = vcmp.eq.f32.partialorder %v12394_v5, %v7373_v32  ;;  %v12395_v21 = vld [vmem:[#allocation217_spill] sm:$0xff]  ;;  %v12409_v32 = vld [vmem:[#allocation62_spill] sm:$0xff] }
 0x36b   : > { %12387 = vst [vmem:[#allocation357_spill] sm:$0xff] %v7965_v8  ;;  %12388 = vst [vmem:[#allocation358_spill] sm:$0xff] %v7969_v28  ;;  %v7980_v30 = vadd.f32 %v2171_v15, %v12391_v50  ;;  %v12398_v50 = vld [vmem:[#allocation218_spill] sm:$0xff]  ;;  %v8005_v29 = vsel %vm11607_vm1, -inf, %v12394_v5  ;;  %v4743_v5 = vsel %vm2607_vm7, 1.0, %v11821_v36 }
 0x36c   : > { %12389 = vst [vmem:[#allocation359_spill] sm:$0xff] %v7971_v39  ;;  %3202 = vmax.xlane.f32.xlu0 %v7977_v48  ;;  %v7992_v49 = vadd.f32 %v2172_v57, %v12395_v21  ;;  %vm11699_vm6 = vcmp.eq.f32.partialorder %v12398_v50, %v7450_v61  ;;  %12400 = vst [vmem:[#allocation364_spill] sm:$0xff] %v8005_v29  ;;  %v992_v57 = vsub.f32 3.0, %v12402_v56  ;;  %v12403_v21 = vld [vmem:[#allocation220_spill] sm:$0xff]  ;;  %v12404_v48 = vld [vmem:[#allocation225_spill] sm:$0xff]  ;;  %v4742_v61 = vsel %vm2606_vm3, 1.0, %v11821_v36 }
 0x36d   : > { %12392 = vst [vmem:[#allocation92_spill] sm:$0xff] %v7980_v30  ;;  %3204 = vmax.xlane.f32.xlu1 %v7987_v10  ;;  %v7995_v25 = vpop.xlane.xlu0 %4099  ;;  %v8012_v15 = vsel %vm11699_vm6, -inf, %v12398_v50  ;;  %vm1172_vm8 = vcmp.gt.f32.partialorder %v12403_v21, -inf  ;;  %v12405_v39 = vld [vmem:[#allocation227_spill] sm:$0xff] }
 0x36e   : > { %12396 = vst [vmem:[#allocation217_spill] sm:$0xff] %v7992_v49  ;;  %12397 = vst [vmem:[#allocation362_spill] sm:$0xff] %v7995_v25  ;;  %v7999_v23 = vpop.xlane.xlu1 %4101  ;;  %v993_v49 = vsub.f32 3.0, %v12404_v48  ;;  %vm1173_vm1 = vcmp.gt.f32.partialorder %v12405_v39, -inf  ;;  %v1232_v50 = vsel %vm1172_vm8, %v12403_v21, 0.0  ;;  %v12466_v25 = vld [vmem:[#allocation239_spill] sm:$0xff] }
 0x36f   : > { %12399 = vst [vmem:[#allocation363_spill] sm:$0xff] %v7999_v23  ;;  %12401 = vst [vmem:[#allocation365_spill] sm:$0xff] %v8012_v15 }
 0x370   : > { %4123 = vmax.xlane.f32.xlu0 %v8005_v29 }
 0x371   : > { %4125 = vmax.xlane.f32.xlu1 %v8012_v15  ;;  %v1141_v10 = vpop.xlane.xlu0 %1140  ;;  %v12427_v15 = vld [vmem:[#allocation71_spill] sm:$0xff] }
 0x372   : > { %v1192_v30 = vmin.f32 %v1141_v10, %v992_v57  ;;  %v1143_v8 = vpop.xlane.xlu1 %1142  ;;  %v1233_v10 = vsel %vm1173_vm1, %v12405_v39, 0.0  ;;  %v12418_v39 = vld [vmem:[#allocation82_spill] sm:$0xff] }
 0x373   : > { %v1193_v29 = vmin.f32 %v1143_v8, %v993_v49 }
 0x374   : > { %v1212_v56 = vsel %vm1172_vm8, %v1192_v30, 0.0  ;;  %2666 = vadd.xlane.f32.xlu0 %v4742_v61  ;;  %v12414_v30 = vld [vmem:[#allocation75_spill] sm:$0xff] }
 0x375   : > { %v1252_v48 = vmul.f32 %v1232_v50, %v1212_v56  ;;  %v1213_v11 = vsel %vm1173_vm1, %v1193_v29, 0.0  ;;  %2668 = vadd.xlane.f32.xlu1 %v4743_v5  ;;  %v8029_v8 = vpop.xlane.xlu0 %1340  ;;  %v8031_v19 = vsub.f32 %v992_v57, %v1212_v56  ;;  %v4802_v50 = vsel %vm3527_vm4, 1.0, %v11821_v36  ;;  %v12421_v57 = vld [vmem:[#allocation65_spill] sm:$0xff] }
 0x376   : > { %12410 = vst [vmem:[#allocation103_spill] sm:$0xff] %v8029_v8  ;;  %v1253_v59 = vmul.f32 %v1233_v10, %v1213_v11  ;;  %v8033_v6 = vpop.xlane.xlu1 %1342  ;;  %v8035_v21 = vsub.f32 %v993_v49, %v1213_v11  ;;  %v4803_v56 = vsel %vm3528_vm9, 1.0, %v11821_v36  ;;  %v12425_v10 = vld [vmem:[#allocation66_spill] sm:$0xff] }
 0x377   : > { %12411 = vst [vmem:[#allocation220_spill] sm:$0xff] %v8031_v19  ;;  %12412 = vst [vmem:[#allocation225_spill] sm:$0xff] %v8033_v6  ;;  %v8038_v61 = vadd.f32 %v1252_v48, %v12414_v30  ;;  %v4744_v30 = vsel %vm2608_vm11, 1.0, %v11821_v36  ;;  %v12431_v19 = vld [vmem:[#allocation233_spill] sm:$0xff] }
 0x378   : > { %12413 = vst [vmem:[#allocation227_spill] sm:$0xff] %v8035_v21  ;;  %v8045_v29 = vadd.f32 %v1253_v59, %v12418_v39  ;;  %3587 = vadd.xlane.f32.xlu0 %v4802_v50  ;;  %v4745_v50 = vsel %vm2609_vm15, 1.0, %v11821_v36  ;;  %v12428_v39 = vld [vmem:[#allocation15_spill] sm:$0xff]  ;;  %v12430_v21 = vld [vmem:[#allocation226_spill] sm:$0xff]  ;;  %vm2094_vm4 = vcmp.gt.f32.partialorder %v12431_v19, -inf }
 0x379   : > { %12415 = vst [vmem:[#allocation3_spill] sm:$0xff] %v8038_v61  ;;  %3589 = vadd.xlane.f32.xlu1 %v4803_v56  ;;  %v8051_v11 = vpop.xlane.xlu0 %3182  ;;  %v1913_v35 = vsub.f32 3.0, %v12428_v39  ;;  %v12429_v56 = vld [vmem:[#allocation230_spill] sm:$0xff]  ;;  %vm2093_vm3 = vcmp.gt.f32.partialorder %v12430_v21, -inf  ;;  %v12436_v39 = vld [vmem:[#allocation171_spill] sm:$0xff] }
 0x37a   : > { %12419 = vst [vmem:[#allocation55_spill] sm:$0xff] %v8045_v29  ;;  %12422 = vst [vmem:[#allocation5_spill] sm:$0xff] %v8051_v11  ;;  %v8053_v49 = vpop.xlane.xlu1 %3184  ;;  %v1914_v29 = vsub.f32 3.0, %v12429_v56  ;;  %v12435_v59 = vld [vmem:[#allocation78_spill] sm:$0xff]  ;;  %v2153_v56 = vsel %vm2093_vm3, %v12430_v21, 0.0  ;;  %v2154_v11 = vsel %vm2094_vm4, %v12431_v19, 0.0 }
 0x37b   : > { %12423 = vst [vmem:[#allocation62_spill] sm:$0xff] %v8053_v49  ;;  %vm12437_vm9 = vcmp.eq.f32.partialorder %v12435_v59, %v12436_v39  ;;  %v12442_v59 = vld [vmem:[#allocation8_spill] sm:$0xff]  ;;  %v12445_v21 = vld [vmem:[#allocation74_spill] sm:$0xff] }
 0x37c   : > { %2670 = vadd.xlane.f32.xlu0 %v4744_v30  ;;  %v12432_v30 = vld [vmem:[#allocation67_spill] sm:$0xff]  ;;  %vm12444_vm11 = vcmp.eq.f32.partialorder %v12442_v59, %v12443_v22  ;;  %v12450_v19 = vld [vmem:[#allocation222_spill] sm:$0xff]  ;;  %v12455_v59 = vld [vmem:[#allocation81_spill] sm:$0xff] }
 0x37d   : > { %2672 = vadd.xlane.f32.xlu1 %v4745_v50  ;;  %v2062_v5 = vpop.xlane.xlu0 %2061  ;;  %vm12434_vm7 = vcmp.eq.f32.partialorder %v12432_v30, %v12433_v12  ;;  %v4763_v50 = vsel %vm12437_vm9, 1.0, %v11821_v36  ;;  %vm1364_vm8 = vcmp.eq.f32.partialorder %v12450_v19, %v7489_v55  ;;  %v12460_v19 = vld [vmem:[#allocation244_spill] sm:$0xff] }
 0x37e   : > { %v2113_v61 = vmin.f32 %v2062_v5, %v1913_v35  ;;  %v2064_v52 = vpop.xlane.xlu1 %2063  ;;  %v4762_v7 = vsel %vm12434_vm7, 1.0, %v11821_v36 }
 0x37f   : > { %v2114_v48 = vmin.f32 %v2064_v52, %v1914_v29 }
 0x380   : > { %2966 = vadd.xlane.f32.xlu0 %v4762_v7  ;;  %v2133_v17 = vsel %vm2093_vm3, %v2113_v61, 0.0  ;;  %v4804_v61 = vsel %vm12444_vm11, 1.0, %v11821_v36  ;;  %vm1366_vm11 = vcmp.eq.f32.partialorder %v12466_v25, %v7605_v20 }
 0x381   : > { %2968 = vadd.xlane.f32.xlu1 %v4763_v50  ;;  %v8076_v5 = vpop.xlane.xlu0 %2261  ;;  %v2173_v63 = vmul.f32 %v2153_v56, %v2133_v17  ;;  %v8078_v49 = vsub.f32 %v1913_v35, %v2133_v17  ;;  %v2134_v52 = vsel %vm2094_vm4, %v2114_v48, 0.0  ;;  %v12447_v17 = vld [vmem:[#allocation10_spill] sm:$0xff]  ;;  %v12448_v35 = vld [vmem:[#allocation72_spill] sm:$0xff]  ;;  %v4664_v25 = vsel %vm1366_vm11, 1.0, %v11821_v36 }
 0x382   : > { %12438 = vst [vmem:[#allocation75_spill] sm:$0xff] %v8076_v5  ;;  %v8081_v30 = vpop.xlane.xlu1 %2263  ;;  %v2174_v7 = vmul.f32 %v2154_v11, %v2134_v52  ;;  %v8083_v37 = vsub.f32 %v1914_v29, %v2134_v52  ;;  %vm12449_vm15 = vcmp.eq.f32.partialorder %v12447_v17, %v12448_v35  ;;  %v12451_v11 = vld [vmem:[#allocation232_spill] sm:$0xff]  ;;  %v12458_v17 = vld [vmem:[#allocation95_spill] sm:$0xff]  ;;  %vm3630_vm0 = vcmp.gt.f32.partialorder %v12448_v35, -inf }
 0x383   : > { %12439 = vst [vmem:[#allocation4_spill] sm:$0xff] %v8078_v49  ;;  %12440 = vst [vmem:[#allocation57_spill] sm:$0xff] %v8081_v30  ;;  %v8090_v50 = vadd.f32 %v2173_v63, %v12445_v21  ;;  %v4805_v48 = vsel %vm12449_vm15, 1.0, %v11821_v36  ;;  %v4662_v63 = vsel %vm1364_vm8, 1.0, %v11821_v36 }
 0x384   : > { %12441 = vst [vmem:[#allocation82_spill] sm:$0xff] %v8083_v37  ;;  %3591 = vadd.xlane.f32.xlu0 %v4804_v61  ;;  %v8099_v29 = vadd.f32 %v2174_v7, %v12451_v11  ;;  %v12456_v61 = vld [vmem:[#allocation174_spill] sm:$0xff]  ;;  %v12459_v37 = vld [vmem:[#allocation237_spill] sm:$0xff] }
 0x385   : > { %12446 = vst [vmem:[#allocation7_spill] sm:$0xff] %v8090_v50  ;;  %3593 = vadd.xlane.f32.xlu1 %v4805_v48  ;;  %v8101_v56 = vpop.xlane.xlu0 %4103  ;;  %vm12457_vm1 = vcmp.eq.f32.partialorder %v12455_v59, %v12456_v61  ;;  %v994_v50 = vsub.f32 3.0, %v12458_v17  ;;  %vm1174_vm3 = vcmp.gt.f32.partialorder %v12459_v37, -inf  ;;  %v995_v48 = vsub.f32 3.0, %v12460_v19  ;;  %v12461_v11 = vld [vmem:[#allocation246_spill] sm:$0xff] }
 0x386   : > { %12452 = vst [vmem:[#allocation65_spill] sm:$0xff] %v8099_v29  ;;  %12453 = vst [vmem:[#allocation6_spill] sm:$0xff] %v8101_v56  ;;  %v8103_v52 = vpop.xlane.xlu1 %4105  ;;  %v4823_v21 = vsel %vm12457_vm1, 1.0, %v11821_v36  ;;  %vm1175_vm4 = vcmp.gt.f32.partialorder %v12461_v11, -inf  ;;  %v12462_v29 = vld [vmem:[#allocation223_spill] sm:$0xff]  ;;  %v12463_v59 = vld [vmem:[#allocation70_spill] sm:$0xff] }
 0x387   : > { %12454 = vst [vmem:[#allocation66_spill] sm:$0xff] %v8103_v52  ;;  %vm1365_vm7 = vcmp.eq.f32.partialorder %v12462_v29, %v7495_v62  ;;  %v1234_v52 = vsel %vm1174_vm3, %v12459_v37, 0.0  ;;  %vm12465_vm9 = vcmp.eq.f32.partialorder %v12463_v59, %v12464_v53  ;;  %v12468_v37 = vld [vmem:[#allocation229_spill] sm:$0xff] }
 0x388   : > { %1424 = vadd.xlane.f32.xlu0 %v4662_v63  ;;  %v4822_v17 = vsel %vm12465_vm9, 1.0, %v11821_v36  ;;  %v4663_v19 = vsel %vm1365_vm7, 1.0, %v11821_v36  ;;  %vm2286_vm15 = vcmp.eq.f32.partialorder %v12468_v37, %v7547_v42  ;;  %v12476_v37 = vld [vmem:[#allocation111_spill] sm:$0xff] }
 0x389   : > { %3889 = vadd.xlane.f32.xlu1 %v4823_v21  ;;  %v1145_v7 = vpop.xlane.xlu0 %1144  ;;  %v1235_v21 = vsel %vm1175_vm4, %v12461_v11, 0.0  ;;  %vm2285_vm8 = vcmp.eq.f32.partialorder %v12476_v37, %v7543_v33  ;;  %v12483_v37 = vld [vmem:[#allocation245_spill] sm:$0xff] }
 0x38a   : > { %v1194_v49 = vmin.f32 %v1145_v7, %v994_v50  ;;  %v1147_v63 = vpop.xlane.xlu1 %1146 }
 0x38b   : > { %v1195_v56 = vmin.f32 %v1147_v63, %v995_v48 }
 0x38c   : > { %v1214_v23 = vsel %vm1174_vm3, %v1194_v49, 0.0  ;;  %3887 = vadd.xlane.f32.xlu0 %v4822_v17  ;;  %v12472_v17 = vld [vmem:[#allocation236_spill] sm:$0xff] }
 0x38d   : > { %v1254_v29 = vmul.f32 %v1234_v52, %v1214_v23  ;;  %v1215_v7 = vsel %vm1175_vm4, %v1195_v56, 0.0  ;;  %1426 = vadd.xlane.f32.xlu1 %v4663_v19  ;;  %v8125_v30 = vpop.xlane.xlu0 %1344  ;;  %v8129_v63 = vsub.f32 %v994_v50, %v1214_v23  ;;  %v12474_v52 = vld [vmem:[#allocation102_spill] sm:$0xff]  ;;  %v4723_v19 = vsel %vm2286_vm15, 1.0, %v11821_v36  ;;  %v12478_v50 = vld [vmem:[#allocation240_spill] sm:$0xff] }
 0x38e   : > { %12467 = vst [vmem:[#allocation9_spill] sm:$0xff] %v8125_v30  ;;  %v1255_v59 = vmul.f32 %v1235_v21, %v1215_v7  ;;  %v8131_v49 = vpop.xlane.xlu1 %1346  ;;  %v8133_v11 = vsub.f32 %v995_v48, %v1215_v7  ;;  %vm1367_vm1 = vcmp.eq.f32.partialorder %v12478_v50, %v7609_v18  ;;  %v4722_v21 = vsel %vm2285_vm8, 1.0, %v11821_v36  ;;  %v12480_v7 = vld [vmem:[#allocation242_spill] sm:$0xff] }
 0x38f   : > { %12469 = vst [vmem:[#allocation71_spill] sm:$0xff] %v8129_v63  ;;  %12470 = vst [vmem:[#allocation15_spill] sm:$0xff] %v8131_v49  ;;  %v8136_v5 = vadd.f32 %v1254_v29, %v12472_v17  ;;  %v4665_v29 = vsel %vm1367_vm1, 1.0, %v11821_v36  ;;  %v12481_v17 = vld [vmem:[#allocation259_spill] sm:$0xff]  ;;  %vm2095_vm4 = vcmp.gt.f32.partialorder %v12483_v37, -inf }
 0x390   : > { %12471 = vst [vmem:[#allocation230_spill] sm:$0xff] %v8133_v11  ;;  %v8140_v56 = vadd.f32 %v1255_v59, %v12474_v52  ;;  %1428 = vadd.xlane.f32.xlu0 %v4664_v25  ;;  %v1915_v59 = vsub.f32 3.0, %v12480_v7  ;;  %vm1368_vm3 = vcmp.eq.f32.partialorder %v12481_v17, %v7737_v40  ;;  %v12482_v52 = vld [vmem:[#allocation250_spill] sm:$0xff]  ;;  %v12486_v7 = vld [vmem:[#allocation83_spill] sm:$0xff] }
 0x391   : > { %12473 = vst [vmem:[#allocation226_spill] sm:$0xff] %v8136_v5  ;;  %2347 = vadd.xlane.f32.xlu1 %v4723_v19  ;;  %v8145_v23 = vpop.xlane.xlu0 %3186  ;;  %v1916_v19 = vsub.f32 3.0, %v12482_v52  ;;  %v12485_v11 = vld [vmem:[#allocation14_spill] sm:$0xff]  ;;  %vm2711_vm12 = vcmp.gt.f32.partialorder %v12486_v7, -inf }
 0x392   : > { %12475 = vst [vmem:[#allocation233_spill] sm:$0xff] %v8140_v56  ;;  %12477 = vst [vmem:[#allocation67_spill] sm:$0xff] %v8145_v23  ;;  %v8149_v48 = vpop.xlane.xlu1 %3188  ;;  %v12484_v56 = vld [vmem:[#allocation253_spill] sm:$0xff]  ;;  %vm12487_vm9 = vcmp.eq.f32.partialorder %v12485_v11, %v12486_v7 }
 0x393   : > { %12479 = vst [vmem:[#allocation156_spill] sm:$0xff] %v8149_v48  ;;  %vm2096_vm7 = vcmp.gt.f32.partialorder %v12484_v56, -inf  ;;  %v4747_v5 = vsel %vm12487_vm9, 1.0, %v11821_v36 }
 0x394   : > { %2345 = vadd.xlane.f32.xlu0 %v4722_v21  ;;  %v4666_v21 = vsel %vm1368_vm3, 1.0, %v11821_v36  ;;  %v2156_v52 = vsel %vm2096_vm7, %v12484_v56, 0.0 }
 0x395   : > { %1430 = vadd.xlane.f32.xlu1 %v4665_v29  ;;  %v2066_v25 = vpop.xlane.xlu0 %2065  ;;  %v2155_v29 = vsel %vm2095_vm4, %v12483_v37, 0.0  ;;  %v12494_v37 = vld [vmem:[#allocation77_spill] sm:$0xff] }
 0x396   : > { %v2115_v50 = vmin.f32 %v2066_v25, %v1915_v59  ;;  %v2068_v48 = vpop.xlane.xlu1 %2067  ;;  %v12489_v25 = vld [vmem:[#allocation260_spill] sm:$0xff]  ;;  %vm2710_vm14 = vcmp.gt.f32.partialorder %v12494_v37, -inf }
 0x397   : > { %v2116_v23 = vmin.f32 %v2068_v48, %v1916_v19  ;;  %vm1369_vm11 = vcmp.eq.f32.partialorder %v12489_v25, %v7743_v1  ;;  %v12518_v1 = vld [vmem:[#allocation117_spill] sm:$0xff] }
 0x398   : > { %1432 = vadd.xlane.f32.xlu0 %v4666_v21  ;;  %v2135_v17 = vsel %vm2095_vm4, %v2115_v50, 0.0  ;;  %v12493_v50 = vld [vmem:[#allocation11_spill] sm:$0xff]  ;;  %v4667_v25 = vsel %vm1369_vm11, 1.0, %v11821_v36 }
 0x399   : > { %2676 = vadd.xlane.f32.xlu1 %v4747_v5  ;;  %v8166_v63 = vpop.xlane.xlu0 %2265  ;;  %v2175_v48 = vmul.f32 %v2155_v29, %v2135_v17  ;;  %v8170_v40 = vsub.f32 %v1915_v59, %v2135_v17  ;;  %v2136_v21 = vsel %vm2096_vm7, %v2116_v23, 0.0  ;;  %vm12495_vm15 = vcmp.eq.f32.partialorder %v12493_v50, %v12494_v37  ;;  %v12496_v5 = vld [vmem:[#allocation94_spill] sm:$0xff]  ;;  %v12498_v29 = vld [vmem:[#allocation113_spill] sm:$0xff]  ;;  %v12499_v23 = vld [vmem:[#allocation279_spill] sm:$0xff] }
 0x39a   : > { %12488 = vst [vmem:[#allocation78_spill] sm:$0xff] %v8166_v63  ;;  %v8172_v18 = vpop.xlane.xlu1 %2267  ;;  %v2176_v33 = vmul.f32 %v2156_v52, %v2136_v21  ;;  %v8174_v11 = vsub.f32 %v1916_v19, %v2136_v21  ;;  %v4746_v56 = vsel %vm12495_vm15, 1.0, %v11821_v36  ;;  %v996_v59 = vsub.f32 3.0, %v12498_v29  ;;  %v12500_v17 = vld [vmem:[#allocation252_spill] sm:$0xff]  ;;  %v12502_v19 = vld [vmem:[#allocation257_spill] sm:$0xff] }
 0x39b   : > { %12490 = vst [vmem:[#allocation171_spill] sm:$0xff] %v8170_v40  ;;  %12491 = vst [vmem:[#allocation8_spill] sm:$0xff] %v8172_v18  ;;  %v8181_v42 = vadd.f32 %v2175_v48, %v12496_v5  ;;  %vm1370_vm8 = vcmp.eq.f32.partialorder %v12499_v23, %v7885_v3  ;;  %vm1176_vm1 = vcmp.gt.f32.partialorder %v12502_v19, -inf  ;;  %v12503_v50 = vld [vmem:[#allocation264_spill] sm:$0xff]  ;;  %v12504_v40 = vld [vmem:[#allocation266_spill] sm:$0xff] }
 0x39c   : > { %12492 = vst [vmem:[#allocation68_spill] sm:$0xff] %v8174_v11  ;;  %2674 = vadd.xlane.f32.xlu0 %v4746_v56  ;;  %v8188_v52 = vadd.f32 %v2176_v33, %v12500_v17  ;;  %v997_v11 = vsub.f32 3.0, %v12503_v50  ;;  %vm1177_vm3 = vcmp.gt.f32.partialorder %v12504_v40, -inf  ;;  %v1236_v29 = vsel %vm1176_vm1, %v12502_v19, 0.0  ;;  %v12505_v33 = vld [vmem:[#allocation98_spill] sm:$0xff] }
 0x39d   : > { %12497 = vst [vmem:[#allocation74_spill] sm:$0xff] %v8181_v42  ;;  %1434 = vadd.xlane.f32.xlu1 %v4667_v25  ;;  %v1149_v21 = vpop.xlane.xlu0 %1148  ;;  %v4668_v42 = vsel %vm1370_vm8, 1.0, %v11821_v36  ;;  %v1237_v23 = vsel %vm1177_vm3, %v12504_v40, 0.0  ;;  %v12506_v25 = vld [vmem:[#allocation192_spill] sm:$0xff] }
 0x39e   : > { %12501 = vst [vmem:[#allocation10_spill] sm:$0xff] %v8188_v52  ;;  %v1196_v48 = vmin.f32 %v1149_v21, %v996_v59  ;;  %v1151_v56 = vpop.xlane.xlu1 %1150  ;;  %vm12507_vm4 = vcmp.eq.f32.partialorder %v12505_v33, %v12506_v25  ;;  %v12509_v21 = vld [vmem:[#allocation280_spill] sm:$0xff]  ;;  %v12514_v33 = vld [vmem:[#allocation85_spill] sm:$0xff] }
 0x39f   : > { %v1197_v5 = vmin.f32 %v1151_v56, %v997_v11  ;;  %v4765_v17 = vsel %vm12507_vm4, 1.0, %v11821_v36  ;;  %vm1371_vm7 = vcmp.eq.f32.partialorder %v12509_v21, %v7891_v24  ;;  %v12523_v21 = vld [vmem:[#allocation167_spill] sm:$0xff]  ;;  %v12567_v24 = vld [vmem:[#allocation182_spill] sm:$0xff] }
 0x3a0   : > { %v1216_v18 = vsel %vm1176_vm1, %v1196_v48, 0.0  ;;  %1436 = vadd.xlane.f32.xlu0 %v4668_v42  ;;  %v12512_v42 = vld [vmem:[#allocation256_spill] sm:$0xff] }
 0x3a1   : > { %v1256_v52 = vmul.f32 %v1236_v29, %v1216_v18  ;;  %v1217_v50 = vsel %vm1177_vm3, %v1197_v5, 0.0  ;;  %2972 = vadd.xlane.f32.xlu1 %v4765_v17  ;;  %v8200_v63 = vpop.xlane.xlu0 %1348  ;;  %v8204_v56 = vsub.f32 %v996_v59, %v1216_v18  ;;  %v12515_v29 = vld [vmem:[#allocation178_spill] sm:$0xff]  ;;  %v4669_v18 = vsel %vm1371_vm7, 1.0, %v11821_v36  ;;  %v12520_v59 = vld [vmem:[#allocation296_spill] sm:$0xff] }
 0x3a2   : > { %12508 = vst [vmem:[#allocation72_spill] sm:$0xff] %v8200_v63  ;;  %v1257_v19 = vmul.f32 %v1237_v23, %v1217_v50  ;;  %v8206_v48 = vpop.xlane.xlu1 %1350  ;;  %v8208_v40 = vsub.f32 %v997_v11, %v1217_v50  ;;  %vm12516_vm9 = vcmp.eq.f32.partialorder %v12514_v33, %v12515_v29  ;;  %v12517_v17 = vld [vmem:[#allocation262_spill] sm:$0xff]  ;;  %vm1372_vm11 = vcmp.eq.f32.partialorder %v12520_v59, %v8029_v8  ;;  %v12521_v11 = vld [vmem:[#allocation265_spill] sm:$0xff] }
 0x3a3   : > { %12510 = vst [vmem:[#allocation222_spill] sm:$0xff] %v8204_v56  ;;  %v8211_v3 = vadd.f32 %v1256_v52, %v12512_v42  ;;  %v4764_v5 = vsel %vm12516_vm9, 1.0, %v11821_v36  ;;  %v1917_v25 = vsub.f32 3.0, %v12517_v17  ;;  %vm2097_vm15 = vcmp.gt.f32.partialorder %v12521_v11, -inf  ;;  %v12522_v23 = vld [vmem:[#allocation270_spill] sm:$0xff]  ;;  %v12524_v42 = vld [vmem:[#allocation224_spill] sm:$0xff] }
 0x3a4   : > { %12511 = vst [vmem:[#allocation232_spill] sm:$0xff] %v8208_v40  ;;  %v8219_v20 = vadd.f32 %v1257_v19, %v12518_v1  ;;  %2970 = vadd.xlane.f32.xlu0 %v4764_v5  ;;  %v1918_v50 = vsub.f32 3.0, %v12522_v23  ;;  %vm3207_vm8 = vcmp.eq.f32.partialorder %v12524_v42, %v12523_v21  ;;  %v12525_v33 = vld [vmem:[#allocation273_spill] sm:$0xff]  ;;  %v4670_v5 = vsel %vm1372_vm11, 1.0, %v11821_v36  ;;  %v12526_v40 = vld [vmem:[#allocation159_spill] sm:$0xff]  ;;  %v12533_v21 = vld [vmem:[#allocation112_spill] sm:$0xff] }
 0x3a5   : > { %12513 = vst [vmem:[#allocation81_spill] sm:$0xff] %v8211_v3  ;;  %1438 = vadd.xlane.f32.xlu1 %v4669_v18  ;;  %v2070_v52 = vpop.xlane.xlu0 %2069  ;;  %vm2098_vm1 = vcmp.gt.f32.partialorder %v12525_v33, -inf  ;;  %v4783_v59 = vsel %vm3207_vm8, 1.0, %v11821_v36  ;;  %v12527_v18 = vld [vmem:[#allocation106_spill] sm:$0xff] }
 0x3a6   : > { %12519 = vst [vmem:[#allocation174_spill] sm:$0xff] %v8219_v20  ;;  %v2117_v17 = vmin.f32 %v2070_v52, %v1917_v25  ;;  %v2072_v1 = vpop.xlane.xlu1 %2071  ;;  %v2157_v20 = vsel %vm2097_vm15, %v12521_v11, 0.0  ;;  %vm3206_vm3 = vcmp.eq.f32.partialorder %v12527_v18, %v12526_v40  ;;  %v2158_v23 = vsel %vm2098_vm1, %v12525_v33, 0.0  ;;  %v12529_v52 = vld [vmem:[#allocation297_spill] sm:$0xff] }
 0x3a7   : > { %v2118_v19 = vmin.f32 %v2072_v1, %v1918_v50  ;;  %vm1373_vm4 = vcmp.eq.f32.partialorder %v12529_v52, %v8033_v6  ;;  %v4782_v40 = vsel %vm3206_vm3, 1.0, %v11821_v36  ;;  %v12535_v52 = vld [vmem:[#allocation123_spill] sm:$0xff]  ;;  %vm2099_vm3 = vcmp.gt.f32.partialorder %v7177_v38, -inf }
 0x3a8   : > { %1440 = vadd.xlane.f32.xlu0 %v4670_v5  ;;  %v2137_v3 = vsel %vm2097_vm15, %v2117_v17, 0.0 }
 0x3a9   : > { %3268 = vadd.xlane.f32.xlu1 %v4783_v59  ;;  %v8237_v42 = vpop.xlane.xlu0 %2269  ;;  %v2177_v1 = vmul.f32 %v2157_v20, %v2137_v3  ;;  %v8241_v56 = vsub.f32 %v1917_v25, %v2137_v3  ;;  %v2138_v11 = vsel %vm2098_vm1, %v2118_v19, 0.0  ;;  %v998_v20 = vsub.f32 3.0, %v12535_v52  ;;  %v12536_v3 = vld [vmem:[#allocation313_spill] sm:$0xff]  ;;  %v12537_v25 = vld [vmem:[#allocation272_spill] sm:$0xff] }
 0x3aa   : > { %12528 = vst [vmem:[#allocation95_spill] sm:$0xff] %v8237_v42  ;;  %v8245_v5 = vpop.xlane.xlu1 %2271  ;;  %v2178_v18 = vmul.f32 %v2158_v23, %v2138_v11  ;;  %v8247_v17 = vsub.f32 %v1918_v50, %v2138_v11  ;;  %v4671_v42 = vsel %vm1373_vm4, 1.0, %v11821_v36  ;;  %vm1374_vm7 = vcmp.eq.f32.partialorder %v12536_v3, %v8125_v30  ;;  %v12539_v19 = vld [vmem:[#allocation277_spill] sm:$0xff]  ;;  %v12540_v23 = vld [vmem:[#allocation284_spill] sm:$0xff] }
 0x3ab   : > { %12530 = vst [vmem:[#allocation237_spill] sm:$0xff] %v8241_v56  ;;  %12531 = vst [vmem:[#allocation244_spill] sm:$0xff] %v8245_v5  ;;  %v8251_v59 = vadd.f32 %v2177_v1, %v12533_v21  ;;  %vm1178_vm9 = vcmp.gt.f32.partialorder %v12539_v19, -inf  ;;  %v999_v11 = vsub.f32 3.0, %v12540_v23 }
 0x3ac   : > { %12532 = vst [vmem:[#allocation246_spill] sm:$0xff] %v8247_v17  ;;  %3266 = vadd.xlane.f32.xlu0 %v4782_v40  ;;  %v8258_v33 = vadd.f32 %v2178_v18, %v12537_v25  ;;  %v12541_v17 = vld [vmem:[#allocation285_spill] sm:$0xff]  ;;  %v1238_v52 = vsel %vm1178_vm9, %v12539_v19, 0.0  ;;  %v12543_v18 = vld [vmem:[#allocation86_spill] sm:$0xff] }
 0x3ad   : > { %12534 = vst [vmem:[#allocation223_spill] sm:$0xff] %v8251_v59  ;;  %1442 = vadd.xlane.f32.xlu1 %v4671_v42  ;;  %v1153_v50 = vpop.xlane.xlu0 %1152  ;;  %vm1179_vm11 = vcmp.gt.f32.partialorder %v12541_v17, -inf  ;;  %v4672_v59 = vsel %vm1374_vm7, 1.0, %v11821_v36  ;;  %v12542_v42 = vld [vmem:[#allocation16_spill] sm:$0xff]  ;;  %vm2100_vm7 = vcmp.gt.f32.partialorder %v7217_v0, -inf  ;;  %vm11716_vm10 = vcmp.gt.f32.partialorder %v12543_v18, -inf }
 0x3ae   : > { %12538 = vst [vmem:[#allocation70_spill] sm:$0xff] %v8258_v33  ;;  %v1198_v21 = vmin.f32 %v1153_v50, %v998_v20  ;;  %v1155_v40 = vpop.xlane.xlu1 %1154  ;;  %v1239_v3 = vsel %vm1179_vm11, %v12541_v17, 0.0  ;;  %vm12544_vm15 = vcmp.eq.f32.partialorder %v12542_v42, %v12543_v18  ;;  %v12545_v50 = vld [vmem:[#allocation314_spill] sm:$0xff]  ;;  %v12550_v42 = vld [vmem:[#allocation13_spill] sm:$0xff] }
 0x3af   : > { %v1199_v1 = vmin.f32 %v1155_v40, %v999_v11  ;;  %v4807_v25 = vsel %vm12544_vm15, 1.0, %v11821_v36  ;;  %vm1375_vm8 = vcmp.eq.f32.partialorder %v12545_v50, %v8131_v49  ;;  %v12554_v50 = vld [vmem:[#allocation127_spill] sm:$0xff] }
 0x3b0   : > { %v1218_v56 = vsel %vm1178_vm9, %v1198_v21, 0.0  ;;  %1444 = vadd.xlane.f32.xlu0 %v4672_v59  ;;  %v12548_v59 = vld [vmem:[#allocation276_spill] sm:$0xff] }
 0x3b1   : > { %v1258_v33 = vmul.f32 %v1238_v52, %v1218_v56  ;;  %v1219_v23 = vsel %vm1179_vm11, %v1199_v1, 0.0  ;;  %3597 = vadd.xlane.f32.xlu1 %v4807_v25  ;;  %v8270_v5 = vpop.xlane.xlu0 %1352  ;;  %v8274_v40 = vsub.f32 %v998_v20, %v1218_v56  ;;  %v12551_v52 = vld [vmem:[#allocation80_spill] sm:$0xff]  ;;  %v12553_v25 = vld [vmem:[#allocation282_spill] sm:$0xff]  ;;  %v4673_v20 = vsel %vm1375_vm8, 1.0, %v11821_v36 }
 0x3b2   : > { %v1259_v19 = vmul.f32 %v1239_v3, %v1219_v23  ;;  %v8276_v21 = vpop.xlane.xlu1 %1354  ;;  %v8278_v17 = vsub.f32 %v999_v11, %v1219_v23  ;;  %vm12552_vm1 = vcmp.eq.f32.partialorder %v12550_v42, %v12551_v52  ;;  %v1919_v6 = vsub.f32 3.0, %v12553_v25  ;;  %v12556_v11 = vld [vmem:[#allocation157_spill] sm:$0xff] }
 0x3b3   : > { %12546 = vst [vmem:[#allocation161_spill] sm:$0xff] %v8274_v40  ;;  %v8281_v30 = vadd.f32 %v1258_v33, %v12548_v59  ;;  %v4806_v1 = vsel %vm12552_vm1, 1.0, %v11821_v36  ;;  %vm1376_vm4 = vcmp.eq.f32.partialorder %v12556_v11, %v8200_v63  ;;  %v12557_v3 = vld [vmem:[#allocation289_spill] sm:$0xff]  ;;  %vm1180_vm11 = vcmp.gt.f32.partialorder %v7251_v14, -inf  ;;  %v12564_v63 = vld [vmem:[#allocation160_spill] sm:$0xff] }
 0x3b4   : > { %12547 = vst [vmem:[#allocation239_spill] sm:$0xff] %v8278_v17  ;;  %v8290_v56 = vadd.f32 %v1259_v19, %v12554_v50  ;;  %3595 = vadd.xlane.f32.xlu0 %v4806_v1  ;;  %v1920_v23 = vsub.f32 3.0, %v12557_v3  ;;  %v12558_v25 = vld [vmem:[#allocation101_spill] sm:$0xff]  ;;  %v2159_v1 = vsel %vm2099_vm3, %v7177_v38, 0.0  ;;  %v4674_v11 = vsel %vm1376_vm4, 1.0, %v11821_v36 }
 0x3b5   : > { %12549 = vst [vmem:[#allocation229_spill] sm:$0xff] %v8281_v30  ;;  %1446 = vadd.xlane.f32.xlu1 %v4673_v20  ;;  %v2074_v33 = vpop.xlane.xlu0 %2073  ;;  %v12559_v17 = vld [vmem:[#allocation193_spill] sm:$0xff]  ;;  %v2160_v20 = vsel %vm2100_vm7, %v7217_v0, 0.0  ;;  %vm1377_vm8 = vcmp.eq.f32.partialorder %v12564_v63, %v8206_v48  ;;  %v1240_v63 = vsel %vm1180_vm11, %v7251_v14, 0.0 }
 0x3b6   : > { %12555 = vst [vmem:[#allocation236_spill] sm:$0xff] %v8290_v56  ;;  %v2119_v59 = vmin.f32 %v2074_v33, %v1919_v6  ;;  %v2076_v42 = vpop.xlane.xlu1 %2075  ;;  %vm12560_vm9 = vcmp.eq.f32.partialorder %v12558_v25, %v12559_v17  ;;  %v12561_v56 = vld [vmem:[#allocation133_spill] sm:$0xff]  ;;  %v12563_v25 = vld [vmem:[#allocation302_spill] sm:$0xff] }
 0x3b7   : > { %v4825_v19 = vsel %vm12560_vm9, 1.0, %v11821_v36  ;;  %v2120_v50 = vmin.f32 %v2076_v42, %v1920_v23  ;;  %v1000_v30 = vsub.f32 3.0, %v12561_v56  ;;  %v12562_v33 = vld [vmem:[#allocation301_spill] sm:$0xff]  ;;  %vm1181_vm15 = vcmp.gt.f32.partialorder %v12563_v25, -inf }
 0x3b8   : > { %1448 = vadd.xlane.f32.xlu0 %v4674_v11  ;;  %v1001_v3 = vsub.f32 3.0, %v12562_v33  ;;  %v2139_v40 = vsel %vm2099_vm3, %v2119_v59, 0.0  ;;  %v12566_v33 = vld [vmem:[#allocation89_spill] sm:$0xff] }
 0x3b9   : > { %3893 = vadd.xlane.f32.xlu1 %v4825_v19  ;;  %v1157_v42 = vpop.xlane.xlu0 %1156  ;;  %v2179_v56 = vmul.f32 %v2159_v1, %v2139_v40  ;;  %v8316_v17 = vsub.f32 %v1919_v6, %v2139_v40  ;;  %v2140_v11 = vsel %vm2100_vm7, %v2120_v50, 0.0  ;;  %vm12568_vm1 = vcmp.eq.f32.partialorder %v12566_v33, %v12567_v24  ;;  %v12570_v40 = vld [vmem:[#allocation122_spill] sm:$0xff] }
 0x3ba   : > { %v1200_v49 = vmin.f32 %v1157_v42, %v1000_v30  ;;  %v1159_v8 = vpop.xlane.xlu1 %1158  ;;  %v4824_v29 = vsel %vm12568_vm1, 1.0, %v11821_v36  ;;  %v2180_v38 = vmul.f32 %v2160_v20, %v2140_v11  ;;  %v8324_v59 = vsub.f32 %v1920_v23, %v2140_v11  ;;  %v12572_v23 = vld [vmem:[#allocation323_spill] sm:$0xff] }
 0x3bb   : > { %12565 = vst [vmem:[#allocation102_spill] sm:$0xff] %v8316_v17  ;;  %v1241_v6 = vsel %vm1181_vm15, %v12563_v25, 0.0  ;;  %v1201_v0 = vmin.f32 %v1159_v8, %v1001_v3  ;;  %v8333_v19 = vadd.f32 %v2179_v56, %v12570_v40  ;;  %v4675_v50 = vsel %vm1377_vm8, 1.0, %v11821_v36  ;;  %v12573_v20 = vld [vmem:[#allocation291_spill] sm:$0xff]  ;;  %v12575_v56 = vld [vmem:[#allocation249_spill] sm:$0xff] }
 0x3bc   : > { %12569 = vst [vmem:[#allocation111_spill] sm:$0xff] %v8324_v59  ;;  %v1220_v1 = vsel %vm1180_vm11, %v1200_v49, 0.0  ;;  %3891 = vadd.xlane.f32.xlu0 %v4824_v29  ;;  %vm1378_vm3 = vcmp.eq.f32.partialorder %v12572_v23, %v8270_v5  ;;  %v8341_v42 = vadd.f32 %v2180_v38, %v12573_v20  ;;  %vm2288_vm4 = vcmp.eq.f32.partialorder %v12575_v56, %v7676_v16  ;;  %v12577_v23 = vld [vmem:[#allocation294_spill] sm:$0xff]  ;;  %v12579_v25 = vld [vmem:[#allocation299_spill] sm:$0xff] }
 0x3bd   : > { %12571 = vst [vmem:[#allocation240_spill] sm:$0xff] %v8333_v19  ;;  %v1260_v11 = vmul.f32 %v1240_v63, %v1220_v1  ;;  %v1221_v33 = vsel %vm1181_vm15, %v1201_v0, 0.0  ;;  %1450 = vadd.xlane.f32.xlu1 %v4675_v50  ;;  %v8345_v8 = vpop.xlane.xlu0 %1356  ;;  %v8349_v14 = vsub.f32 %v1000_v30, %v1220_v1  ;;  %v4676_v63 = vsel %vm1378_vm3, 1.0, %v11821_v36  ;;  %v12580_v50 = vld [vmem:[#allocation139_spill] sm:$0xff]  ;;  %v12583_v1 = vld [vmem:[#allocation306_spill] sm:$0xff] }
 0x3be   : > { %12574 = vst [vmem:[#allocation242_spill] sm:$0xff] %v8341_v42  ;;  %v1261_v49 = vmul.f32 %v1241_v6, %v1221_v33  ;;  %v8351_v29 = vpop.xlane.xlu1 %1358  ;;  %v8353_v40 = vsub.f32 %v1001_v3, %v1221_v33  ;;  %v1921_v0 = vsub.f32 3.0, %v12579_v25  ;;  %vm2101_vm7 = vcmp.gt.f32.partialorder %v7297_v34, -inf  ;;  %v12582_v6 = vld [vmem:[#allocation248_spill] sm:$0xff] }
 0x3bf   : > { %v8356_v38 = vadd.f32 %v1260_v11, %v12577_v23  ;;  %v4725_v30 = vsel %vm2288_vm4, 1.0, %v11821_v36  ;;  %vm2287_vm9 = vcmp.eq.f32.partialorder %v12582_v6, %v7670_v2  ;;  %vm2102_vm11 = vcmp.gt.f32.partialorder %v7337_v31, -inf  ;;  %v12584_v33 = vld [vmem:[#allocation324_spill] sm:$0xff] }
 0x3c0   : > { %12576 = vst [vmem:[#allocation259_spill] sm:$0xff] %v8353_v40  ;;  %v8362_v20 = vadd.f32 %v1261_v49, %v12580_v50  ;;  %1452 = vadd.xlane.f32.xlu0 %v4676_v63  ;;  %v1922_v11 = vsub.f32 3.0, %v12583_v1  ;;  %vm1379_vm15 = vcmp.eq.f32.partialorder %v12584_v33, %v8276_v21  ;;  %v4724_v49 = vsel %vm2287_vm9, 1.0, %v11821_v36  ;;  %v12585_v6 = vld [vmem:[#allocation148_spill] sm:$0xff]  ;;  %v12586_v33 = vld [vmem:[#allocation181_spill] sm:$0xff] }
 0x3c1   : > { %12578 = vst [vmem:[#allocation250_spill] sm:$0xff] %v8356_v38  ;;  %2351 = vadd.xlane.f32.xlu1 %v4725_v30  ;;  %v2078_v3 = vpop.xlane.xlu0 %2077  ;;  %v2161_v63 = vsel %vm2101_vm7, %v7297_v34, 0.0  ;;  %v2162_v50 = vsel %vm2102_vm11, %v7337_v31, 0.0  ;;  %v4677_v30 = vsel %vm1379_vm15, 1.0, %v11821_v36  ;;  %v1002_v1 = vsub.f32 3.0, %v12585_v6  ;;  %v12590_v34 = vld [vmem:[#allocation132_spill] sm:$0xff] }
 0x3c2   : > { %12581 = vst [vmem:[#allocation245_spill] sm:$0xff] %v8362_v20  ;;  %v2121_v56 = vmin.f32 %v2078_v3, %v1921_v0  ;;  %v2080_v23 = vpop.xlane.xlu1 %2079  ;;  %vm1380_vm8 = vcmp.eq.f32.partialorder %v12586_v33, %v8345_v8  ;;  %vm1182_vm1 = vcmp.gt.f32.partialorder %v7371_v44, -inf  ;;  %vm2103_vm15 = vcmp.gt.f32.partialorder %v7417_v26, -inf }
 0x3c3   : > { %v2122_v25 = vmin.f32 %v2080_v23, %v1922_v11  ;;  %v4678_v33 = vsel %vm1380_vm8, 1.0, %v11821_v36 }
 0x3c4   : > { %2349 = vadd.xlane.f32.xlu0 %v4724_v49  ;;  %v2141_v3 = vsel %vm2101_vm7, %v2121_v56, 0.0  ;;  %vm1183_vm7 = vcmp.gt.f32.partialorder %v7424_v27, -inf }
 0x3c5   : > { %1454 = vadd.xlane.f32.xlu1 %v4677_v30  ;;  %v1161_v23 = vpop.xlane.xlu0 %1160  ;;  %v2181_v42 = vmul.f32 %v2161_v63, %v2141_v3  ;;  %v8385_v19 = vsub.f32 %v1921_v0, %v2141_v3  ;;  %v2142_v49 = vsel %vm2102_vm11, %v2122_v25, 0.0  ;;  %v1242_v30 = vsel %vm1182_vm1, %v7371_v44, 0.0  ;;  %v12592_v0 = vld [vmem:[#allocation22_spill] sm:$0xff]  ;;  %v12593_v63 = vld [vmem:[#allocation96_spill] sm:$0xff] }
 0x3c6   : > { %v1202_v59 = vmin.f32 %v1161_v23, %v1002_v1  ;;  %v8389_v17 = vpop.xlane.xlu1 %4109  ;;  %v2182_v6 = vmul.f32 %v2162_v50, %v2142_v49  ;;  %v8391_v20 = vsub.f32 %v1922_v11, %v2142_v49  ;;  %vm12594_vm3 = vcmp.eq.f32.partialorder %v12592_v0, %v12593_v63  ;;  %v12595_v25 = vld [vmem:[#allocation308_spill] sm:$0xff]  ;;  %v12598_v23 = vld [vmem:[#allocation317_spill] sm:$0xff] }
 0x3c7   : > { %12587 = vst [vmem:[#allocation253_spill] sm:$0xff] %v8385_v19  ;;  %12588 = vst [vmem:[#allocation14_spill] sm:$0xff] %v8389_v17  ;;  %v8395_v56 = vadd.f32 %v2181_v42, %v12590_v34  ;;  %v4749_v31 = vsel %vm12594_vm3, 1.0, %v11821_v36  ;;  %v1003_v49 = vsub.f32 3.0, %v12598_v23  ;;  %v12599_v42 = vld [vmem:[#allocation325_spill] sm:$0xff]  ;;  %v12606_v23 = vld [vmem:[#allocation315_spill] sm:$0xff] }
 0x3c8   : > { %12589 = vst [vmem:[#allocation83_spill] sm:$0xff] %v8391_v20  ;;  %v1222_v40 = vsel %vm1182_vm1, %v1202_v59, 0.0  ;;  %1456 = vadd.xlane.f32.xlu0 %v4678_v33  ;;  %v8403_v3 = vadd.f32 %v2182_v6, %v12595_v25  ;;  %vm1381_vm4 = vcmp.eq.f32.partialorder %v12599_v42, %v8351_v29  ;;  %v12601_v33 = vld [vmem:[#allocation311_spill] sm:$0xff] }
 0x3c9   : > { %12591 = vst [vmem:[#allocation260_spill] sm:$0xff] %v8395_v56  ;;  %v1262_v50 = vmul.f32 %v1242_v30, %v1222_v40  ;;  %2680 = vadd.xlane.f32.xlu1 %v4749_v31  ;;  %v8405_v11 = vpop.xlane.xlu0 %1360  ;;  %v8410_v44 = vsub.f32 %v1002_v1, %v1222_v40  ;;  %v12603_v6 = vld [vmem:[#allocation19_spill] sm:$0xff]  ;;  %v4679_v25 = vsel %vm1381_vm4, 1.0, %v11821_v36  ;;  %v12607_v40 = vld [vmem:[#allocation186_spill] sm:$0xff]  ;;  %v1243_v1 = vsel %vm1183_vm7, %v7424_v27, 0.0 }
 0x3ca   : > { %12596 = vst [vmem:[#allocation11_spill] sm:$0xff] %v8403_v3  ;;  %12597 = vst [vmem:[#allocation77_spill] sm:$0xff] %v8405_v11  ;;  %v1163_v59 = vpop.xlane.xlu1 %1162  ;;  %v12604_v30 = vld [vmem:[#allocation91_spill] sm:$0xff]  ;;  %v1923_v3 = vsub.f32 3.0, %v12606_v23  ;;  %vm1382_vm11 = vcmp.eq.f32.partialorder %v12607_v40, %v8405_v11  ;;  %v2163_v40 = vsel %vm2103_vm15, %v7417_v26, 0.0  ;;  %vm2104_vm4 = vcmp.gt.f32.partialorder %v7457_v45, -inf }
 0x3cb   : > { %12600 = vst [vmem:[#allocation94_spill] sm:$0xff] %v8410_v44  ;;  %v8414_v34 = vadd.f32 %v1262_v50, %v12601_v33  ;;  %v1203_v0 = vmin.f32 %v1163_v59, %v1003_v49  ;;  %vm12605_vm9 = vcmp.eq.f32.partialorder %v12603_v6, %v12604_v30  ;;  %v12608_v59 = vld [vmem:[#allocation196_spill] sm:$0xff]  ;;  %v12609_v33 = vld [vmem:[#allocation235_spill] sm:$0xff]  ;;  %v4680_v23 = vsel %vm1382_vm11, 1.0, %v11821_v36  ;;  %v12707_v11 = vld [vmem:[#allocation18_spill] sm:$0xff] }
 0x3cc   : > { %v4748_v31 = vsel %vm12605_vm9, 1.0, %v11821_v36  ;;  %vm4128_vm8 = vcmp.eq.f32.partialorder %v12609_v33, %v12608_v59  ;;  %v12612_v19 = vld [vmem:[#allocation155_spill] sm:$0xff]  ;;  %v12615_v33 = vld [vmem:[#allocation234_spill] sm:$0xff] }
 0x3cd   : > { %12602 = vst [vmem:[#allocation113_spill] sm:$0xff] %v8414_v34  ;;  %2678 = vadd.xlane.f32.xlu0 %v4748_v31  ;;  %v1223_v50 = vsel %vm1183_vm7, %v1203_v0, 0.0  ;;  %1458 = vadd.xlane.f32.xlu1 %v4679_v25  ;;  %v2082_v42 = vpop.xlane.xlu0 %2081  ;;  %v4843_v0 = vsel %vm4128_vm8, 1.0, %v11821_v36  ;;  %v12614_v25 = vld [vmem:[#allocation190_spill] sm:$0xff] }
 0x3ce   : > { %v1263_v6 = vmul.f32 %v1243_v1, %v1223_v50  ;;  %v2123_v56 = vmin.f32 %v2082_v42, %v1923_v3  ;;  %v8428_v31 = vpop.xlane.xlu1 %1362  ;;  %v8430_v20 = vsub.f32 %v1003_v49, %v1223_v50  ;;  %vm4127_vm1 = vcmp.eq.f32.partialorder %v12615_v33, %v12614_v25  ;;  %v12617_v50 = vld [vmem:[#allocation162_spill] sm:$0xff] }
 0x3cf   : > { %12610 = vst [vmem:[#allocation279_spill] sm:$0xff] %v8428_v31  ;;  %v1924_v42 = vsub.f32 3.0, %v12617_v50  ;;  %v4842_v33 = vsel %vm4127_vm1, 1.0, %v11821_v36  ;;  %v8664_v25 = vsel %vm11716_vm10, %v12543_v18, 0.0 }
 0x3d0   : > { %12611 = vst [vmem:[#allocation252_spill] sm:$0xff] %v8430_v20  ;;  %v8437_v27 = vadd.f32 %v1263_v6, %v12612_v19  ;;  %v2143_v1 = vsel %vm2103_vm15, %v2123_v56, 0.0  ;;  %v12618_v20 = vld [vmem:[#allocation327_spill] sm:$0xff] }
 0x3d1   : > { %1460 = vadd.xlane.f32.xlu0 %v4680_v23  ;;  %4189 = vadd.xlane.f32.xlu1 %v4843_v0  ;;  %v8444_v49 = vpop.xlane.xlu0 %4107  ;;  %vm1383_vm3 = vcmp.eq.f32.partialorder %v12618_v20, %v8428_v31  ;;  %v2183_v34 = vmul.f32 %v2163_v40, %v2143_v1  ;;  %v8449_v19 = vsub.f32 %v1923_v3, %v2143_v1  ;;  %v2164_v20 = vsel %vm2104_vm4, %v7457_v45, 0.0  ;;  %v12633_v45 = vld [vmem:[#allocation170_spill] sm:$0xff] }
 0x3d2   : > { %12613 = vst [vmem:[#allocation257_spill] sm:$0xff] %v8437_v27  ;;  %12616 = vst [vmem:[#allocation264_spill] sm:$0xff] %v8444_v49  ;;  %v2084_v6 = vpop.xlane.xlu1 %2083  ;;  %v12620_v27 = vld [vmem:[#allocation147_spill] sm:$0xff]  ;;  %v4681_v56 = vsel %vm1383_vm3, 1.0, %v11821_v36 }
 0x3d3   : > { %12619 = vst [vmem:[#allocation266_spill] sm:$0xff] %v8449_v19  ;;  %v2124_v23 = vmin.f32 %v2084_v6, %v1924_v42  ;;  %v8454_v26 = vadd.f32 %v2183_v34, %v12620_v27  ;;  %v12625_v6 = vld [vmem:[#allocation105_spill] sm:$0xff]  ;;  %v12626_v19 = vld [vmem:[#allocation134_spill] sm:$0xff] }
 0x3d4   : > { %vm12627_vm7 = vcmp.eq.f32.partialorder %v12625_v6, %v12626_v19  ;;  %v12628_v27 = vld [vmem:[#allocation114_spill] sm:$0xff] }
 0x3d5   : > { %12621 = vst [vmem:[#allocation98_spill] sm:$0xff] %v8454_v26  ;;  %4187 = vadd.xlane.f32.xlu0 %v4842_v33  ;;  %1462 = vadd.xlane.f32.xlu1 %v4681_v56  ;;  %v8457_v0 = vpop.xlane.xlu0 %3190  ;;  %v2144_v50 = vsel %vm2104_vm4, %v2124_v23, 0.0  ;;  %v4766_v34 = vsel %vm12627_vm7, 1.0, %v11821_v36  ;;  %v12629_v33 = vld [vmem:[#allocation203_spill] sm:$0xff]  ;;  %v12631_v26 = vld [vmem:[#allocation201_spill] sm:$0xff] }
 0x3d6   : > { %12622 = vst [vmem:[#allocation280_spill] sm:$0xff] %v8457_v0  ;;  %v8460_v3 = vpop.xlane.xlu1 %3192  ;;  %v2184_v40 = vmul.f32 %v2164_v20, %v2144_v50  ;;  %v8462_v1 = vsub.f32 %v1924_v42, %v2144_v50  ;;  %vm12630_vm9 = vcmp.eq.f32.partialorder %v12628_v27, %v12629_v33  ;;  %v12632_v23 = vld [vmem:[#allocation241_spill] sm:$0xff]  ;;  %v12636_v50 = vld [vmem:[#allocation207_spill] sm:$0xff] }
 0x3d7   : > { %12623 = vst [vmem:[#allocation256_spill] sm:$0xff] %v8460_v3  ;;  %v4767_v56 = vsel %vm12630_vm9, 1.0, %v11821_v36  ;;  %vm3208_vm11 = vcmp.eq.f32.partialorder %v12632_v23, %v12631_v26  ;;  %v12637_v20 = vld [vmem:[#allocation243_spill] sm:$0xff]  ;;  %v12655_v26 = vld [vmem:[#allocation268_spill] sm:$0xff]  ;;  %v11685_v3 = vmov 0.0|0.0  }
 0x3d8   : > { %12624 = vst [vmem:[#allocation85_spill] sm:$0xff] %v8462_v1  ;;  %v8475_v0 = vadd.f32 %v2184_v40, %v12633_v45  ;;  %vm3209_vm15 = vcmp.eq.f32.partialorder %v12637_v20, %v12636_v50  ;;  %v12641_v40 = vld [vmem:[#allocation21_spill] sm:$0xff]  ;;  %v12644_v20 = vld [vmem:[#allocation24_spill] sm:$0xff]  ;;  %vm2289_vm7 = vcmp.eq.f32.partialorder %v12655_v26, %v7811_v51  ;;  %v12661_v26 = vld [vmem:[#allocation27_spill] sm:$0xff]  ;;  %4884 = vmatprep.subr.bf16.mxu0 %v11685_v3 }
 0x3d9   : > { %2974 = vadd.xlane.f32.xlu0 %v4766_v34  ;;  %2976 = vadd.xlane.f32.xlu1 %v4767_v56  ;;  %v8477_v42 = vpop.xlane.xlu0 %2273  ;;  %v4784_v34 = vsel %vm3208_vm11, 1.0, %v11821_v36  ;;  %v4785_v27 = vsel %vm3209_vm15, 1.0, %v11821_v36  ;;  %v12642_v56 = vld [vmem:[#allocation93_spill] sm:$0xff]  ;;  %v12653_v50 = vld [vmem:[#allocation204_spill] sm:$0xff] }
 0x3da   : > { %12634 = vst [vmem:[#allocation262_spill] sm:$0xff] %v8475_v0  ;;  %12635 = vst [vmem:[#allocation117_spill] sm:$0xff] %v8477_v42  ;;  %v8481_v6 = vpop.xlane.xlu1 %2275  ;;  %vm12643_vm8 = vcmp.eq.f32.partialorder %v12641_v40, %v12642_v56  ;;  %v12645_v0 = vld [vmem:[#allocation99_spill] sm:$0xff]  ;;  %v12652_v40 = vld [vmem:[#allocation116_spill] sm:$0xff]  ;;  %4914 = vmatprep.subr.bf16.mxu1 %v11685_v3 }
 0x3db   : > { %12638 = vst [vmem:[#allocation296_spill] sm:$0xff] %v8481_v6  ;;  %v4808_v45 = vsel %vm12643_vm8, 1.0, %v11821_v36  ;;  %vm12646_vm1 = vcmp.eq.f32.partialorder %v12644_v20, %v12645_v0  ;;  %vm12654_vm4 = vcmp.eq.f32.partialorder %v12652_v40, %v12653_v50  ;;  %v12657_v20 = vld [vmem:[#allocation269_spill] sm:$0xff]  ;;  %v12671_v50 = vld [vmem:[#allocation255_spill] sm:$0xff]  ;;  %vm11726_vm13 = vcmp.gt.f32.partialorder %v12645_v0, -inf }
 0x3dc   : > { %v4809_v6 = vsel %vm12646_vm1, 1.0, %v11821_v36  ;;  %vm2290_vm9 = vcmp.eq.f32.partialorder %v12657_v20, %v7817_v13  ;;  %v12664_v20 = vld [vmem:[#allocation30_spill] sm:$0xff]  ;;  %v12665_v13 = vld [vmem:[#allocation12_spill] sm:$0xff]  ;;  %v12667_v51 = vld [vmem:[#allocation213_spill] sm:$0xff] }
 0x3dd   : > { %3270 = vadd.xlane.f32.xlu0 %v4784_v34  ;;  %3272 = vadd.xlane.f32.xlu1 %v4785_v27  ;;  %v8485_v1 = vpop.xlane.xlu0 %4111  ;;  %v12649_v27 = vld [vmem:[#allocation109_spill] sm:$0xff]  ;;  %vm12666_vm15 = vcmp.eq.f32.partialorder %v12664_v20, %v12665_v13  ;;  %v12683_v3 = vld [vmem:[#allocation263_spill] sm:$0xff] }
 0x3de   : > { %12639 = vst [vmem:[#allocation265_spill] sm:$0xff] %v8485_v1  ;;  %v8487_v23 = vpop.xlane.xlu1 %4113  ;;  %v12650_v1 = vld [vmem:[#allocation198_spill] sm:$0xff] }
 0x3df   : > { %12640 = vst [vmem:[#allocation270_spill] sm:$0xff] %v8487_v23  ;;  %vm12651_vm3 = vcmp.eq.f32.partialorder %v12649_v27, %v12650_v1  ;;  %v4726_v27 = vsel %vm2289_vm7, 1.0, %v11821_v36 }
 0x3e0   : > { %v4826_v23 = vsel %vm12651_vm3, 1.0, %v11821_v36 }
 0x3e1   : > { %3599 = vadd.xlane.f32.xlu0 %v4808_v45  ;;  %3601 = vadd.xlane.f32.xlu1 %v4809_v6  ;;  %v8497_v34 = vpop.xlane.xlu0 %3194  ;;  %v4827_v45 = vsel %vm12654_vm4, 1.0, %v11821_v36 }
 0x3e2   : > { %12647 = vst [vmem:[#allocation224_spill] sm:$0xff] %v8497_v34  ;;  %v8499_v42 = vpop.xlane.xlu1 %3196 }
 0x3e3   : > { %12648 = vst [vmem:[#allocation273_spill] sm:$0xff] %v8499_v42 }
 0x3e5   : > { %3895 = vadd.xlane.f32.xlu0 %v4826_v23  ;;  %3897 = vadd.xlane.f32.xlu1 %v4827_v45  ;;  %v8511_v6 = vpop.xlane.xlu0 %2277  ;;  %v4727_v23 = vsel %vm2290_vm9, 1.0, %v11821_v36  ;;  %v12662_v45 = vld [vmem:[#allocation104_spill] sm:$0xff]  ;;  %vm3211_vm9 = vcmp.eq.f32.partialorder %v12683_v3, %v7769_v46 }
 0x3e6   : > { %12656 = vst [vmem:[#allocation106_spill] sm:$0xff] %v8511_v6  ;;  %v8515_v42 = vpop.xlane.xlu1 %2279  ;;  %vm12663_vm11 = vcmp.eq.f32.partialorder %v12661_v26, %v12662_v45  ;;  %v12690_v3 = vld [vmem:[#allocation32_spill] sm:$0xff]  ;;  %vm2714_vm5 = vcmp.gt.f32.partialorder %v12662_v45, -inf }
 0x3e7   : > { %12658 = vst [vmem:[#allocation297_spill] sm:$0xff] %v8515_v42  ;;  %v4750_v6 = vsel %vm12663_vm11, 1.0, %v11821_v36  ;;  %v4751_v42 = vsel %vm12666_vm15, 1.0, %v11821_v36  ;;  %vm2706_vm15 = vcmp.gt.f32.partialorder %v12407_v47, -inf  ;;  %v12699_v46 = vld [vmem:[#allocation216_spill] sm:$0xff] }
 0x3e9   : > { %2353 = vadd.xlane.f32.xlu0 %v4726_v27  ;;  %2355 = vadd.xlane.f32.xlu1 %v4727_v23  ;;  %v8519_v34 = vpop.xlane.xlu0 %4115  ;;  %v12668_v27 = vld [vmem:[#allocation254_spill] sm:$0xff] }
 0x3ea   : > { %12659 = vst [vmem:[#allocation112_spill] sm:$0xff] %v8519_v34  ;;  %v8521_v40 = vpop.xlane.xlu1 %4117  ;;  %vm4129_vm8 = vcmp.eq.f32.partialorder %v12668_v27, %v12667_v51  ;;  %v12670_v34 = vld [vmem:[#allocation326_spill] sm:$0xff] }
 0x3eb   : > { %12660 = vst [vmem:[#allocation123_spill] sm:$0xff] %v8521_v40  ;;  %vm4130_vm1 = vcmp.eq.f32.partialorder %v12671_v50, %v12670_v34  ;;  %v4844_v26 = vsel %vm4129_vm8, 1.0, %v11821_v36  ;;  %v12675_v27 = vld [vmem:[#allocation118_spill] sm:$0xff]  ;;  %v12679_v34 = vld [vmem:[#allocation215_spill] sm:$0xff]  ;;  %vm3627_vm8 = vcmp.gt.f32.partialorder %v12417_v43, -inf }
 0x3ec   : > { %v12676_v50 = vld [vmem:[#allocation54_spill] sm:$0xff] }
 0x3ed   : > { %2682 = vadd.xlane.f32.xlu0 %v4750_v6  ;;  %2684 = vadd.xlane.f32.xlu1 %v4751_v42  ;;  %v8533_v23 = vpop.xlane.xlu0 %3198  ;;  %v4845_v6 = vsel %vm4130_vm1, 1.0, %v11821_v36  ;;  %vm12677_vm3 = vcmp.eq.f32.partialorder %v12675_v27, %v12676_v50 }
 0x3ee   : > { %12669 = vst [vmem:[#allocation313_spill] sm:$0xff] %v8533_v23  ;;  %v8537_v40 = vpop.xlane.xlu1 %3200  ;;  %v12678_v23 = vld [vmem:[#allocation25_spill] sm:$0xff] }
 0x3ef   : > { %12672 = vst [vmem:[#allocation272_spill] sm:$0xff] %v8537_v40  ;;  %v4768_v40 = vsel %vm12677_vm3, 1.0, %v11821_v36  ;;  %vm12680_vm4 = vcmp.eq.f32.partialorder %v12678_v23, %v12679_v34  ;;  %vm2707_vm3 = vcmp.gt.f32.partialorder %v12409_v32, -inf  ;;  %v12701_v34 = vld [vmem:[#allocation287_spill] sm:$0xff] }
 0x3f0   : > { %v4769_v51 = vsel %vm12680_vm4, 1.0, %v11821_v36  ;;  %vm3628_vm4 = vcmp.gt.f32.partialorder %v12421_v57, -inf  ;;  %vm2291_vm6 = vcmp.eq.f32.partialorder %v12701_v34, %v7961_v60 }
 0x3f1   : > { %4191 = vadd.xlane.f32.xlu0 %v4844_v26  ;;  %4193 = vadd.xlane.f32.xlu1 %v4845_v6  ;;  %v8543_v20 = vpop.xlane.xlu0 %2281  ;;  %v12681_v26 = vld [vmem:[#allocation261_spill] sm:$0xff] }
 0x3f2   : > { %12673 = vst [vmem:[#allocation277_spill] sm:$0xff] %v8543_v20  ;;  %v8545_v42 = vpop.xlane.xlu1 %2283  ;;  %vm3210_vm7 = vcmp.eq.f32.partialorder %v12681_v26, %v7767_v54  ;;  %v12687_v26 = vld [vmem:[#allocation29_spill] sm:$0xff] }
 0x3f3   : > { %12674 = vst [vmem:[#allocation284_spill] sm:$0xff] %v8545_v42  ;;  %v4786_v27 = vsel %vm3210_vm7, 1.0, %v11821_v36  ;;  %vm2708_vm7 = vcmp.gt.f32.partialorder %v12425_v10, -inf }
 0x3f5   : > { %2978 = vadd.xlane.f32.xlu0 %v4768_v40  ;;  %2980 = vadd.xlane.f32.xlu1 %v4769_v51  ;;  %v8557_v6 = vpop.xlane.xlu0 %4119  ;;  %v4787_v40 = vsel %vm3211_vm9, 1.0, %v11821_v36  ;;  %v12688_v51 = vld [vmem:[#allocation107_spill] sm:$0xff] }
 0x3f6   : > { %12682 = vst [vmem:[#allocation285_spill] sm:$0xff] %v8557_v6  ;;  %v8561_v42 = vpop.xlane.xlu1 %4121  ;;  %vm12689_vm11 = vcmp.eq.f32.partialorder %v12687_v26, %v12688_v51  ;;  %v2766_v26 = vsel %vm2706_vm15, %v12407_v47, 0.0 }
 0x3f7   : > { %12684 = vst [vmem:[#allocation16_spill] sm:$0xff] %v8561_v42  ;;  %v4810_v6 = vsel %vm12689_vm11, 1.0, %v11821_v36  ;;  %vm3629_vm11 = vcmp.gt.f32.partialorder %v12443_v22, -inf }
 0x3f8   : > { %v8621_v34 = vsel %vm3629_vm11, %v12443_v22, 0.0 }
 0x3f9   : > { %3274 = vadd.xlane.f32.xlu0 %v4786_v27  ;;  %3276 = vadd.xlane.f32.xlu1 %v4787_v40  ;;  %v8565_v20 = vpop.xlane.xlu0 %3202  ;;  %v12691_v27 = vld [vmem:[#allocation110_spill] sm:$0xff] }
 0x3fa   : > { %12685 = vst [vmem:[#allocation86_spill] sm:$0xff] %v8565_v20  ;;  %v8567_v23 = vpop.xlane.xlu1 %3204  ;;  %vm12692_vm1 = vcmp.eq.f32.partialorder %v12690_v3, %v12691_v27  ;;  %v12695_v3 = vld [vmem:[#allocation121_spill] sm:$0xff]  ;;  %v12696_v20 = vld [vmem:[#allocation210_spill] sm:$0xff] }
 0x3fb   : > { %12686 = vst [vmem:[#allocation314_spill] sm:$0xff] %v8567_v23  ;;  %v4811_v42 = vsel %vm12692_vm1, 1.0, %v11821_v36  ;;  %vm12697_vm9 = vcmp.eq.f32.partialorder %v12695_v3, %v12696_v20  ;;  %v12702_v20 = vld [vmem:[#allocation288_spill] sm:$0xff] }
 0x3fc   : > { %v4828_v27 = vsel %vm12697_vm9, 1.0, %v11821_v36  ;;  %vm2709_vm9 = vcmp.gt.f32.partialorder %v12427_v15, -inf  ;;  %vm2292_vm2 = vcmp.eq.f32.partialorder %v12702_v20, %v7969_v28  ;;  %v4728_v20 = vsel %vm2291_vm6, 1.0, %v11821_v36 }
 0x3fd   : > { %3603 = vadd.xlane.f32.xlu0 %v4810_v6  ;;  %3605 = vadd.xlane.f32.xlu1 %v4811_v42  ;;  %v8581_v40 = vpop.xlane.xlu0 %4123  ;;  %v3687_v6 = vsel %vm3627_vm8, %v12417_v43, 0.0  ;;  %v2767_v42 = vsel %vm2707_vm3, %v12409_v32, 0.0  ;;  %v2769_v28 = vsel %vm2709_vm9, %v12427_v15, 0.0  ;;  %v4729_v50 = vsel %vm2292_vm2, 1.0, %v11821_v36 }
 0x3fe   : > { %12693 = vst [vmem:[#allocation276_spill] sm:$0xff] %v8581_v40  ;;  %v8583_v23 = vpop.xlane.xlu1 %4125  ;;  %v12698_v40 = vld [vmem:[#allocation126_spill] sm:$0xff]  ;;  %vm2712_vm2 = vcmp.gt.f32.partialorder %v12604_v30, -inf  ;;  %vm3633_vm6 = vcmp.gt.f32.partialorder %v12642_v56, -inf }
 0x3ff   : > { %12694 = vst [vmem:[#allocation13_spill] sm:$0xff] %v8583_v23  ;;  %v3688_v23 = vsel %vm3628_vm4, %v12421_v57, 0.0  ;;  %vm12700_vm1 = vcmp.eq.f32.partialorder %v12698_v40, %v12699_v46 }
 0x400   : > { %v4829_v54 = vsel %vm12700_vm1, 1.0, %v11821_v36  ;;  %vm11714_vm1 = vcmp.gt.f32.partialorder %v12551_v52, -inf }
 0x401   : > { %3899 = vadd.xlane.f32.xlu0 %v4828_v27  ;;  %3901 = vadd.xlane.f32.xlu1 %v4829_v54  ;;  %v2667_v3 = vpop.xlane.xlu0 %2666  ;;  %v2768_v27 = vsel %vm2708_vm7, %v12425_v10, 0.0  ;;  %v8647_v1 = vsel %vm11714_vm1, %v12551_v52, 0.0 }
 0x402   : > { %v2726_v40 = vmin.f32 %v2667_v3, 3.0  ;;  %v2669_v46 = vpop.xlane.xlu1 %2668  ;;  %v8632_v3 = vsel %vm3630_vm0, %v12448_v35, 0.0 }
 0x403   : > { %v2727_v54 = vmin.f32 %v2669_v46, 3.0  ;;  %v8642_v46 = vsel %vm2710_vm14, %v12494_v37, 0.0 }
 0x404   : > { %v8636_v60 = vsel %vm2706_vm15, %v2726_v40, 0.0 }
 0x405   : > { %2357 = vadd.xlane.f32.xlu0 %v4728_v20  ;;  %v8650_v31 = vmul.f32 %v2766_v26, %v8636_v60  ;;  %v8654_v47 = vsel %vm2707_vm3, %v2727_v54, 0.0  ;;  %2359 = vadd.xlane.f32.xlu1 %v4729_v50  ;;  %v3588_v40 = vpop.xlane.xlu0 %3587  ;;  %v8659_v20 = vsel %vm2711_vm12, %v12486_v7, 0.0  ;;  %v12703_v50 = vld [vmem:[#allocation33_spill] sm:$0xff]  ;;  %vm2713_vm3 = vcmp.gt.f32.partialorder %v12593_v63, -inf }
 0x406   : > { %v8667_v33 = vmul.f32 %v2767_v42, %v8654_v47  ;;  %v3647_v26 = vmin.f32 %v3588_v40, 3.0  ;;  %v3590_v59 = vpop.xlane.xlu1 %3589  ;;  %v12704_v54 = vld [vmem:[#allocation17_spill] sm:$0xff]  ;;  %v12706_v40 = vld [vmem:[#allocation35_spill] sm:$0xff]  ;;  %v8708_v57 = vsel %vm2713_vm3, %v12593_v63, 0.0  ;;  %v2827_v10 = vsub.f32 3.0, %v8654_v47 }
 0x407   : > { %v3648_v32 = vmin.f32 %v3590_v59, 3.0  ;;  %vm12705_vm15 = vcmp.eq.f32.partialorder %v12703_v50, %v12704_v54  ;;  %vm12708_vm1 = vcmp.eq.f32.partialorder %v12706_v40, %v12707_v11  ;;  %v12709_v59 = vld [vmem:[#allocation274_spill] sm:$0xff]  ;;  %12712 = vst [vmem:[#allocation282_spill] sm:$0xff] %v8708_v57  ;;  %v12775_v7 = vld [vmem:[#allocation141_spill] sm:$0xff] }
 0x408   : > { %v4752_v44 = vsel %vm12705_vm15, 1.0, %v11821_v36  ;;  %v8679_v42 = vsel %vm3627_vm8, %v3647_v26, 0.0  ;;  %v4753_v17 = vsel %vm12708_vm1, 1.0, %v11821_v36  ;;  %vm4131_vm10 = vcmp.eq.f32.partialorder %v12709_v59, %v7841_v58  ;;  %v12906_v63 = vld [vmem:[#allocation149_spill] sm:$0xff] }
 0x409   : > { %2686 = vadd.xlane.f32.xlu0 %v4752_v44  ;;  %v8689_v50 = vmul.f32 %v3687_v6, %v8679_v42  ;;  %v8693_v49 = vsel %vm3628_vm4, %v3648_v32, 0.0  ;;  %2688 = vadd.xlane.f32.xlu1 %v4753_v17  ;;  %v2671_v43 = vpop.xlane.xlu0 %2670  ;;  %v12710_v44 = vld [vmem:[#allocation275_spill] sm:$0xff]  ;;  %v8700_v26 = vsel %vm2712_vm2, %v12604_v30, 0.0  ;;  %v8713_v17 = vsel %vm3633_vm6, %v12642_v56, 0.0  ;;  %v12719_v56 = vld [vmem:[#allocation136_spill] sm:$0xff] }
 0x40a   : > { %vm4132_vm8 = vcmp.eq.f32.partialorder %v12710_v44, %v7843_v4  ;;  %12711 = vst [vmem:[#allocation80_spill] sm:$0xff] %v8700_v26  ;;  %v8703_v40 = vmul.f32 %v3688_v23, %v8693_v49  ;;  %v2728_v59 = vmin.f32 %v2671_v43, 3.0  ;;  %v2673_v6 = vpop.xlane.xlu1 %2672  ;;  %12713 = vst [vmem:[#allocation127_spill] sm:$0xff] %v8713_v17  ;;  %v4846_v44 = vsel %vm4131_vm10, 1.0, %v11821_v36 }
 0x40b   : > { %v2729_v32 = vmin.f32 %v2673_v6, 3.0  ;;  %v8719_v23 = vsel %vm11726_vm13, %v12645_v0, 0.0  ;;  %v8724_v43 = vsel %vm2714_vm5, %v12662_v45, 0.0  ;;  %v4847_v17 = vsel %vm4132_vm8, 1.0, %v11821_v36  ;;  %v12722_v45 = vld [vmem:[#allocation281_spill] sm:$0xff] }
 0x40c   : > { %12714 = vst [vmem:[#allocation157_spill] sm:$0xff] %v8719_v23  ;;  %12715 = vst [vmem:[#allocation289_spill] sm:$0xff] %v8724_v43  ;;  %v8728_v4 = vsel %vm2708_vm7, %v2728_v59, 0.0  ;;  %v2826_v6 = vsub.f32 3.0, %v8636_v60  ;;  %vm3006_vm10 = vcmp.gt.f32.partialorder %v12433_v12, -inf  ;;  %vm3007_vm4 = vcmp.gt.f32.partialorder %v12436_v39, -inf }
 0x40d   : > { %4195 = vadd.xlane.f32.xlu0 %v4846_v44  ;;  %v8734_v58 = vmul.f32 %v2768_v27, %v8728_v4  ;;  %v8738_v23 = vsel %vm2709_vm9, %v2729_v32, 0.0  ;;  %4197 = vadd.xlane.f32.xlu1 %v4847_v17  ;;  %v2967_v0 = vpop.xlane.xlu0 %2966  ;;  %vm11736_vm7 = vcmp.gt.f32.partialorder %v12688_v51, -inf  ;;  %vm2715_vm1 = vcmp.gt.f32.partialorder %v12665_v13, -inf  ;;  %v12716_v17 = vld [vmem:[#allocation128_spill] sm:$0xff]  ;;  %v12717_v32 = vld [vmem:[#allocation69_spill] sm:$0xff] }
 0x40e   : > { %v8743_v59 = vmul.f32 %v2769_v28, %v8738_v23  ;;  %v3026_v44 = vmin.f32 %v2967_v0, %v2826_v6  ;;  %v2969_v60 = vpop.xlane.xlu1 %2968  ;;  %v3066_v15 = vsel %vm3006_vm10, %v12433_v12, 0.0  ;;  %vm12718_vm9 = vcmp.eq.f32.partialorder %v12716_v17, %v12717_v32  ;;  %v12720_v43 = vld [vmem:[#allocation228_spill] sm:$0xff] }
 0x40f   : > { %v3027_v27 = vmin.f32 %v2969_v60, %v2827_v10  ;;  %v4770_v47 = vsel %vm12718_vm9, 1.0, %v11821_v36  ;;  %vm11744_vm15 = vcmp.gt.f32.partialorder %v12704_v54, -inf  ;;  %v3067_v0 = vsel %vm3007_vm4, %v12436_v39, 0.0 }
 0x410   : > { %v3046_v28 = vsel %vm3006_vm10, %v3026_v44, 0.0  ;;  %vm12721_vm8 = vcmp.eq.f32.partialorder %v12719_v56, %v12720_v43  ;;  %vm3212_vm13 = vcmp.eq.f32.partialorder %v12722_v45, %v7915_v9  ;;  %v12723_v44 = vld [vmem:[#allocation283_spill] sm:$0xff]  ;;  %v8777_v56 = vsel %vm11736_vm7, %v12688_v51, 0.0 }
 0x411   : > { %2982 = vadd.xlane.f32.xlu0 %v4770_v47  ;;  %v4771_v60 = vsel %vm12721_vm8, 1.0, %v11821_v36  ;;  %v3086_v17 = vmul.f32 %v3066_v15, %v3046_v28  ;;  %v3047_v32 = vsel %vm3007_vm4, %v3027_v27, 0.0  ;;  %v3592_v12 = vpop.xlane.xlu0 %3591  ;;  %vm3213_vm10 = vcmp.eq.f32.partialorder %v12723_v44, %v7917_v41  ;;  %12724 = vst [vmem:[#allocation101_spill] sm:$0xff] %v8777_v56  ;;  %v12752_v41 = vld [vmem:[#allocation164_spill] sm:$0xff] }
 0x412   : > { %2984 = vadd.xlane.f32.xlu1 %v4771_v60  ;;  %v8770_v26 = vsub.f32 %v2826_v6, %v3046_v28  ;;  %v3087_v47 = vmul.f32 %v3067_v0, %v3047_v32  ;;  %v3649_v30 = vmin.f32 %v3592_v12, 3.0  ;;  %v3594_v38 = vpop.xlane.xlu1 %3593  ;;  %v8772_v57 = vsub.f32 %v2827_v10, %v3047_v32  ;;  %v12727_v0 = vld [vmem:[#allocation166_spill] sm:$0xff]  ;;  %v12729_v12 = vld [vmem:[#allocation115_spill] sm:$0xff] }
 0x413   : > { %v8780_v39 = vadd.f32 %v3086_v17, %v8650_v31  ;;  %v3650_v45 = vmin.f32 %v3594_v38, 3.0  ;;  %v4788_v15 = vsel %vm3212_vm13, 1.0, %v11821_v36  ;;  %v8786_v6 = vsel %vm2715_vm1, %v12665_v13, 0.0  ;;  %v12728_v17 = vld [vmem:[#allocation34_spill] sm:$0xff] }
 0x414   : > { %12725 = vst [vmem:[#allocation133_spill] sm:$0xff] %v8786_v6  ;;  %v8789_v27 = vadd.f32 %v3087_v47, %v8667_v33  ;;  %v8793_v10 = vsel %vm3629_vm11, %v3649_v30, 0.0  ;;  %v4789_v32 = vsel %vm3213_vm10, 1.0, %v11821_v36  ;;  %v8799_v38 = vsel %vm11744_vm15, %v12704_v54, 0.0  ;;  %v12731_v47 = vld [vmem:[#allocation36_spill] sm:$0xff] }
 0x415   : > { %3278 = vadd.xlane.f32.xlu0 %v4788_v15  ;;  %12726 = vst [vmem:[#allocation301_spill] sm:$0xff] %v8799_v38  ;;  %v8803_v31 = vmul.f32 %v8621_v34, %v8793_v10  ;;  %v8807_v33 = vsel %vm3630_vm0, %v3650_v45, 0.0  ;;  %vm1464_vm13 = vcmp.gt.f32.partialorder %v7489_v55, -inf  ;;  %v1425_v22 = vpop.xlane.xlu0 %1424  ;;  %v3748_v30 = vsub.f32 3.0, %v8693_v49  ;;  %v12732_v49 = vld [vmem:[#allocation119_spill] sm:$0xff]  ;;  %v12735_v15 = vld [vmem:[#allocation20_spill] sm:$0xff] }
 0x416   : > { %3280 = vadd.xlane.f32.xlu1 %v4789_v32  ;;  %v8813_v28 = vmul.f32 %v8632_v3, %v8807_v33  ;;  %v1484_v60 = vmin.f32 %v1425_v22, %v12727_v0  ;;  %vm3928_vm11 = vcmp.gt.f32.partialorder %v12456_v61, -inf  ;;  %v3890_v34 = vpop.xlane.xlu1 %3889  ;;  %vm3927_vm4 = vcmp.gt.f32.partialorder %v12464_v53, -inf  ;;  %v12734_v3 = vld [vmem:[#allocation37_spill] sm:$0xff] }
 0x417   : > { %v3948_v35 = vmin.f32 %v3890_v34, %v3748_v30  ;;  %vm12730_vm0 = vcmp.eq.f32.partialorder %v12728_v17, %v12729_v12  ;;  %vm12733_vm9 = vcmp.eq.f32.partialorder %v12731_v47, %v12732_v49  ;;  %vm12736_vm8 = vcmp.eq.f32.partialorder %v12734_v3, %v12735_v15 }
 0x418   : > { %v4812_v44 = vsel %vm12730_vm0, 1.0, %v11821_v36  ;;  %v4813_v45 = vsel %vm12733_vm9, 1.0, %v11821_v36  ;;  %v8830_v32 = vsel %vm12736_vm8, 1.0, %v11821_v36  ;;  %v1524_v22 = vsel %vm1464_vm13, %v7489_v55, 0.0  ;;  %v12737_v55 = vld [vmem:[#allocation131_spill] sm:$0xff] }
 0x419   : > { %v1504_v0 = vsel %vm1464_vm13, %v1484_v60, 0.0  ;;  %3607 = vadd.xlane.f32.xlu0 %v4812_v44  ;;  %v3747_v34 = vsub.f32 3.0, %v8679_v42  ;;  %vm1465_vm10 = vcmp.gt.f32.partialorder %v7495_v62, -inf  ;;  %v3988_v12 = vsel %vm3928_vm11, %v12456_v61, 0.0  ;;  %v3888_v3 = vpop.xlane.xlu0 %3887  ;;  %v12738_v60 = vld [vmem:[#allocation221_spill] sm:$0xff] }
 0x41a   : > { %v1544_v17 = vmul.f32 %v1524_v22, %v1504_v0  ;;  %v3968_v56 = vsel %vm3928_vm11, %v3948_v35, 0.0  ;;  %3609 = vadd.xlane.f32.xlu1 %v4813_v45  ;;  %v3987_v47 = vsel %vm3927_vm4, %v12464_v53, 0.0  ;;  %v1427_v51 = vpop.xlane.xlu1 %1426  ;;  %vm12739_vm13 = vcmp.eq.f32.partialorder %v12737_v55, %v12738_v60  ;;  %v12740_v22 = vld [vmem:[#allocation169_spill] sm:$0xff]  ;;  %v12741_v35 = vld [vmem:[#allocation168_spill] sm:$0xff]  ;;  %v12750_v53 = vld [vmem:[#allocation199_spill] sm:$0xff] }
 0x41b   : > { %v4008_v49 = vmul.f32 %v3988_v12, %v3968_v56  ;;  %v3947_v15 = vmin.f32 %v3888_v3, %v3747_v34  ;;  %v4830_v42 = vsel %vm12739_vm13, 1.0, %v11821_v36  ;;  %v8843_v44 = vsub.f32 %v3748_v30, %v3968_v56  ;;  %v12742_v12 = vld [vmem:[#allocation138_spill] sm:$0xff]  ;;  %v12743_v3 = vld [vmem:[#allocation231_spill] sm:$0xff]  ;;  %v12747_v55 = vld [vmem:[#allocation304_spill] sm:$0xff] }
 0x41c   : > { %v8846_v0 = vadd.f32 %v1544_v17, %v12740_v22  ;;  %v1525_v61 = vsel %vm1465_vm10, %v7495_v62, 0.0  ;;  %v1485_v45 = vmin.f32 %v1427_v51, %v12741_v35  ;;  %vm12744_vm11 = vcmp.eq.f32.partialorder %v12742_v12, %v12743_v3  ;;  %v12745_v30 = vld [vmem:[#allocation179_spill] sm:$0xff]  ;;  %v12748_v12 = vld [vmem:[#allocation57_spill] sm:$0xff] }
 0x41d   : > { %v4831_v38 = vsel %vm12744_vm11, 1.0, %v11821_v36  ;;  %v8857_v54 = vadd.f32 %v4008_v49, %v8703_v40  ;;  %v3967_v56 = vsel %vm3927_vm4, %v3947_v15, 0.0  ;;  %3903 = vadd.xlane.f32.xlu0 %v4830_v42  ;;  %vm1466_vm0 = vcmp.gt.f32.partialorder %v12745_v30, -inf  ;;  %v12746_v17 = vld [vmem:[#allocation75_spill] sm:$0xff]  ;;  %v1429_v35 = vpop.xlane.xlu0 %1428  ;;  %v12749_v3 = vld [vmem:[#allocation305_spill] sm:$0xff] }
 0x41e   : > { %vm2293_vm9 = vcmp.eq.f32.partialorder %v12747_v55, %v12746_v17  ;;  %v4007_v22 = vmul.f32 %v3987_v47, %v3967_v56  ;;  %v1505_v51 = vsel %vm1465_vm10, %v1485_v45, 0.0  ;;  %3905 = vadd.xlane.f32.xlu1 %v4831_v38  ;;  %vm2294_vm8 = vcmp.eq.f32.partialorder %v12749_v3, %v12748_v12  ;;  %v12751_v42 = vld [vmem:[#allocation173_spill] sm:$0xff]  ;;  %v2348_v60 = vpop.xlane.xlu1 %2347  ;;  %v12753_v38 = vld [vmem:[#allocation191_spill] sm:$0xff] }
 0x41f   : > { %v8868_v40 = vsub.f32 %v3747_v34, %v3967_v56  ;;  %v1545_v49 = vmul.f32 %v1525_v61, %v1505_v51  ;;  %v1486_v15 = vmin.f32 %v1429_v35, %v12750_v53  ;;  %vm2386_vm4 = vcmp.gt.f32.partialorder %v12751_v42, -inf  ;;  %v12754_v3 = vld [vmem:[#allocation177_spill] sm:$0xff]  ;;  %v12755_v51 = vld [vmem:[#allocation187_spill] sm:$0xff] }
 0x420   : > { %vm2385_vm13 = vcmp.gt.f32.partialorder %v12752_v41, -inf  ;;  %v8874_v47 = vadd.f32 %v4007_v22, %v8689_v50  ;;  %v1526_v62 = vsel %vm1466_vm0, %v12745_v30, 0.0  ;;  %v2406_v45 = vmin.f32 %v2348_v60, %v12753_v38  ;;  %v12756_v12 = vld [vmem:[#allocation51_spill] sm:$0xff] }
 0x421   : > { %v4730_v34 = vsel %vm2293_vm9, 1.0, %v11821_v36  ;;  %v1565_v61 = vadd.f32 %v1545_v49, %v12754_v3  ;;  %v1506_v56 = vsel %vm1466_vm0, %v1486_v15, 0.0  ;;  %v4731_v55 = vsel %vm2294_vm8, 1.0, %v11821_v36  ;;  %v2346_v53 = vpop.xlane.xlu0 %2345  ;;  %v12757_v30 = vld [vmem:[#allocation183_spill] sm:$0xff]  ;;  %v12759_v3 = vld [vmem:[#allocation124_spill] sm:$0xff] }
 0x422   : > { %2361 = vadd.xlane.f32.xlu0 %v4730_v34  ;;  %vm1467_vm10 = vcmp.gt.f32.partialorder %v12755_v51, -inf  ;;  %v1546_v50 = vmul.f32 %v1526_v62, %v1506_v56  ;;  %v2446_v22 = vsel %vm2386_vm4, %v12751_v42, 0.0  ;;  %v2426_v35 = vsel %vm2386_vm4, %v2406_v45, 0.0  ;;  %2363 = vadd.xlane.f32.xlu1 %v4731_v55  ;;  %v1431_v38 = vpop.xlane.xlu1 %1430  ;;  %v12758_v34 = vld [vmem:[#allocation39_spill] sm:$0xff]  ;;  %v12761_v56 = vld [vmem:[#allocation189_spill] sm:$0xff]  ;;  %v12762_v45 = vld [vmem:[#allocation2_spill] sm:$0xff] }
 0x423   : > { %vm1468_vm11 = vcmp.gt.f32.partialorder %v12756_v12, -inf  ;;  %v2466_v60 = vmul.f32 %v2446_v22, %v2426_v35  ;;  %v2445_v49 = vsel %vm2385_vm13, %v12752_v41, 0.0  ;;  %v2405_v15 = vmin.f32 %v2346_v53, %v12757_v30  ;;  %v12763_v22 = vld [vmem:[#allocation202_spill] sm:$0xff]  ;;  %v12764_v17 = vld [vmem:[#allocation175_spill] sm:$0xff]  ;;  %v12768_v41 = vld [vmem:[#allocation293_spill] sm:$0xff] }
 0x424   : > { %vm12760_vm0 = vcmp.eq.f32.partialorder %v12758_v34, %v12759_v3  ;;  %v8897_v42 = vadd.f32 %v1546_v50, %v12761_v56  ;;  %vm11753_vm9 = vcmp.eq.s32.totalorder %v12762_v45, 1  ;;  %v1527_v55 = vsel %vm1467_vm10, %v12755_v51, 0.0  ;;  %v12765_v30 = vld [vmem:[#allocation362_spill] sm:$0xff]  ;;  %v12766_v34 = vld [vmem:[#allocation292_spill] sm:$0xff]  ;;  %v12769_v3 = vld [vmem:[#allocation219_spill] sm:$0xff] }
 0x425   : > { %v4755_v62 = vsel %vm12760_vm0, 1.0, %v11821_v36  ;;  %v1487_v35 = vmin.f32 %v1431_v38, %v12763_v22  ;;  %v2486_v9 = vadd.f32 %v2466_v60, %v12764_v17  ;;  %v2425_v53 = vsel %vm2385_vm13, %v2405_v15, 0.0  ;;  %v1433_v17 = vpop.xlane.xlu0 %1432  ;;  %v12767_v60 = vld [vmem:[#allocation363_spill] sm:$0xff] }
 0x426   : > { %2690 = vadd.xlane.f32.xlu0 %v8830_v32  ;;  %v1528_v50 = vsel %vm1468_vm11, %v12756_v12, 0.0  ;;  %vm4133_vm8 = vcmp.eq.f32.partialorder %v12766_v34, %v12765_v30  ;;  %vm1584_vm4 = vcmp.eq.s32.totalorder %v12762_v45, 0  ;;  %v2465_v56 = vmul.f32 %v2445_v49, %v2425_v53  ;;  %2692 = vadd.xlane.f32.xlu1 %v4755_v62  ;;  %v2677_v30 = vpop.xlane.xlu1 %2676  ;;  %v12770_v49 = vld [vmem:[#allocation165_spill] sm:$0xff]  ;;  %v12771_v53 = vld [vmem:[#allocation188_spill] sm:$0xff] }
 0x427   : > { %v1507_v38 = vsel %vm1467_vm10, %v1487_v35, 0.0  ;;  %vm4134_vm13 = vcmp.eq.f32.partialorder %v12768_v41, %v12767_v60  ;;  %v1586_v32 = vsel %vm1584_vm4, %v1565_v61, 0.0  ;;  %v2507_v15 = vsel %vm11753_vm9, %v2486_v9, 0.0 }
 0x428   : > { %v1547_v22 = vmul.f32 %v1527_v55, %v1507_v38  ;;  %v1488_v34 = vmin.f32 %v1433_v17, %v12769_v3  ;;  %v8923_v43 = vadd.f32 %v2507_v15, %v1586_v32  ;;  %v2485_v51 = vadd.f32 %v2465_v56, %v12770_v49  ;;  %v12772_v55 = vld [vmem:[#allocation328_spill] sm:$0xff] }
 0x429   : > { %v2731_v35 = vmin.f32 %v2677_v30, 3.0  ;;  %v4848_v62 = vsel %vm4133_vm8, 1.0, %v11821_v36  ;;  %v4849_v9 = vsel %vm4134_vm13, 1.0, %v11821_v36  ;;  %vm1469_vm10 = vcmp.gt.f32.partialorder %v12772_v55, -inf  ;;  %v2675_v12 = vpop.xlane.xlu0 %2674  ;;  %v12776_v49 = vld [vmem:[#allocation88_spill] sm:$0xff] }
 0x42a   : > { %v8928_v6 = vadd.f32 %v1547_v22, %v12771_v53  ;;  %v1508_v61 = vsel %vm1468_vm11, %v1488_v34, 0.0  ;;  %4199 = vadd.xlane.f32.xlu0 %v4848_v62  ;;  %v1585_v3 = vsel %vm1584_vm4, %v8846_v0, 0.0  ;;  %v2506_v30 = vsel %vm11753_vm9, %v2485_v51, 0.0  ;;  %4201 = vadd.xlane.f32.xlu1 %v4849_v9  ;;  %v1435_v15 = vpop.xlane.xlu1 %1434  ;;  %v12773_v0 = vld [vmem:[#allocation197_spill] sm:$0xff]  ;;  %v12779_v62 = vld [vmem:[#allocation247_spill] sm:$0xff]  ;;  %v12781_v9 = vld [vmem:[#allocation346_spill] sm:$0xff] }
 0x42b   : > { %v1548_v56 = vmul.f32 %v1528_v50, %v1508_v61  ;;  %v8941_v38 = vsel %vm2711_vm12, %v2731_v35, 0.0  ;;  %v8943_v17 = vadd.f32 %v2506_v30, %v1585_v3  ;;  %v2730_v32 = vmin.f32 %v2675_v12, 3.0  ;;  %v12774_v50 = vld [vmem:[#allocation329_spill] sm:$0xff]  ;;  %v12778_v35 = vld [vmem:[#allocation151_spill] sm:$0xff]  ;;  %v12783_v30 = vld [vmem:[#allocation298_spill] sm:$0xff] }
 0x42c   : > { %v8947_v41 = vmul.f32 %v8659_v20, %v8941_v38  ;;  %vm11739_vm11 = vcmp.gt.f32.partialorder %v12707_v11, -inf  ;;  %v1489_v34 = vmin.f32 %v1435_v15, %v12774_v50  ;;  %vm12777_vm12 = vcmp.eq.f32.partialorder %v12775_v7, %v12776_v49  ;;  %v12782_v3 = vld [vmem:[#allocation5_spill] sm:$0xff]  ;;  %v12784_v15 = vld [vmem:[#allocation62_spill] sm:$0xff]  ;;  %v12786_v7 = vld [vmem:[#allocation347_spill] sm:$0xff] }
 0x42d   : > { %v8951_v22 = vadd.f32 %v1548_v56, %v12773_v0  ;;  %v4772_v51 = vsel %vm12777_vm12, 1.0, %v11821_v36  ;;  %vm12780_vm0 = vcmp.eq.f32.partialorder %v12778_v35, %v12779_v62  ;;  %v8964_v53 = vsel %vm2710_vm14, %v2730_v32, 0.0  ;;  %v1437_v37 = vpop.xlane.xlu0 %1436  ;;  %v12785_v0 = vld [vmem:[#allocation300_spill] sm:$0xff] }
 0x42e   : > { %v4773_v20 = vsel %vm12780_vm0, 1.0, %v11821_v36  ;;  %v1529_v61 = vsel %vm1469_vm10, %v12772_v55, 0.0  ;;  %2986 = vadd.xlane.f32.xlu0 %v4772_v51  ;;  %vm1470_vm8 = vcmp.gt.f32.partialorder %v12781_v9, -inf  ;;  %vm3214_vm13 = vcmp.eq.f32.partialorder %v12783_v30, %v12782_v3  ;;  %v12787_v35 = vld [vmem:[#allocation192_spill] sm:$0xff]  ;;  %v2973_v30 = vpop.xlane.xlu1 %2972 }
 0x42f   : > { %v8974_v56 = vmul.f32 %v8642_v46, %v8964_v53  ;;  %v1509_v12 = vsel %vm1469_vm10, %v1489_v34, 0.0  ;;  %2988 = vadd.xlane.f32.xlu1 %v4773_v20  ;;  %v2829_v32 = vsub.f32 3.0, %v8738_v23  ;;  %vm3215_vm14 = vcmp.eq.f32.partialorder %v12785_v0, %v12784_v15  ;;  %v12789_v20 = vld [vmem:[#allocation178_spill] sm:$0xff]  ;;  %v12791_v49 = vld [vmem:[#allocation348_spill] sm:$0xff] }
 0x430   : > { %v1549_v50 = vmul.f32 %v1529_v61, %v1509_v12  ;;  %v1490_v51 = vmin.f32 %v1437_v37, %v12786_v7  ;;  %vm3009_vm12 = vcmp.gt.f32.partialorder %v12787_v35, -inf  ;;  %v8986_v46 = vsel %vm11739_vm11, %v12707_v11, 0.0  ;;  %v12790_v61 = vld [vmem:[#allocation84_spill] sm:$0xff]  ;;  %v12795_v11 = vld [vmem:[#allocation209_spill] sm:$0xff] }
 0x431   : > { %12788 = vst [vmem:[#allocation302_spill] sm:$0xff] %v8986_v46  ;;  %v1530_v55 = vsel %vm1470_vm8, %v12781_v9, 0.0  ;;  %v3029_v34 = vmin.f32 %v2973_v30, %v2829_v32  ;;  %v4790_v23 = vsel %vm3214_vm13, 1.0, %v11821_v36  ;;  %vm3008_vm10 = vcmp.gt.f32.partialorder %v12789_v20, -inf  ;;  %v2971_v30 = vpop.xlane.xlu0 %2970  ;;  %v12793_v9 = vld [vmem:[#allocation23_spill] sm:$0xff] }
 0x432   : > { %v8994_v12 = vadd.f32 %v1549_v50, %v12790_v61  ;;  %v1510_v37 = vsel %vm1470_vm8, %v1490_v51, 0.0  ;;  %3282 = vadd.xlane.f32.xlu0 %v4790_v23  ;;  %v4791_v0 = vsel %vm3215_vm14, 1.0, %v11821_v36  ;;  %v2828_v7 = vsub.f32 3.0, %v8728_v4  ;;  %v1439_v50 = vpop.xlane.xlu1 %1438  ;;  %v12792_v61 = vld [vmem:[#allocation38_spill] sm:$0xff] }
 0x433   : > { %v1550_v15 = vmul.f32 %v1530_v55, %v1510_v37  ;;  %v3069_v3 = vsel %vm3009_vm12, %v12787_v35, 0.0  ;;  %v3049_v62 = vsel %vm3009_vm12, %v3029_v34, 0.0  ;;  %3284 = vadd.xlane.f32.xlu1 %v4791_v0  ;;  %vm1471_vm0 = vcmp.gt.f32.partialorder %v12791_v49, -inf  ;;  %v12797_v55 = vld [vmem:[#allocation349_spill] sm:$0xff]  ;;  %v12798_v34 = vld [vmem:[#allocation40_spill] sm:$0xff] }
 0x434   : > { %v3089_v60 = vmul.f32 %v3069_v3, %v3049_v62  ;;  %v3028_v46 = vmin.f32 %v2971_v30, %v2828_v7  ;;  %vm12794_vm8 = vcmp.eq.f32.partialorder %v12792_v61, %v12793_v9  ;;  %v9006_v23 = vsub.f32 %v2829_v32, %v3049_v62  ;;  %v12799_v37 = vld [vmem:[#allocation125_spill] sm:$0xff]  ;;  %v12802_v30 = vld [vmem:[#allocation26_spill] sm:$0xff]  ;;  %v12807_v9 = vld [vmem:[#allocation144_spill] sm:$0xff] }
 0x435   : > { %v4814_v51 = vsel %vm12794_vm8, 1.0, %v11821_v36  ;;  %v9009_v4 = vadd.f32 %v1550_v15, %v12795_v11  ;;  %v1491_v35 = vmin.f32 %v1439_v50, %v12797_v55  ;;  %vm12800_vm13 = vcmp.eq.f32.partialorder %v12798_v34, %v12799_v37  ;;  %v12801_v3 = vld [vmem:[#allocation41_spill] sm:$0xff]  ;;  %v12804_v55 = vld [vmem:[#allocation103_spill] sm:$0xff] }
 0x436   : > { %v4815_v0 = vsel %vm12800_vm13, 1.0, %v11821_v36  ;;  %vm12803_vm14 = vcmp.eq.f32.partialorder %v12801_v3, %v12802_v30  ;;  %v9023_v61 = vadd.f32 %v3089_v60, %v8743_v59  ;;  %v3068_v11 = vsel %vm3008_vm10, %v12789_v20, 0.0  ;;  %3611 = vadd.xlane.f32.xlu0 %v4814_v51  ;;  %v1441_v59 = vpop.xlane.xlu0 %1440  ;;  %v12805_v3 = vld [vmem:[#allocation220_spill] sm:$0xff]  ;;  %v12806_v20 = vld [vmem:[#allocation167_spill] sm:$0xff]  ;;  %v12808_v30 = vld [vmem:[#allocation238_spill] sm:$0xff] }
 0x437   : > { %12796 = vst [vmem:[#allocation160_spill] sm:$0xff] %v9009_v4  ;;  %v9020_v13 = vsel %vm12803_vm14, 1.0, %v11821_v36  ;;  %v3048_v62 = vsel %vm3008_vm10, %v3028_v46, 0.0  ;;  %v1531_v32 = vsel %vm1471_vm0, %v12791_v49, 0.0  ;;  %v1511_v50 = vsel %vm1471_vm0, %v1491_v35, 0.0  ;;  %3613 = vadd.xlane.f32.xlu1 %v4815_v0  ;;  %v3269_v46 = vpop.xlane.xlu1 %3268  ;;  %v12810_v0 = vld [vmem:[#allocation154_spill] sm:$0xff] }
 0x438   : > { %v3088_v15 = vmul.f32 %v3068_v11, %v3048_v62  ;;  %vm1472_vm12 = vcmp.gt.f32.partialorder %v12804_v55, -inf  ;;  %v9036_v60 = vsub.f32 %v2828_v7, %v3048_v62  ;;  %v1551_v34 = vmul.f32 %v1531_v32, %v1511_v50  ;;  %v12811_v7 = vld [vmem:[#allocation251_spill] sm:$0xff]  ;;  %v12814_v32 = vld [vmem:[#allocation97_spill] sm:$0xff] }
 0x439   : > { %v1492_v37 = vmin.f32 %v1441_v59, %v12805_v3  ;;  %vm3307_vm10 = vcmp.gt.f32.partialorder %v12806_v20, -inf  ;;  %vm12809_vm8 = vcmp.eq.f32.partialorder %v12807_v9, %v12808_v30  ;;  %v3327_v35 = vmin.f32 %v3269_v46, %v8772_v57  ;;  %v12813_v62 = vld [vmem:[#allocation159_spill] sm:$0xff]  ;;  %v12815_v9 = vld [vmem:[#allocation78_spill] sm:$0xff]  ;;  %v12816_v30 = vld [vmem:[#allocation153_spill] sm:$0xff] }
 0x43a   : > { %v4832_v51 = vsel %vm12809_vm8, 1.0, %v11821_v36  ;;  %v9045_v49 = vadd.f32 %v3088_v15, %v8734_v58  ;;  %vm12812_vm0 = vcmp.eq.f32.partialorder %v12810_v0, %v12811_v7  ;;  %vm3306_vm13 = vcmp.gt.f32.partialorder %v12813_v62, -inf  ;;  %v3267_v46 = vpop.xlane.xlu0 %3266  ;;  %v12817_v0 = vld [vmem:[#allocation8_spill] sm:$0xff]  ;;  %v12818_v7 = vld [vmem:[#allocation319_spill] sm:$0xff] }
 0x43b   : > { %v4833_v11 = vsel %vm12812_vm0, 1.0, %v11821_v36  ;;  %v9054_v50 = vadd.f32 %v1551_v34, %v12814_v32  ;;  %v1532_v59 = vsel %vm1472_vm12, %v12804_v55, 0.0  ;;  %v1512_v3 = vsel %vm1472_vm12, %v1492_v37, 0.0  ;;  %3907 = vadd.xlane.f32.xlu0 %v4832_v51  ;;  %v12819_v32 = vld [vmem:[#allocation225_spill] sm:$0xff]  ;;  %v1443_v55 = vpop.xlane.xlu1 %1442  ;;  %v12820_v37 = vld [vmem:[#allocation42_spill] sm:$0xff] }
 0x43c   : > { %vm2295_vm14 = vcmp.eq.f32.partialorder %v12816_v30, %v12815_v9  ;;  %v1552_v58 = vmul.f32 %v1532_v59, %v1512_v3  ;;  %v3367_v57 = vsel %vm3307_vm10, %v12806_v20, 0.0  ;;  %v3347_v15 = vsel %vm3307_vm10, %v3327_v35, 0.0  ;;  %3909 = vadd.xlane.f32.xlu1 %v4833_v11  ;;  %v12821_v51 = vld [vmem:[#allocation129_spill] sm:$0xff]  ;;  %v12823_v59 = vld [vmem:[#allocation3_spill] sm:$0xff] }
 0x43d   : > { %vm2296_vm8 = vcmp.eq.f32.partialorder %v12818_v7, %v12817_v0  ;;  %v3387_v4 = vmul.f32 %v3367_v57, %v3347_v15  ;;  %v3326_v34 = vmin.f32 %v3267_v46, %v8770_v26  ;;  %vm1473_vm0 = vcmp.gt.f32.partialorder %v12819_v32, -inf  ;;  %v12825_v35 = vld [vmem:[#allocation227_spill] sm:$0xff] }
 0x43e   : > { %vm12822_vm12 = vcmp.eq.f32.partialorder %v12820_v37, %v12821_v51  ;;  %v9071_v20 = vadd.f32 %v1552_v58, %v12823_v59  ;;  %vm3426_vm10 = vcmp.eq.s32.totalorder %v12762_v45, 2  ;;  %v1493_v11 = vmin.f32 %v1443_v55, %v12825_v35  ;;  %v12826_v55 = vld [vmem:[#allocation9_spill] sm:$0xff]  ;;  %v1445_v59 = vpop.xlane.xlu0 %1444  ;;  %v12827_v35 = vld [vmem:[#allocation71_spill] sm:$0xff] }
 0x43f   : > { %v9068_v30 = vsel %vm12822_vm12, 1.0, %v11821_v36  ;;  %v4732_v7 = vsel %vm2295_vm14, 1.0, %v11821_v36  ;;  %v3407_v26 = vadd.f32 %v3387_v4, %v8789_v27  ;;  %v3366_v3 = vsel %vm3306_vm13, %v12813_v62, 0.0  ;;  %v3598_v0 = vpop.xlane.xlu1 %3597  ;;  %v12828_v62 = vld [vmem:[#allocation43_spill] sm:$0xff] }
 0x440   : > { %12824 = vst [vmem:[#allocation89_spill] sm:$0xff] %v9071_v20  ;;  %v3346_v57 = vsel %vm3306_vm13, %v3326_v34, 0.0  ;;  %2365 = vadd.xlane.f32.xlu0 %v4732_v7  ;;  %v4733_v15 = vsel %vm2296_vm8, 1.0, %v11821_v36  ;;  %v1533_v46 = vsel %vm1473_vm0, %v12819_v32, 0.0  ;;  %v1513_v37 = vsel %vm1473_vm0, %v1493_v11, 0.0  ;;  %v12829_v34 = vld [vmem:[#allocation28_spill] sm:$0xff] }
 0x441   : > { %v3386_v58 = vmul.f32 %v3366_v3, %v3346_v57  ;;  %2367 = vadd.xlane.f32.xlu1 %v4733_v15  ;;  %vm1474_vm12 = vcmp.gt.f32.partialorder %v12826_v55, -inf  ;;  %v3428_v27 = vsel %vm3426_vm10, %v3407_v26, 0.0  ;;  %v1553_v4 = vmul.f32 %v1533_v46, %v1513_v37  ;;  %v12831_v57 = vld [vmem:[#allocation6_spill] sm:$0xff]  ;;  %v12832_v15 = vld [vmem:[#allocation309_spill] sm:$0xff]  ;;  %v12833_v9 = vld [vmem:[#allocation55_spill] sm:$0xff] }
 0x442   : > { %v1494_v51 = vmin.f32 %v1445_v59, %v12827_v35  ;;  %vm12830_vm13 = vcmp.eq.f32.partialorder %v12828_v62, %v12829_v34  ;;  %v9093_v3 = vadd.f32 %v3428_v27, %v8923_v43  ;;  %v3652_v11 = vmin.f32 %v3598_v0, 3.0  ;;  %v12835_v59 = vld [vmem:[#allocation66_spill] sm:$0xff]  ;;  %v3596_v0 = vpop.xlane.xlu0 %3595  ;;  %v12840_v62 = vld [vmem:[#allocation31_spill] sm:$0xff] }
 0x443   : > { %v4757_v7 = vsel %vm12830_vm13, 1.0, %v11821_v36  ;;  %v3406_v32 = vadd.f32 %v3386_v58, %v8780_v39  ;;  %vm4135_vm14 = vcmp.eq.f32.partialorder %v12832_v15, %v12831_v57  ;;  %v9099_v26 = vadd.f32 %v1553_v4, %v12833_v9  ;;  %v12836_v35 = vld [vmem:[#allocation310_spill] sm:$0xff]  ;;  %v12838_v9 = vld [vmem:[#allocation15_spill] sm:$0xff]  ;;  %v12839_v4 = vld [vmem:[#allocation44_spill] sm:$0xff] }
 0x444   : > { %v1534_v46 = vsel %vm1474_vm12, %v12826_v55, 0.0  ;;  %v1514_v37 = vsel %vm1474_vm12, %v1494_v51, 0.0  ;;  %2694 = vadd.xlane.f32.xlu0 %v9020_v13  ;;  %vm4136_vm8 = vcmp.eq.f32.partialorder %v12836_v35, %v12835_v59  ;;  %vm12837_vm0 = vcmp.gt.f32.partialorder %v12543_v18, -inf  ;;  %v1447_v55 = vpop.xlane.xlu1 %1446  ;;  %v12848_v15 = vld [vmem:[#allocation135_spill] sm:$0xff] }
 0x445   : > { %12834 = vst [vmem:[#allocation182_spill] sm:$0xff] %v9099_v26  ;;  %v3427_v43 = vsel %vm3426_vm10, %v3406_v32, 0.0  ;;  %v1554_v27 = vmul.f32 %v1534_v46, %v1514_v37  ;;  %v9109_v39 = vsel %vm12837_vm0, %v3652_v11, 0.0  ;;  %2696 = vadd.xlane.f32.xlu1 %v4757_v7  ;;  %vm1475_vm13 = vcmp.gt.f32.partialorder %v12838_v9, -inf  ;;  %v12842_v32 = vld [vmem:[#allocation226_spill] sm:$0xff] }
 0x446   : > { %v9113_v58 = vadd.f32 %v3427_v43, %v8943_v17  ;;  %v9117_v13 = vmul.f32 %v8664_v25, %v9109_v39  ;;  %v3651_v51 = vmin.f32 %v3596_v0, 3.0  ;;  %vm12841_vm12 = vcmp.eq.f32.partialorder %v12839_v4, %v12840_v62  ;;  %v12844_v11 = vld [vmem:[#allocation230_spill] sm:$0xff]  ;;  %v12845_v25 = vld [vmem:[#allocation193_spill] sm:$0xff]  ;;  %v12847_v0 = vld [vmem:[#allocation47_spill] sm:$0xff] }
 0x447   : > { %v9123_v18 = vsel %vm12841_vm12, 1.0, %v11821_v36  ;;  %v9126_v7 = vadd.f32 %v1554_v27, %v12842_v32  ;;  %v1495_v46 = vmin.f32 %v1447_v55, %v12844_v11  ;;  %v4850_v17 = vsel %vm4135_vm14, 1.0, %v11821_v36  ;;  %v12850_v4 = vld [vmem:[#allocation72_spill] sm:$0xff]  ;;  %v1449_v32 = vpop.xlane.xlu0 %1448 }
 0x448   : > { %vm3930_vm0 = vcmp.gt.f32.partialorder %v12845_v25, -inf  ;;  %vm12846_vm7 = vcmp.gt.f32.partialorder %v12551_v52, -inf  ;;  %v1535_v43 = vsel %vm1475_vm13, %v12838_v9, 0.0  ;;  %4203 = vadd.xlane.f32.xlu0 %v4850_v17  ;;  %v4851_v27 = vsel %vm4136_vm8, 1.0, %v11821_v36  ;;  %v12851_v17 = vld [vmem:[#allocation222_spill] sm:$0xff]  ;;  %v3894_v59 = vpop.xlane.xlu1 %3893 }
 0x449   : > { %12843 = vst [vmem:[#allocation122_spill] sm:$0xff] %v9126_v7  ;;  %v9136_v37 = vsel %vm12846_vm7, %v3651_v51, 0.0  ;;  %vm12849_vm14 = vcmp.eq.f32.partialorder %v12847_v0, %v12848_v15  ;;  %v1515_v51 = vsel %vm1475_vm13, %v1495_v46, 0.0  ;;  %4205 = vadd.xlane.f32.xlu1 %v4851_v27  ;;  %vm1476_vm7 = vcmp.gt.f32.partialorder %v12850_v4, -inf  ;;  %v12852_v9 = vld [vmem:[#allocation158_spill] sm:$0xff]  ;;  %v12853_v46 = vld [vmem:[#allocation108_spill] sm:$0xff] }
 0x44a   : > { %v9149_v55 = vsel %vm12849_vm14, 1.0, %v11821_v36  ;;  %v9153_v52 = vmul.f32 %v8647_v1, %v9136_v37  ;;  %v3750_v35 = vsub.f32 3.0, %v8807_v33  ;;  %v1555_v11 = vmul.f32 %v1535_v43, %v1515_v51  ;;  %v12855_v15 = vld [vmem:[#allocation172_spill] sm:$0xff]  ;;  %v12856_v7 = vld [vmem:[#allocation267_spill] sm:$0xff]  ;;  %v12859_v51 = vld [vmem:[#allocation150_spill] sm:$0xff] }
 0x44b   : > { %v1496_v62 = vmin.f32 %v1449_v32, %v12851_v17  ;;  %vm3929_vm8 = vcmp.gt.f32.partialorder %v12567_v24, -inf  ;;  %v3990_v1 = vsel %vm3930_vm0, %v12845_v25, 0.0  ;;  %vm12854_vm13 = vcmp.eq.f32.partialorder %v12852_v9, %v12853_v46  ;;  %v12858_v43 = vld [vmem:[#allocation67_spill] sm:$0xff]  ;;  %v12860_v32 = vld [vmem:[#allocation233_spill] sm:$0xff]  ;;  %v3892_v9 = vpop.xlane.xlu0 %3891  ;;  %v12862_v46 = vld [vmem:[#allocation156_spill] sm:$0xff] }
 0x44c   : > { %v3950_v0 = vmin.f32 %v3894_v59, %v3750_v35  ;;  %v4774_v27 = vsel %vm12854_vm13, 1.0, %v11821_v36  ;;  %vm12857_vm12 = vcmp.eq.f32.partialorder %v12855_v15, %v12856_v7  ;;  %vm3216_vm14 = vcmp.eq.f32.partialorder %v12859_v51, %v12858_v43  ;;  %v12863_v15 = vld [vmem:[#allocation316_spill] sm:$0xff] }
 0x44d   : > { %v4775_v33 = vsel %vm12857_vm12, 1.0, %v11821_v36  ;;  %v9175_v17 = vadd.f32 %v1555_v11, %v12860_v32  ;;  %v1536_v57 = vsel %vm1476_vm7, %v12850_v4, 0.0  ;;  %v1516_v34 = vsel %vm1476_vm7, %v1496_v62, 0.0  ;;  %2990 = vadd.xlane.f32.xlu0 %v4774_v27  ;;  %v1451_v11 = vpop.xlane.xlu1 %1450  ;;  %v12864_v32 = vld [vmem:[#allocation49_spill] sm:$0xff] }
 0x44e   : > { %v3749_v59 = vsub.f32 3.0, %v8793_v10  ;;  %v1556_v26 = vmul.f32 %v1536_v57, %v1516_v34  ;;  %2992 = vadd.xlane.f32.xlu1 %v4775_v33  ;;  %vm1477_vm13 = vcmp.gt.f32.partialorder %v8206_v48, -inf  ;;  %vm3217_vm12 = vcmp.eq.f32.partialorder %v12863_v15, %v12862_v46  ;;  %v12865_v4 = vld [vmem:[#allocation137_spill] sm:$0xff]  ;;  %v12869_v33 = vld [vmem:[#allocation232_spill] sm:$0xff] }
 0x44f   : > { %12861 = vst [vmem:[#allocation323_spill] sm:$0xff] %v9175_v17  ;;  %v3970_v7 = vsel %vm3930_vm0, %v3950_v0, 0.0  ;;  %vm12866_vm7 = vcmp.eq.f32.partialorder %v12864_v32, %v12865_v4  ;;  %v12867_v57 = vld [vmem:[#allocation81_spill] sm:$0xff]  ;;  %v1497_v17 = vmin.f32 %v1451_v11, %v12869_v33  ;;  %v4792_v25 = vsel %vm3216_vm14, 1.0, %v11821_v36  ;;  %v12894_v4 = vld [vmem:[#allocation95_spill] sm:$0xff] }
 0x450   : > { %v3949_v20 = vmin.f32 %v3892_v9, %v3749_v59  ;;  %v9188_v62 = vsel %vm12866_vm7, 1.0, %v11821_v36  ;;  %v4010_v10 = vmul.f32 %v3990_v1, %v3970_v7  ;;  %v9190_v34 = vsub.f32 %v3750_v35, %v3970_v7  ;;  %v1453_v9 = vpop.xlane.xlu0 %1452 }
 0x451   : > { %v9193_v27 = vadd.f32 %v1556_v26, %v12867_v57  ;;  %v3989_v0 = vsel %vm3929_vm8, %v12567_v24, 0.0  ;;  %v1537_v1 = vsel %vm1477_vm13, %v8206_v48, 0.0  ;;  %3286 = vadd.xlane.f32.xlu0 %v4792_v25  ;;  %v4793_v7 = vsel %vm3217_vm12, 1.0, %v11821_v36  ;;  %v12870_v57 = vld [vmem:[#allocation161_spill] sm:$0xff]  ;;  %v2352_v24 = vpop.xlane.xlu1 %2351  ;;  %v12875_v25 = vld [vmem:[#allocation52_spill] sm:$0xff] }
 0x452   : > { %v3969_v26 = vsel %vm3929_vm8, %v3949_v20, 0.0  ;;  %v9210_v35 = vadd.f32 %v4010_v10, %v8813_v28  ;;  %v1517_v51 = vsel %vm1477_vm13, %v1497_v17, 0.0  ;;  %3288 = vadd.xlane.f32.xlu1 %v4793_v7  ;;  %vm1478_vm0 = vcmp.gt.f32.partialorder %v8270_v5, -inf  ;;  %v12871_v20 = vld [vmem:[#allocation50_spill] sm:$0xff]  ;;  %v12872_v28 = vld [vmem:[#allocation140_spill] sm:$0xff]  ;;  %v12874_v48 = vld [vmem:[#allocation73_spill] sm:$0xff] }
 0x453   : > { %12868 = vst [vmem:[#allocation291_spill] sm:$0xff] %v9193_v27  ;;  %v4009_v15 = vmul.f32 %v3989_v0, %v3969_v26  ;;  %v9215_v11 = vsub.f32 %v3749_v59, %v3969_v26  ;;  %v1557_v32 = vmul.f32 %v1537_v1, %v1517_v51  ;;  %v1498_v33 = vmin.f32 %v1453_v9, %v12870_v57  ;;  %v12876_v7 = vld [vmem:[#allocation142_spill] sm:$0xff]  ;;  %v12878_v0 = vld [vmem:[#allocation56_spill] sm:$0xff]  ;;  %v12879_v1 = vld [vmem:[#allocation145_spill] sm:$0xff] }
 0x454   : > { %vm2388_vm14 = vcmp.gt.f32.partialorder %v7676_v16, -inf  ;;  %vm12873_vm8 = vcmp.eq.f32.partialorder %v12871_v20, %v12872_v28  ;;  %v2408_v17 = vmin.f32 %v2352_v24, %v12874_v48  ;;  %vm12877_vm13 = vcmp.eq.f32.partialorder %v12875_v25, %v12876_v7  ;;  %v12881_v9 = vld [vmem:[#allocation174_spill] sm:$0xff] }
 0x455   : > { %v9223_v10 = vsel %vm12873_vm8, 1.0, %v11821_v36  ;;  %v9230_v59 = vsel %vm12877_vm13, 1.0, %v11821_v36  ;;  %vm12880_vm12 = vcmp.eq.f32.partialorder %v12878_v0, %v12879_v1  ;;  %v9239_v51 = vadd.f32 %v4009_v15, %v8803_v31  ;;  %3615 = vadd.xlane.f32.xlu0 %v9068_v30  ;;  %v2350_v0 = vpop.xlane.xlu0 %2349  ;;  %v12883_v15 = vld [vmem:[#allocation211_spill] sm:$0xff]  ;;  %v12885_v30 = vld [vmem:[#allocation258_spill] sm:$0xff] }
 0x456   : > { %v9236_v26 = vsel %vm12880_vm12, 1.0, %v11821_v36  ;;  %v9242_v57 = vadd.f32 %v1557_v32, %v12881_v9  ;;  %v1538_v24 = vsel %vm1478_vm0, %v8270_v5, 0.0  ;;  %v1518_v20 = vsel %vm1478_vm0, %v1498_v33, 0.0  ;;  %3617 = vadd.xlane.f32.xlu1 %v9123_v18  ;;  %v1455_v5 = vpop.xlane.xlu1 %1454  ;;  %v12884_v33 = vld [vmem:[#allocation163_spill] sm:$0xff] }
 0x457   : > { %vm2387_vm7 = vcmp.gt.f32.partialorder %v7670_v2, -inf  ;;  %v1558_v48 = vmul.f32 %v1538_v24, %v1518_v20  ;;  %v2448_v25 = vsel %vm2388_vm14, %v7676_v16, 0.0  ;;  %v2428_v7 = vsel %vm2388_vm14, %v2408_v17, 0.0  ;;  %v12887_v24 = vld [vmem:[#allocation229_spill] sm:$0xff]  ;;  %v12889_v18 = vld [vmem:[#allocation239_spill] sm:$0xff] }
 0x458   : > { %12882 = vst [vmem:[#allocation249_spill] sm:$0xff] %v9242_v57  ;;  %vm3010_vm8 = vcmp.gt.f32.partialorder %v12626_v19, -inf  ;;  %v2468_v31 = vmul.f32 %v2448_v25, %v2428_v7  ;;  %v2407_v32 = vmin.f32 %v2350_v0, %v12883_v15  ;;  %vm1479_vm13 = vcmp.gt.f32.partialorder %v8276_v21, -inf  ;;  %v12890_v7 = vld [vmem:[#allocation176_spill] sm:$0xff]  ;;  %v12891_v25 = vld [vmem:[#allocation271_spill] sm:$0xff]  ;;  %v12893_v15 = vld [vmem:[#allocation194_spill] sm:$0xff] }
 0x459   : > { %vm12886_vm0 = vcmp.eq.f32.partialorder %v12884_v33, %v12885_v30  ;;  %v9257_v20 = vadd.f32 %v1558_v48, %v12887_v24  ;;  %v2447_v16 = vsel %vm2387_vm7, %v7670_v2, 0.0  ;;  %v1499_v17 = vmin.f32 %v1455_v5, %v12889_v18  ;;  %v12895_v48 = vld [vmem:[#allocation321_spill] sm:$0xff]  ;;  %v12896_v24 = vld [vmem:[#allocation244_spill] sm:$0xff] }
 0x45a   : > { %v4834_v9 = vsel %vm12886_vm0, 1.0, %v11821_v36  ;;  %vm12892_vm14 = vcmp.eq.f32.partialorder %v12890_v7, %v12891_v25  ;;  %v2488_v1 = vadd.f32 %v2468_v31, %v12893_v15  ;;  %v2427_v33 = vsel %vm2387_vm7, %v2407_v32, 0.0  ;;  %v1457_v7 = vpop.xlane.xlu0 %1456  ;;  %v2681_v15 = vpop.xlane.xlu1 %2680 }
 0x45b   : > { %12888 = vst [vmem:[#allocation294_spill] sm:$0xff] %v9257_v20  ;;  %v4835_v0 = vsel %vm12892_vm14, 1.0, %v11821_v36  ;;  %3911 = vadd.xlane.f32.xlu0 %v4834_v9  ;;  %vm2297_vm12 = vcmp.eq.f32.partialorder %v12895_v48, %v12894_v4  ;;  %v12897_v20 = vld [vmem:[#allocation322_spill] sm:$0xff]  ;;  %v2467_v57 = vmul.f32 %v2447_v16, %v2427_v33  ;;  %v1539_v5 = vsel %vm1479_vm13, %v8276_v21, 0.0  ;;  %v12899_v33 = vld [vmem:[#allocation236_spill] sm:$0xff] }
 0x45c   : > { %vm2298_vm0 = vcmp.eq.f32.partialorder %v12897_v20, %v12896_v24  ;;  %v1519_v18 = vsel %vm1479_vm13, %v1499_v17, 0.0  ;;  %3913 = vadd.xlane.f32.xlu1 %v4835_v0  ;;  %vm1480_vm11 = vcmp.gt.f32.partialorder %v8345_v8, -inf  ;;  %v1588_v2 = vsel %vm1584_vm4, %v8928_v6, 0.0  ;;  %v12898_v16 = vld [vmem:[#allocation214_spill] sm:$0xff] }
 0x45d   : > { %v2509_v31 = vsel %vm11753_vm9, %v2488_v1, 0.0  ;;  %v1559_v32 = vmul.f32 %v1539_v5, %v1519_v18  ;;  %v1500_v9 = vmin.f32 %v1457_v7, %v8349_v14  ;;  %v2487_v21 = vadd.f32 %v2467_v57, %v12898_v16 }
 0x45e   : > { %v9282_v27 = vadd.f32 %v2509_v31, %v1588_v2  ;;  %v2733_v17 = vmin.f32 %v2681_v15, 3.0  ;;  %v4734_v0 = vsel %vm2297_vm12, 1.0, %v11821_v36  ;;  %v1540_v6 = vsel %vm1480_vm11, %v8345_v8, 0.0  ;;  %v2679_v18 = vpop.xlane.xlu0 %2678  ;;  %v1459_v20 = vpop.xlane.xlu1 %1458  ;;  %v12901_v31 = vld [vmem:[#allocation282_spill] sm:$0xff]  ;;  %v12904_v15 = vld [vmem:[#allocation259_spill] sm:$0xff] }
 0x45f   : > { %v9290_v28 = vadd.f32 %v1559_v32, %v12899_v33  ;;  %v1520_v1 = vsel %vm1480_vm11, %v1500_v9, 0.0  ;;  %2369 = vadd.xlane.f32.xlu0 %v4734_v0  ;;  %v4735_v14 = vsel %vm2298_vm0, 1.0, %v11821_v36  ;;  %v1587_v57 = vsel %vm1584_vm4, %v8897_v42, 0.0  ;;  %v12902_v42 = vld [vmem:[#allocation250_spill] sm:$0xff]  ;;  %v12908_v0 = vld [vmem:[#allocation59_spill] sm:$0xff] }
 0x460   : > { %v2508_v48 = vsel %vm11753_vm9, %v2487_v21, 0.0  ;;  %v1560_v5 = vmul.f32 %v1540_v6, %v1520_v1  ;;  %2371 = vadd.xlane.f32.xlu1 %v4735_v14  ;;  %v9304_v8 = vsel %vm2713_vm3, %v2733_v17, 0.0  ;;  %v2732_v2 = vmin.f32 %v2679_v18, 3.0  ;;  %v12905_v21 = vld [vmem:[#allocation60_spill] sm:$0xff]  ;;  %v12909_v33 = vld [vmem:[#allocation146_spill] sm:$0xff] }
 0x461   : > { %12900 = vst [vmem:[#allocation299_spill] sm:$0xff] %v9290_v28  ;;  %v9306_v7 = vadd.f32 %v2508_v48, %v1587_v57  ;;  %vm1481_vm11 = vcmp.gt.f32.partialorder %v8351_v29, -inf  ;;  %v9311_v32 = vmul.f32 %v12901_v31, %v9304_v8  ;;  %v1501_v16 = vmin.f32 %v1459_v20, %v12904_v15  ;;  %v12911_v1 = vld [vmem:[#allocation264_spill] sm:$0xff]  ;;  %v12912_v14 = vld [vmem:[#allocation46_spill] sm:$0xff]  ;;  %v12914_v48 = vld [vmem:[#allocation185_spill] sm:$0xff] }
 0x462   : > { %v9314_v9 = vadd.f32 %v1560_v5, %v12902_v42  ;;  %vm12907_vm3 = vcmp.eq.f32.partialorder %v12905_v21, %v12906_v63  ;;  %vm12910_vm7 = vcmp.eq.f32.partialorder %v12908_v0, %v12909_v33  ;;  %vm4137_vm13 = vcmp.eq.f32.partialorder %v12912_v14, %v12911_v1  ;;  %v12913_v57 = vld [vmem:[#allocation14_spill] sm:$0xff]  ;;  %v1461_v15 = vpop.xlane.xlu0 %1460  ;;  %v12917_v21 = vld [vmem:[#allocation80_spill] sm:$0xff]  ;;  %v4190_v63 = vpop.xlane.xlu1 %4189  ;;  %v12920_v33 = vld [vmem:[#allocation203_spill] sm:$0xff] }
 0x463   : > { %v9321_v17 = vsel %vm12907_vm3, 1.0, %v11821_v36  ;;  %v9327_v6 = vsel %vm12910_vm7, 1.0, %v11821_v36  ;;  %2698 = vadd.xlane.f32.xlu0 %v9149_v55  ;;  %vm4138_vm14 = vcmp.eq.f32.partialorder %v12914_v48, %v12913_v57  ;;  %v9336_v18 = vsel %vm2712_vm2, %v2732_v2, 0.0  ;;  %v12916_v55 = vld [vmem:[#allocation77_spill] sm:$0xff]  ;;  %v12918_v2 = vld [vmem:[#allocation94_spill] sm:$0xff]  ;;  %v12919_v28 = vld [vmem:[#allocation196_spill] sm:$0xff] }
 0x464   : > { %12903 = vst [vmem:[#allocation139_spill] sm:$0xff] %v9314_v9  ;;  %v9341_v20 = vsel %vm3010_vm8, %v12626_v19, 0.0  ;;  %v1541_v31 = vsel %vm1481_vm11, %v8351_v29, 0.0  ;;  %v1521_v42 = vsel %vm1481_vm11, %v1501_v16, 0.0  ;;  %2700 = vadd.xlane.f32.xlu1 %v9223_v10  ;;  %vm1482_vm12 = vcmp.gt.f32.partialorder %v12916_v55, -inf  ;;  %v12925_v48 = vld [vmem:[#allocation180_spill] sm:$0xff] }
 0x465   : > { %v9348_v0 = vmul.f32 %v12917_v21, %v9336_v18  ;;  %v1561_v5 = vmul.f32 %v1541_v31, %v1521_v42  ;;  %v1502_v9 = vmin.f32 %v1461_v15, %v12918_v2  ;;  %vm4228_vm2 = vcmp.gt.f32.partialorder %v12919_v28, -inf  ;;  %v12921_v31 = vld [vmem:[#allocation190_spill] sm:$0xff]  ;;  %v12922_v42 = vld [vmem:[#allocation245_spill] sm:$0xff]  ;;  %v12926_v57 = vld [vmem:[#allocation120_spill] sm:$0xff] }
 0x466   : > { %vm3011_vm0 = vcmp.gt.f32.partialorder %v12920_v33, -inf  ;;  %v4248_v29 = vmin.f32 %v4190_v63, %v8843_v44  ;;  %v4852_v10 = vsel %vm4137_vm13, 1.0, %v11821_v36  ;;  %v4853_v16 = vsel %vm4138_vm14, 1.0, %v11821_v36  ;;  %v12924_v44 = vld [vmem:[#allocation279_spill] sm:$0xff]  ;;  %v4188_v24 = vpop.xlane.xlu0 %4187 }
 0x467   : > { %vm4227_vm11 = vcmp.gt.f32.partialorder %v12921_v31, -inf  ;;  %v9364_v15 = vadd.f32 %v1561_v5, %v12922_v42  ;;  %v1542_v21 = vsel %vm1482_vm12, %v12916_v55, 0.0  ;;  %v1522_v2 = vsel %vm1482_vm12, %v1502_v9, 0.0  ;;  %4207 = vadd.xlane.f32.xlu0 %v4852_v10  ;;  %v1463_v5 = vpop.xlane.xlu1 %1462  ;;  %v12928_v10 = vld [vmem:[#allocation45_spill] sm:$0xff]  ;;  %v12929_v42 = vld [vmem:[#allocation286_spill] sm:$0xff] }
 0x468   : > { %vm1483_vm3 = vcmp.gt.f32.partialorder %v12924_v44, -inf  ;;  %v1562_v63 = vmul.f32 %v1542_v21, %v1522_v2  ;;  %v4288_v14 = vsel %vm4228_vm2, %v12919_v28, 0.0  ;;  %v4268_v1 = vsel %vm4228_vm2, %v4248_v29, 0.0  ;;  %4209 = vadd.xlane.f32.xlu1 %v4853_v16  ;;  %v12931_v29 = vld [vmem:[#allocation113_spill] sm:$0xff]  ;;  %v12933_v21 = vld [vmem:[#allocation252_spill] sm:$0xff] }
 0x469   : > { %12923 = vst [vmem:[#allocation248_spill] sm:$0xff] %v9364_v15  ;;  %vm12927_vm7 = vcmp.eq.f32.partialorder %v12925_v48, %v12926_v57  ;;  %v4308_v25 = vmul.f32 %v4288_v14, %v4268_v1  ;;  %v4287_v55 = vsel %vm4227_vm11, %v12921_v31, 0.0  ;;  %v4247_v9 = vmin.f32 %v4188_v24, %v8868_v40  ;;  %v12934_v14 = vld [vmem:[#allocation198_spill] sm:$0xff] }
 0x46a   : > { %v4776_v4 = vsel %vm12927_vm7, 1.0, %v11821_v36  ;;  %vm12930_vm13 = vcmp.eq.f32.partialorder %v12928_v10, %v12929_v42  ;;  %v9382_v16 = vadd.f32 %v1562_v63, %v12931_v29  ;;  %vm4347_vm14 = vcmp.eq.s32.totalorder %v12762_v45, 3  ;;  %v12935_v63 = vld [vmem:[#allocation280_spill] sm:$0xff]  ;;  %v12936_v10 = vld [vmem:[#allocation330_spill] sm:$0xff]  ;;  %v2975_v15 = vpop.xlane.xlu0 %2974  ;;  %v12938_v42 = vld [vmem:[#allocation331_spill] sm:$0xff] }
 0x46b   : > { %v4777_v28 = vsel %vm12930_vm13, 1.0, %v11821_v36  ;;  %v1543_v1 = vsel %vm1483_vm3, %v12924_v44, 0.0  ;;  %v1503_v2 = vmin.f32 %v1463_v5, %v12933_v21  ;;  %vm3931_vm12 = vcmp.gt.f32.partialorder %v12934_v14, -inf  ;;  %2994 = vadd.xlane.f32.xlu0 %v4776_v4  ;;  %v12937_v21 = vld [vmem:[#allocation256_spill] sm:$0xff] }
 0x46c   : > { %12932 = vst [vmem:[#allocation306_spill] sm:$0xff] %v9382_v16  ;;  %v4328_v40 = vadd.f32 %v4308_v25, %v8857_v54  ;;  %v4267_v24 = vsel %vm4227_vm11, %v4247_v9, 0.0  ;;  %v2830_v48 = vsub.f32 3.0, %v8964_v53  ;;  %vm3218_vm2 = vcmp.eq.f32.partialorder %v12936_v10, %v12935_v63  ;;  %2996 = vadd.xlane.f32.xlu1 %v4777_v28  ;;  %v2977_v53 = vpop.xlane.xlu1 %2976  ;;  %v12939_v28 = vld [vmem:[#allocation257_spill] sm:$0xff] }
 0x46d   : > { %v4307_v29 = vmul.f32 %v4287_v55, %v4267_v24  ;;  %v1523_v16 = vsel %vm1483_vm3, %v1503_v2, 0.0  ;;  %v2831_v5 = vsub.f32 3.0, %v8941_v38  ;;  %vm3219_vm7 = vcmp.eq.f32.partialorder %v12938_v42, %v12937_v21  ;;  %v12990_v21 = vld [vmem:[#allocation332_spill] sm:$0xff] }
 0x46e   : > { %v4349_v54 = vsel %vm4347_vm14, %v4328_v40, 0.0  ;;  %v1563_v4 = vmul.f32 %v1543_v1, %v1523_v16  ;;  %v3030_v25 = vmin.f32 %v2975_v15, %v2830_v48  ;;  %v3071_v31 = vsel %vm3011_vm0, %v12920_v33, 0.0  ;;  %v12941_v16 = vld [vmem:[#allocation201_spill] sm:$0xff] }
 0x46f   : > { %v4327_v44 = vadd.f32 %v4307_v29, %v8874_v47  ;;  %v3031_v55 = vmin.f32 %v2977_v53, %v2831_v5  ;;  %v4794_v9 = vsel %vm3218_vm2, 1.0, %v11821_v36  ;;  %v4369_v38 = vadd.f32 %v4349_v54, %v9093_v3  ;;  %v3271_v47 = vpop.xlane.xlu0 %3270  ;;  %v12942_v29 = vld [vmem:[#allocation207_spill] sm:$0xff] }
 0x470   : > { %v9410_v2 = vadd.f32 %v1563_v4, %v12939_v28  ;;  %3290 = vadd.xlane.f32.xlu0 %v4794_v9  ;;  %v4795_v42 = vsel %vm3219_vm7, 1.0, %v11821_v36  ;;  %vm3308_vm11 = vcmp.gt.f32.partialorder %v12941_v16, -inf  ;;  %v3050_v15 = vsel %vm3010_vm8, %v3030_v25, 0.0  ;;  %v3273_v54 = vpop.xlane.xlu1 %3272  ;;  %v12945_v9 = vld [vmem:[#allocation152_spill] sm:$0xff] }
 0x471   : > { %v4348_v1 = vsel %vm4347_vm14, %v4327_v44, 0.0  ;;  %3292 = vadd.xlane.f32.xlu1 %v4795_v42  ;;  %v3090_v40 = vmul.f32 %v9341_v20, %v3050_v15  ;;  %v9419_v24 = vsub.f32 %v2830_v48, %v3050_v15  ;;  %v3051_v3 = vsel %vm3011_vm0, %v3031_v55, 0.0  ;;  %v12943_v20 = vld [vmem:[#allocation204_spill] sm:$0xff]  ;;  %v12944_v55 = vld [vmem:[#allocation63_spill] sm:$0xff] }
 0x472   : > { %12940 = vst [vmem:[#allocation324_spill] sm:$0xff] %v9410_v2  ;;  %v3328_v10 = vmin.f32 %v3271_v47, %v9036_v60  ;;  %vm3309_vm3 = vcmp.gt.f32.partialorder %v12942_v29, -inf  ;;  %v4368_v19 = vadd.f32 %v4348_v1, %v9113_v58  ;;  %v3091_v4 = vmul.f32 %v3071_v31, %v3051_v3  ;;  %v12948_v15 = vld [vmem:[#allocation184_spill] sm:$0xff]  ;;  %v12949_v1 = vld [vmem:[#allocation278_spill] sm:$0xff] }
 0x473   : > { %v3329_v25 = vmin.f32 %v3273_v54, %v9006_v23  ;;  %v9428_v53 = vadd.f32 %v3090_v40, %v8974_v56  ;;  %v9430_v44 = vsub.f32 %v2831_v5, %v3051_v3  ;;  %vm3932_vm8 = vcmp.gt.f32.partialorder %v12943_v20, -inf  ;;  %v9444_v31 = vpop.xlane.xlu0 %3599  ;;  %v12951_v40 = vld [vmem:[#allocation215_spill] sm:$0xff] }
 0x474   : > { %v3368_v33 = vsel %vm3308_vm11, %v12941_v16, 0.0  ;;  %v3348_v60 = vsel %vm3308_vm11, %v3328_v10, 0.0  ;;  %3619 = vadd.xlane.f32.xlu0 %v9188_v62  ;;  %v4885_v58 = vpack.c.bf16 %v4369_v38, %v4368_v19  ;;  %v9440_v48 = vadd.f32 %v3091_v4, %v8947_v41  ;;  %v9452_v62 = vpop.xlane.xlu1 %3601  ;;  %v12947_v41 = vld [vmem:[#allocation54_spill] sm:$0xff]  ;;  %v12954_v54 = vld [vmem:[#allocation195_spill] sm:$0xff] }
 0x475   : > { %v3388_v23 = vmul.f32 %v3368_v33, %v3348_v60  ;;  %v3369_v56 = vsel %vm3309_vm3, %v12942_v29, 0.0  ;;  %v3349_v5 = vsel %vm3309_vm3, %v3329_v25, 0.0  ;;  %3621 = vadd.xlane.f32.xlu1 %v9230_v59  ;;  %vm12946_vm0 = vcmp.eq.f32.partialorder %v12944_v55, %v12945_v9  ;;  %v12953_v10 = vld [vmem:[#allocation210_spill] sm:$0xff]  ;;  %v12957_v25 = vld [vmem:[#allocation117_spill] sm:$0xff] }
 0x476   : > { %v9450_v28 = vsel %vm12946_vm0, 1.0, %v11821_v36  ;;  %v3389_v42 = vmul.f32 %v3369_v56, %v3349_v5  ;;  %4886 = vmatpush1.bf16.msra.mxu0 %v4885_v58  ;;  %4924 = vmatpush1.bf16.msra.mxu1 %v4885_v58  ;;  %vm3012_vm13 = vcmp.gt.f32.partialorder %v12947_v41, -inf  ;;  %v3991_v38 = vsel %vm3931_vm12, %v12934_v14, 0.0  ;;  %v12955_v19 = vld [vmem:[#allocation290_spill] sm:$0xff]  ;;  %v12959_v56 = vld [vmem:[#allocation296_spill] sm:$0xff] }
 0x477   : > { %v3992_v59 = vsel %vm3932_vm8, %v12943_v20, 0.0  ;;  %v3408_v16 = vadd.f32 %v3388_v23, %v9045_v49  ;;  %vm12950_vm2 = vcmp.eq.f32.partialorder %v12948_v15, %v12949_v1  ;;  %vm3013_vm7 = vcmp.gt.f32.partialorder %v12951_v40, -inf  ;;  %v12958_v33 = vld [vmem:[#allocation334_spill] sm:$0xff]  ;;  %v3896_v58 = vpop.xlane.xlu0 %3895  ;;  %v12989_v1 = vld [vmem:[#allocation341_spill] sm:$0xff] }
 0x478   : > { %v4836_v47 = vsel %vm12950_vm2, 1.0, %v11821_v36  ;;  %v12952_v3 = vmov 0.0|0.0   ;;  %vm11745_vm11 = vcmp.gt.f32.partialorder %v12953_v10, -inf  ;;  %v3409_v29 = vadd.f32 %v3389_v42, %v9023_v61  ;;  %v12960_v61 = vld [vmem:[#allocation335_spill] sm:$0xff]  ;;  %v12965_v9 = vld [vmem:[#allocation338_spill] sm:$0xff] }
 0x479   : > { %4887 = vmatprep.subr.bf16.mxu0 %v12952_v3  ;;  %4915 = vmatprep.subr.bf16.mxu1 %v12952_v3  ;;  %vm12956_vm3 = vcmp.eq.f32.partialorder %v12954_v54, %v12955_v19  ;;  %v3751_v4 = vsub.f32 3.0, %v9136_v37  ;;  %vm2299_vm0 = vcmp.eq.f32.partialorder %v12958_v33, %v12957_v25  ;;  %v3429_v60 = vsel %vm3426_vm10, %v3408_v16, 0.0  ;;  %v3898_v16 = vpop.xlane.xlu1 %3897 }
 0x47a   : > { %3915 = vadd.xlane.f32.xlu0 %v4836_v47  ;;  %v4837_v49 = vsel %vm12956_vm3, 1.0, %v11821_v36  ;;  %v3752_v23 = vsub.f32 3.0, %v9109_v39  ;;  %vm2300_vm2 = vcmp.eq.f32.partialorder %v12960_v61, %v12959_v56  ;;  %v9486_v5 = vsel %vm3012_vm13, %v12947_v41, 0.0 }
 0x47b   : > { %3917 = vadd.xlane.f32.xlu1 %v4837_v49  ;;  %v9489_v37 = vadd.f32 %v3429_v60, %v9306_v7  ;;  %v3430_v55 = vsel %vm3426_vm10, %v3409_v29, 0.0  ;;  %v3951_v42 = vmin.f32 %v3896_v58, %v3751_v4  ;;  %v9496_v39 = vsel %vm11745_vm11, %v12953_v10, 0.0  ;;  %v12961_v49 = vld [vmem:[#allocation216_spill] sm:$0xff]  ;;  %v12962_v60 = vld [vmem:[#allocation69_spill] sm:$0xff]  ;;  %v2354_v58 = vpop.xlane.xlu0 %2353 }
 0x47c   : > { %v9499_v15 = vadd.f32 %v3430_v55, %v9282_v27  ;;  %v3952_v47 = vmin.f32 %v3898_v16, %v3752_v23  ;;  %v4736_v54 = vsel %vm2299_vm0, 1.0, %v11821_v36  ;;  %v9505_v7 = vsel %vm3013_vm7, %v12951_v40, 0.0  ;;  %v12963_v27 = vld [vmem:[#allocation336_spill] sm:$0xff] }
 0x47d   : > { %v4737_v29 = vsel %vm2300_vm2, 1.0, %v11821_v36  ;;  %vm3934_vm3 = vcmp.gt.f32.partialorder %v12961_v49, -inf  ;;  %v3971_v33 = vsel %vm3931_vm12, %v3951_v42, 0.0  ;;  %vm3014_vm15 = vcmp.gt.f32.partialorder %v12962_v60, -inf  ;;  %v2356_v56 = vpop.xlane.xlu1 %2355  ;;  %v12966_v42 = vld [vmem:[#allocation339_spill] sm:$0xff] }
 0x47e   : > { %2373 = vadd.xlane.f32.xlu0 %v4736_v54  ;;  %vm2389_vm11 = vcmp.gt.f32.partialorder %v12963_v27, -inf  ;;  %v4011_v61 = vmul.f32 %v3991_v38, %v3971_v33  ;;  %v9513_v55 = vsub.f32 %v3751_v4, %v3971_v33  ;;  %v3972_v16 = vsel %vm3932_vm8, %v3952_v47, 0.0  ;;  %v12964_v54 = vld [vmem:[#allocation337_spill] sm:$0xff] }
 0x47f   : > { %2375 = vadd.xlane.f32.xlu1 %v4737_v29  ;;  %v2409_v2 = vmin.f32 %v2354_v58, %v12964_v54  ;;  %vm2390_vm0 = vcmp.gt.f32.partialorder %v12965_v9, -inf  ;;  %v4012_v25 = vmul.f32 %v3992_v59, %v3972_v16  ;;  %v9519_v14 = vsub.f32 %v3752_v23, %v3972_v16  ;;  %v12967_v23 = vld [vmem:[#allocation265_spill] sm:$0xff]  ;;  %v12969_v16 = vld [vmem:[#allocation270_spill] sm:$0xff]  ;;  %v12970_v54 = vld [vmem:[#allocation87_spill] sm:$0xff] }
 0x480   : > { %v2410_v19 = vmin.f32 %v2356_v56, %v12966_v42  ;;  %v9525_v29 = vsel %vm3934_vm3, %v12961_v49, 0.0  ;;  %v9528_v38 = vadd.f32 %v4011_v61, %v9153_v52  ;;  %v9533_v20 = vsel %vm3014_vm15, %v12962_v60, 0.0  ;;  %v12968_v56 = vld [vmem:[#allocation48_spill] sm:$0xff]  ;;  %v2683_v61 = vpop.xlane.xlu0 %2682 }
 0x481   : > { %v2449_v4 = vsel %vm2389_vm11, %v12963_v27, 0.0  ;;  %v2429_v59 = vsel %vm2389_vm11, %v2409_v2, 0.0  ;;  %vm4139_vm12 = vcmp.eq.f32.partialorder %v12968_v56, %v12967_v23  ;;  %v9540_v47 = vadd.f32 %v4012_v25, %v9117_v13  ;;  %v2685_v42 = vpop.xlane.xlu1 %2684  ;;  %v12972_v56 = vld [vmem:[#allocation76_spill] sm:$0xff]  ;;  %v12973_v23 = vld [vmem:[#allocation130_spill] sm:$0xff]  ;;  %v12975_v25 = vld [vmem:[#allocation79_spill] sm:$0xff] }
 0x482   : > { %2702 = vadd.xlane.f32.xlu0 %v9236_v26  ;;  %v2469_v33 = vmul.f32 %v2449_v4, %v2429_v59  ;;  %v2450_v52 = vsel %vm2390_vm0, %v12965_v9, 0.0  ;;  %v2430_v58 = vsel %vm2390_vm0, %v2410_v19, 0.0  ;;  %vm4140_vm8 = vcmp.eq.f32.partialorder %v12970_v54, %v12969_v16  ;;  %v12971_v26 = vld [vmem:[#allocation213_spill] sm:$0xff] }
 0x483   : > { %2704 = vadd.xlane.f32.xlu1 %v9321_v17  ;;  %v2470_v27 = vmul.f32 %v2450_v52, %v2430_v58  ;;  %v2734_v2 = vmin.f32 %v2683_v61, 3.0  ;;  %vm4229_vm11 = vcmp.gt.f32.partialorder %v12971_v26, -inf  ;;  %vm12974_vm2 = vcmp.eq.f32.partialorder %v12972_v56, %v12973_v23  ;;  %v12976_v17 = vld [vmem:[#allocation326_spill] sm:$0xff]  ;;  %v12977_v52 = vld [vmem:[#allocation205_spill] sm:$0xff] }
 0x484   : > { %v4778_v13 = vsel %vm12974_vm2, 1.0, %v11821_v36  ;;  %v2489_v4 = vadd.f32 %v2469_v33, %v12975_v25  ;;  %v2735_v9 = vmin.f32 %v2685_v42, 3.0  ;;  %v4854_v19 = vsel %vm4139_vm12, 1.0, %v11821_v36  ;;  %v4192_v25 = vpop.xlane.xlu0 %4191 }
 0x485   : > { %vm4230_vm0 = vcmp.gt.f32.partialorder %v12976_v17, -inf  ;;  %v1589_v59 = vsel %vm1584_vm4, %v8951_v22, 0.0  ;;  %v2490_v58 = vadd.f32 %v2470_v27, %v12977_v52  ;;  %v4855_v61 = vsel %vm4140_vm8, 1.0, %v11821_v36  ;;  %v12979_v22 = vld [vmem:[#allocation289_spill] sm:$0xff]  ;;  %v4194_v54 = vpop.xlane.xlu1 %4193  ;;  %v12985_v27 = vld [vmem:[#allocation228_spill] sm:$0xff] }
 0x486   : > { %4211 = vadd.xlane.f32.xlu0 %v4854_v19  ;;  %v9561_v56 = vsel %vm2714_vm5, %v2734_v2, 0.0  ;;  %v1590_v33 = vsel %vm1584_vm4, %v8994_v12, 0.0  ;;  %v2510_v42 = vsel %vm11753_vm9, %v2489_v4, 0.0  ;;  %v9574_v19 = vsel %vm2715_vm1, %v2735_v9, 0.0  ;;  %v12981_v4 = vld [vmem:[#allocation133_spill] sm:$0xff] }
 0x487   : > { %4213 = vadd.xlane.f32.xlu1 %v4855_v61  ;;  %v9570_v16 = vmul.f32 %v12979_v22, %v9561_v56  ;;  %v9576_v52 = vadd.f32 %v2510_v42, %v1589_v59  ;;  %v2511_v2 = vsel %vm11753_vm9, %v2490_v58, 0.0  ;;  %v4249_v12 = vmin.f32 %v4192_v25, %v9215_v11  ;;  %v12982_v59 = vld [vmem:[#allocation53_spill] sm:$0xff]  ;;  %v12983_v42 = vld [vmem:[#allocation303_spill] sm:$0xff]  ;;  %v12986_v25 = vld [vmem:[#allocation224_spill] sm:$0xff] }
 0x488   : > { %v9583_v61 = vmul.f32 %v12981_v4, %v9574_v19  ;;  %v9585_v23 = vadd.f32 %v2511_v2, %v1590_v33  ;;  %v4289_v22 = vsel %vm4229_vm11, %v12971_v26, 0.0  ;;  %v4250_v9 = vmin.f32 %v4194_v54, %v9190_v34  ;;  %v12987_v2 = vld [vmem:[#allocation340_spill] sm:$0xff]  ;;  %v12988_v4 = vld [vmem:[#allocation273_spill] sm:$0xff]  ;;  %v2979_v26 = vpop.xlane.xlu0 %2978 }
 0x489   : > { %vm12984_vm5 = vcmp.eq.f32.partialorder %v12982_v59, %v12983_v42  ;;  %vm3015_vm1 = vcmp.gt.f32.partialorder %v12985_v27, -inf  ;;  %v4269_v11 = vsel %vm4229_vm11, %v4249_v12, 0.0  ;;  %v2832_v33 = vsub.f32 3.0, %v9336_v18  ;;  %v2981_v42 = vpop.xlane.xlu1 %2980 }
 0x48a   : > { %v4779_v58 = vsel %vm12984_vm5, 1.0, %v11821_v36  ;;  %2998 = vadd.xlane.f32.xlu0 %v4778_v13  ;;  %vm3220_vm12 = vcmp.eq.f32.partialorder %v12987_v2, %v12986_v25  ;;  %vm3221_vm8 = vcmp.eq.f32.partialorder %v12989_v1, %v12988_v4  ;;  %v4309_v34 = vmul.f32 %v4289_v22, %v4269_v11  ;;  %v12991_v2 = vld [vmem:[#allocation333_spill] sm:$0xff] }
 0x48b   : > { %v4290_v54 = vsel %vm4230_vm0, %v12976_v17, 0.0  ;;  %v4270_v59 = vsel %vm4230_vm0, %v4250_v9, 0.0  ;;  %3000 = vadd.xlane.f32.xlu1 %v4779_v58  ;;  %v2833_v13 = vsub.f32 3.0, %v9304_v8  ;;  %v3032_v18 = vmin.f32 %v2979_v26, %v2832_v33 }
 0x48c   : > { %v4310_v12 = vmul.f32 %v4290_v54, %v4270_v59  ;;  %vm3310_vm11 = vcmp.gt.f32.partialorder %v12990_v21, -inf  ;;  %vm3311_vm2 = vcmp.gt.f32.partialorder %v12991_v2, -inf  ;;  %v4329_v1 = vadd.f32 %v4309_v34, %v9239_v51  ;;  %v3275_v34 = vpop.xlane.xlu0 %3274 }
 0x48d   : > { %v3033_v22 = vmin.f32 %v2981_v42, %v2833_v13  ;;  %v4796_v11 = vsel %vm3220_vm12, 1.0, %v11821_v36  ;;  %v4797_v4 = vsel %vm3221_vm8, 1.0, %v11821_v36  ;;  %v3653_v17 = vmin.f32 %v9444_v31, 3.0  ;;  %v3277_v26 = vpop.xlane.xlu1 %3276 }
 0x48e   : > { %v3654_v9 = vmin.f32 %v9452_v62, 3.0  ;;  %v4330_v8 = vadd.f32 %v4310_v12, %v9210_v35  ;;  %v3052_v58 = vsel %vm3012_vm13, %v3032_v18, 0.0  ;;  %3294 = vadd.xlane.f32.xlu0 %v4796_v11  ;;  %v4350_v54 = vsel %vm4347_vm14, %v4329_v1, 0.0  ;;  %v12994_v11 = vld [vmem:[#allocation295_spill] sm:$0xff] }
 0x48f   : > { %v3092_v51 = vmul.f32 %v9486_v5, %v3052_v58  ;;  %v3053_v42 = vsel %vm3013_vm7, %v3033_v22, 0.0  ;;  %3296 = vadd.xlane.f32.xlu1 %v4797_v4  ;;  %v9624_v59 = vsub.f32 %v2832_v33, %v3052_v58  ;;  %v4370_v31 = vadd.f32 %v4350_v54, %v9489_v37  ;;  %v12993_v22 = vld [vmem:[#allocation200_spill] sm:$0xff]  ;;  %v12999_v54 = vld [vmem:[#allocation307_spill] sm:$0xff] }
 0x490   : > { %v4351_v35 = vsel %vm4347_vm14, %v4330_v8, 0.0  ;;  %v3093_v62 = vmul.f32 %v9505_v7, %v3053_v42  ;;  %v3330_v41 = vmin.f32 %v3275_v34, %v9419_v24  ;;  %v3331_v40 = vmin.f32 %v3277_v26, %v9430_v44  ;;  %v12996_v8 = vld [vmem:[#allocation99_spill] sm:$0xff]  ;;  %v13007_v26 = vld [vmem:[#allocation106_spill] sm:$0xff] }
 0x491   : > { %v4371_v12 = vadd.f32 %v4351_v35, %v9499_v15  ;;  %v9633_v5 = vadd.f32 %v3092_v51, %v9348_v0  ;;  %v9636_v4 = vsub.f32 %v2833_v13, %v3053_v42  ;;  %v3370_v37 = vsel %vm3310_vm11, %v12990_v21, 0.0  ;;  %v9657_v1 = vpop.xlane.xlu1 %3605  ;;  %v13001_v42 = vld [vmem:[#allocation208_spill] sm:$0xff]  ;;  %v13002_v34 = vld [vmem:[#allocation143_spill] sm:$0xff]  ;;  %v13014_v13 = vld [vmem:[#allocation342_spill] sm:$0xff] }
 0x492   : > { %v9639_v33 = vadd.f32 %v3093_v62, %v9311_v32  ;;  %v3350_v24 = vsel %vm3310_vm11, %v3330_v41, 0.0  ;;  %v3371_v15 = vsel %vm3311_vm2, %v12991_v2, 0.0  ;;  %3623 = vadd.xlane.f32.xlu0 %v9327_v6  ;;  %v3351_v44 = vsel %vm3311_vm2, %v3331_v40, 0.0  ;;  %v9653_v32 = vpop.xlane.xlu0 %3603  ;;  %v13005_v35 = vld [vmem:[#allocation312_spill] sm:$0xff] }
 0x493   : > { %v3390_v0 = vmul.f32 %v3370_v37, %v3350_v24  ;;  %3625 = vadd.xlane.f32.xlu1 %v9450_v28  ;;  %v4888_v7 = vpack.c.bf16 %v4371_v12, %v4370_v31  ;;  %v3673_v18 = vsel %vm3633_vm6, %v3653_v17, 0.0  ;;  %v3391_v21 = vmul.f32 %v3371_v15, %v3351_v44  ;;  %v12998_v17 = vld [vmem:[#allocation206_spill] sm:$0xff]  ;;  %v13008_v12 = vld [vmem:[#allocation344_spill] sm:$0xff] }
 0x494   : > { %vm12995_vm13 = vcmp.eq.f32.partialorder %v12993_v22, %v12994_v11  ;;  %vm12997_vm7 = vcmp.gt.f32.partialorder %v12996_v8, -inf  ;;  %v9668_v28 = vsel %vm3015_vm1, %v12985_v27, 0.0  ;;  %vm13000_vm6 = vcmp.eq.f32.partialorder %v12998_v17, %v12999_v54  ;;  %v13009_v40 = vld [vmem:[#allocation64_spill] sm:$0xff]  ;;  %v13010_v37 = vld [vmem:[#allocation318_spill] sm:$0xff] }
 0x495   : > { %v4838_v6 = vsel %vm12995_vm13, 1.0, %v11821_v36  ;;  %v3674_v2 = vsel %vm12997_vm7, %v3654_v9, 0.0  ;;  %v3410_v58 = vadd.f32 %v3390_v0, %v9428_v53  ;;  %4889 = vmatpush1.bf16.msra.mxu0 %v4888_v7  ;;  %4925 = vmatpush1.bf16.msra.mxu1 %v4888_v7  ;;  %v4839_v51 = vsel %vm13000_vm6, 1.0, %v11821_v36  ;;  %v13004_v9 = vld [vmem:[#allocation212_spill] sm:$0xff]  ;;  %v13013_v7 = vld [vmem:[#allocation345_spill] sm:$0xff]  ;;  %v3902_v8 = vpop.xlane.xlu1 %3901 }
 0x496   : > { %vm13003_vm0 = vcmp.eq.f32.partialorder %v13001_v42, %v13002_v34  ;;  %vm13006_vm5 = vcmp.eq.f32.partialorder %v13004_v9, %v13005_v35  ;;  %v3411_v53 = vadd.f32 %v3391_v21, %v9440_v48  ;;  %3919 = vadd.xlane.f32.xlu0 %v4838_v6  ;;  %v3753_v41 = vsub.f32 3.0, %v3673_v18  ;;  %4890 = vmatprep.subr.bf16.mxu0 %v12952_v3  ;;  %v3900_v0 = vpop.xlane.xlu0 %3899  ;;  %v13012_v48 = vld [vmem:[#allocation297_spill] sm:$0xff]  ;;  %v13015_v17 = vld [vmem:[#allocation356_spill] sm:$0xff]  ;;  %v13016_v9 = vld [vmem:[#allocation358_spill] sm:$0xff] }
 0x497   : > { %v9679_v31 = vsel %vm13003_vm0, 1.0, %v11821_v36  ;;  %v9685_v62 = vsel %vm13006_vm5, 1.0, %v11821_v36  ;;  %vm2301_vm12 = vcmp.eq.f32.partialorder %v13008_v12, %v13007_v26  ;;  %vm13011_vm8 = vcmp.eq.f32.partialorder %v13009_v40, %v13010_v37  ;;  %3921 = vadd.xlane.f32.xlu1 %v4839_v51  ;;  %4916 = vmatprep.subr.bf16.mxu1 %v12952_v3  ;;  %v13018_v40 = vld [vmem:[#allocation112_spill] sm:$0xff]  ;;  %v13024_v26 = vld [vmem:[#allocation357_spill] sm:$0xff] }
 0x498   : > { %v9694_v24 = vsel %vm13011_vm8, 1.0, %v11821_v36  ;;  %v3431_v15 = vsel %vm3426_vm10, %v3410_v58, 0.0  ;;  %v3754_v44 = vsub.f32 3.0, %v3674_v2  ;;  %vm2302_vm11 = vcmp.eq.f32.partialorder %v13013_v7, %v13012_v48  ;;  %v13022_v7 = vld [vmem:[#allocation127_spill] sm:$0xff] }
 0x499   : > { %vm4231_vm2 = vcmp.gt.f32.partialorder %v13014_v13, -inf  ;;  %v9704_v21 = vadd.f32 %v3431_v15, %v9576_v52  ;;  %v3432_v22 = vsel %vm3426_vm10, %v3411_v53, 0.0  ;;  %v3953_v6 = vmin.f32 %v3900_v0, %v3753_v41  ;;  %v13019_v15 = vld [vmem:[#allocation90_spill] sm:$0xff]  ;;  %v13020_v0 = vld [vmem:[#allocation123_spill] sm:$0xff] }
 0x49a   : > { %vm2391_vm13 = vcmp.gt.f32.partialorder %v13015_v17, -inf  ;;  %v9710_v58 = vadd.f32 %v3432_v22, %v9585_v23  ;;  %v3954_v51 = vmin.f32 %v3902_v8, %v3754_v44  ;;  %v4738_v42 = vsel %vm2301_vm12, 1.0, %v11821_v36  ;;  %v13021_v23 = vld [vmem:[#allocation61_spill] sm:$0xff]  ;;  %v2358_v48 = vpop.xlane.xlu0 %2357 }
 0x49b   : > { %vm2392_vm7 = vcmp.gt.f32.partialorder %v13016_v9, -inf  ;;  %vm13017_vm6 = vcmp.gt.f32.partialorder %v12953_v10, -inf  ;;  %2377 = vadd.xlane.f32.xlu0 %v4738_v42  ;;  %v4739_v53 = vsel %vm2302_vm11, 1.0, %v11821_v36  ;;  %vm4141_vm0 = vcmp.eq.f32.partialorder %v13019_v15, %v13018_v40  ;;  %v2360_v40 = vpop.xlane.xlu1 %2359 }
 0x49c   : > { %v3973_v52 = vsel %vm13017_vm6, %v3953_v6, 0.0  ;;  %vm4142_vm5 = vcmp.eq.f32.partialorder %v13021_v23, %v13020_v0  ;;  %v3713_v22 = vmul.f32 %v13022_v7, %v3673_v18  ;;  %v3974_v12 = vsel %vm3934_vm3, %v3954_v51, 0.0  ;;  %2379 = vadd.xlane.f32.xlu1 %v4739_v53  ;;  %v13023_v6 = vld [vmem:[#allocation157_spill] sm:$0xff]  ;;  %v13025_v18 = vld [vmem:[#allocation359_spill] sm:$0xff]  ;;  %v13026_v51 = vld [vmem:[#allocation218_spill] sm:$0xff] }
 0x49d   : > { %v4013_v8 = vmul.f32 %v9496_v39, %v3973_v52  ;;  %v9728_v10 = vsub.f32 %v3753_v41, %v3973_v52  ;;  %v3714_v42 = vmul.f32 %v13023_v6, %v3674_v2  ;;  %v4014_v37 = vmul.f32 %v9525_v29, %v3974_v12  ;;  %v13027_v53 = vld [vmem:[#allocation320_spill] sm:$0xff]  ;;  %v13045_v0 = vld [vmem:[#allocation110_spill] sm:$0xff] }
 0x49e   : > { %v2411_v15 = vmin.f32 %v2358_v48, %v13024_v26  ;;  %v9733_v25 = vsub.f32 %v3754_v44, %v3974_v12  ;;  %v2412_v39 = vmin.f32 %v2360_v40, %v13025_v18  ;;  %v4856_v49 = vsel %vm4141_vm0, 1.0, %v11821_v36  ;;  %v2687_v40 = vpop.xlane.xlu0 %2686  ;;  %v13029_v12 = vld [vmem:[#allocation343_spill] sm:$0xff]  ;;  %v13030_v23 = vld [vmem:[#allocation352_spill] sm:$0xff]  ;;  %v13032_v18 = vld [vmem:[#allocation313_spill] sm:$0xff] }
 0x49f   : > { %v9735_v35 = vadd.f32 %v4013_v8, %v3713_v22  ;;  %vm13028_vm3 = vcmp.eq.f32.partialorder %v13026_v51, %v13027_v53  ;;  %v9745_v2 = vadd.f32 %v4014_v37, %v3714_v42  ;;  %v2451_v29 = vsel %vm2391_vm13, %v13015_v17, 0.0  ;;  %4215 = vadd.xlane.f32.xlu0 %v4856_v49  ;;  %v2689_v8 = vpop.xlane.xlu1 %2688  ;;  %v13031_v6 = vld [vmem:[#allocation92_spill] sm:$0xff]  ;;  %v13033_v49 = vld [vmem:[#allocation350_spill] sm:$0xff] }
 0x4a0   : > { %v9743_v41 = vsel %vm13028_vm3, 1.0, %v11821_v36  ;;  %v2431_v26 = vsel %vm2391_vm13, %v2411_v15, 0.0  ;;  %v4857_v44 = vsel %vm4142_vm5, 1.0, %v11821_v36  ;;  %v2452_v52 = vsel %vm2392_vm7, %v13016_v9, 0.0  ;;  %v13034_v9 = vld [vmem:[#allocation353_spill] sm:$0xff] }
 0x4a1   : > { %v2471_v48 = vmul.f32 %v2451_v29, %v2431_v26  ;;  %v2432_v37 = vsel %vm2392_vm7, %v2412_v39, 0.0  ;;  %4217 = vadd.xlane.f32.xlu1 %v4857_v44  ;;  %v4291_v17 = vsel %vm4231_vm2, %v13014_v13, 0.0  ;;  %v2736_v22 = vmin.f32 %v2687_v40, 3.0  ;;  %v13035_v39 = vld [vmem:[#allocation160_spill] sm:$0xff]  ;;  %v13036_v29 = vld [vmem:[#allocation217_spill] sm:$0xff] }
 0x4a2   : > { %v2472_v7 = vmul.f32 %v2452_v52, %v2432_v37  ;;  %vm4232_vm12 = vcmp.gt.f32.partialorder %v13029_v12, -inf  ;;  %vm3312_vm8 = vcmp.gt.f32.partialorder %v13030_v23, -inf  ;;  %v2737_v15 = vmin.f32 %v2689_v8, 3.0  ;;  %v13037_v44 = vld [vmem:[#allocation17_spill] sm:$0xff]  ;;  %v13039_v37 = vld [vmem:[#allocation272_spill] sm:$0xff] }
 0x4a3   : > { %v2491_v42 = vadd.f32 %v2471_v48, %v13031_v6  ;;  %vm3222_vm11 = vcmp.eq.f32.partialorder %v13033_v49, %v13032_v18  ;;  %vm3313_vm13 = vcmp.gt.f32.partialorder %v13034_v9, -inf  ;;  %v1591_v51 = vsel %vm1584_vm4, %v13035_v39, 0.0  ;;  %3002 = vadd.xlane.f32.xlu0 %v9679_v31  ;;  %v13040_v48 = vld [vmem:[#allocation351_spill] sm:$0xff]  ;;  %v13041_v6 = vld [vmem:[#allocation301_spill] sm:$0xff]  ;;  %v4196_v31 = vpop.xlane.xlu0 %4195 }
 0x4a4   : > { %v2492_v26 = vadd.f32 %v2472_v7, %v13036_v29  ;;  %vm13038_vm7 = vcmp.gt.f32.partialorder %v13037_v44, -inf  ;;  %vm3223_vm6 = vcmp.eq.f32.partialorder %v13040_v48, %v13039_v37  ;;  %v1592_v40 = vsel %vm1584_vm4, %v9054_v50, 0.0  ;;  %v13042_v7 = vld [vmem:[#allocation18_spill] sm:$0xff] }
 0x4a5   : > { %v9776_v52 = vsel %vm13038_vm7, %v2736_v22, 0.0  ;;  %v2512_v8 = vsel %vm11753_vm9, %v2491_v42, 0.0  ;;  %vm13043_vm0 = vcmp.gt.f32.partialorder %v13042_v7, -inf  ;;  %3004 = vadd.xlane.f32.xlu1 %v9694_v24  ;;  %v13044_v50 = vld [vmem:[#allocation302_spill] sm:$0xff]  ;;  %v4251_v42 = vmin.f32 %v4196_v31, %v9513_v55  ;;  %v13049_v31 = vld [vmem:[#allocation355_spill] sm:$0xff] }
 0x4a6   : > { %v9788_v39 = vmul.f32 %v13041_v6, %v9776_v52  ;;  %v9792_v22 = vsel %vm13043_vm0, %v2737_v15, 0.0  ;;  %v9795_v29 = vadd.f32 %v2512_v8, %v1591_v51  ;;  %v2513_v44 = vsel %vm11753_vm9, %v2492_v26, 0.0  ;;  %v4198_v6 = vpop.xlane.xlu1 %4197  ;;  %v13047_v8 = vld [vmem:[#allocation354_spill] sm:$0xff] }
 0x4a7   : > { %v9801_v53 = vmul.f32 %v13044_v50, %v9792_v22  ;;  %vm3636_vm5 = vcmp.gt.f32.partialorder %v13045_v0, -inf  ;;  %v9805_v7 = vadd.f32 %v2513_v44, %v1592_v40  ;;  %v4252_v15 = vmin.f32 %v4198_v6, %v9519_v14  ;;  %v13046_v40 = vld [vmem:[#allocation277_spill] sm:$0xff]  ;;  %v13048_v14 = vld [vmem:[#allocation284_spill] sm:$0xff]  ;;  %v2983_v50 = vpop.xlane.xlu0 %2982 }
 0x4a8   : > { %v4798_v24 = vsel %vm3222_vm11, 1.0, %v11821_v36  ;;  %v4799_v51 = vsel %vm3223_vm6, 1.0, %v11821_v36  ;;  %v4271_v55 = vsel %vm4231_vm2, %v4251_v42, 0.0  ;;  %v2834_v26 = vsub.f32 3.0, %v9561_v56  ;;  %v13050_v44 = vld [vmem:[#allocation221_spill] sm:$0xff] }
 0x4a9   : > { %3298 = vadd.xlane.f32.xlu0 %v4798_v24  ;;  %vm2303_vm3 = vcmp.eq.f32.partialorder %v13047_v8, %v13046_v40  ;;  %vm2304_vm7 = vcmp.eq.f32.partialorder %v13049_v31, %v13048_v14  ;;  %vm3935_vm0 = vcmp.gt.f32.partialorder %v13050_v44, -inf  ;;  %v4311_v49 = vmul.f32 %v4291_v17, %v4271_v55  ;;  %3300 = vadd.xlane.f32.xlu1 %v4799_v51 }
 0x4aa   : > { %v4292_v48 = vsel %vm4232_vm12, %v13029_v12, 0.0  ;;  %v4272_v13 = vsel %vm4232_vm12, %v4252_v15, 0.0  ;;  %v2835_v56 = vsub.f32 3.0, %v9574_v19  ;;  %v3034_v6 = vmin.f32 %v2983_v50, %v2834_v26  ;;  %v2985_v24 = vpop.xlane.xlu1 %2984 }
 0x4ab   : > { %v4312_v42 = vmul.f32 %v4292_v48, %v4272_v13  ;;  %v3372_v37 = vsel %vm3312_vm8, %v13030_v23, 0.0  ;;  %v3373_v17 = vsel %vm3313_vm13, %v13034_v9, 0.0  ;;  %v4331_v55 = vadd.f32 %v4311_v49, %v9528_v38 }
 0x4ac   : > { %v3035_v18 = vmin.f32 %v2985_v24, %v2835_v56  ;;  %v4740_v12 = vsel %vm2303_vm3, 1.0, %v11821_v36  ;;  %v4741_v19 = vsel %vm2304_vm7, 1.0, %v11821_v36  ;;  %v3655_v15 = vmin.f32 %v9653_v32, 3.0  ;;  %v3279_v32 = vpop.xlane.xlu0 %3278 }
 0x4ad   : > { %v3656_v51 = vmin.f32 %v9657_v1, 3.0  ;;  %v4332_v48 = vadd.f32 %v4312_v42, %v9540_v47  ;;  %v3054_v38 = vsel %vm3014_vm15, %v3034_v6, 0.0  ;;  %3923 = vadd.xlane.f32.xlu0 %v9685_v62  ;;  %v4352_v8 = vsel %vm4347_vm14, %v4331_v55, 0.0  ;;  %3925 = vadd.xlane.f32.xlu1 %v9743_v41  ;;  %v13052_v42 = vld [vmem:[#allocation58_spill] sm:$0xff]  ;;  %v13054_v6 = vld [vmem:[#allocation100_spill] sm:$0xff] }
 0x4ae   : > { %v3094_v49 = vmul.f32 %v9533_v20, %v3054_v38  ;;  %v3055_v31 = vsel %vm3015_vm1, %v3035_v18, 0.0  ;;  %v9857_v13 = vsub.f32 %v2834_v26, %v3054_v38  ;;  %v4372_v47 = vadd.f32 %v4352_v8, %v9704_v21  ;;  %v3281_v50 = vpop.xlane.xlu1 %3280  ;;  %v13057_v38 = vld [vmem:[#allocation231_spill] sm:$0xff]  ;;  %v13060_v8 = vld [vmem:[#allocation360_spill] sm:$0xff] }
 0x4af   : > { %v4353_v60 = vsel %vm4347_vm14, %v4332_v48, 0.0  ;;  %v3095_v1 = vmul.f32 %v9668_v28, %v3055_v31  ;;  %v3332_v62 = vmin.f32 %v3279_v32, %v9624_v59  ;;  %v3333_v41 = vmin.f32 %v3281_v50, %v9636_v4  ;;  %v13051_v28 = vld [vmem:[#allocation285_spill] sm:$0xff]  ;;  %v13053_v59 = vld [vmem:[#allocation16_spill] sm:$0xff] }
 0x4b0   : > { %v4373_v20 = vadd.f32 %v4353_v60, %v9710_v58  ;;  %v9866_v27 = vadd.f32 %v3094_v49, %v9570_v16  ;;  %v9869_v18 = vsub.f32 %v2835_v56, %v3055_v31  ;;  %vm4143_vm15 = vcmp.eq.f32.partialorder %v13052_v42, %v13051_v28  ;;  %v13055_v58 = vld [vmem:[#allocation107_spill] sm:$0xff]  ;;  %v13062_v60 = vld [vmem:[#allocation361_spill] sm:$0xff] }
 0x4b1   : > { %v9872_v26 = vadd.f32 %v3095_v1, %v9583_v61  ;;  %v3352_v21 = vsel %vm3312_vm8, %v3332_v62, 0.0  ;;  %2381 = vadd.xlane.f32.xlu0 %v4740_v12  ;;  %vm4144_vm1 = vcmp.eq.f32.partialorder %v13054_v6, %v13053_v59  ;;  %vm13056_vm2 = vcmp.gt.f32.partialorder %v13055_v58, -inf  ;;  %2383 = vadd.xlane.f32.xlu1 %v4741_v19  ;;  %v9884_v61 = vpop.xlane.xlu0 %3607  ;;  %v13064_v58 = vld [vmem:[#allocation57_spill] sm:$0xff] }
 0x4b2   : > { %v3675_v16 = vsel %vm13056_vm2, %v3655_v15, 0.0  ;;  %v3392_v24 = vmul.f32 %v3372_v37, %v3352_v21  ;;  %v3353_v4 = vsel %vm3313_vm13, %v3333_v41, 0.0  ;;  %v4891_v56 = vpack.c.bf16 %v4373_v20, %v4372_v47  ;;  %v9891_v48 = vpop.xlane.xlu1 %3609  ;;  %v13061_v47 = vld [vmem:[#allocation314_spill] sm:$0xff]  ;;  %v13063_v41 = vld [vmem:[#allocation75_spill] sm:$0xff] }
 0x4b3   : > { %v3696_v23 = vsel %vm3636_vm5, %v13045_v0, 0.0  ;;  %v3676_v55 = vsel %vm3636_vm5, %v3656_v51, 0.0  ;;  %v3393_v12 = vmul.f32 %v3373_v17, %v3353_v4  ;;  %vm3936_vm12 = vcmp.gt.f32.partialorder %v13057_v38, -inf  ;;  %v13058_v0 = vld [vmem:[#allocation20_spill] sm:$0xff]  ;;  %v13059_v51 = vld [vmem:[#allocation86_spill] sm:$0xff] }
 0x4b4   : > { %v3412_v37 = vadd.f32 %v3392_v24, %v9633_v5  ;;  %4892 = vmatpush1.bf16.msra.mxu0 %v4891_v56  ;;  %4926 = vmatpush1.bf16.msra.mxu1 %v4891_v56  ;;  %v4858_v9 = vsel %vm4143_vm15, 1.0, %v11821_v36  ;;  %v3995_v19 = vsel %vm3935_vm0, %v13050_v44, 0.0  ;;  %vm2718_vm8 = vcmp.gt.f32.partialorder %v13058_v0, -inf  ;;  %v13065_v4 = vld [vmem:[#allocation276_spill] sm:$0xff] }
 0x4b5   : > { %v3413_v17 = vadd.f32 %v3393_v12, %v9639_v33  ;;  %4219 = vadd.xlane.f32.xlu0 %v4858_v9  ;;  %v4859_v5 = vsel %vm4144_vm1, 1.0, %v11821_v36  ;;  %v3755_v15 = vsub.f32 3.0, %v3675_v16  ;;  %vm3224_vm11 = vcmp.eq.f32.partialorder %v13060_v8, %v13059_v51  ;;  %4893 = vmatprep.subr.bf16.mxu0 %v12952_v3  ;;  %v3904_v31 = vpop.xlane.xlu0 %3903  ;;  %v13066_v56 = vld [vmem:[#allocation364_spill] sm:$0xff]  ;;  %v13067_v12 = vld [vmem:[#allocation13_spill] sm:$0xff] }
 0x4b6   : > { %v3433_v49 = vsel %vm3426_vm10, %v3412_v37, 0.0  ;;  %4221 = vadd.xlane.f32.xlu1 %v4859_v5  ;;  %v3756_v32 = vsub.f32 3.0, %v3676_v55  ;;  %v3996_v33 = vsel %vm3936_vm12, %v13057_v38, 0.0  ;;  %vm3225_vm13 = vcmp.eq.f32.partialorder %v13062_v60, %v13061_v47  ;;  %4917 = vmatprep.subr.bf16.mxu1 %v12952_v3  ;;  %v3906_v20 = vpop.xlane.xlu1 %3905  ;;  %v13069_v37 = vld [vmem:[#allocation101_spill] sm:$0xff]  ;;  %v13070_v60 = vld [vmem:[#allocation4_spill] sm:$0xff] }
 0x4b7   : > { %v9920_v1 = vadd.f32 %v3433_v49, %v9795_v29  ;;  %v3434_v62 = vsel %vm3426_vm10, %v3413_v17, 0.0  ;;  %v3955_v50 = vmin.f32 %v3904_v31, %v3755_v15  ;;  %vm2393_vm6 = vcmp.gt.f32.partialorder %v13063_v41, -inf }
 0x4b8   : > { %v9926_v21 = vadd.f32 %v3434_v62, %v9805_v7  ;;  %v3956_v42 = vmin.f32 %v3906_v20, %v3756_v32  ;;  %v4800_v6 = vsel %vm3224_vm11, 1.0, %v11821_v36  ;;  %vm2394_vm5 = vcmp.gt.f32.partialorder %v13064_v58, -inf  ;;  %v13068_v7 = vld [vmem:[#allocation365_spill] sm:$0xff] }
 0x4b9   : > { %v3975_v29 = vsel %vm3935_vm0, %v3955_v50, 0.0  ;;  %3302 = vadd.xlane.f32.xlu0 %v4800_v6  ;;  %v4801_v24 = vsel %vm3225_vm13, 1.0, %v11821_v36  ;;  %vm4145_vm3 = vcmp.eq.f32.partialorder %v13066_v56, %v13065_v4  ;;  %vm4146_vm7 = vcmp.eq.f32.partialorder %v13068_v7, %v13067_v12  ;;  %v2362_v8 = vpop.xlane.xlu0 %2361  ;;  %v13071_v56 = vld [vmem:[#allocation82_spill] sm:$0xff]  ;;  %v13144_v12 = vld [vmem:[#allocation273_spill] sm:$0xff] }
 0x4ba   : > { %v3715_v9 = vmul.f32 %v13069_v37, %v3675_v16  ;;  %v4015_v17 = vmul.f32 %v3995_v19, %v3975_v29  ;;  %v3976_v5 = vsel %vm3936_vm12, %v3956_v42, 0.0  ;;  %3304 = vadd.xlane.f32.xlu1 %v4801_v24  ;;  %v9943_v49 = vsub.f32 %v3755_v15, %v3975_v29  ;;  %v2364_v50 = vpop.xlane.xlu1 %2363  ;;  %v13072_v19 = vld [vmem:[#allocation124_spill] sm:$0xff] }
 0x4bb   : > { %v3716_v44 = vmul.f32 %v3696_v23, %v3676_v55  ;;  %v4016_v31 = vmul.f32 %v3996_v33, %v3976_v5  ;;  %v2413_v62 = vmin.f32 %v2362_v8, %v13070_v60  ;;  %v9946_v20 = vsub.f32 %v3756_v32, %v3976_v5  ;;  %v13074_v8 = vld [vmem:[#allocation362_spill] sm:$0xff] }
 0x4bc   : > { %v9948_v6 = vadd.f32 %v4015_v17, %v3715_v9  ;;  %v2414_v4 = vmin.f32 %v2364_v50, %v13071_v56  ;;  %v4860_v16 = vsel %vm4145_vm3, 1.0, %v11821_v36  ;;  %vm2719_vm0 = vcmp.gt.f32.partialorder %v13072_v19, -inf  ;;  %v13073_v17 = vld [vmem:[#allocation7_spill] sm:$0xff]  ;;  %v13078_v50 = vld [vmem:[#allocation182_spill] sm:$0xff] }
 0x4bd   : > { %v9953_v38 = vadd.f32 %v4016_v31, %v3716_v44  ;;  %v2453_v23 = vsel %vm2393_vm6, %v13063_v41, 0.0  ;;  %v2433_v55 = vsel %vm2393_vm6, %v2413_v62, 0.0  ;;  %4223 = vadd.xlane.f32.xlu0 %v4860_v16  ;;  %v4861_v15 = vsel %vm4146_vm7, 1.0, %v11821_v36  ;;  %v2691_v29 = vpop.xlane.xlu0 %2690  ;;  %v13076_v44 = vld [vmem:[#allocation65_spill] sm:$0xff]  ;;  %v13077_v62 = vld [vmem:[#allocation363_spill] sm:$0xff] }
 0x4be   : > { %v2473_v32 = vmul.f32 %v2453_v23, %v2433_v55  ;;  %v2454_v33 = vsel %vm2394_vm5, %v13064_v58, 0.0  ;;  %v2434_v42 = vsel %vm2394_vm5, %v2414_v4, 0.0  ;;  %4225 = vadd.xlane.f32.xlu1 %v4861_v15  ;;  %v2778_v41 = vsel %vm2718_vm8, %v13058_v0, 0.0  ;;  %v2693_v9 = vpop.xlane.xlu1 %2692  ;;  %v13075_v58 = vld [vmem:[#allocation89_spill] sm:$0xff] }
 0x4bf   : > { %v2474_v24 = vmul.f32 %v2454_v33, %v2434_v42  ;;  %v2738_v37 = vmin.f32 %v2691_v29, 3.0  ;;  %v2779_v36 = vsel %vm2719_vm0, %v13072_v19, 0.0  ;;  %v2739_v5 = vmin.f32 %v2693_v9, 3.0  ;;  %v13080_v19 = vld [vmem:[#allocation247_spill] sm:$0xff] }
 0x4c0   : > { %v2493_v7 = vadd.f32 %v2473_v32, %v13073_v17  ;;  %vm4233_vm15 = vcmp.gt.f32.partialorder %v13074_v8, -inf  ;;  %v1593_v4 = vsel %vm1584_vm4, %v13075_v58, 0.0  ;;  %vm4234_vm1 = vcmp.gt.f32.partialorder %v13077_v62, -inf  ;;  %v13081_v9 = vld [vmem:[#allocation115_spill] sm:$0xff] }
 0x4c1   : > { %v2494_v31 = vadd.f32 %v2474_v24, %v13076_v44  ;;  %v9983_v60 = vsel %vm2718_vm8, %v2738_v37, 0.0  ;;  %v1594_v56 = vsel %vm1584_vm4, %v13078_v50, 0.0  ;;  %v9996_v55 = vsel %vm2719_vm0, %v2739_v5, 0.0  ;;  %v4200_v15 = vpop.xlane.xlu0 %4199  ;;  %v13079_v37 = vld [vmem:[#allocation88_spill] sm:$0xff] }
 0x4c2   : > { %v2514_v16 = vsel %vm11753_vm9, %v2493_v7, 0.0  ;;  %v9992_v23 = vmul.f32 %v2778_v41, %v9983_v60  ;;  %v10003_v33 = vmul.f32 %v2779_v36, %v9996_v55  ;;  %v4253_v42 = vmin.f32 %v4200_v15, %v9728_v10  ;;  %v4202_v29 = vpop.xlane.xlu1 %4201  ;;  %v13082_v36 = vld [vmem:[#allocation119_spill] sm:$0xff] }
 0x4c3   : > { %v9998_v0 = vadd.f32 %v2514_v16, %v1593_v4  ;;  %v2515_v32 = vsel %vm11753_vm9, %v2494_v31, 0.0  ;;  %v4254_v41 = vmin.f32 %v4202_v29, %v9733_v25  ;;  %vm3016_vm2 = vcmp.gt.f32.partialorder %v13079_v37, -inf }
 0x4c4   : > { %v10006_v24 = vadd.f32 %v2515_v32, %v1594_v56  ;;  %vm3017_vm12 = vcmp.gt.f32.partialorder %v13080_v19, -inf  ;;  %vm3637_vm8 = vcmp.gt.f32.partialorder %v13081_v9, -inf  ;;  %v4293_v17 = vsel %vm4233_vm15, %v13074_v8, 0.0  ;;  %v13083_v32 = vld [vmem:[#allocation5_spill] sm:$0xff] }
 0x4c5   : > { %v4273_v7 = vsel %vm4233_vm15, %v4253_v42, 0.0  ;;  %v2836_v10 = vsub.f32 3.0, %v9776_v52  ;;  %vm3638_vm11 = vcmp.gt.f32.partialorder %v13082_v36, -inf  ;;  %v4294_v25 = vsel %vm4234_vm1, %v13077_v62, 0.0  ;;  %v2987_v4 = vpop.xlane.xlu0 %2986  ;;  %v13084_v62 = vld [vmem:[#allocation62_spill] sm:$0xff] }
 0x4c6   : > { %v4313_v5 = vmul.f32 %v4293_v17, %v4273_v7  ;;  %v4274_v58 = vsel %vm4234_vm1, %v4254_v41, 0.0  ;;  %v2837_v44 = vsub.f32 3.0, %v9792_v22  ;;  %v3076_v8 = vsel %vm3016_vm2, %v13079_v37, 0.0  ;;  %v2989_v56 = vpop.xlane.xlu1 %2988 }
 0x4c7   : > { %v4314_v31 = vmul.f32 %v4294_v25, %v4274_v58  ;;  %v3036_v50 = vmin.f32 %v2987_v4, %v2836_v10  ;;  %v3077_v52 = vsel %vm3017_vm12, %v13080_v19, 0.0  ;;  %vm3314_vm13 = vcmp.gt.f32.partialorder %v13083_v32, -inf }
 0x4c8   : > { %v4333_v16 = vadd.f32 %v4313_v5, %v9735_v35  ;;  %v3037_v15 = vmin.f32 %v2989_v56, %v2837_v44  ;;  %vm3315_vm6 = vcmp.gt.f32.partialorder %v13084_v62, -inf  ;;  %v3657_v22 = vmin.f32 %v9884_v61, 3.0 }
 0x4c9   : > { %v3658_v42 = vmin.f32 %v9891_v48, 3.0  ;;  %v4334_v29 = vadd.f32 %v4314_v31, %v9745_v2  ;;  %v3056_v41 = vsel %vm3016_vm2, %v3036_v50, 0.0  ;;  %v3283_v5 = vpop.xlane.xlu0 %3282  ;;  %vm13093_vm2 = vcmask 261120  }
 0x4ca   : > { %v4354_v17 = vsel %vm4347_vm14, %v4333_v16, 0.0  ;;  %v3096_v7 = vmul.f32 %v3076_v8, %v3056_v41  ;;  %v3057_v35 = vsel %vm3017_vm12, %v3037_v15, 0.0  ;;  %v10043_v25 = vsub.f32 %v2836_v10, %v3056_v41  ;;  %v3285_v37 = vpop.xlane.xlu1 %3284  ;;  %vm13094_vm12 = vmmov %vm13093_vm2 }
 0x4cb   : > { %v4374_v58 = vadd.f32 %v4354_v17, %v9920_v1  ;;  %v4355_v61 = vsel %vm4347_vm14, %v4334_v29, 0.0  ;;  %v3097_v48 = vmul.f32 %v3077_v52, %v3057_v35  ;;  %v3334_v2 = vmin.f32 %v3283_v5, %v9857_v13  ;;  %v13085_v29 = vld [vmem:[#allocation238_spill] sm:$0xff]  ;;  %v13086_v17 = vld [vmem:[#allocation251_spill] sm:$0xff] }
 0x4cc   : > { %v4375_v4 = vadd.f32 %v4355_v61, %v9926_v21  ;;  %v10051_v31 = vadd.f32 %v3096_v7, %v9788_v39  ;;  %v3335_v19 = vmin.f32 %v3285_v37, %v9869_v18  ;;  %v10054_v8 = vsub.f32 %v2837_v44, %v3057_v35  ;;  %v13087_v37 = vld [vmem:[#allocation78_spill] sm:$0xff] }
 0x4cd   : > { %v10057_v10 = vadd.f32 %v3097_v48, %v9801_v53  ;;  %v3374_v1 = vsel %vm3314_vm13, %v13083_v32, 0.0  ;;  %v3354_v13 = vsel %vm3314_vm13, %v3334_v2, 0.0  ;;  %v3375_v21 = vsel %vm3315_vm6, %v13084_v62, 0.0  ;;  %v10071_v53 = vpop.xlane.xlu0 %3611 }
 0x4ce   : > { %v3677_v39 = vsel %vm3637_vm8, %v3657_v22, 0.0  ;;  %v3394_v18 = vmul.f32 %v3374_v1, %v3354_v13  ;;  %v3355_v44 = vsel %vm3315_vm6, %v3335_v19, 0.0  ;;  %v4894_v50 = vpack.c.bf16 %v4375_v4, %v4374_v58  ;;  %v10075_v16 = vpop.xlane.xlu1 %3613  ;;  %v13088_v4 = vld [vmem:[#allocation8_spill] sm:$0xff] }
 0x4cf   : > { %v3678_v52 = vsel %vm3638_vm11, %v3658_v42, 0.0  ;;  %v3395_v56 = vmul.f32 %v3375_v21, %v3355_v44  ;;  %v3757_v22 = vsub.f32 3.0, %v3677_v39  ;;  %vm3937_vm5 = vcmp.gt.f32.partialorder %v13085_v29, -inf  ;;  %v13089_v44 = vld [vmem:[#allocation171_spill] sm:$0xff] }
 0x4d0   : > { %v3414_v15 = vadd.f32 %v3394_v18, %v9866_v27  ;;  %4895 = vmatpush1.bf16.msra.mxu0 %v4894_v50  ;;  %4927 = vmatpush1.bf16.msra.mxu1 %v4894_v50  ;;  %v3758_v41 = vsub.f32 3.0, %v3678_v52  ;;  %vm3938_vm3 = vcmp.gt.f32.partialorder %v13086_v17, -inf  ;;  %v3697_v27 = vsel %vm3637_vm8, %v13081_v9, 0.0 }
 0x4d1   : > { %v3415_v32 = vadd.f32 %v3395_v56, %v9872_v26  ;;  %4896 = vmatprep.subr.bf16.mxu0 %v12952_v3  ;;  %4918 = vmatprep.subr.bf16.mxu1 %v12952_v3  ;;  %v3908_v42 = vpop.xlane.xlu0 %3907  ;;  %v3698_v58 = vsel %vm3638_vm11, %v13082_v36, 0.0  ;;  %v3997_v48 = vsel %vm3937_vm5, %v13085_v29, 0.0  ;;  %v3998_v2 = vsel %vm3938_vm3, %v13086_v17, 0.0  ;;  %v13090_v29 = vld [vmem:[#allocation68_spill] sm:$0xff] }
 0x4d2   : > { %v3435_v62 = vsel %vm3426_vm10, %v3414_v15, 0.0  ;;  %v3957_v35 = vmin.f32 %v3908_v42, %v3757_v22  ;;  %v3910_v5 = vpop.xlane.xlu1 %3909  ;;  %vm2395_vm7 = vcmp.gt.f32.partialorder %v13087_v37, -inf  ;;  %vm2396_vm0 = vcmp.gt.f32.partialorder %v13088_v4, -inf  ;;  %v13091_v42 = vld [vmem:[#allocation26_spill] sm:$0xff] }
 0x4d3   : > { %v10089_v26 = vadd.f32 %v3435_v62, %v9998_v0  ;;  %v3436_v7 = vsel %vm3426_vm10, %v3415_v32, 0.0  ;;  %v3958_v9 = vmin.f32 %v3910_v5, %v3758_v41  ;;  %v3717_v36 = vmul.f32 %v3697_v27, %v3677_v39  ;;  %v267_v39 = vld [vmem:[%s10862_s2 + $0x8] sm:$0xff]  ;;  %v13092_v27 = vld [vmem:[#allocation28_spill] sm:$0xff] }
 0x4d4   : > { %v10097_v61 = vadd.f32 %v3436_v7, %v10006_v24  ;;  %v3977_v0 = vsel %vm3937_vm5, %v3957_v35, 0.0  ;;  %v3718_v21 = vmul.f32 %v3698_v58, %v3678_v52  ;;  %vm2720_vm15 = vcmp.gt.f32.partialorder %v13091_v42, -inf  ;;  %v269_v52 = vld [vmem:[%s10862_s2 + $0x18] sm:$0x3]  ;;  %4862 = vmatprep.mubr.msk.f32.mxu0 %vm13093_vm2, %v267_v39 }
 0x4d5   : > { %v4017_v19 = vmul.f32 %v3997_v48, %v3977_v0  ;;  %v3978_v24 = vsel %vm3938_vm3, %v3958_v9, 0.0  ;;  %v2366_v1 = vpop.xlane.xlu0 %2365  ;;  %v10111_v13 = vsub.f32 %v3757_v22, %v3977_v0  ;;  %vm2721_vm1 = vcmp.gt.f32.partialorder %v13092_v27, -inf  ;;  %4863 = vmatprep.mubr.msk.f32.mxu1 %vm13094_vm12, %v269_v52 }
 0x4d6   : > { %v4018_v18 = vmul.f32 %v3998_v2, %v3978_v24  ;;  %v2415_v50 = vmin.f32 %v2366_v1, %v13089_v44  ;;  %v2368_v56 = vpop.xlane.xlu1 %2367  ;;  %v10114_v15 = vsub.f32 %v3758_v41, %v3978_v24  ;;  %v2455_v41 = vsel %vm2395_vm7, %v13087_v37, 0.0  ;;  %v13095_v37 = vld [vmem:[#allocation74_spill] sm:$0xff] }
 0x4d7   : > { %v10116_v32 = vadd.f32 %v4017_v19, %v3717_v36  ;;  %v2416_v62 = vmin.f32 %v2368_v56, %v13090_v29  ;;  %v2456_v35 = vsel %vm2396_vm0, %v13088_v4, 0.0  ;;  %v2780_v9 = vsel %vm2720_vm15, %v13091_v42, 0.0  ;;  %v13096_v1 = vld [vmem:[#allocation6_spill] sm:$0xff]  ;;  %v13100_v29 = vld [vmem:[#allocation323_spill] sm:$0xff] }
 0x4d8   : > { %v10126_v22 = vadd.f32 %v4018_v18, %v3718_v21  ;;  %v2435_v17 = vsel %vm2395_vm7, %v2415_v50, 0.0  ;;  %v2781_v19 = vsel %vm2721_vm1, %v13092_v27, 0.0  ;;  %vm4235_vm8 = vcmp.gt.f32.partialorder %v13096_v1, -inf  ;;  %v13097_v21 = vld [vmem:[#allocation122_spill] sm:$0xff]  ;;  %v13102_v27 = vld [vmem:[#allocation267_spill] sm:$0xff] }
 0x4d9   : > { %v2475_v7 = vmul.f32 %v2455_v41, %v2435_v17  ;;  %v2436_v5 = vsel %vm2396_vm0, %v2416_v62, 0.0  ;;  %v2695_v58 = vpop.xlane.xlu0 %2694  ;;  %v1595_v4 = vsel %vm1584_vm4, %v13097_v21, 0.0  ;;  %v13098_v18 = vld [vmem:[#allocation10_spill] sm:$0xff]  ;;  %v1596_v62 = vsel %vm1584_vm4, %v13100_v29, 0.0 }
 0x4da   : > { %v2476_v48 = vmul.f32 %v2456_v35, %v2436_v5  ;;  %v2740_v0 = vmin.f32 %v2695_v58, 3.0  ;;  %v2697_v2 = vpop.xlane.xlu1 %2696  ;;  %v13099_v56 = vld [vmem:[#allocation66_spill] sm:$0xff]  ;;  %vm3019_vm6 = vcmp.gt.f32.partialorder %v13102_v27, -inf  ;;  %vm3316_vm7 = vcmp.gt.f32.partialorder %v12858_v43, -inf }
 0x4db   : > { %v2495_v36 = vadd.f32 %v2475_v7, %v13095_v37  ;;  %v2741_v24 = vmin.f32 %v2697_v2, 3.0  ;;  %vm4236_vm11 = vcmp.gt.f32.partialorder %v13099_v56, -inf  ;;  %v13103_v2 = vld [vmem:[#allocation23_spill] sm:$0xff]  ;;  %v4295_v37 = vsel %vm4235_vm8, %v13096_v1, 0.0 }
 0x4dc   : > { %v2496_v44 = vadd.f32 %v2476_v48, %v13098_v18  ;;  %v10155_v50 = vsel %vm2720_vm15, %v2740_v0, 0.0  ;;  %v13101_v0 = vld [vmem:[#allocation108_spill] sm:$0xff]  ;;  %vm3639_vm5 = vcmp.gt.f32.partialorder %v13103_v2, -inf  ;;  %v2839_v18 = vsub.f32 3.0, %v9996_v55 }
 0x4dd   : > { %v2516_v39 = vsel %vm11753_vm9, %v2495_v36, 0.0  ;;  %v10164_v52 = vmul.f32 %v2780_v9, %v10155_v50  ;;  %v10168_v41 = vsel %vm2721_vm1, %v2741_v24, 0.0  ;;  %v4204_v17 = vpop.xlane.xlu0 %4203  ;;  %vm3018_vm13 = vcmp.gt.f32.partialorder %v13101_v0, -inf }
 0x4de   : > { %v10170_v42 = vadd.f32 %v2516_v39, %v1595_v4  ;;  %v2517_v7 = vsel %vm11753_vm9, %v2496_v44, 0.0  ;;  %v10175_v35 = vmul.f32 %v2781_v19, %v10168_v41  ;;  %v4255_v5 = vmin.f32 %v4204_v17, %v9943_v49  ;;  %v4206_v58 = vpop.xlane.xlu1 %4205  ;;  %v13104_v19 = vld [vmem:[#allocation125_spill] sm:$0xff] }
 0x4df   : > { %v10178_v48 = vadd.f32 %v2517_v7, %v1596_v62  ;;  %v4256_v9 = vmin.f32 %v4206_v58, %v9946_v20  ;;  %v2838_v49 = vsub.f32 3.0, %v9983_v60  ;;  %vm3640_vm3 = vcmp.gt.f32.partialorder %v13104_v19, -inf }
 0x4e0   : > { %v4275_v36 = vsel %vm4235_vm8, %v4255_v5, 0.0  ;;  %v4296_v20 = vsel %vm4236_vm11, %v13099_v56, 0.0  ;;  %v3078_v1 = vsel %vm3018_vm13, %v13101_v0, 0.0  ;;  %v3079_v60 = vsel %vm3019_vm6, %v13102_v27, 0.0 }
 0x4e1   : > { %v4315_v24 = vmul.f32 %v4295_v37, %v4275_v36  ;;  %v4276_v21 = vsel %vm4236_vm11, %v4256_v9, 0.0  ;;  %v2991_v4 = vpop.xlane.xlu0 %2990  ;;  %vm3317_vm0 = vcmp.gt.f32.partialorder %v12862_v46, -inf  ;;  %v3659_v55 = vmin.f32 %v10071_v53, 3.0 }
 0x4e2   : > { %v4316_v44 = vmul.f32 %v4296_v20, %v4276_v21  ;;  %v3038_v29 = vmin.f32 %v2991_v4, %v2838_v49  ;;  %v2993_v62 = vpop.xlane.xlu1 %2992  ;;  %v3660_v56 = vmin.f32 %v10075_v16, 3.0  ;;  %vm3939_vm15 = vcmp.gt.f32.partialorder %v12885_v30, -inf }
 0x4e3   : > { %v4335_v39 = vadd.f32 %v4315_v24, %v9948_v6  ;;  %v3039_v17 = vmin.f32 %v2993_v62, %v2839_v18 }
 0x4e4   : > { %v4336_v7 = vadd.f32 %v4316_v44, %v9953_v38  ;;  %v3058_v5 = vsel %vm3018_vm13, %v3038_v29, 0.0 }
 0x4e5   : > { %v4356_v58 = vsel %vm4347_vm14, %v4335_v39, 0.0  ;;  %v3098_v9 = vmul.f32 %v3078_v1, %v3058_v5  ;;  %v3059_v6 = vsel %vm3019_vm6, %v3039_v17, 0.0  ;;  %v3287_v37 = vpop.xlane.xlu0 %3286  ;;  %v10215_v36 = vsub.f32 %v2838_v49, %v3058_v5 }
 0x4e6   : > { %v4376_v24 = vadd.f32 %v4356_v58, %v10089_v26  ;;  %v4357_v53 = vsel %vm4347_vm14, %v4336_v7, 0.0  ;;  %v3099_v16 = vmul.f32 %v3079_v60, %v3059_v6  ;;  %v3336_v38 = vmin.f32 %v3287_v37, %v10043_v25  ;;  %v3289_v0 = vpop.xlane.xlu1 %3288 }
 0x4e7   : > { %v4377_v20 = vadd.f32 %v4357_v53, %v10097_v61  ;;  %v10223_v21 = vadd.f32 %v3098_v9, %v9992_v23  ;;  %v3337_v27 = vmin.f32 %v3289_v0, %v10054_v8  ;;  %v10226_v4 = vsub.f32 %v2839_v18, %v3059_v6  ;;  %v13106_v53 = vld [vmem:[#allocation95_spill] sm:$0xff] }
 0x4e8   : > { %v10229_v49 = vadd.f32 %v3099_v16, %v10003_v33  ;;  %v3376_v26 = vsel %vm3316_vm7, %v12858_v43, 0.0  ;;  %v3356_v25 = vsel %vm3316_vm7, %v3336_v38, 0.0  ;;  %v3377_v61 = vsel %vm3317_vm0, %v12862_v46, 0.0  ;;  %v13107_v16 = vld [vmem:[#allocation244_spill] sm:$0xff] }
 0x4e9   : > { %v3679_v23 = vsel %vm3639_vm5, %v3659_v55, 0.0  ;;  %v3396_v8 = vmul.f32 %v3376_v26, %v3356_v25  ;;  %v3357_v18 = vsel %vm3317_vm0, %v3337_v27, 0.0  ;;  %v10243_v33 = vpop.xlane.xlu0 %3615  ;;  %v4897_v44 = vpack.c.bf16 %v4377_v20, %v4376_v24 }
 0x4ea   : > { %v3680_v1 = vsel %vm3640_vm3, %v3660_v56, 0.0  ;;  %v3397_v29 = vmul.f32 %v3377_v61, %v3357_v18  ;;  %v10247_v43 = vpop.xlane.xlu1 %3617  ;;  %v3759_v39 = vsub.f32 3.0, %v3679_v23  ;;  %v13105_v56 = vld [vmem:[#allocation271_spill] sm:$0xff]  ;;  %v3700_v9 = vsel %vm3640_vm3, %v13104_v19, 0.0 }
 0x4eb   : > { %v3416_v60 = vadd.f32 %v3396_v8, %v10051_v31  ;;  %4898 = vmatpush1.bf16.msra.mxu0 %v4897_v44  ;;  %4928 = vmatpush1.bf16.msra.mxu1 %v4897_v44  ;;  %v3760_v55 = vsub.f32 3.0, %v3680_v1  ;;  %vm3940_vm1 = vcmp.gt.f32.partialorder %v13105_v56, -inf  ;;  %v3699_v31 = vsel %vm3639_vm5, %v13103_v2, 0.0  ;;  %v13109_v44 = vld [vmem:[#allocation246_spill] sm:$0xff] }
 0x4ec   : > { %v3417_v62 = vadd.f32 %v3397_v29, %v10057_v10  ;;  %4899 = vmatprep.subr.bf16.mxu0 %v12952_v3  ;;  %4919 = vmatprep.subr.bf16.mxu1 %v12952_v3  ;;  %v3999_v37 = vsel %vm3939_vm15, %v12885_v30, 0.0  ;;  %v4000_v24 = vsel %vm3940_vm1, %v13105_v56, 0.0  ;;  %vm2397_vm2 = vcmp.gt.f32.partialorder %v13106_v53, -inf  ;;  %v13108_v30 = vld [vmem:[#allocation237_spill] sm:$0xff] }
 0x4ed   : > { %v3437_v46 = vsel %vm3426_vm10, %v3416_v60, 0.0  ;;  %v3912_v17 = vpop.xlane.xlu0 %3911  ;;  %vm2398_vm12 = vcmp.gt.f32.partialorder %v13107_v16, -inf  ;;  %v3719_v19 = vmul.f32 %v3699_v31, %v3679_v23  ;;  %v3720_v27 = vmul.f32 %v3700_v9, %v3680_v1  ;;  %v13110_v60 = vld [vmem:[#allocation135_spill] sm:$0xff] }
 0x4ee   : > { %v10261_v10 = vadd.f32 %v3437_v46, %v10170_v42  ;;  %v3438_v7 = vsel %vm3426_vm10, %v3417_v62, 0.0  ;;  %v3959_v5 = vmin.f32 %v3912_v17, %v3759_v39  ;;  %v3914_v58 = vpop.xlane.xlu1 %3913  ;;  %vm2722_vm8 = vcmp.gt.f32.partialorder %v13110_v60, -inf  ;;  %v13112_v9 = vld [vmem:[#allocation223_spill] sm:$0xff] }
 0x4ef   : > { %v10269_v6 = vadd.f32 %v3438_v7, %v10178_v48  ;;  %v3960_v2 = vmin.f32 %v3914_v58, %v3760_v55  ;;  %v2457_v62 = vsel %vm2397_vm2, %v13106_v53, 0.0  ;;  %v2458_v17 = vsel %vm2398_vm12, %v13107_v16, 0.0  ;;  %v13114_v53 = vld [vmem:[#allocation291_spill] sm:$0xff] }
 0x4f0   : > { %v3979_v42 = vsel %vm3939_vm15, %v3959_v5, 0.0  ;;  %v2782_v7 = vsel %vm2722_vm8, %v13110_v60, 0.0  ;;  %v1597_v16 = vsel %vm1584_vm4, %v13114_v53, 0.0  ;;  %vm3020_vm5 = vcmp.gt.f32.partialorder %v12926_v57, -inf }
 0x4f1   : > { %v4019_v38 = vmul.f32 %v3999_v37, %v3979_v42  ;;  %v3980_v48 = vsel %vm3940_vm1, %v3960_v2, 0.0  ;;  %v2370_v0 = vpop.xlane.xlu0 %2369  ;;  %v10283_v20 = vsub.f32 %v3759_v39, %v3979_v42  ;;  %v13111_v39 = vld [vmem:[#allocation140_spill] sm:$0xff]  ;;  %v3080_v53 = vsel %vm3020_vm5, %v12926_v57, 0.0 }
 0x4f2   : > { %v4020_v26 = vmul.f32 %v4000_v24, %v3980_v48  ;;  %v2417_v25 = vmin.f32 %v2370_v0, %v13108_v30  ;;  %v2372_v61 = vpop.xlane.xlu1 %2371  ;;  %v10286_v8 = vsub.f32 %v3760_v55, %v3980_v48  ;;  %vm2723_vm11 = vcmp.gt.f32.partialorder %v13111_v39, -inf  ;;  %v13113_v24 = vld [vmem:[#allocation14_spill] sm:$0xff]  ;;  %v13116_v0 = vld [vmem:[#allocation264_spill] sm:$0xff] }
 0x4f3   : > { %v10288_v18 = vadd.f32 %v4019_v38, %v3719_v19  ;;  %v2418_v29 = vmin.f32 %v2372_v61, %v13109_v44  ;;  %v2783_v2 = vsel %vm2723_vm11, %v13111_v39, 0.0  ;;  %vm4238_vm13 = vcmp.gt.f32.partialorder %v13113_v24, -inf  ;;  %v13115_v19 = vld [vmem:[#allocation70_spill] sm:$0xff] }
 0x4f4   : > { %v10292_v23 = vadd.f32 %v4020_v26, %v3720_v27  ;;  %v2437_v1 = vsel %vm2397_vm2, %v2417_v25, 0.0  ;;  %vm4237_vm6 = vcmp.gt.f32.partialorder %v13116_v0, -inf  ;;  %v13117_v27 = vld [vmem:[#allocation249_spill] sm:$0xff]  ;;  %v13118_v39 = vld [vmem:[#allocation286_spill] sm:$0xff]  ;;  %vm3318_vm15 = vcmp.gt.f32.partialorder %v12935_v63, -inf }
 0x4f5   : > { %v2477_v46 = vmul.f32 %v2457_v62, %v2437_v1  ;;  %v2438_v55 = vsel %vm2398_vm12, %v2418_v29, 0.0  ;;  %v2699_v56 = vpop.xlane.xlu0 %2698  ;;  %v1598_v26 = vsel %vm1584_vm4, %v13117_v27, 0.0  ;;  %vm3021_vm3 = vcmp.gt.f32.partialorder %v13118_v39, -inf }
 0x4f6   : > { %v2478_v31 = vmul.f32 %v2458_v17, %v2438_v55  ;;  %v2742_v5 = vmin.f32 %v2699_v56, 3.0  ;;  %v2701_v58 = vpop.xlane.xlu1 %2700  ;;  %v13119_v56 = vld [vmem:[#allocation129_spill] sm:$0xff]  ;;  %v3662_v27 = vmin.f32 %v10247_v43, 3.0 }
 0x4f7   : > { %v2497_v37 = vadd.f32 %v2477_v46, %v13112_v9  ;;  %v2743_v42 = vmin.f32 %v2701_v58, 3.0  ;;  %vm3641_vm7 = vcmp.gt.f32.partialorder %v13119_v56, -inf }
 0x4f8   : > { %v2498_v38 = vadd.f32 %v2478_v31, %v13115_v19  ;;  %v10319_v48 = vsel %vm2722_vm8, %v2742_v5, 0.0  ;;  %v4297_v31 = vsel %vm4237_vm6, %v13116_v0, 0.0  ;;  %v13120_v5 = vld [vmem:[#allocation31_spill] sm:$0xff] }
 0x4f9   : > { %v2518_v30 = vsel %vm11753_vm9, %v2497_v37, 0.0  ;;  %v10328_v25 = vmul.f32 %v2782_v7, %v10319_v48  ;;  %v10332_v61 = vsel %vm2723_vm11, %v2743_v42, 0.0  ;;  %v4208_v44 = vpop.xlane.xlu0 %4207  ;;  %vm3642_vm0 = vcmp.gt.f32.partialorder %v13120_v5, -inf }
 0x4fa   : > { %v10334_v29 = vadd.f32 %v2518_v30, %v1597_v16  ;;  %v2519_v60 = vsel %vm11753_vm9, %v2498_v38, 0.0  ;;  %v10339_v62 = vmul.f32 %v2783_v2, %v10332_v61  ;;  %v4257_v1 = vmin.f32 %v4208_v44, %v10111_v13  ;;  %v4210_v46 = vpop.xlane.xlu1 %4209 }
 0x4fb   : > { %v10342_v17 = vadd.f32 %v2519_v60, %v1598_v26  ;;  %v4258_v55 = vmin.f32 %v4210_v46, %v10114_v15  ;;  %v2840_v13 = vsub.f32 3.0, %v10155_v50  ;;  %v4298_v15 = vsel %vm4238_vm13, %v13113_v24, 0.0  ;;  %v13121_v24 = vld [vmem:[#allocation256_spill] sm:$0xff] }
 0x4fc   : > { %v4277_v7 = vsel %vm4237_vm6, %v4257_v1, 0.0  ;;  %v2841_v2 = vsub.f32 3.0, %v10168_v41  ;;  %v3081_v50 = vsel %vm3021_vm3, %v13118_v39, 0.0  ;;  %vm3319_vm1 = vcmp.gt.f32.partialorder %v13121_v24, -inf }
 0x4fd   : > { %v4317_v58 = vmul.f32 %v4297_v31, %v4277_v7  ;;  %v4278_v9 = vsel %vm4238_vm13, %v4258_v55, 0.0  ;;  %v2995_v37 = vpop.xlane.xlu0 %2994  ;;  %v3661_v41 = vmin.f32 %v10243_v33, 3.0 }
 0x4fe   : > { %v4318_v42 = vmul.f32 %v4298_v15, %v4278_v9  ;;  %v3040_v16 = vmin.f32 %v2995_v37, %v2840_v13  ;;  %v2997_v19 = vpop.xlane.xlu1 %2996  ;;  %v3682_v37 = vsel %vm3642_vm0, %v3662_v27, 0.0  ;;  %v13124_v27 = vld [vmem:[#allocation137_spill] sm:$0xff] }
 0x4ff   : > { %v4337_v38 = vadd.f32 %v4317_v58, %v10116_v32  ;;  %v3041_v0 = vmin.f32 %v2997_v19, %v2841_v2  ;;  %v13122_v19 = vld [vmem:[#allocation278_spill] sm:$0xff]  ;;  %vm3643_vm8 = vcmp.gt.f32.partialorder %v13124_v27, -inf }
 0x500   : > { %v4338_v26 = vadd.f32 %v4318_v42, %v10126_v22  ;;  %v3060_v30 = vsel %vm3020_vm5, %v3040_v16, 0.0  ;;  %vm3941_vm2 = vcmp.gt.f32.partialorder %v13122_v19, -inf }
 0x501   : > { %v4358_v44 = vsel %vm4347_vm14, %v4337_v38, 0.0  ;;  %v3100_v60 = vmul.f32 %v3080_v53, %v3060_v30  ;;  %v3061_v32 = vsel %vm3021_vm3, %v3041_v0, 0.0  ;;  %v3291_v1 = vpop.xlane.xlu0 %3290  ;;  %v10379_v46 = vsub.f32 %v2840_v13, %v3060_v30 }
 0x502   : > { %v4378_v55 = vadd.f32 %v4358_v44, %v10261_v10  ;;  %v4359_v33 = vsel %vm4347_vm14, %v4338_v26, 0.0  ;;  %v3101_v43 = vmul.f32 %v3081_v50, %v3061_v32  ;;  %v3338_v22 = vmin.f32 %v3291_v1, %v10215_v36  ;;  %v3293_v57 = vpop.xlane.xlu1 %3292 }
 0x503   : > { %v4379_v31 = vadd.f32 %v4359_v33, %v10269_v6  ;;  %v10387_v7 = vadd.f32 %v3100_v60, %v10164_v52  ;;  %v3339_v39 = vmin.f32 %v3293_v57, %v10226_v4  ;;  %v10390_v58 = vsub.f32 %v2841_v2, %v3061_v32  ;;  %v13127_v33 = vld [vmem:[#allocation296_spill] sm:$0xff] }
 0x504   : > { %v10393_v13 = vadd.f32 %v3101_v43, %v10175_v35  ;;  %v3378_v10 = vsel %vm3318_vm15, %v12935_v63, 0.0  ;;  %v3358_v36 = vsel %vm3318_vm15, %v3338_v22, 0.0  ;;  %v3379_v6 = vsel %vm3319_vm1, %v13121_v24, 0.0 }
 0x505   : > { %v3681_v52 = vsel %vm3641_vm7, %v3661_v41, 0.0  ;;  %v3398_v4 = vmul.f32 %v3378_v10, %v3358_v36  ;;  %v3359_v15 = vsel %vm3319_vm1, %v3339_v39, 0.0  ;;  %v10407_v35 = vpop.xlane.xlu0 %3619  ;;  %v4900_v9 = vpack.c.bf16 %v4379_v31, %v4378_v55  ;;  %v13123_v41 = vld [vmem:[#allocation290_spill] sm:$0xff]  ;;  %v13126_v55 = vld [vmem:[#allocation117_spill] sm:$0xff] }
 0x506   : > { %v3399_v2 = vmul.f32 %v3379_v6, %v3359_v15  ;;  %v10411_v63 = vpop.xlane.xlu1 %3621  ;;  %v3701_v53 = vsel %vm3641_vm7, %v13119_v56, 0.0  ;;  %v3761_v50 = vsub.f32 3.0, %v3681_v52  ;;  %v3702_v38 = vsel %vm3642_vm0, %v13120_v5, 0.0  ;;  %v13125_v5 = vld [vmem:[#allocation142_spill] sm:$0xff] }
 0x507   : > { %v3418_v42 = vadd.f32 %v3398_v4, %v10223_v21  ;;  %4901 = vmatpush1.bf16.msra.mxu0 %v4900_v9  ;;  %4929 = vmatpush1.bf16.msra.mxu1 %v4900_v9  ;;  %v3762_v24 = vsub.f32 3.0, %v3682_v37  ;;  %vm3942_vm12 = vcmp.gt.f32.partialorder %v13123_v41, -inf  ;;  %vm3644_vm11 = vcmp.gt.f32.partialorder %v13125_v5, -inf  ;;  %v13128_v36 = vld [vmem:[#allocation102_spill] sm:$0xff] }
 0x508   : > { %v3419_v16 = vadd.f32 %v3399_v2, %v10229_v49  ;;  %4902 = vmatprep.subr.bf16.mxu0 %v12952_v3  ;;  %4920 = vmatprep.subr.bf16.mxu1 %v12952_v3  ;;  %v4001_v60 = vsel %vm3941_vm2, %v13122_v19, 0.0  ;;  %v4002_v1 = vsel %vm3942_vm12, %v13123_v41, 0.0  ;;  %vm2399_vm13 = vcmp.gt.f32.partialorder %v13126_v55, -inf  ;;  %v13129_v2 = vld [vmem:[#allocation111_spill] sm:$0xff]  ;;  %v13132_v19 = vld [vmem:[#allocation149_spill] sm:$0xff]  ;;  %v13133_v41 = vld [vmem:[#allocation152_spill] sm:$0xff] }
 0x509   : > { %v3439_v21 = vsel %vm3426_vm10, %v3418_v42, 0.0  ;;  %v3916_v0 = vpop.xlane.xlu0 %3915  ;;  %vm2400_vm6 = vcmp.gt.f32.partialorder %v13127_v33, -inf  ;;  %v3722_v39 = vmul.f32 %v3702_v38, %v3682_v37  ;;  %v2459_v37 = vsel %vm2399_vm13, %v13126_v55, 0.0 }
 0x50a   : > { %v10428_v49 = vadd.f32 %v3439_v21, %v10334_v29  ;;  %v3440_v56 = vsel %vm3426_vm10, %v3419_v16, 0.0  ;;  %v3961_v26 = vmin.f32 %v3916_v0, %v3761_v50  ;;  %v3918_v30 = vpop.xlane.xlu1 %3917  ;;  %v13130_v16 = vld [vmem:[#allocation145_spill] sm:$0xff]  ;;  %vm2725_vm7 = vcmp.gt.f32.partialorder %v13132_v19, -inf }
 0x50b   : > { %v10434_v44 = vadd.f32 %v3440_v56, %v10342_v17  ;;  %v3962_v32 = vmin.f32 %v3918_v30, %v3762_v24  ;;  %v3721_v17 = vmul.f32 %v3701_v53, %v3681_v52  ;;  %vm2724_vm5 = vcmp.gt.f32.partialorder %v13130_v16, -inf  ;;  %v13131_v52 = vld [vmem:[#allocation146_spill] sm:$0xff] }
 0x50c   : > { %v3981_v29 = vsel %vm3941_vm2, %v3961_v26, 0.0  ;;  %vm11751_vm3 = vcmp.gt.f32.partialorder %v13131_v52, -inf  ;;  %v2460_v21 = vsel %vm2400_vm6, %v13127_v33, 0.0  ;;  %vm11750_vm0 = vcmp.gt.f32.partialorder %v13133_v41, -inf }
 0x50d   : > { %v4021_v43 = vmul.f32 %v4001_v60, %v3981_v29  ;;  %v3982_v22 = vsel %vm3942_vm12, %v3962_v32, 0.0  ;;  %v2374_v57 = vpop.xlane.xlu0 %2373  ;;  %v10449_v31 = vsub.f32 %v3761_v50, %v3981_v29  ;;  %v10478_v56 = vsel %vm3643_vm8, %v13124_v27, 0.0  ;;  %v13134_v32 = vld [vmem:[#allocation240_spill] sm:$0xff] }
 0x50e   : > { %v4022_v10 = vmul.f32 %v4002_v1, %v3982_v22  ;;  %v2419_v6 = vmin.f32 %v2374_v57, %v13128_v36  ;;  %v2376_v4 = vpop.xlane.xlu1 %2375  ;;  %v10452_v15 = vsub.f32 %v3762_v24, %v3982_v22  ;;  %v10483_v26 = vsel %vm3644_vm11, %v13125_v5, 0.0  ;;  %v13136_v22 = vld [vmem:[#allocation130_spill] sm:$0xff]  ;;  %v13137_v57 = vld [vmem:[#allocation303_spill] sm:$0xff]  ;;  %v13147_v5 = vld [vmem:[#allocation297_spill] sm:$0xff] }
 0x50f   : > { %v10454_v9 = vadd.f32 %v4021_v43, %v3721_v17  ;;  %v2420_v42 = vmin.f32 %v2376_v4, %v13129_v2  ;;  %v10491_v1 = vsel %vm2724_vm5, %v13130_v16, 0.0  ;;  %v10496_v55 = vsel %vm2725_vm7, %v13132_v19, 0.0  ;;  %v13135_v17 = vld [vmem:[#allocation242_spill] sm:$0xff]  ;;  %v13139_v4 = vld [vmem:[#allocation265_spill] sm:$0xff]  ;;  %v13154_v16 = vld [vmem:[#allocation272_spill] sm:$0xff] }
 0x510   : > { %v10459_v53 = vadd.f32 %v4022_v10, %v3722_v39  ;;  %v2439_v50 = vsel %vm2399_vm13, %v2419_v6, 0.0  ;;  %v10501_v33 = vsel %vm11751_vm3, %v13131_v52, 0.0  ;;  %vm3022_vm15 = vcmp.gt.f32.partialorder %v13136_v22, -inf  ;;  %v13138_v10 = vld [vmem:[#allocation294_spill] sm:$0xff] }
 0x511   : > { %v2479_v38 = vmul.f32 %v2459_v37, %v2439_v50  ;;  %v2440_v0 = vsel %vm2400_vm6, %v2420_v42, 0.0  ;;  %v10472_v24 = vpop.xlane.xlu0 %2702  ;;  %vm3023_vm1 = vcmp.gt.f32.partialorder %v13137_v57, -inf  ;;  %v10509_v39 = vsel %vm11750_vm0, %v13133_v41, 0.0  ;;  %v13140_v42 = vld [vmem:[#allocation270_spill] sm:$0xff]  ;;  %v13141_v37 = vld [vmem:[#allocation299_spill] sm:$0xff] }
 0x512   : > { %v2480_v30 = vmul.f32 %v2460_v21, %v2440_v0  ;;  %v10485_v60 = vpop.xlane.xlu1 %2704  ;;  %v1599_v36 = vsel %vm1584_vm4, %v13138_v10, 0.0  ;;  %vm4239_vm2 = vcmp.gt.f32.partialorder %v13139_v4, -inf  ;;  %vm4240_vm12 = vcmp.gt.f32.partialorder %v13140_v42, -inf }
 0x513   : > { %v2499_v29 = vadd.f32 %v2479_v38, %v13134_v32  ;;  %v1600_v50 = vsel %vm1584_vm4, %v13141_v37, 0.0  ;;  %v3083_v10 = vsel %vm3023_vm1, %v13137_v57, 0.0  ;;  %vm3943_vm13 = vcmp.gt.f32.partialorder %v12994_v11, -inf }
 0x514   : > { %v2500_v43 = vadd.f32 %v2480_v30, %v13135_v17  ;;  %v3082_v17 = vsel %vm3022_vm15, %v13136_v22, 0.0  ;;  %vm3944_vm6 = vcmp.gt.f32.partialorder %v12999_v54, -inf }
 0x515   : > { %v2520_v6 = vsel %vm11753_vm9, %v2499_v29, 0.0  ;;  %v4212_v2 = vpop.xlane.xlu0 %4211 }
 0x516   : > { %v10521_v38 = vadd.f32 %v2520_v6, %v1599_v36  ;;  %v2521_v21 = vsel %vm11753_vm9, %v2500_v43, 0.0  ;;  %v4259_v0 = vmin.f32 %v4212_v2, %v10283_v20  ;;  %v4214_v30 = vpop.xlane.xlu1 %4213  ;;  %v4299_v36 = vsel %vm4239_vm2, %v13139_v4, 0.0 }
 0x517   : > { %v10526_v32 = vadd.f32 %v2521_v21, %v1600_v50  ;;  %v4260_v29 = vmin.f32 %v4214_v30, %v10286_v8  ;;  %v2842_v43 = vsub.f32 3.0, %v10319_v48  ;;  %v4300_v8 = vsel %vm4240_vm12, %v13140_v42, 0.0  ;;  %v13142_v48 = vld [vmem:[#allocation312_spill] sm:$0xff] }
 0x518   : > { %v4279_v6 = vsel %vm4239_vm2, %v4259_v0, 0.0  ;;  %v2843_v50 = vsub.f32 3.0, %v10332_v61  ;;  %vm3024_vm2 = vcmp.gt.f32.partialorder %v13002_v34, -inf  ;;  %vm3945_vm0 = vcmp.gt.f32.partialorder %v13142_v48, -inf }
 0x519   : > { %v4319_v20 = vmul.f32 %v4299_v36, %v4279_v6  ;;  %v4280_v2 = vsel %vm4240_vm12, %v4260_v29, 0.0  ;;  %v2999_v37 = vpop.xlane.xlu0 %2998  ;;  %v13143_v6 = vld [vmem:[#allocation224_spill] sm:$0xff]  ;;  %vm3321_vm9 = vcmp.gt.f32.partialorder %v13144_v12, -inf  ;;  %v3663_v42 = vmin.f32 %v10407_v35, 3.0 }
 0x51a   : > { %v4320_v21 = vmul.f32 %v4300_v8, %v4280_v2  ;;  %v3042_v4 = vmin.f32 %v2999_v37, %v2842_v43  ;;  %v3001_v0 = vpop.xlane.xlu1 %3000  ;;  %vm3320_vm3 = vcmp.gt.f32.partialorder %v13143_v6, -inf  ;;  %v3664_v29 = vmin.f32 %v10411_v63, 3.0 }
 0x51b   : > { %v4339_v30 = vadd.f32 %v4319_v20, %v10288_v18  ;;  %v3043_v36 = vmin.f32 %v3001_v0, %v2843_v50 }
 0x51c   : > { %v4340_v61 = vadd.f32 %v4320_v21, %v10292_v23  ;;  %v3062_v8 = vsel %vm3022_vm15, %v3042_v4, 0.0 }
 0x51d   : > { %v4360_v2 = vsel %vm4347_vm14, %v4339_v30, 0.0  ;;  %v3102_v37 = vmul.f32 %v3082_v17, %v3062_v8  ;;  %v3063_v18 = vsel %vm3023_vm1, %v3043_v36, 0.0  ;;  %v3295_v20 = vpop.xlane.xlu0 %3294  ;;  %v10559_v0 = vsub.f32 %v2842_v43, %v3062_v8  ;;  %v13146_v8 = vld [vmem:[#allocation318_spill] sm:$0xff] }
 0x51e   : > { %v4380_v47 = vadd.f32 %v4360_v2, %v10428_v49  ;;  %v4361_v35 = vsel %vm4347_vm14, %v4340_v61, 0.0  ;;  %v3103_v63 = vmul.f32 %v3083_v10, %v3063_v18  ;;  %v3340_v23 = vmin.f32 %v3295_v20, %v10379_v46  ;;  %v3297_v22 = vpop.xlane.xlu1 %3296  ;;  %v13145_v61 = vld [vmem:[#allocation106_spill] sm:$0xff] }
 0x51f   : > { %v4381_v21 = vadd.f32 %v4361_v35, %v10434_v44  ;;  %v10567_v4 = vadd.f32 %v3102_v37, %v10328_v25  ;;  %v3341_v57 = vmin.f32 %v3297_v22, %v10390_v58  ;;  %v10570_v17 = vsub.f32 %v2843_v50, %v3063_v18 }
 0x520   : > { %v10573_v43 = vadd.f32 %v3103_v63, %v10339_v62  ;;  %v3380_v49 = vsel %vm3320_vm3, %v13143_v6, 0.0  ;;  %v3360_v46 = vsel %vm3320_vm3, %v3340_v23, 0.0  ;;  %v3381_v44 = vsel %vm3321_vm9, %v13144_v12, 0.0 }
 0x521   : > { %v3683_v25 = vsel %vm3643_vm8, %v3663_v42, 0.0  ;;  %v3400_v58 = vmul.f32 %v3380_v49, %v3360_v46  ;;  %v3361_v10 = vsel %vm3321_vm9, %v3341_v57, 0.0  ;;  %v10587_v62 = vpop.xlane.xlu0 %3623  ;;  %v4903_v50 = vpack.c.bf16 %v4381_v21, %v4380_v47 }
 0x522   : > { %v3684_v30 = vsel %vm3644_vm11, %v3664_v29, 0.0  ;;  %v3401_v36 = vmul.f32 %v3381_v44, %v3361_v10  ;;  %v10591_v6 = vpop.xlane.xlu1 %3625  ;;  %vm2401_vm3 = vcmp.gt.f32.partialorder %v13145_v61, -inf  ;;  %vm3025_vm15 = vcmp.gt.f32.partialorder %v13146_v8, -inf  ;;  %v13148_v44 = vld [vmem:[#allocation112_spill] sm:$0xff] }
 0x523   : > { %v3420_v27 = vadd.f32 %v3400_v58, %v10387_v7  ;;  %4904 = vmatpush1.bf16.msra.mxu0 %v4903_v50  ;;  %4930 = vmatpush1.bf16.msra.mxu1 %v4903_v50  ;;  %v4003_v12 = vsel %vm3943_vm13, %v12994_v11, 0.0  ;;  %v4004_v47 = vsel %vm3944_vm6, %v12999_v54, 0.0  ;;  %vm2402_vm9 = vcmp.gt.f32.partialorder %v13147_v5, -inf  ;;  %v13149_v58 = vld [vmem:[#allocation123_spill] sm:$0xff] }
 0x524   : > { %v3421_v42 = vadd.f32 %v3401_v36, %v10393_v13  ;;  %v3763_v29 = vsub.f32 3.0, %v3683_v25  ;;  %v10607_v2 = vsel %vm3024_vm2, %v13002_v34, 0.0  ;;  %v10612_v7 = vsel %vm3945_vm0, %v13142_v48, 0.0  ;;  %4905 = vmatprep.subr.bf16.mxu0 %v12952_v3  ;;  %4921 = vmatprep.subr.bf16.mxu1 %v12952_v3  ;;  %v13150_v36 = vld [vmem:[#allocation313_spill] sm:$0xff] }
 0x525   : > { %v3441_v37 = vsel %vm3426_vm10, %v3420_v27, 0.0  ;;  %v3920_v18 = vpop.xlane.xlu0 %3919  ;;  %v3764_v13 = vsub.f32 3.0, %v3684_v30  ;;  %v2461_v20 = vsel %vm2401_vm3, %v13145_v61, 0.0  ;;  %v10624_v35 = vsel %vm3025_vm15, %v13146_v8, 0.0 }
 0x526   : > { %v10627_v63 = vadd.f32 %v3441_v37, %v10521_v38  ;;  %v3442_v23 = vsel %vm3426_vm10, %v3421_v42, 0.0  ;;  %v3963_v22 = vmin.f32 %v3920_v18, %v3763_v29  ;;  %v3922_v21 = vpop.xlane.xlu1 %3921  ;;  %v2462_v57 = vsel %vm2402_vm9, %v13147_v5, 0.0 }
 0x527   : > { %v10635_v49 = vadd.f32 %v3442_v23, %v10526_v32  ;;  %v3964_v46 = vmin.f32 %v3922_v21, %v3764_v13  ;;  %vm4241_vm8 = vcmp.gt.f32.partialorder %v13148_v44, -inf  ;;  %vm4242_vm11 = vcmp.gt.f32.partialorder %v13149_v58, -inf }
 0x528   : > { %v3723_v38 = vmul.f32 %v10478_v56, %v3683_v25  ;;  %v2744_v10 = vmin.f32 %v10472_v24, 3.0  ;;  %v3983_v50 = vsel %vm3943_vm13, %v3963_v22, 0.0  ;;  %vm3322_vm1 = vcmp.gt.f32.partialorder %v13150_v36, -inf  ;;  %v13151_v56 = vld [vmem:[#allocation253_spill] sm:$0xff]  ;;  %v13152_v22 = vld [vmem:[#allocation83_spill] sm:$0xff] }
 0x529   : > { %v3724_v27 = vmul.f32 %v10483_v26, %v3684_v30  ;;  %v4023_v42 = vmul.f32 %v4003_v12, %v3983_v50  ;;  %v3984_v32 = vsel %vm3944_vm6, %v3964_v46, 0.0  ;;  %v2378_v37 = vpop.xlane.xlu0 %2377  ;;  %v10647_v18 = vsub.f32 %v3763_v29, %v3983_v50  ;;  %v13153_v29 = vld [vmem:[#allocation139_spill] sm:$0xff] }
 0x52a   : > { %v2745_v23 = vmin.f32 %v10485_v60, 3.0  ;;  %v4024_v21 = vmul.f32 %v4004_v47, %v3984_v32  ;;  %v2421_v25 = vmin.f32 %v2378_v37, %v13151_v56  ;;  %v2380_v24 = vpop.xlane.xlu1 %2379  ;;  %v10651_v51 = vsub.f32 %v3764_v13, %v3984_v32 }
 0x52b   : > { %v10653_v11 = vadd.f32 %v4023_v42, %v3723_v38  ;;  %v2422_v59 = vmin.f32 %v2380_v24, %v13152_v22  ;;  %v4301_v54 = vsel %vm4241_vm8, %v13148_v44, 0.0  ;;  %v4302_v26 = vsel %vm4242_vm11, %v13149_v58, 0.0 }
 0x52c   : > { %v2764_v60 = vsel %vm2724_vm5, %v2744_v10, 0.0  ;;  %v10664_v30 = vadd.f32 %v4024_v21, %v3724_v27  ;;  %v2441_v12 = vsel %vm2401_vm3, %v2421_v25, 0.0  ;;  %v3382_v47 = vsel %vm3322_vm1, %v13150_v36, 0.0  ;;  %v13155_v10 = vld [vmem:[#allocation248_spill] sm:$0xff] }
 0x52d   : > { %v1601_v13 = vsel %vm1584_vm4, %v13153_v29, 0.0  ;;  %v2481_v46 = vmul.f32 %v2461_v20, %v2441_v12  ;;  %v2442_v38 = vsel %vm2402_vm9, %v2422_v59, 0.0  ;;  %v4216_v50 = vpop.xlane.xlu0 %4215  ;;  %vm3323_vm5 = vcmp.gt.f32.partialorder %v13154_v16, -inf  ;;  %v13156_v20 = vld [vmem:[#allocation260_spill] sm:$0xff]  ;;  %v13158_v12 = vld [vmem:[#allocation11_spill] sm:$0xff] }
 0x52e   : > { %v1602_v61 = vsel %vm1584_vm4, %v13155_v10, 0.0  ;;  %v2765_v27 = vsel %vm2725_vm7, %v2745_v23, 0.0  ;;  %v2482_v42 = vmul.f32 %v2462_v57, %v2442_v38  ;;  %v4261_v32 = vmin.f32 %v4216_v50, %v10449_v31  ;;  %v4218_v37 = vpop.xlane.xlu1 %4217  ;;  %v13157_v25 = vld [vmem:[#allocation320_spill] sm:$0xff] }
 0x52f   : > { %v2804_v21 = vmul.f32 %v10491_v1, %v2764_v60  ;;  %v2501_v56 = vadd.f32 %v2481_v46, %v13156_v20  ;;  %v4262_v59 = vmin.f32 %v4218_v37, %v10452_v15  ;;  %v2844_v5 = vsub.f32 3.0, %v2764_v60 }
 0x530   : > { %vm3946_vm12 = vcmp.gt.f32.partialorder %v13157_v25, -inf  ;;  %v3665_v24 = vmin.f32 %v10587_v62, 3.0  ;;  %v3666_v22 = vmin.f32 %v10591_v6, 3.0  ;;  %v2502_v19 = vadd.f32 %v2482_v42, %v13158_v12 }
 0x531   : > { %v4281_v57 = vsel %vm4241_vm8, %v4261_v32, 0.0  ;;  %vm13159_vm7 = vcmp.eq.s32.totalorder %v12762_v45, 1  ;;  %v4282_v23 = vsel %vm4242_vm11, %v4262_v59, 0.0  ;;  %v3003_v15 = vpop.xlane.xlu0 %3002  ;;  %v2845_v60 = vsub.f32 3.0, %v2765_v27 }
 0x532   : > { %v2522_v31 = vsel %vm13159_vm7, %v2501_v56, 0.0  ;;  %v4321_v1 = vmul.f32 %v4301_v54, %v4281_v57  ;;  %vm13160_vm13 = vmmov %vm13159_vm7  ;;  %v4322_v46 = vmul.f32 %v4302_v26, %v4282_v23  ;;  %v3044_v6 = vmin.f32 %v3003_v15, %v2844_v5  ;;  %v3005_v38 = vpop.xlane.xlu1 %3004 }
 0x533   : > { %v2542_v29 = vadd.f32 %v2522_v31, %v1601_v13  ;;  %v2523_v62 = vsel %vm13160_vm13, %v2502_v19, 0.0  ;;  %v2805_v50 = vmul.f32 %v10496_v55, %v2765_v27  ;;  %v3045_v42 = vmin.f32 %v3005_v38, %v2845_v60 }
 0x534   : > { %v2543_v44 = vadd.f32 %v2523_v62, %v1602_v61  ;;  %v4341_v10 = vadd.f32 %v4321_v1, %v10454_v9  ;;  %vm13161_vm6 = vcmp.gt.f32.partialorder %v13131_v52, -inf  ;;  %vm13162_vm3 = vcmp.gt.f32.partialorder %v13133_v41, -inf }
 0x535   : > { %v3685_v54 = vsel %vm13161_vm6, %v3665_v24, 0.0  ;;  %v3686_v58 = vsel %vm13162_vm3, %v3666_v22, 0.0  ;;  %v4342_v13 = vadd.f32 %v4322_v46, %v10459_v53  ;;  %v3064_v32 = vsel %vm3024_vm2, %v3044_v6, 0.0  ;;  %v13163_v46 = vld [vmem:[#allocation266_spill] sm:$0xff] }
 0x536   : > { %v4362_v26 = vsel %vm4347_vm14, %v4341_v10, 0.0  ;;  %v3104_v55 = vmul.f32 %v10607_v2, %v3064_v32  ;;  %v3065_v9 = vsel %vm3025_vm15, %v3045_v42, 0.0  ;;  %v3299_v61 = vpop.xlane.xlu0 %3298  ;;  %v10712_v27 = vsub.f32 %v2844_v5, %v3064_v32  ;;  %v3301_v37 = vpop.xlane.xlu1 %3300  ;;  %v13164_v42 = vld [vmem:[#allocation85_spill] sm:$0xff] }
 0x537   : > { %v4382_v52 = vadd.f32 %v4362_v26, %v10627_v63  ;;  %v4363_v41 = vsel %vm4347_vm14, %v4342_v13, 0.0  ;;  %v3105_v53 = vmul.f32 %v10624_v35, %v3065_v9  ;;  %v3342_v34 = vmin.f32 %v3299_v61, %v10559_v0  ;;  %v13165_v13 = vld [vmem:[#allocation16_spill] sm:$0xff] }
 0x538   : > { %v4383_v20 = vadd.f32 %v4363_v41, %v10635_v49  ;;  %v10720_v56 = vadd.f32 %v3104_v55, %v2804_v21  ;;  %v3343_v8 = vmin.f32 %v3301_v37, %v10570_v17  ;;  %v10723_v2 = vsub.f32 %v2845_v60, %v3065_v9  ;;  %v13166_v41 = vld [vmem:[#allocation98_spill] sm:$0xff] }
 0x539   : > { %v10725_v59 = vadd.f32 %v3105_v53, %v2805_v50  ;;  %v3362_v63 = vsel %vm3322_vm1, %v3342_v34, 0.0  ;;  %v3383_v35 = vsel %vm3323_vm5, %v13154_v16, 0.0  ;;  %v3765_v5 = vsub.f32 3.0, %v3685_v54  ;;  %vm13172_vm1 = vmmov %vm13159_vm7 }
 0x53a   : > { %v3402_v0 = vmul.f32 %v3382_v47, %v3362_v63  ;;  %v3363_v49 = vsel %vm3323_vm5, %v3343_v8, 0.0  ;;  %v3924_v21 = vpop.xlane.xlu0 %3923  ;;  %v3766_v24 = vsub.f32 3.0, %v3686_v58  ;;  %v4906_v22 = vpack.c.bf16 %v4383_v20, %v4382_v52  ;;  %v3926_v36 = vpop.xlane.xlu1 %3925  ;;  %v13167_v20 = vld [vmem:[#allocation86_spill] sm:$0xff]  ;;  %vm13173_vm5 = vmmov %vm13172_vm1 }
 0x53b   : > { %v3403_v17 = vmul.f32 %v3383_v35, %v3363_v49  ;;  %v3965_v12 = vmin.f32 %v3924_v21, %v3765_v5  ;;  %v4006_v19 = vsel %vm3946_vm12, %v13157_v25, 0.0  ;;  %vm2403_vm2 = vcmp.gt.f32.partialorder %v13046_v40, -inf  ;;  %v13169_v63 = vld [vmem:[#allocation262_spill] sm:$0xff] }
 0x53c   : > { %v3422_v57 = vadd.f32 %v3402_v0, %v10567_v4  ;;  %v3966_v31 = vmin.f32 %v3926_v36, %v3766_v24  ;;  %4907 = vmatpush1.bf16.msra.mxu0 %v4906_v22  ;;  %4931 = vmatpush1.bf16.msra.mxu1 %v4906_v22  ;;  %vm2404_vm15 = vcmp.gt.f32.partialorder %v13048_v14, -inf  ;;  %vm4243_vm9 = vcmp.gt.f32.partialorder %v13051_v28, -inf  ;;  %v13171_v0 = vld [vmem:[#allocation324_spill] sm:$0xff] }
 0x53d   : > { %v3725_v47 = vmul.f32 %v10501_v33, %v3685_v54  ;;  %v3726_v16 = vmul.f32 %v10509_v39, %v3686_v58  ;;  %v3423_v1 = vadd.f32 %v3403_v17, %v10573_v43  ;;  %v3985_v23 = vsel %vm3945_vm0, %v3965_v12, 0.0  ;;  %4908 = vmatprep.subr.bf16.mxu0 %v12952_v3  ;;  %4922 = vmatprep.subr.bf16.mxu1 %v12952_v3 }
 0x53e   : > { %v3443_v4 = vsel %vm3426_vm10, %v3422_v57, 0.0  ;;  %v4025_v15 = vmul.f32 %v10612_v7, %v3985_v23  ;;  %v3986_v60 = vsel %vm3946_vm12, %v3966_v31, 0.0  ;;  %v2382_v33 = vpop.xlane.xlu0 %2381  ;;  %v10753_v62 = vsub.f32 %v3765_v5, %v3985_v23  ;;  %v2384_v38 = vpop.xlane.xlu1 %2383  ;;  %v13170_v5 = vld [vmem:[#allocation314_spill] sm:$0xff] }
 0x53f   : > { %v3463_v39 = vadd.f32 %v3443_v4, %v2542_v29  ;;  %v3444_v48 = vsel %vm3426_vm10, %v3423_v1, 0.0  ;;  %v4026_v43 = vmul.f32 %v4006_v19, %v3986_v60  ;;  %v2423_v6 = vmin.f32 %v2382_v33, %v13163_v46 }
 0x540   : > { %v3464_v50 = vadd.f32 %v3444_v48, %v2543_v44  ;;  %v10758_v10 = vadd.f32 %v4025_v15, %v3725_v47  ;;  %v2424_v54 = vmin.f32 %v2384_v38, %v13164_v42  ;;  %v4066_v7 = vsub.f32 %v3766_v24, %v3986_v60 }
 0x541   : > { %v10761_v58 = vadd.f32 %v4026_v43, %v3726_v16  ;;  %v2463_v25 = vsel %vm2403_vm2, %v13046_v40, 0.0  ;;  %v2443_v29 = vsel %vm2403_vm2, %v2423_v6, 0.0  ;;  %vm4244_vm0 = vcmp.gt.f32.partialorder %v13165_v13, -inf }
 0x542   : > { %v2483_v32 = vmul.f32 %v2463_v25, %v2443_v29  ;;  %v2464_v44 = vsel %vm2404_vm15, %v13048_v14, 0.0  ;;  %v2444_v26 = vsel %vm2404_vm15, %v2424_v54, 0.0  ;;  %v4220_v55 = vpop.xlane.xlu0 %4219  ;;  %v4303_v61 = vsel %vm4243_vm9, %v13051_v28, 0.0  ;;  %v13168_v14 = vld [vmem:[#allocation306_spill] sm:$0xff] }
 0x543   : > { %v2484_v9 = vmul.f32 %v2464_v44, %v2444_v26  ;;  %v4263_v52 = vmin.f32 %v4220_v55, %v10647_v18  ;;  %v4222_v40 = vpop.xlane.xlu1 %4221  ;;  %v4304_v34 = vsel %vm4244_vm0, %v13165_v13, 0.0  ;;  %vm3324_vm8 = vcmp.gt.f32.partialorder %v13167_v20, -inf }
 0x544   : > { %v2503_v53 = vadd.f32 %v2483_v32, %v13166_v41  ;;  %v4264_v37 = vmin.f32 %v4222_v40, %v10651_v51  ;;  %v1603_v8 = vsel %vm1584_vm4, %v13168_v14, 0.0  ;;  %vm3325_vm11 = vcmp.gt.f32.partialorder %v13170_v5, -inf }
 0x545   : > { %v2504_v35 = vadd.f32 %v2484_v9, %v13169_v63  ;;  %v4283_v18 = vsel %vm4243_vm9, %v4263_v52, 0.0  ;;  %v1604_v49 = vsel %vm1584_vm4, %v13171_v0, 0.0  ;;  %v3384_v47 = vsel %vm3324_vm8, %v13167_v20, 0.0 }
 0x546   : > { %v2524_v51 = vsel %vm13172_vm1, %v2503_v53, 0.0  ;;  %v4323_v21 = vmul.f32 %v4303_v61, %v4283_v18  ;;  %v4284_v24 = vsel %vm4244_vm0, %v4264_v37, 0.0  ;;  %v3303_v22 = vpop.xlane.xlu0 %3302  ;;  %v3385_v4 = vsel %vm3325_vm11, %v13170_v5, 0.0 }
 0x547   : > { %v2544_v17 = vadd.f32 %v2524_v51, %v1603_v8  ;;  %v2525_v12 = vsel %vm13173_vm5, %v2504_v35, 0.0  ;;  %v4324_v28 = vmul.f32 %v4304_v34, %v4284_v24  ;;  %v3344_v19 = vmin.f32 %v3303_v22, %v10712_v27  ;;  %v3305_v36 = vpop.xlane.xlu1 %3304  ;;  %v13174_v27 = vld [vmem:[#allocation276_spill] sm:$0xff] }
 0x548   : > { %v2545_v57 = vadd.f32 %v2525_v12, %v1604_v49  ;;  %v4343_v31 = vadd.f32 %v4323_v21, %v10653_v11  ;;  %v3345_v16 = vmin.f32 %v3305_v36, %v10723_v2  ;;  %vm4245_vm4 = vcmp.gt.f32.partialorder %v13174_v27, -inf  ;;  %v13175_v2 = vld [vmem:[#allocation13_spill] sm:$0xff] }
 0x549   : > { %v4344_v1 = vadd.f32 %v4324_v28, %v10664_v30  ;;  %v3364_v23 = vsel %vm3324_vm8, %v3344_v19, 0.0  ;;  %vm4246_vm12 = vcmp.gt.f32.partialorder %v13175_v2, -inf  ;;  %v4305_v29 = vsel %vm4245_vm4, %v13174_v27, 0.0 }
 0x54a   : > { %v4364_v11 = vsel %vm4347_vm14, %v4343_v31, 0.0  ;;  %v3404_v15 = vmul.f32 %v3384_v47, %v3364_v23  ;;  %v3365_v60 = vsel %vm3325_vm11, %v3345_v16, 0.0  ;;  %v4224_v33 = vpop.xlane.xlu0 %4223  ;;  %v4306_v13 = vsel %vm4246_vm12, %v13175_v2, 0.0 }
 0x54b   : > { %v4384_v30 = vadd.f32 %v4364_v11, %v3463_v39  ;;  %v4365_v48 = vsel %vm4347_vm14, %v4344_v1, 0.0  ;;  %v3405_v43 = vmul.f32 %v3385_v4, %v3365_v60  ;;  %v4265_v46 = vmin.f32 %v4224_v33, %v10753_v62  ;;  %v4226_v6 = vpop.xlane.xlu1 %4225 }
 0x54c   : > { %v4385_v38 = vadd.f32 %v4365_v48, %v3464_v50  ;;  %v3424_v42 = vadd.f32 %v3404_v15, %v10720_v56  ;;  %v4266_v54 = vmin.f32 %v4226_v6, %v4066_v7 }
 0x54d   : > { %v3425_v25 = vadd.f32 %v3405_v43, %v10725_v59  ;;  %v4285_v39 = vsel %vm4245_vm4, %v4265_v46, 0.0 }
 0x54e   : > { %v3445_v32 = vsel %vm3426_vm10, %v3424_v42, 0.0  ;;  %v4325_v62 = vmul.f32 %v4305_v29, %v4285_v39  ;;  %v4286_v44 = vsel %vm4246_vm12, %v4266_v54, 0.0  ;;  %v4909_v50 = vpack.c.bf16 %v4385_v38, %v4384_v30 }
 0x54f   : > { %v3465_v26 = vadd.f32 %v3445_v32, %v2544_v17  ;;  %v3446_v56 = vsel %vm3426_vm10, %v3425_v25, 0.0  ;;  %v4326_v59 = vmul.f32 %v4306_v13, %v4286_v44  ;;  %vm4469_vm10 = vcmask 31744  }
 0x550   : > { %v3466_v7 = vadd.f32 %v3446_v56, %v2545_v57  ;;  %v4345_v55 = vadd.f32 %v4325_v62, %v10758_v10  ;;  %4910 = vmatpush1.bf16.msra.mxu0 %v4909_v50  ;;  %4932 = vmatpush1.bf16.msra.mxu1 %v4909_v50  ;;  %v266_v10 = vld [vmem:[%s10862_s2] sm:$0xff] }
 0x551   : > { %v4346_v9 = vadd.f32 %v4326_v59, %v10761_v58  ;;  %4911 = vmatprep.subr.bf16.mxu0 %v12952_v3  ;;  %4923 = vmatprep.subr.bf16.mxu1 %v12952_v3  ;;  %v268_v58 = vld [vmem:[%s10862_s2 + $0x10] sm:$0x3] }
 0x552   : > { %v4366_v61 = vsel %vm4347_vm14, %v4345_v55, 0.0 }
 0x553   : > { %v4386_v52 = vadd.f32 %v4366_v61, %v3465_v26  ;;  %v4367_v40 = vsel %vm4347_vm14, %v4346_v9, 0.0  ;;  %vm4471_vm14 = vcmask 25600  }
 0x554   : > { %v4387_v41 = vadd.f32 %v4367_v40, %v3466_v7 }
 0x556   : > { %v4912_v53 = vpack.c.bf16 %v4387_v41, %v4386_v52 }
 0x558   : > { %4913 = vmatpush1.bf16.msra.mxu0 %v4912_v53  ;;  %4933 = vmatpush1.bf16.msra.mxu1 %v4912_v53 }
 0x55b   : > { %4459 = vmatmul.mubr.f32.vlgmr.msra.gmra.mrb[40].mxu0 %v266_v10  ;;  %4464 = vmatmul.mubr.f32.vlgmr.msra.gmra.mrb[40].mxu1 %v268_v58 }
 0x62e   : > { %v4460_v45 = vpop.f32.mrb[40].mxu0  ;;  %v4465_v3 = vpop.f32.mrb[40].mxu1 }
 0x62f   : > { %4470 = vst.msk [vmem:[%s228_s8] sm:$0xff] %vm4469_vm10, %v4460_v45  ;;  %v4462_v34 = vpop.f32.mrb[41].mxu0  ;;  %v4467_v37 = vpop.f32.mrb[41].mxu1 }
 0x630   : > { %4472 = vst.msk [vmem:[%s228_s8 + $0x8] sm:$0x3] %vm4471_vm14, %v4465_v3 }
 0x631 PF: > { %s13_s14 = sadd.s32 1, %s4983_s14   ;;  %s13176_s12 = smov %s4979_s13 }
 0x632   : > { %p10_p5 = scmp.ge.s32.totalorder %s13_s14, 4   ;;  %s13177_s13 = smov %s13179_s15 }
 0x634   :  { %12 = sbr.rel (!%p10_p5) target bundleno = 2 (0x2), region = 65 }

</bundles_post_ra>
